<compile_context>
chip_gen: v7x
topology: tpu7x:2x2x1
jax: 0.10.0
libtpu: 0.0.40
codegen_flags: <defaults>
</compile_context>

<pallas_src>
import math
import jax
import jax.numpy as jnp
from jax.experimental import pallas as pl
from jax.experimental.pallas import tpu as pltpu

_BN_EPS = 1e-5
_POOL = 4
_LANES = 128


def _round_up(x, m):
    return (x + m - 1) // m * m


def _make_backbone_kernel(B, CP, SBLK, G1, T1):
    """Fused kernel: conv1 (G1 shifted matmuls) + 3x conv(k=3) stages, each with
    train-mode BN + ReLU + MaxPool1d(4), then global avg-pool + fc1."""
    P = _POOL

    def kernel(xb_ref, w1_ref, p1_ref, w2_ref, p2_ref, w3_ref, p3_ref,
               w4_ref, p4_ref, wfc_ref, bfc_ref, o_ref,
               s1_ref, s2_ref, s3_ref, s4_ref):

        def bn_relu_pool(y, p_ref, s_ref, t_out):
            # y: (B*t_out, CP) conv output (bias not yet added).
            y = y + p_ref[0:1, :]                                  # conv bias
            # One-pass batch statistics (biased variance), per channel.
            inv_n = 1.0 / float(B * t_out)
            mean = jnp.sum(y, axis=0, keepdims=True) * inv_n
            var = jnp.sum(y * y, axis=0, keepdims=True) * inv_n - mean * mean
            var = jnp.maximum(var, 0.0)
            scale = p_ref[1:2, :] * jax.lax.rsqrt(var + _BN_EPS)   # gamma row
            shift = p_ref[2:3, :] - mean * scale                   # beta row
            s_ref[...] = jnp.maximum(y * scale + shift, 0.0)       # BN + ReLU
            # MaxPool1d(P): max over P sublane-strided views of the scratch ref
            # (no reshapes / relayouts on the hot path).
            t_p = t_out // P
            if t_out == t_p * P:
                out = s_ref[pl.ds(0, B * t_p, stride=P), :]
                for j in range(1, P):
                    out = jnp.maximum(out, s_ref[pl.ds(j, B * t_p, stride=P), :])
            else:
                # Floor semantics: trailing remainder rows of each batch dropped.
                pieces = []
                for b in range(B):
                    o = s_ref[pl.ds(b * t_out, t_p, stride=P), :]
                    for j in range(1, P):
                        o = jnp.maximum(
                            o, s_ref[pl.ds(b * t_out + j, t_p, stride=P), :])
                    pieces.append(o)
                out = jnp.concatenate(pieces, axis=0)
            return out, t_p

        # ---- stage 1: Conv1d(kernel=G1*stride, stride) as G1 shifted matmuls
        #      over the stride-blocked input (im2col built in VMEM).
        acc = None
        for j in range(G1):
            xj = xb_ref[:, j:j + T1, :].reshape(B * T1, SBLK)
            m = jnp.dot(xj, w1_ref[j * SBLK:(j + 1) * SBLK, :],
                        preferred_element_type=jnp.float32)
            acc = m if acc is None else acc + m
        h, t = bn_relu_pool(acc, p1_ref, s1_ref, T1)

        # ---- stages 2-4: Conv1d(kernel=3, stride=1) as 3 shifted matmuls.
        def conv3(h, t_in, w_ref):
            t_out = t_in - 2
            h3 = h.reshape(B, t_in, CP)
            acc = None
            for j in range(3):
                xj = h3[:, j:j + t_out, :].reshape(B * t_out, CP)
                m = jnp.dot(xj, w_ref[j * CP:(j + 1) * CP, :],
                            preferred_element_type=jnp.float32)
                acc = m if acc is None else acc + m
            return acc, t_out

        y, tc = conv3(h, t, w2_ref)
        h, t = bn_relu_pool(y, p2_ref, s2_ref, tc)
        y, tc = conv3(h, t, w3_ref)
        h, t = bn_relu_pool(y, p3_ref, s3_ref, tc)
        y, tc = conv3(h, t, w4_ref)
        h, t = bn_relu_pool(y, p4_ref, s4_ref, tc)

        # ---- F.avg_pool1d over the remaining time axis, then fc1.
        pooled = h if t == 1 else jnp.mean(h.reshape(B, t, CP), axis=1)
        o_ref[...] = jnp.dot(pooled, wfc_ref[...],
                             preferred_element_type=jnp.float32) + bfc_ref[...]

    return kernel


def _pack_bn(bias, gamma, beta, cp):
    # Row 0: conv bias, row 1: BN gamma, row 2: BN beta.
    # Zero-padding (also for gamma!) keeps padded channels exactly zero.
    pad = lambda v: jnp.pad(v, (0, cp - v.shape[0]))
    return jnp.stack([pad(bias), pad(gamma), pad(beta)], axis=0)


def backbone_forward(x_ncl, p):
    """x_ncl: (B, n_input, L), exactly like the PyTorch module's input.
    Returns (B, 1, n_output)."""
    x_ncl = x_ncl.astype(jnp.float32)
    B, C_in, L = x_ncl.shape
    w1, w2, w3, w4 = p["w1"], p["w2"], p["w3"], p["w4"]
    C1, _, K1 = w1.shape
    C2 = w3.shape[0]
    stride = p["stride"]
    n_out = p["w_fc"].shape[0]
    CP = _round_up(max(C1, C2, n_out, _LANES), _LANES)

    # TODO(synk): in-kernel im2col assumes kernel_size % stride == 0 (true for the
    # module defaults 80/16); other configs would need a wrapper-side im2col path.
    assert K1 % stride == 0 and L >= K1
    G1 = K1 // stride
    SBLK = stride * C_in
    T1 = (L - K1) // stride + 1
    M1 = T1 + G1 - 1
    T2 = T1 // _POOL - 2
    T3 = T2 // _POOL - 2
    T4 = T3 // _POOL - 2
    assert T4 >= _POOL, "input too short for 4 conv+pool stages"

    # Stride-blocked view of the input: (B, M1, stride*C_in); element order inside
    # a block is (time, channel), matching the row order of the weight blocks.
    xb = jnp.transpose(x_ncl, (0, 2, 1))[:, :M1 * stride, :].reshape(B, M1, SBLK)

    # Stage-1 weight in im2col order (k, c_in) x c_out, cols zero-padded to CP.
    w1m = jnp.pad(jnp.transpose(w1, (2, 1, 0)).reshape(K1 * C_in, C1),
                  ((0, 0), (0, CP - C1)))

    def conv3_weight(w):
        c_out, c_in, k = w.shape
        wp = jnp.pad(w, ((0, CP - c_out), (0, CP - c_in), (0, 0)))
        return jnp.transpose(wp, (2, 1, 0)).reshape(k * CP, CP)

    w2m, w3m, w4m = conv3_weight(w2), conv3_weight(w3), conv3_weight(w4)
    p1 = _pack_bn(p["b1"], p["g1"], p["be1"], CP)
    p2 = _pack_bn(p["b2"], p["g2"], p["be2"], CP)
    p3 = _pack_bn(p["b3"], p["g3"], p["be3"], CP)
    p4 = _pack_bn(p["b4"], p["g4"], p["be4"], CP)
    wfcm = jnp.pad(jnp.transpose(p["w_fc"]),
                   ((0, CP - p["w_fc"].shape[1]), (0, CP - n_out)))
    bfcm = jnp.pad(p["b_fc"], (0, CP - n_out)).reshape(1, CP)

    vmem = pl.BlockSpec(memory_space=pltpu.MemorySpace.VMEM)
    out = pl.pallas_call(
        _make_backbone_kernel(B, CP, SBLK, G1, T1),
        out_shape=jax.ShapeDtypeStruct((B, CP), jnp.float32),
        in_specs=[vmem] * 11,
        out_specs=vmem,
        scratch_shapes=[
            pltpu.VMEM((B * T1, CP), jnp.float32),
            pltpu.VMEM((B * T2, CP), jnp.float32),
            pltpu.VMEM((B * T3, CP), jnp.float32),
            pltpu.VMEM((B * T4, CP), jnp.float32),
        ],
    )(xb, w1m, p1, w2m, p2, w3m, p3, w4m, p4, wfcm, bfcm)
    return out[:, :n_out].reshape(B, 1, n_out)


def init_params(key, n_input=1, n_channel=32, stride=16, n_output=35):
    def conv_init(k, c_out, c_in, ksz):
        kw, kb = jax.random.split(k)
        bound = 1.0 / math.sqrt(c_in * ksz)
        w = jax.random.uniform(kw, (c_out, c_in, ksz), jnp.float32, -bound, bound)
        b = jax.random.uniform(kb, (c_out,), jnp.float32, -bound, bound)
        return w, b

    k1, k2, k3, k4, k5 = jax.random.split(key, 5)
    w1, b1 = conv_init(k1, n_channel, n_input, 80)
    w2, b2 = conv_init(k2, n_channel, n_channel, 3)
    w3, b3 = conv_init(k3, 2 * n_channel, n_channel, 3)
    w4, b4 = conv_init(k4, 2 * n_channel, 2 * n_channel, 3)
    kw, kb = jax.random.split(k5)
    bound = 1.0 / math.sqrt(2 * n_channel)
    w_fc = jax.random.uniform(kw, (n_output, 2 * n_channel), jnp.float32, -bound, bound)
    b_fc = jax.random.uniform(kb, (n_output,), jnp.float32, -bound, bound)
    ones = lambda c: jnp.ones((c,), jnp.float32)     # BN gamma init (PyTorch default)
    zeros = lambda c: jnp.zeros((c,), jnp.float32)   # BN beta init (PyTorch default)
    return dict(stride=stride,
                w1=w1, b1=b1, g1=ones(n_channel), be1=zeros(n_channel),
                w2=w2, b2=b2, g2=ones(n_channel), be2=zeros(n_channel),
                w3=w3, b3=b3, g3=ones(2 * n_channel), be3=zeros(2 * n_channel),
                w4=w4, b4=b4, g4=ones(2 * n_channel), be4=zeros(2 * n_channel),
                w_fc=w_fc, b_fc=b_fc)


if __name__ == "__main__":
    key = jax.random.PRNGKey(0)
    kx, kp = jax.random.split(key)
    # Minimal L for which all four conv+pool stages are valid with stride=16
    # (6848 -> conv1: 424 -> 106 -> conv2: 104 -> 26 -> conv3: 24 -> 6 -> conv4: 4 -> 1).
    B, L = 2, 6848
    x = jax.random.normal(kx, (B, 1, L), jnp.float32)
    params = init_params(kp)

    fwd = jax.jit(lambda inp: backbone_forward(inp, params))
    out = jax.block_until_ready(fwd(x))

    assert out.shape == (B, 1, 35), out.shape
    assert bool(jnp.all(jnp.isfinite(out)))
    print("KERNEL_OK")
</pallas_src>

<mosaic_0001>
module attributes {stable_mosaic.version = 11 : i64} {
  func.func @kernel(%arg0: memref<2x428x16xf32, #tpu.memory_space<vmem>>, %arg1: memref<80x128xf32, #tpu.memory_space<vmem>>, %arg2: memref<3x128xf32, #tpu.memory_space<vmem>>, %arg3: memref<384x128xf32, #tpu.memory_space<vmem>>, %arg4: memref<3x128xf32, #tpu.memory_space<vmem>>, %arg5: memref<384x128xf32, #tpu.memory_space<vmem>>, %arg6: memref<3x128xf32, #tpu.memory_space<vmem>>, %arg7: memref<384x128xf32, #tpu.memory_space<vmem>>, %arg8: memref<3x128xf32, #tpu.memory_space<vmem>>, %arg9: memref<128x128xf32, #tpu.memory_space<vmem>>, %arg10: memref<1x128xf32, #tpu.memory_space<vmem>>, %arg11: memref<2x128xf32, #tpu.memory_space<vmem>>, %arg12: memref<848x128xf32, #tpu.memory_space<vmem>>, %arg13: memref<208x128xf32, #tpu.memory_space<vmem>>, %arg14: memref<48x128xf32, #tpu.memory_space<vmem>>, %arg15: memref<8x128xf32, #tpu.memory_space<vmem>>) attributes {dimension_semantics = [], scalar_prefetch = 0 : i64, scratch_operands = 4 : i64, tpu.core_type = #tpu.core_type<tc>} {
    %c0 = arith.constant 0 : index
    %c0_0 = arith.constant 0 : index
    %c0_1 = arith.constant 0 : index
    %0 = vector.load %arg0[%c0, %c0_0, %c0_1] : memref<2x428x16xf32, #tpu.memory_space<vmem>>, vector<2x424x16xf32>
    %1 = vector.shape_cast %0 : vector<2x424x16xf32> to vector<848x16xf32>
    %c0_2 = arith.constant 0 : index
    %c0_3 = arith.constant 0 : index
    %2 = vector.load %arg1[%c0_2, %c0_3] : memref<80x128xf32, #tpu.memory_space<vmem>>, vector<16x128xf32>
    %cst = arith.constant dense<0.000000e+00> : vector<848x128xf32>
    %3 = tpu.matmul %1, %2, %cst {dimension_numbers = #tpu.dot_dimension_numbers<[1], [0], [0], [1], [0, 0, 1, 1], [], []>} : vector<848x16xf32>, vector<16x128xf32>, vector<848x128xf32> -> vector<848x128xf32>
    %c0_4 = arith.constant 0 : index
    %c1 = arith.constant 1 : index
    %c0_5 = arith.constant 0 : index
    %4 = vector.load %arg0[%c0_4, %c1, %c0_5] : memref<2x428x16xf32, #tpu.memory_space<vmem>>, vector<2x424x16xf32>
    %5 = vector.shape_cast %4 : vector<2x424x16xf32> to vector<848x16xf32>
    %c16 = arith.constant 16 : index
    %c0_6 = arith.constant 0 : index
    %6 = vector.load %arg1[%c16, %c0_6] : memref<80x128xf32, #tpu.memory_space<vmem>>, vector<16x128xf32>
    %cst_7 = arith.constant dense<0.000000e+00> : vector<848x128xf32>
    %7 = tpu.matmul %5, %6, %cst_7 {dimension_numbers = #tpu.dot_dimension_numbers<[1], [0], [0], [1], [0, 0, 1, 1], [], []>} : vector<848x16xf32>, vector<16x128xf32>, vector<848x128xf32> -> vector<848x128xf32>
    %8 = arith.addf %3, %7 : vector<848x128xf32>
    %c0_8 = arith.constant 0 : index
    %c2 = arith.constant 2 : index
    %c0_9 = arith.constant 0 : index
    %9 = vector.load %arg0[%c0_8, %c2, %c0_9] : memref<2x428x16xf32, #tpu.memory_space<vmem>>, vector<2x424x16xf32>
    %10 = vector.shape_cast %9 : vector<2x424x16xf32> to vector<848x16xf32>
    %c32 = arith.constant 32 : index
    %c0_10 = arith.constant 0 : index
    %11 = vector.load %arg1[%c32, %c0_10] : memref<80x128xf32, #tpu.memory_space<vmem>>, vector<16x128xf32>
    %cst_11 = arith.constant dense<0.000000e+00> : vector<848x128xf32>
    %12 = tpu.matmul %10, %11, %cst_11 {dimension_numbers = #tpu.dot_dimension_numbers<[1], [0], [0], [1], [0, 0, 1, 1], [], []>} : vector<848x16xf32>, vector<16x128xf32>, vector<848x128xf32> -> vector<848x128xf32>
    %13 = arith.addf %8, %12 : vector<848x128xf32>
    %c0_12 = arith.constant 0 : index
    %c3 = arith.constant 3 : index
    %c0_13 = arith.constant 0 : index
    %14 = vector.load %arg0[%c0_12, %c3, %c0_13] : memref<2x428x16xf32, #tpu.memory_space<vmem>>, vector<2x424x16xf32>
    %15 = vector.shape_cast %14 : vector<2x424x16xf32> to vector<848x16xf32>
    %c48 = arith.constant 48 : index
    %c0_14 = arith.constant 0 : index
    %16 = vector.load %arg1[%c48, %c0_14] : memref<80x128xf32, #tpu.memory_space<vmem>>, vector<16x128xf32>
    %cst_15 = arith.constant dense<0.000000e+00> : vector<848x128xf32>
    %17 = tpu.matmul %15, %16, %cst_15 {dimension_numbers = #tpu.dot_dimension_numbers<[1], [0], [0], [1], [0, 0, 1, 1], [], []>} : vector<848x16xf32>, vector<16x128xf32>, vector<848x128xf32> -> vector<848x128xf32>
    %18 = arith.addf %13, %17 : vector<848x128xf32>
    %c0_16 = arith.constant 0 : index
    %c4 = arith.constant 4 : index
    %c0_17 = arith.constant 0 : index
    %19 = vector.load %arg0[%c0_16, %c4, %c0_17] : memref<2x428x16xf32, #tpu.memory_space<vmem>>, vector<2x424x16xf32>
    %20 = vector.shape_cast %19 : vector<2x424x16xf32> to vector<848x16xf32>
    %c64 = arith.constant 64 : index
    %c0_18 = arith.constant 0 : index
    %21 = vector.load %arg1[%c64, %c0_18] : memref<80x128xf32, #tpu.memory_space<vmem>>, vector<16x128xf32>
    %cst_19 = arith.constant dense<0.000000e+00> : vector<848x128xf32>
    %22 = tpu.matmul %20, %21, %cst_19 {dimension_numbers = #tpu.dot_dimension_numbers<[1], [0], [0], [1], [0, 0, 1, 1], [], []>} : vector<848x16xf32>, vector<16x128xf32>, vector<848x128xf32> -> vector<848x128xf32>
    %23 = arith.addf %18, %22 : vector<848x128xf32>
    %c0_20 = arith.constant 0 : index
    %c0_21 = arith.constant 0 : index
    %24 = vector.load %arg2[%c0_20, %c0_21] : memref<3x128xf32, #tpu.memory_space<vmem>>, vector<1x128xf32>
    %25 = vector.broadcast %24 : vector<1x128xf32> to vector<848x128xf32>
    %26 = arith.addf %23, %25 : vector<848x128xf32>
    %cst_22 = arith.constant dense<0.000000e+00> : vector<128xf32>
    %27 = vector.multi_reduction <add>, %26, %cst_22 [0] : vector<848x128xf32> to vector<128xf32>
    %28 = vector.shape_cast %27 : vector<128xf32> to vector<1x128xf32>
    %cst_23 = arith.constant 0.0011792453 : f32
    %29 = vector.broadcast %cst_23 : f32 to vector<1x128xf32>
    %30 = arith.mulf %28, %29 : vector<1x128xf32>
    %31 = arith.mulf %26, %26 : vector<848x128xf32>
    %cst_24 = arith.constant dense<0.000000e+00> : vector<128xf32>
    %32 = vector.multi_reduction <add>, %31, %cst_24 [0] : vector<848x128xf32> to vector<128xf32>
    %33 = vector.shape_cast %32 : vector<128xf32> to vector<1x128xf32>
    %cst_25 = arith.constant 0.0011792453 : f32
    %34 = vector.broadcast %cst_25 : f32 to vector<1x128xf32>
    %35 = arith.mulf %33, %34 : vector<1x128xf32>
    %36 = arith.mulf %30, %30 : vector<1x128xf32>
    %37 = arith.subf %35, %36 : vector<1x128xf32>
    %cst_26 = arith.constant 0.000000e+00 : f32
    %38 = vector.broadcast %cst_26 : f32 to vector<1x128xf32>
    %39 = arith.maximumf %37, %38 : vector<1x128xf32>
    %c1_27 = arith.constant 1 : index
    %c0_28 = arith.constant 0 : index
    %40 = vector.load %arg2[%c1_27, %c0_28] : memref<3x128xf32, #tpu.memory_space<vmem>>, vector<1x128xf32>
    %cst_29 = arith.constant 9.99999974E-6 : f32
    %41 = vector.broadcast %cst_29 : f32 to vector<1x128xf32>
    %42 = arith.addf %39, %41 : vector<1x128xf32>
    %43 = math.rsqrt %42 : vector<1x128xf32>
    %44 = arith.mulf %40, %43 : vector<1x128xf32>
    %c2_30 = arith.constant 2 : index
    %c0_31 = arith.constant 0 : index
    %45 = vector.load %arg2[%c2_30, %c0_31] : memref<3x128xf32, #tpu.memory_space<vmem>>, vector<1x128xf32>
    %46 = arith.mulf %30, %44 : vector<1x128xf32>
    %47 = arith.subf %45, %46 : vector<1x128xf32>
    %48 = vector.broadcast %44 : vector<1x128xf32> to vector<848x128xf32>
    %49 = arith.mulf %26, %48 : vector<848x128xf32>
    %50 = vector.broadcast %47 : vector<1x128xf32> to vector<848x128xf32>
    %51 = arith.addf %49, %50 : vector<848x128xf32>
    %cst_32 = arith.constant 0.000000e+00 : f32
    %52 = vector.broadcast %cst_32 : f32 to vector<848x128xf32>
    %53 = arith.maximumf %51, %52 : vector<848x128xf32>
    %c0_33 = arith.constant 0 : index
    %c0_34 = arith.constant 0 : index
    %54 = vector.load %arg12[%c0_33, %c0_34] : memref<848x128xf32, #tpu.memory_space<vmem>>, vector<848x128xf32>
    tpu.vector_store %arg12[%c0_33, %c0_34], %53 {strides = array<i32>} : memref<848x128xf32, #tpu.memory_space<vmem>>, vector<848x128xf32>,
    %c0_35 = arith.constant 0 : index
    %c0_36 = arith.constant 0 : index
    %55 = tpu.strided_load %arg12[%c0_35, %c0_36] {strides = array<i32: 4, 1>} : memref<848x128xf32, #tpu.memory_space<vmem>>, vector<212x128xf32>
    %c1_37 = arith.constant 1 : index
    %c0_38 = arith.constant 0 : index
    %56 = tpu.strided_load %arg12[%c1_37, %c0_38] {strides = array<i32: 4, 1>} : memref<848x128xf32, #tpu.memory_space<vmem>>, vector<212x128xf32>
    %57 = arith.maximumf %55, %56 : vector<212x128xf32>
    %c2_39 = arith.constant 2 : index
    %c0_40 = arith.constant 0 : index
    %58 = tpu.strided_load %arg12[%c2_39, %c0_40] {strides = array<i32: 4, 1>} : memref<848x128xf32, #tpu.memory_space<vmem>>, vector<212x128xf32>
    %59 = arith.maximumf %57, %58 : vector<212x128xf32>
    %c3_41 = arith.constant 3 : index
    %c0_42 = arith.constant 0 : index
    %60 = tpu.strided_load %arg12[%c3_41, %c0_42] {strides = array<i32: 4, 1>} : memref<848x128xf32, #tpu.memory_space<vmem>>, vector<212x128xf32>
    %61 = arith.maximumf %59, %60 : vector<212x128xf32>
    %62 = vector.shape_cast %61 : vector<212x128xf32> to vector<2x106x128xf32>
    %63 = vector.extract_strided_slice %62 {offsets = [0, 0, 0], sizes = [2, 104, 128], strides = [1, 1, 1]} : vector<2x106x128xf32> to vector<2x104x128xf32>
    %64 = vector.shape_cast %63 : vector<2x104x128xf32> to vector<208x128xf32>
    %c0_43 = arith.constant 0 : index
    %c0_44 = arith.constant 0 : index
    %65 = vector.load %arg3[%c0_43, %c0_44] : memref<384x128xf32, #tpu.memory_space<vmem>>, vector<128x128xf32>
    %cst_45 = arith.constant dense<0.000000e+00> : vector<208x128xf32>
    %66 = tpu.matmul %64, %65, %cst_45 {dimension_numbers = #tpu.dot_dimension_numbers<[1], [0], [0], [1], [0, 0, 1, 1], [], []>} : vector<208x128xf32>, vector<128x128xf32>, vector<208x128xf32> -> vector<208x128xf32>
    %67 = vector.extract_strided_slice %62 {offsets = [0, 1, 0], sizes = [2, 104, 128], strides = [1, 1, 1]} : vector<2x106x128xf32> to vector<2x104x128xf32>
    %68 = vector.shape_cast %67 : vector<2x104x128xf32> to vector<208x128xf32>
    %c128 = arith.constant 128 : index
    %c0_46 = arith.constant 0 : index
    %69 = vector.load %arg3[%c128, %c0_46] : memref<384x128xf32, #tpu.memory_space<vmem>>, vector<128x128xf32>
    %cst_47 = arith.constant dense<0.000000e+00> : vector<208x128xf32>
    %70 = tpu.matmul %68, %69, %cst_47 {dimension_numbers = #tpu.dot_dimension_numbers<[1], [0], [0], [1], [0, 0, 1, 1], [], []>} : vector<208x128xf32>, vector<128x128xf32>, vector<208x128xf32> -> vector<208x128xf32>
    %71 = arith.addf %66, %70 : vector<208x128xf32>
    %72 = vector.extract_strided_slice %62 {offsets = [0, 2, 0], sizes = [2, 104, 128], strides = [1, 1, 1]} : vector<2x106x128xf32> to vector<2x104x128xf32>
    %73 = vector.shape_cast %72 : vector<2x104x128xf32> to vector<208x128xf32>
    %c256 = arith.constant 256 : index
    %c0_48 = arith.constant 0 : index
    %74 = vector.load %arg3[%c256, %c0_48] : memref<384x128xf32, #tpu.memory_space<vmem>>, vector<128x128xf32>
    %cst_49 = arith.constant dense<0.000000e+00> : vector<208x128xf32>
    %75 = tpu.matmul %73, %74, %cst_49 {dimension_numbers = #tpu.dot_dimension_numbers<[1], [0], [0], [1], [0, 0, 1, 1], [], []>} : vector<208x128xf32>, vector<128x128xf32>, vector<208x128xf32> -> vector<208x128xf32>
    %76 = arith.addf %71, %75 : vector<208x128xf32>
    %c0_50 = arith.constant 0 : index
    %c0_51 = arith.constant 0 : index
    %77 = vector.load %arg4[%c0_50, %c0_51] : memref<3x128xf32, #tpu.memory_space<vmem>>, vector<1x128xf32>
    %78 = vector.broadcast %77 : vector<1x128xf32> to vector<208x128xf32>
    %79 = arith.addf %76, %78 : vector<208x128xf32>
    %cst_52 = arith.constant dense<0.000000e+00> : vector<128xf32>
    %80 = vector.multi_reduction <add>, %79, %cst_52 [0] : vector<208x128xf32> to vector<128xf32>
    %81 = vector.shape_cast %80 : vector<128xf32> to vector<1x128xf32>
    %cst_53 = arith.constant 0.00480769249 : f32
    %82 = vector.broadcast %cst_53 : f32 to vector<1x128xf32>
    %83 = arith.mulf %81, %82 : vector<1x128xf32>
    %84 = arith.mulf %79, %79 : vector<208x128xf32>
    %cst_54 = arith.constant dense<0.000000e+00> : vector<128xf32>
    %85 = vector.multi_reduction <add>, %84, %cst_54 [0] : vector<208x128xf32> to vector<128xf32>
    %86 = vector.shape_cast %85 : vector<128xf32> to vector<1x128xf32>
    %cst_55 = arith.constant 0.00480769249 : f32
    %87 = vector.broadcast %cst_55 : f32 to vector<1x128xf32>
    %88 = arith.mulf %86, %87 : vector<1x128xf32>
    %89 = arith.mulf %83, %83 : vector<1x128xf32>
    %90 = arith.subf %88, %89 : vector<1x128xf32>
    %cst_56 = arith.constant 0.000000e+00 : f32
    %91 = vector.broadcast %cst_56 : f32 to vector<1x128xf32>
    %92 = arith.maximumf %90, %91 : vector<1x128xf32>
    %c1_57 = arith.constant 1 : index
    %c0_58 = arith.constant 0 : index
    %93 = vector.load %arg4[%c1_57, %c0_58] : memref<3x128xf32, #tpu.memory_space<vmem>>, vector<1x128xf32>
    %cst_59 = arith.constant 9.99999974E-6 : f32
    %94 = vector.broadcast %cst_59 : f32 to vector<1x128xf32>
    %95 = arith.addf %92, %94 : vector<1x128xf32>
    %96 = math.rsqrt %95 : vector<1x128xf32>
    %97 = arith.mulf %93, %96 : vector<1x128xf32>
    %c2_60 = arith.constant 2 : index
    %c0_61 = arith.constant 0 : index
    %98 = vector.load %arg4[%c2_60, %c0_61] : memref<3x128xf32, #tpu.memory_space<vmem>>, vector<1x128xf32>
    %99 = arith.mulf %83, %97 : vector<1x128xf32>
    %100 = arith.subf %98, %99 : vector<1x128xf32>
    %101 = vector.broadcast %97 : vector<1x128xf32> to vector<208x128xf32>
    %102 = arith.mulf %79, %101 : vector<208x128xf32>
    %103 = vector.broadcast %100 : vector<1x128xf32> to vector<208x128xf32>
    %104 = arith.addf %102, %103 : vector<208x128xf32>
    %cst_62 = arith.constant 0.000000e+00 : f32
    %105 = vector.broadcast %cst_62 : f32 to vector<208x128xf32>
    %106 = arith.maximumf %104, %105 : vector<208x128xf32>
    %c0_63 = arith.constant 0 : index
    %c0_64 = arith.constant 0 : index
    %107 = vector.load %arg13[%c0_63, %c0_64] : memref<208x128xf32, #tpu.memory_space<vmem>>, vector<208x128xf32>
    tpu.vector_store %arg13[%c0_63, %c0_64], %106 {strides = array<i32>} : memref<208x128xf32, #tpu.memory_space<vmem>>, vector<208x128xf32>,
    %c0_65 = arith.constant 0 : index
    %c0_66 = arith.constant 0 : index
    %108 = tpu.strided_load %arg13[%c0_65, %c0_66] {strides = array<i32: 4, 1>} : memref<208x128xf32, #tpu.memory_space<vmem>>, vector<52x128xf32>
    %c1_67 = arith.constant 1 : index
    %c0_68 = arith.constant 0 : index
    %109 = tpu.strided_load %arg13[%c1_67, %c0_68] {strides = array<i32: 4, 1>} : memref<208x128xf32, #tpu.memory_space<vmem>>, vector<52x128xf32>
    %110 = arith.maximumf %108, %109 : vector<52x128xf32>
    %c2_69 = arith.constant 2 : index
    %c0_70 = arith.constant 0 : index
    %111 = tpu.strided_load %arg13[%c2_69, %c0_70] {strides = array<i32: 4, 1>} : memref<208x128xf32, #tpu.memory_space<vmem>>, vector<52x128xf32>
    %112 = arith.maximumf %110, %111 : vector<52x128xf32>
    %c3_71 = arith.constant 3 : index
    %c0_72 = arith.constant 0 : index
    %113 = tpu.strided_load %arg13[%c3_71, %c0_72] {strides = array<i32: 4, 1>} : memref<208x128xf32, #tpu.memory_space<vmem>>, vector<52x128xf32>
    %114 = arith.maximumf %112, %113 : vector<52x128xf32>
    %115 = vector.shape_cast %114 : vector<52x128xf32> to vector<2x26x128xf32>
    %116 = vector.extract_strided_slice %115 {offsets = [0, 0, 0], sizes = [2, 24, 128], strides = [1, 1, 1]} : vector<2x26x128xf32> to vector<2x24x128xf32>
    %117 = vector.shape_cast %116 : vector<2x24x128xf32> to vector<48x128xf32>
    %c0_73 = arith.constant 0 : index
    %c0_74 = arith.constant 0 : index
    %118 = vector.load %arg5[%c0_73, %c0_74] : memref<384x128xf32, #tpu.memory_space<vmem>>, vector<128x128xf32>
    %cst_75 = arith.constant dense<0.000000e+00> : vector<48x128xf32>
    %119 = tpu.matmul %117, %118, %cst_75 {dimension_numbers = #tpu.dot_dimension_numbers<[1], [0], [0], [1], [0, 0, 1, 1], [], []>} : vector<48x128xf32>, vector<128x128xf32>, vector<48x128xf32> -> vector<48x128xf32>
    %120 = vector.extract_strided_slice %115 {offsets = [0, 1, 0], sizes = [2, 24, 128], strides = [1, 1, 1]} : vector<2x26x128xf32> to vector<2x24x128xf32>
    %121 = vector.shape_cast %120 : vector<2x24x128xf32> to vector<48x128xf32>
    %c128_76 = arith.constant 128 : index
    %c0_77 = arith.constant 0 : index
    %122 = vector.load %arg5[%c128_76, %c0_77] : memref<384x128xf32, #tpu.memory_space<vmem>>, vector<128x128xf32>
    %cst_78 = arith.constant dense<0.000000e+00> : vector<48x128xf32>
    %123 = tpu.matmul %121, %122, %cst_78 {dimension_numbers = #tpu.dot_dimension_numbers<[1], [0], [0], [1], [0, 0, 1, 1], [], []>} : vector<48x128xf32>, vector<128x128xf32>, vector<48x128xf32> -> vector<48x128xf32>
    %124 = arith.addf %119, %123 : vector<48x128xf32>
    %125 = vector.extract_strided_slice %115 {offsets = [0, 2, 0], sizes = [2, 24, 128], strides = [1, 1, 1]} : vector<2x26x128xf32> to vector<2x24x128xf32>
    %126 = vector.shape_cast %125 : vector<2x24x128xf32> to vector<48x128xf32>
    %c256_79 = arith.constant 256 : index
    %c0_80 = arith.constant 0 : index
    %127 = vector.load %arg5[%c256_79, %c0_80] : memref<384x128xf32, #tpu.memory_space<vmem>>, vector<128x128xf32>
    %cst_81 = arith.constant dense<0.000000e+00> : vector<48x128xf32>
    %128 = tpu.matmul %126, %127, %cst_81 {dimension_numbers = #tpu.dot_dimension_numbers<[1], [0], [0], [1], [0, 0, 1, 1], [], []>} : vector<48x128xf32>, vector<128x128xf32>, vector<48x128xf32> -> vector<48x128xf32>
    %129 = arith.addf %124, %128 : vector<48x128xf32>
    %c0_82 = arith.constant 0 : index
    %c0_83 = arith.constant 0 : index
    %130 = vector.load %arg6[%c0_82, %c0_83] : memref<3x128xf32, #tpu.memory_space<vmem>>, vector<1x128xf32>
    %131 = vector.broadcast %130 : vector<1x128xf32> to vector<48x128xf32>
    %132 = arith.addf %129, %131 : vector<48x128xf32>
    %cst_84 = arith.constant dense<0.000000e+00> : vector<128xf32>
    %133 = vector.multi_reduction <add>, %132, %cst_84 [0] : vector<48x128xf32> to vector<128xf32>
    %134 = vector.shape_cast %133 : vector<128xf32> to vector<1x128xf32>
    %cst_85 = arith.constant 0.020833334 : f32
    %135 = vector.broadcast %cst_85 : f32 to vector<1x128xf32>
    %136 = arith.mulf %134, %135 : vector<1x128xf32>
    %137 = arith.mulf %132, %132 : vector<48x128xf32>
    %cst_86 = arith.constant dense<0.000000e+00> : vector<128xf32>
    %138 = vector.multi_reduction <add>, %137, %cst_86 [0] : vector<48x128xf32> to vector<128xf32>
    %139 = vector.shape_cast %138 : vector<128xf32> to vector<1x128xf32>
    %cst_87 = arith.constant 0.020833334 : f32
    %140 = vector.broadcast %cst_87 : f32 to vector<1x128xf32>
    %141 = arith.mulf %139, %140 : vector<1x128xf32>
    %142 = arith.mulf %136, %136 : vector<1x128xf32>
    %143 = arith.subf %141, %142 : vector<1x128xf32>
    %cst_88 = arith.constant 0.000000e+00 : f32
    %144 = vector.broadcast %cst_88 : f32 to vector<1x128xf32>
    %145 = arith.maximumf %143, %144 : vector<1x128xf32>
    %c1_89 = arith.constant 1 : index
    %c0_90 = arith.constant 0 : index
    %146 = vector.load %arg6[%c1_89, %c0_90] : memref<3x128xf32, #tpu.memory_space<vmem>>, vector<1x128xf32>
    %cst_91 = arith.constant 9.99999974E-6 : f32
    %147 = vector.broadcast %cst_91 : f32 to vector<1x128xf32>
    %148 = arith.addf %145, %147 : vector<1x128xf32>
    %149 = math.rsqrt %148 : vector<1x128xf32>
    %150 = arith.mulf %146, %149 : vector<1x128xf32>
    %c2_92 = arith.constant 2 : index
    %c0_93 = arith.constant 0 : index
    %151 = vector.load %arg6[%c2_92, %c0_93] : memref<3x128xf32, #tpu.memory_space<vmem>>, vector<1x128xf32>
    %152 = arith.mulf %136, %150 : vector<1x128xf32>
    %153 = arith.subf %151, %152 : vector<1x128xf32>
    %154 = vector.broadcast %150 : vector<1x128xf32> to vector<48x128xf32>
    %155 = arith.mulf %132, %154 : vector<48x128xf32>
    %156 = vector.broadcast %153 : vector<1x128xf32> to vector<48x128xf32>
    %157 = arith.addf %155, %156 : vector<48x128xf32>
    %cst_94 = arith.constant 0.000000e+00 : f32
    %158 = vector.broadcast %cst_94 : f32 to vector<48x128xf32>
    %159 = arith.maximumf %157, %158 : vector<48x128xf32>
    %c0_95 = arith.constant 0 : index
    %c0_96 = arith.constant 0 : index
    %160 = vector.load %arg14[%c0_95, %c0_96] : memref<48x128xf32, #tpu.memory_space<vmem>>, vector<48x128xf32>
    tpu.vector_store %arg14[%c0_95, %c0_96], %159 {strides = array<i32>} : memref<48x128xf32, #tpu.memory_space<vmem>>, vector<48x128xf32>,
    %c0_97 = arith.constant 0 : index
    %c0_98 = arith.constant 0 : index
    %161 = tpu.strided_load %arg14[%c0_97, %c0_98] {strides = array<i32: 4, 1>} : memref<48x128xf32, #tpu.memory_space<vmem>>, vector<12x128xf32>
    %c1_99 = arith.constant 1 : index
    %c0_100 = arith.constant 0 : index
    %162 = tpu.strided_load %arg14[%c1_99, %c0_100] {strides = array<i32: 4, 1>} : memref<48x128xf32, #tpu.memory_space<vmem>>, vector<12x128xf32>
    %163 = arith.maximumf %161, %162 : vector<12x128xf32>
    %c2_101 = arith.constant 2 : index
    %c0_102 = arith.constant 0 : index
    %164 = tpu.strided_load %arg14[%c2_101, %c0_102] {strides = array<i32: 4, 1>} : memref<48x128xf32, #tpu.memory_space<vmem>>, vector<12x128xf32>
    %165 = arith.maximumf %163, %164 : vector<12x128xf32>
    %c3_103 = arith.constant 3 : index
    %c0_104 = arith.constant 0 : index
    %166 = tpu.strided_load %arg14[%c3_103, %c0_104] {strides = array<i32: 4, 1>} : memref<48x128xf32, #tpu.memory_space<vmem>>, vector<12x128xf32>
    %167 = arith.maximumf %165, %166 : vector<12x128xf32>
    %168 = vector.shape_cast %167 : vector<12x128xf32> to vector<2x6x128xf32>
    %169 = vector.extract_strided_slice %168 {offsets = [0, 0, 0], sizes = [2, 4, 128], strides = [1, 1, 1]} : vector<2x6x128xf32> to vector<2x4x128xf32>
    %170 = vector.shape_cast %169 : vector<2x4x128xf32> to vector<8x128xf32>
    %c0_105 = arith.constant 0 : index
    %c0_106 = arith.constant 0 : index
    %171 = vector.load %arg7[%c0_105, %c0_106] : memref<384x128xf32, #tpu.memory_space<vmem>>, vector<128x128xf32>
    %cst_107 = arith.constant dense<0.000000e+00> : vector<8x128xf32>
    %172 = tpu.matmul %170, %171, %cst_107 {dimension_numbers = #tpu.dot_dimension_numbers<[1], [0], [0], [1], [0, 0, 1, 1], [], []>} : vector<8x128xf32>, vector<128x128xf32>, vector<8x128xf32> -> vector<8x128xf32>
    %173 = vector.extract_strided_slice %168 {offsets = [0, 1, 0], sizes = [2, 4, 128], strides = [1, 1, 1]} : vector<2x6x128xf32> to vector<2x4x128xf32>
    %174 = vector.shape_cast %173 : vector<2x4x128xf32> to vector<8x128xf32>
    %c128_108 = arith.constant 128 : index
    %c0_109 = arith.constant 0 : index
    %175 = vector.load %arg7[%c128_108, %c0_109] : memref<384x128xf32, #tpu.memory_space<vmem>>, vector<128x128xf32>
    %cst_110 = arith.constant dense<0.000000e+00> : vector<8x128xf32>
    %176 = tpu.matmul %174, %175, %cst_110 {dimension_numbers = #tpu.dot_dimension_numbers<[1], [0], [0], [1], [0, 0, 1, 1], [], []>} : vector<8x128xf32>, vector<128x128xf32>, vector<8x128xf32> -> vector<8x128xf32>
    %177 = arith.addf %172, %176 : vector<8x128xf32>
    %178 = vector.extract_strided_slice %168 {offsets = [0, 2, 0], sizes = [2, 4, 128], strides = [1, 1, 1]} : vector<2x6x128xf32> to vector<2x4x128xf32>
    %179 = vector.shape_cast %178 : vector<2x4x128xf32> to vector<8x128xf32>
    %c256_111 = arith.constant 256 : index
    %c0_112 = arith.constant 0 : index
    %180 = vector.load %arg7[%c256_111, %c0_112] : memref<384x128xf32, #tpu.memory_space<vmem>>, vector<128x128xf32>
    %cst_113 = arith.constant dense<0.000000e+00> : vector<8x128xf32>
    %181 = tpu.matmul %179, %180, %cst_113 {dimension_numbers = #tpu.dot_dimension_numbers<[1], [0], [0], [1], [0, 0, 1, 1], [], []>} : vector<8x128xf32>, vector<128x128xf32>, vector<8x128xf32> -> vector<8x128xf32>
    %182 = arith.addf %177, %181 : vector<8x128xf32>
    %c0_114 = arith.constant 0 : index
    %c0_115 = arith.constant 0 : index
    %183 = vector.load %arg8[%c0_114, %c0_115] : memref<3x128xf32, #tpu.memory_space<vmem>>, vector<1x128xf32>
    %184 = vector.broadcast %183 : vector<1x128xf32> to vector<8x128xf32>
    %185 = arith.addf %182, %184 : vector<8x128xf32>
    %cst_116 = arith.constant dense<0.000000e+00> : vector<128xf32>
    %186 = vector.multi_reduction <add>, %185, %cst_116 [0] : vector<8x128xf32> to vector<128xf32>
    %187 = vector.shape_cast %186 : vector<128xf32> to vector<1x128xf32>
    %cst_117 = arith.constant 1.250000e-01 : f32
    %188 = vector.broadcast %cst_117 : f32 to vector<1x128xf32>
    %189 = arith.mulf %187, %188 : vector<1x128xf32>
    %190 = arith.mulf %185, %185 : vector<8x128xf32>
    %cst_118 = arith.constant dense<0.000000e+00> : vector<128xf32>
    %191 = vector.multi_reduction <add>, %190, %cst_118 [0] : vector<8x128xf32> to vector<128xf32>
    %192 = vector.shape_cast %191 : vector<128xf32> to vector<1x128xf32>
    %cst_119 = arith.constant 1.250000e-01 : f32
    %193 = vector.broadcast %cst_119 : f32 to vector<1x128xf32>
    %194 = arith.mulf %192, %193 : vector<1x128xf32>
    %195 = arith.mulf %189, %189 : vector<1x128xf32>
    %196 = arith.subf %194, %195 : vector<1x128xf32>
    %cst_120 = arith.constant 0.000000e+00 : f32
    %197 = vector.broadcast %cst_120 : f32 to vector<1x128xf32>
    %198 = arith.maximumf %196, %197 : vector<1x128xf32>
    %c1_121 = arith.constant 1 : index
    %c0_122 = arith.constant 0 : index
    %199 = vector.load %arg8[%c1_121, %c0_122] : memref<3x128xf32, #tpu.memory_space<vmem>>, vector<1x128xf32>
    %cst_123 = arith.constant 9.99999974E-6 : f32
    %200 = vector.broadcast %cst_123 : f32 to vector<1x128xf32>
    %201 = arith.addf %198, %200 : vector<1x128xf32>
    %202 = math.rsqrt %201 : vector<1x128xf32>
    %203 = arith.mulf %199, %202 : vector<1x128xf32>
    %c2_124 = arith.constant 2 : index
    %c0_125 = arith.constant 0 : index
    %204 = vector.load %arg8[%c2_124, %c0_125] : memref<3x128xf32, #tpu.memory_space<vmem>>, vector<1x128xf32>
    %205 = arith.mulf %189, %203 : vector<1x128xf32>
    %206 = arith.subf %204, %205 : vector<1x128xf32>
    %207 = vector.broadcast %203 : vector<1x128xf32> to vector<8x128xf32>
    %208 = arith.mulf %185, %207 : vector<8x128xf32>
    %209 = vector.broadcast %206 : vector<1x128xf32> to vector<8x128xf32>
    %210 = arith.addf %208, %209 : vector<8x128xf32>
    %cst_126 = arith.constant 0.000000e+00 : f32
    %211 = vector.broadcast %cst_126 : f32 to vector<8x128xf32>
    %212 = arith.maximumf %210, %211 : vector<8x128xf32>
    %c0_127 = arith.constant 0 : index
    %c0_128 = arith.constant 0 : index
    %213 = vector.load %arg15[%c0_127, %c0_128] : memref<8x128xf32, #tpu.memory_space<vmem>>, vector<8x128xf32>
    tpu.vector_store %arg15[%c0_127, %c0_128], %212 {strides = array<i32>} : memref<8x128xf32, #tpu.memory_space<vmem>>, vector<8x128xf32>,
    %c0_129 = arith.constant 0 : index
    %c0_130 = arith.constant 0 : index
    %214 = tpu.strided_load %arg15[%c0_129, %c0_130] {strides = array<i32: 4, 1>} : memref<8x128xf32, #tpu.memory_space<vmem>>, vector<2x128xf32>
    %c1_131 = arith.constant 1 : index
    %c0_132 = arith.constant 0 : index
    %215 = tpu.strided_load %arg15[%c1_131, %c0_132] {strides = array<i32: 4, 1>} : memref<8x128xf32, #tpu.memory_space<vmem>>, vector<2x128xf32>
    %216 = arith.maximumf %214, %215 : vector<2x128xf32>
    %c2_133 = arith.constant 2 : index
    %c0_134 = arith.constant 0 : index
    %217 = tpu.strided_load %arg15[%c2_133, %c0_134] {strides = array<i32: 4, 1>} : memref<8x128xf32, #tpu.memory_space<vmem>>, vector<2x128xf32>
    %218 = arith.maximumf %216, %217 : vector<2x128xf32>
    %c3_135 = arith.constant 3 : index
    %c0_136 = arith.constant 0 : index
    %219 = tpu.strided_load %arg15[%c3_135, %c0_136] {strides = array<i32: 4, 1>} : memref<8x128xf32, #tpu.memory_space<vmem>>, vector<2x128xf32>
    %220 = arith.maximumf %218, %219 : vector<2x128xf32>
    %c0_137 = arith.constant 0 : index
    %c0_138 = arith.constant 0 : index
    %221 = vector.load %arg9[%c0_137, %c0_138] : memref<128x128xf32, #tpu.memory_space<vmem>>, vector<128x128xf32>
    %cst_139 = arith.constant dense<0.000000e+00> : vector<2x128xf32>
    %222 = tpu.matmul %220, %221, %cst_139 {dimension_numbers = #tpu.dot_dimension_numbers<[1], [0], [0], [1], [0, 0, 1, 1], [], []>} : vector<2x128xf32>, vector<128x128xf32>, vector<2x128xf32> -> vector<2x128xf32>
    %c0_140 = arith.constant 0 : index
    %c0_141 = arith.constant 0 : index
    %223 = vector.load %arg10[%c0_140, %c0_141] : memref<1x128xf32, #tpu.memory_space<vmem>>, vector<1x128xf32>
    %224 = vector.broadcast %223 : vector<1x128xf32> to vector<2x128xf32>
    %225 = arith.addf %222, %224 : vector<2x128xf32>
    %c0_142 = arith.constant 0 : index
    %c0_143 = arith.constant 0 : index
    %226 = vector.load %arg11[%c0_142, %c0_143] : memref<2x128xf32, #tpu.memory_space<vmem>>, vector<2x128xf32>
    tpu.vector_store %arg11[%c0_142, %c0_143], %225 {strides = array<i32>} : memref<2x128xf32, #tpu.memory_space<vmem>>, vector<2x128xf32>,
    return
  }
}

</mosaic_0001>

<bundles_post_ra>
// kernel: _lambda_.1
= control target key start
LH: loop header
LB: loop body
LE: loop exit
PB: predicated region body
PF: predicated region fallthrough
CT: control target
= control target key end

     0   :  { %16 = vsyncpa [#allocation7], 0  ;;  %s21191_s0 = inlined_call_operand.vmem [shape: f32[2,428,16], index: 0, kind: input, shape index: {}]   ;;  %s21192_s1 = inlined_call_operand.vmem [shape: f32[80,128], index: 1, kind: input, shape index: {}]   ;;  %s21193_s2 = inlined_call_operand.vmem [shape: f32[3,128], index: 2, kind: input, shape index: {}]   ;;  %s21194_s3 = inlined_call_operand.vmem [shape: f32[384,128], index: 3, kind: input, shape index: {}]   ;;  %s21195_s4 = inlined_call_operand.vmem [shape: f32[3,128], index: 4, kind: input, shape index: {}]   ;;  %s21196_s5 = inlined_call_operand.vmem [shape: f32[384,128], index: 5, kind: input, shape index: {}]   ;;  %s21197_s6 = inlined_call_operand.vmem [shape: f32[3,128], index: 6, kind: input, shape index: {}]   ;;  %s21198_s7 = inlined_call_operand.vmem [shape: f32[384,128], index: 7, kind: input, shape index: {}]   ;;  %s21199_s8 = inlined_call_operand.vmem [shape: f32[3,128], index: 8, kind: input, shape index: {}]   ;;  %s21200_s9 = inlined_call_operand.hbm [shape: f32[128,128], index: 9, kind: input, shape index: {}]   ;;  %s21201_s10 = inlined_call_operand.vmem [shape: f32[1,128], index: 10, kind: input, shape index: {}]   ;;  %s21202_s11 = inlined_call_operand.hbm [shape: f32[2,128], index: 11, kind: output, shape index: {}]  }
   0x1   :  { %17 = vsyncpa [#allocation8], 0  ;;  %s14805_s17 = smov [#allocation6]   ;;  %s14757_s21 = scalar_lea.hbm %s21200_s9, 2048 }
   0x2   :  { %s41_s18 = sshll.u32 %s14805_s17, 4  ;;  %p14758_p0 = scmp.ne.s32.totalorder %s21200_s9, %s14757_s21  ;;  %s42_s18 = int_to_ptr.vmem [resolvable:$true] %s41_s18 }
   0x3   :  { %p14761_p1 = scmp.lt.u32.totalorder %s14757_s21, %s21200_s9 }
   0x5   :  { %p14763_p2 = pnand %p14761_p1, %p14758_p0 }
   0x7   :  { %14766 = shalt.err (!%p14763_p2)
}
   0x8   :  { %s14767_s26 = scalar_lea.vmem %s42_s18, 2048  ;;  %p14772_p4 = scmp.lt.s32.totalorder %s42_s18, %s42_s18 }
   0x9   :  { %p14768_p3 = scmp.ne.s32.totalorder %s42_s18, %s14767_s26  ;;  %p14773_p5 = scmp.lt.s32.totalorder %s14767_s26, %s14767_s26 }
   0xb   :  { %p14774_p6 = por %p14773_p5, %p14772_p4 }
   0xd   :  { %p14775_p7 = pnand %p14774_p6, %p14768_p3 }
   0xf   :  { %14778 = shalt.err (!%p14775_p7)
}
  0x10   :  { %s14806_s27 = smov 128   ;;  %s14807_s28 = smov 8  }
  0x11   :  { %47 = dma.hbm_to_vmem [thread:$0]  %s21200_s9, 2048, %s42_s18, [#allocation7], %s14806_s27, %s14806_s27, %s14807_s28  }
  0x12   :  { %14801 = dma.done.wait [#allocation7], 2048  }
  0x13   :  { %14802 = vsyncadd [#allocation7], 4294965248  ;;  %vm269_vm0 = vcmask 130048   ;;  %v159_v0 = vld [vmem:[%s21192_s1] sm:$0xff]  ;;  %v160_v1 = vld [vmem:[%s21192_s1 + $0x8] sm:$0xff]  ;;  %vm7149_vm1 = vcmask 1040384  }
  0x14   :  { %v53_v2 = vld [vmem:[%s21191_s0] sm:$0xff]  ;;  %v14894_v3 = vpack.c.bf16 %v160_v1, %v159_v0  ;;  %v2203_v5 = vld [vmem:[%s21192_s1 + $0x28] sm:$0xff]  ;;  %v55_v8 = vld [vmem:[%s21191_s0 + $0x10] sm:$0xff]  ;;  %vm7150_vm2 = vcmask 1042434   ;;  %vm7152_vm3 = vcmask 1044484   ;;  %vm7154_vm4 = vcmask 1046534  }
  0x15   :  { %12818 = vmatprep.mubr.msk.f32.mxu0 %vm269_vm0, %v53_v2  ;;  %v2202_v4 = vld [vmem:[%s21192_s1 + $0x20] sm:$0xff]  ;;  %v54_v7 = vld [vmem:[%s21191_s0 + $0x8] sm:$0xff]  ;;  %v56_v9 = vld [vmem:[%s21191_s0 + $0x18] sm:$0xff]  ;;  %vm14810_vm8 = vmmov 0   ;;  %s14812_s25 = smov [#allocation9]  }
  0x16   :  { %v13950_v6 = vpack.c.bf16 %v2203_v5, %v2202_v4  ;;  %13947 = vmatprep.subr.bf16.mxu0 %v14894_v3  ;;  %v57_v10 = vld [vmem:[%s21191_s0 + $0x20] sm:$0xff]  ;;  %v58_v11 = vld [vmem:[%s21191_s0 + $0x28] sm:$0xff]  ;;  %v59_v12 = vld [vmem:[%s21191_s0 + $0x30] sm:$0xff]  ;;  %s11301_s26 = sshll.u32 %s14812_s25, 4  ;;  %s11302_s26 = int_to_ptr.vmem [resolvable:$true] %s11301_s26 }
  0x17   :  { %13949 = vmatpush3.bf16.msra.mxu0 %v14894_v3  ;;  %v3329_v13 = vld [vmem:[%s21192_s1 + $0x30] sm:$0xff]  ;;  %v3330_v14 = vld [vmem:[%s21192_s1 + $0x38] sm:$0xff]  ;;  %v61_v17 = vld [vmem:[%s21191_s0 + $0x40] sm:$0xff]  ;;  %s14779_s27 = scalar_lea.vmem %s11302_s26, 32  ;;  %p14784_p9 = scmp.lt.s32.totalorder %s11302_s26, %s11302_s26 }
  0x18   :  { %13951 = vmatprep.subr.bf16.mxu0 %v13950_v6  ;;  %v14934_v15 = vpack.c.bf16 %v3330_v14, %v3329_v13  ;;  %v60_v16 = vld [vmem:[%s21191_s0 + $0x38] sm:$0xff]  ;;  %v62_v18 = vld [vmem:[%s21191_s0 + $0x48] sm:$0xff]  ;;  %v63_v19 = vld [vmem:[%s21191_s0 + $0x50] sm:$0xff]  ;;  %p14780_p8 = scmp.ne.s32.totalorder %s11302_s26, %s14779_s27  ;;  %p14785_p10 = scmp.lt.s32.totalorder %s14779_s27, %s14779_s27 }
  0x19   :  { %v64_v20 = vld [vmem:[%s21191_s0 + $0x58] sm:$0xff]  ;;  %v65_v21 = vld [vmem:[%s21191_s0 + $0x60] sm:$0xff]  ;;  %v66_v22 = vld [vmem:[%s21191_s0 + $0x68] sm:$0xff] }
  0x1a   :  { %12819 = vmatmul.mubr.msk.f32.vlgmr.msra.gmra.mrb[0].mxu0 %vm269_vm0, %v54_v7  ;;  %v67_v23 = vld [vmem:[%s21191_s0 + $0x70] sm:$0xff]  ;;  %v68_v24 = vld [vmem:[%s21191_s0 + $0x78] sm:$0xff]  ;;  %v69_v25 = vld [vmem:[%s21191_s0 + $0x80] sm:$0xff]  ;;  %p14786_p11 = por %p14785_p10, %p14784_p9 }
  0x1b   :  { %13953 = vmatpush3.bf16.msra.mxu0 %v13950_v6  ;;  %12821 = vmatprep.mubr.msk.f32.mxu0 %vm269_vm0, %v55_v8  ;;  %v70_v26 = vld [vmem:[%s21191_s0 + $0x88] sm:$0xff]  ;;  %v71_v27 = vld [vmem:[%s21191_s0 + $0x90] sm:$0xff]  ;;  %v72_v28 = vld [vmem:[%s21191_s0 + $0x98] sm:$0xff] }
  0x1c   :  { %13955 = vmatprep.subr.bf16.mxu0 %v14934_v15  ;;  %v73_v29 = vld [vmem:[%s21191_s0 + $0xa0] sm:$0xff]  ;;  %v74_v30 = vld [vmem:[%s21191_s0 + $0xa8] sm:$0xff]  ;;  %v75_v31 = vld [vmem:[%s21191_s0 + $0xb0] sm:$0xff]  ;;  %p14787_p12 = pnand %p14786_p11, %p14780_p8 }
  0x1d   :  { %v76_v32 = vld [vmem:[%s21191_s0 + $0xb8] sm:$0xff]  ;;  %v77_v33 = vld [vmem:[%s21191_s0 + $0xc0] sm:$0xff]  ;;  %v78_v34 = vld [vmem:[%s21191_s0 + $0xc8] sm:$0xff] }
  0x1e   :  { %12822 = vmatmul.mubr.msk.f32.gmra.mrb[2].mxu0 %vm269_vm0, %v56_v9  ;;  %v79_v35 = vld [vmem:[%s21191_s0 + $0xd0] sm:$0xff]  ;;  %v80_v36 = vld [vmem:[%s21191_s0 + $0xd8] sm:$0xff]  ;;  %v81_v37 = vld [vmem:[%s21191_s0 + $0xe0] sm:$0xff] }
  0x1f   :  { %12824 = vmatprep.mubr.msk.f32.mxu0 %vm269_vm0, %v57_v10  ;;  %v82_v38 = vld [vmem:[%s21191_s0 + $0xe8] sm:$0xff]  ;;  %v83_v39 = vld [vmem:[%s21191_s0 + $0xf0] sm:$0xff]  ;;  %v84_v40 = vld [vmem:[%s21191_s0 + $0xf8] sm:$0xff] }
  0x20   :  { %v85_v41 = vld [vmem:[%s21191_s0 + $0x100] sm:$0xff]  ;;  %v86_v42 = vld [vmem:[%s21191_s0 + $0x108] sm:$0xff]  ;;  %v87_v43 = vld [vmem:[%s21191_s0 + $0x110] sm:$0xff] }
  0x21   :  { %v88_v44 = vld [vmem:[%s21191_s0 + $0x118] sm:$0xff]  ;;  %v2096_v45 = vld [vmem:[%s21191_s0 + $0x2] sm:$0xff]  ;;  %v2097_v46 = vld [vmem:[%s21191_s0 + $0xa] sm:$0xff] }
  0x22   :  { %12825 = vmatmul.mubr.msk.f32.gmra.mrb[4].mxu0 %vm269_vm0, %v58_v11  ;;  %v2098_v47 = vld [vmem:[%s21191_s0 + $0x12] sm:$0xff]  ;;  %v2099_v48 = vld [vmem:[%s21191_s0 + $0x1a] sm:$0xff]  ;;  %v2100_v49 = vld [vmem:[%s21191_s0 + $0x22] sm:$0xff] }
  0x23   :  { %12827 = vmatprep.mubr.msk.f32.mxu0 %vm269_vm0, %v59_v12  ;;  %v2101_v50 = vld [vmem:[%s21191_s0 + $0x2a] sm:$0xff]  ;;  %v2102_v51 = vld [vmem:[%s21191_s0 + $0x32] sm:$0xff]  ;;  %v2103_v54 = vld [vmem:[%s21191_s0 + $0x3a] sm:$0xff] }
  0x24   :  { %v267_v52 = vld [vmem:[%s21192_s1 + $0x10] sm:$0xff]  ;;  %v268_v53 = vld [vmem:[%s21192_s1 + $0x18] sm:$0xff]  ;;  %v2104_v56 = vld [vmem:[%s21191_s0 + $0x42] sm:$0xff] }
  0x25   :  { %v13942_v55 = vpack.c.bf16 %v268_v53, %v267_v52  ;;  %v161_v57 = vld [vmem:[%s21191_s0 + $0x1] sm:$0xff]  ;;  %v2105_v58 = vld [vmem:[%s21191_s0 + $0x4a] sm:$0xff]  ;;  %v2106_v60 = vld [vmem:[%s21191_s0 + $0x52] sm:$0xff] }
  0x26   :  { %12828 = vmatmul.mubr.msk.f32.gmra.mrb[6].mxu0 %vm269_vm0, %v60_v16  ;;  %12655 = vmatprep.mubr.msk.f32.mxu1 %vm269_vm0, %v161_v57  ;;  %v162_v59 = vld [vmem:[%s21191_s0 + $0x9] sm:$0xff]  ;;  %v163_v61 = vld [vmem:[%s21191_s0 + $0x11] sm:$0xff]  ;;  %v2107_v62 = vld [vmem:[%s21191_s0 + $0x5a] sm:$0xff] }
  0x27   :  { %12830 = vmatprep.mubr.msk.f32.mxu0 %vm269_vm0, %v61_v17  ;;  %13943 = vmatprep.subr.bf16.mxu1 %v13942_v55  ;;  %v164_v63 = vld [vmem:[%s21191_s0 + $0x19] sm:$0xff]  ;;  %v2108_v0 = vld [vmem:[%s21191_s0 + $0x62] sm:$0xff]  ;;  %v2109_v2 = vld [vmem:[%s21191_s0 + $0x6a] sm:$0xff] }
  0x28   :  { %13945 = vmatpush3.bf16.msra.mxu1 %v13942_v55  ;;  %v165_v1 = vld [vmem:[%s21191_s0 + $0x21] sm:$0xff]  ;;  %v2110_v4 = vld [vmem:[%s21191_s0 + $0x72] sm:$0xff]  ;;  %v2113_v10 = vld [vmem:[%s21191_s0 + $0x8a] sm:$0xff] }
  0x29   :  { %14250 = vmatprep.subr.bf16.mxu1 %v14894_v3  ;;  %v167_v5 = vld [vmem:[%s21191_s0 + $0x31] sm:$0xff]  ;;  %v2111_v6 = vld [vmem:[%s21191_s0 + $0x7a] sm:$0xff]  ;;  %v2112_v8 = vld [vmem:[%s21191_s0 + $0x82] sm:$0xff] }
  0x2a   :  { %12831 = vmatmul.mubr.msk.f32.gmra.mrb[8].mxu0 %vm269_vm0, %v62_v18  ;;  %v168_v7 = vld [vmem:[%s21191_s0 + $0x39] sm:$0xff]  ;;  %v169_v9 = vld [vmem:[%s21191_s0 + $0x41] sm:$0xff]  ;;  %v170_v11 = vld [vmem:[%s21191_s0 + $0x49] sm:$0xff] }
  0x2b   :  { %12833 = vmatprep.mubr.msk.f32.mxu0 %vm269_vm0, %v63_v19  ;;  %12656 = vmatmul.mubr.msk.f32.vlgmr.msra.gmra.mrb[0].mxu1 %vm269_vm0, %v162_v59  ;;  %v2114_v12 = vld [vmem:[%s21191_s0 + $0x92] sm:$0xff]  ;;  %v2115_v14 = vld [vmem:[%s21191_s0 + $0x9a] sm:$0xff]  ;;  %v2116_v16 = vld [vmem:[%s21191_s0 + $0xa2] sm:$0xff] }
  0x2c   :  { %14251 = vmatpush3.bf16.msra.mxu1 %v14894_v3  ;;  %12658 = vmatprep.mubr.msk.f32.mxu1 %vm269_vm0, %v163_v61  ;;  %v166_v3 = vld [vmem:[%s21191_s0 + $0x29] sm:$0xff]  ;;  %v171_v13 = vld [vmem:[%s21191_s0 + $0x51] sm:$0xff]  ;;  %v173_v17 = vld [vmem:[%s21191_s0 + $0x61] sm:$0xff] }
  0x2d   :  { %v2117_v18 = vld [vmem:[%s21191_s0 + $0xaa] sm:$0xff]  ;;  %v2134_v52 = vld [vmem:[%s21191_s0 + $0x132] sm:$0xff]  ;;  %v193_v57 = vld [vmem:[%s21191_s0 + $0x101] sm:$0xff] }
  0x2e   :  { %12834 = vmatmul.mubr.msk.f32.gmra.mrb[10].mxu0 %vm269_vm0, %v64_v20  ;;  %v174_v19 = vld [vmem:[%s21191_s0 + $0x69] sm:$0xff]  ;;  %v2118_v20 = vld [vmem:[%s21191_s0 + $0xb2] sm:$0xff]  ;;  %vm19068_vm5 = vmor %vm7149_vm1, %vm7150_vm2 }
  0x2f   :  { %12836 = vmatprep.mubr.msk.f32.mxu0 %vm269_vm0, %v65_v21  ;;  %12659 = vmatmul.mubr.msk.f32.gmra.mrb[2].mxu1 %vm269_vm0, %v164_v63  ;;  %v175_v21 = vld [vmem:[%s21191_s0 + $0x71] sm:$0xff]  ;;  %v192_v55 = vld [vmem:[%s21191_s0 + $0xf9] sm:$0xff]  ;;  %v194_v59 = vld [vmem:[%s21191_s0 + $0x109] sm:$0xff] }
  0x30   :  { %12661 = vmatprep.mubr.msk.f32.mxu1 %vm269_vm0, %v165_v1  ;;  %v191_v53 = vld [vmem:[%s21191_s0 + $0xf1] sm:$0xff]  ;;  %v196_v63 = vld [vmem:[%s21191_s0 + $0x119] sm:$0xff]  ;;  %vm7153_vm6 = vmor %vm19068_vm5, %vm7152_vm3 }
  0x31   :  { %v195_v61 = vld [vmem:[%s21191_s0 + $0x111] sm:$0xff]  ;;  %v4456_v1 = vld [vmem:[%s21192_s1 + $0x40] sm:$0xff]  ;;  %vm19131_vm7 = vmor %vm7153_vm6, %vm7154_vm4 }
  0x32   :  { %12837 = vmatmul.mubr.msk.f32.gmra.mrb[12].mxu0 %vm269_vm0, %v66_v22  ;;  %v2119_v22 = vld [vmem:[%s21191_s0 + $0xba] sm:$0xff] }
  0x33   :  { %12839 = vmatprep.mubr.msk.f32.mxu0 %vm269_vm0, %v67_v23  ;;  %12662 = vmatmul.mubr.msk.f32.gmra.mrb[4].mxu1 %vm269_vm0, %v166_v3  ;;  %v176_v23 = vld [vmem:[%s21191_s0 + $0x79] sm:$0xff]  ;;  %v2141_v3 = vld [vmem:[%s21191_s0 + $0x16a] sm:$0xff] }
  0x34   :  { %12664 = vmatprep.mubr.msk.f32.mxu1 %vm269_vm0, %v167_v5  ;;  %v197_v5 = vld [vmem:[%s21191_s0 + $0x121] sm:$0xff] }
  0x36   :  { %12840 = vmatmul.mubr.msk.f32.gmra.mrb[14].mxu0 %vm269_vm0, %v68_v24  ;;  %v2120_v24 = vld [vmem:[%s21191_s0 + $0xc2] sm:$0xff] }
  0x37   :  { %12842 = vmatprep.mubr.msk.f32.mxu0 %vm269_vm0, %v69_v25  ;;  %12665 = vmatmul.mubr.msk.f32.gmra.mrb[6].mxu1 %vm269_vm0, %v168_v7  ;;  %v177_v25 = vld [vmem:[%s21191_s0 + $0x81] sm:$0xff]  ;;  %v2142_v7 = vld [vmem:[%s21191_s0 + $0x172] sm:$0xff] }
  0x38   :  { %12667 = vmatprep.mubr.msk.f32.mxu1 %vm269_vm0, %v169_v9  ;;  %v2143_v9 = vld [vmem:[%s21191_s0 + $0x17a] sm:$0xff] }
  0x3a   :  { %12843 = vmatmul.mubr.msk.f32.gmra.mrb[16].mxu0 %vm269_vm0, %v70_v26  ;;  %v2121_v26 = vld [vmem:[%s21191_s0 + $0xca] sm:$0xff] }
  0x3b   :  { %12845 = vmatprep.mubr.msk.f32.mxu0 %vm269_vm0, %v71_v27  ;;  %12668 = vmatmul.mubr.msk.f32.gmra.mrb[8].mxu1 %vm269_vm0, %v170_v11  ;;  %v178_v27 = vld [vmem:[%s21191_s0 + $0x89] sm:$0xff] }
  0x3c   :  { %12670 = vmatprep.mubr.msk.f32.mxu1 %vm269_vm0, %v171_v13  ;;  %v2144_v11 = vld [vmem:[%s21191_s0 + $0x182] sm:$0xff]  ;;  %v2145_v13 = vld [vmem:[%s21191_s0 + $0x18a] sm:$0xff] }
  0x3e   :  { %12846 = vmatmul.mubr.msk.f32.gmra.mrb[18].mxu0 %vm269_vm0, %v72_v28  ;;  %v2122_v28 = vld [vmem:[%s21191_s0 + $0xd2] sm:$0xff] }
  0x3f   :  { %12848 = vmatprep.mubr.msk.f32.mxu0 %vm269_vm0, %v73_v29  ;;  %v179_v29 = vld [vmem:[%s21191_s0 + $0x91] sm:$0xff] }
  0x42   :  { %12849 = vmatmul.mubr.msk.f32.gmra.mrb[20].mxu0 %vm269_vm0, %v74_v30  ;;  %v2123_v30 = vld [vmem:[%s21191_s0 + $0xda] sm:$0xff] }
  0x43   :  { %12851 = vmatprep.mubr.msk.f32.mxu0 %vm269_vm0, %v75_v31  ;;  %v180_v31 = vld [vmem:[%s21191_s0 + $0x99] sm:$0xff] }
  0x46   :  { %12852 = vmatmul.mubr.msk.f32.gmra.mrb[22].mxu0 %vm269_vm0, %v76_v32  ;;  %v2124_v32 = vld [vmem:[%s21191_s0 + $0xe2] sm:$0xff] }
  0x47   :  { %12854 = vmatprep.mubr.msk.f32.mxu0 %vm269_vm0, %v77_v33  ;;  %v181_v33 = vld [vmem:[%s21191_s0 + $0xa1] sm:$0xff] }
  0x4a   :  { %12855 = vmatmul.mubr.msk.f32.gmra.mrb[24].mxu0 %vm269_vm0, %v78_v34  ;;  %v2125_v34 = vld [vmem:[%s21191_s0 + $0xea] sm:$0xff] }
  0x4b   :  { %12857 = vmatprep.mubr.msk.f32.mxu0 %vm269_vm0, %v79_v35  ;;  %v182_v35 = vld [vmem:[%s21191_s0 + $0xa9] sm:$0xff] }
  0x4e   :  { %12858 = vmatmul.mubr.msk.f32.gmra.mrb[26].mxu0 %vm269_vm0, %v80_v36  ;;  %v2126_v36 = vld [vmem:[%s21191_s0 + $0xf2] sm:$0xff] }
  0x4f   :  { %12860 = vmatprep.mubr.msk.f32.mxu0 %vm269_vm0, %v81_v37  ;;  %v183_v37 = vld [vmem:[%s21191_s0 + $0xb1] sm:$0xff] }
  0x52   :  { %12861 = vmatmul.mubr.msk.f32.gmra.mrb[28].mxu0 %vm269_vm0, %v82_v38  ;;  %v2127_v38 = vld [vmem:[%s21191_s0 + $0xfa] sm:$0xff] }
  0x53   :  { %12863 = vmatprep.mubr.msk.f32.mxu0 %vm269_vm0, %v83_v39  ;;  %v184_v39 = vld [vmem:[%s21191_s0 + $0xb9] sm:$0xff] }
  0x56   :  { %12864 = vmatmul.mubr.msk.f32.gmra.mrb[30].mxu0 %vm269_vm0, %v84_v40  ;;  %v2128_v40 = vld [vmem:[%s21191_s0 + $0x102] sm:$0xff] }
  0x57   :  { %12866 = vmatprep.mubr.msk.f32.mxu0 %vm269_vm0, %v85_v41  ;;  %v185_v41 = vld [vmem:[%s21191_s0 + $0xc1] sm:$0xff] }
  0x5a   :  { %12867 = vmatmul.mubr.msk.f32.gmra.mrb[32].mxu0 %vm269_vm0, %v86_v42  ;;  %v2129_v42 = vld [vmem:[%s21191_s0 + $0x10a] sm:$0xff] }
  0x5b   :  { %12869 = vmatprep.mubr.msk.f32.mxu0 %vm269_vm0, %v87_v43  ;;  %v186_v43 = vld [vmem:[%s21191_s0 + $0xc9] sm:$0xff] }
  0x5e   :  { %12870 = vmatmul.mubr.msk.f32.gmra.mrb[34].mxu0 %vm269_vm0, %v88_v44  ;;  %v2130_v44 = vld [vmem:[%s21191_s0 + $0x112] sm:$0xff] }
  0x5f   :  { %12981 = vmatprep.mubr.msk.f32.mxu0 %vm269_vm0, %v2096_v45  ;;  %v187_v45 = vld [vmem:[%s21191_s0 + $0xd1] sm:$0xff] }
  0x62   :  { %12982 = vmatmul.mubr.msk.f32.vlgmr.msra.gmra.mrb[0].mxu0 %vm269_vm0, %v2097_v46  ;;  %v2131_v46 = vld [vmem:[%s21191_s0 + $0x11a] sm:$0xff] }
  0x63   :  { %13957 = vmatpush3.bf16.msra.mxu0 %v14934_v15  ;;  %12984 = vmatprep.mubr.msk.f32.mxu0 %vm269_vm0, %v2098_v47  ;;  %v172_v15 = vld [vmem:[%s21191_s0 + $0x59] sm:$0xff] }
  0x64   :  { %12671 = vmatmul.mubr.msk.f32.gmra.mrb[10].mxu1 %vm269_vm0, %v172_v15  ;;  %v188_v47 = vld [vmem:[%s21191_s0 + $0xd9] sm:$0xff] }
  0x65   :  { %12673 = vmatprep.mubr.msk.f32.mxu1 %vm269_vm0, %v173_v17  ;;  %v2146_v15 = vld [vmem:[%s21191_s0 + $0x192] sm:$0xff]  ;;  %v2147_v17 = vld [vmem:[%s21191_s0 + $0x19a] sm:$0xff] }
  0x66   :  { %12985 = vmatmul.mubr.msk.f32.gmra.mrb[2].mxu0 %vm269_vm0, %v2099_v48  ;;  %v2132_v48 = vld [vmem:[%s21191_s0 + $0x122] sm:$0xff] }
  0x67   :  { %12987 = vmatprep.mubr.msk.f32.mxu0 %vm269_vm0, %v2100_v49  ;;  %v189_v49 = vld [vmem:[%s21191_s0 + $0xe1] sm:$0xff] }
  0x68   :  { %12674 = vmatmul.mubr.msk.f32.gmra.mrb[12].mxu1 %vm269_vm0, %v174_v19  ;;  %v2148_v19 = vld [vmem:[%s21191_s0 + $0x1a2] sm:$0xff] }
  0x69   :  { %12676 = vmatprep.mubr.msk.f32.mxu1 %vm269_vm0, %v175_v21  ;;  %v2149_v21 = vld [vmem:[%s21191_s0 + $0x1b2] sm:$0xff] }
  0x6a   :  { %12988 = vmatmul.mubr.msk.f32.gmra.mrb[4].mxu0 %vm269_vm0, %v2101_v50  ;;  %v2133_v50 = vld [vmem:[%s21191_s0 + $0x12a] sm:$0xff] }
  0x6b   :  { %12990 = vmatprep.mubr.msk.f32.mxu0 %vm269_vm0, %v2102_v51  ;;  %v190_v51 = vld [vmem:[%s21191_s0 + $0xe9] sm:$0xff] }
  0x6c   :  { %12677 = vmatmul.mubr.msk.f32.gmra.mrb[14].mxu1 %vm269_vm0, %v176_v23  ;;  %v2150_v23 = vld [vmem:[%s21191_s0 + $0x1ba] sm:$0xff] }
  0x6d   :  { %12679 = vmatprep.mubr.msk.f32.mxu1 %vm269_vm0, %v177_v25  ;;  %v2151_v25 = vld [vmem:[%s21191_s0 + $0x1c2] sm:$0xff] }
  0x6e   :  { %12991 = vmatmul.mubr.msk.f32.gmra.mrb[6].mxu0 %vm269_vm0, %v2103_v54  ;;  %v2135_v54 = vld [vmem:[%s21191_s0 + $0x13a] sm:$0xff] }
  0x6f   :  { %12993 = vmatprep.mubr.msk.f32.mxu0 %vm269_vm0, %v2104_v56  ;;  %v2136_v56 = vld [vmem:[%s21191_s0 + $0x142] sm:$0xff] }
  0x70   :  { %12680 = vmatmul.mubr.msk.f32.gmra.mrb[16].mxu1 %vm269_vm0, %v178_v27  ;;  %v2152_v27 = vld [vmem:[%s21191_s0 + $0x1ca] sm:$0xff] }
  0x71   :  { %12682 = vmatprep.mubr.msk.f32.mxu1 %vm269_vm0, %v179_v29  ;;  %v2153_v29 = vld [vmem:[%s21191_s0 + $0x1d2] sm:$0xff] }
  0x72   :  { %12994 = vmatmul.mubr.msk.f32.gmra.mrb[8].mxu0 %vm269_vm0, %v2105_v58  ;;  %v2137_v58 = vld [vmem:[%s21191_s0 + $0x14a] sm:$0xff] }
  0x73   :  { %12996 = vmatprep.mubr.msk.f32.mxu0 %vm269_vm0, %v2106_v60  ;;  %v2138_v60 = vld [vmem:[%s21191_s0 + $0x152] sm:$0xff] }
  0x74   :  { %12683 = vmatmul.mubr.msk.f32.gmra.mrb[18].mxu1 %vm269_vm0, %v180_v31  ;;  %v2154_v31 = vld [vmem:[%s21191_s0 + $0x1da] sm:$0xff] }
  0x75   :  { %12685 = vmatprep.mubr.msk.f32.mxu1 %vm269_vm0, %v181_v33  ;;  %v2155_v33 = vld [vmem:[%s21191_s0 + $0x1e2] sm:$0xff] }
  0x76   :  { %12997 = vmatmul.mubr.msk.f32.gmra.mrb[10].mxu0 %vm269_vm0, %v2107_v62  ;;  %v2139_v62 = vld [vmem:[%s21191_s0 + $0x15a] sm:$0xff] }
  0x77   :  { %12999 = vmatprep.mubr.msk.f32.mxu0 %vm269_vm0, %v2108_v0  ;;  %v2140_v0 = vld [vmem:[%s21191_s0 + $0x162] sm:$0xff] }
  0x78   :  { %12686 = vmatmul.mubr.msk.f32.gmra.mrb[20].mxu1 %vm269_vm0, %v182_v35  ;;  %v2156_v35 = vld [vmem:[%s21191_s0 + $0x1ea] sm:$0xff] }
  0x79   :  { %12688 = vmatprep.mubr.msk.f32.mxu1 %vm269_vm0, %v183_v37  ;;  %v2157_v37 = vld [vmem:[%s21191_s0 + $0x1f2] sm:$0xff] }
  0x7a   :  { %13000 = vmatmul.mubr.msk.f32.gmra.mrb[12].mxu0 %vm269_vm0, %v2109_v2  ;;  %v4457_v2 = vld [vmem:[%s21192_s1 + $0x48] sm:$0xff] }
  0x7b   :  { %13002 = vmatprep.mubr.msk.f32.mxu0 %vm269_vm0, %v2110_v4  ;;  %v15396_v4 = vpack.c.bf16 %v4457_v2, %v4456_v1  ;;  %v2171_v1 = vld [vmem:[%s21191_s0 + $0x262] sm:$0xff] }
  0x7c   :  { %12689 = vmatmul.mubr.msk.f32.gmra.mrb[22].mxu1 %vm269_vm0, %v184_v39  ;;  %v2158_v39 = vld [vmem:[%s21191_s0 + $0x1fa] sm:$0xff] }
  0x7d   :  { %12691 = vmatprep.mubr.msk.f32.mxu1 %vm269_vm0, %v185_v41  ;;  %13959 = vmatprep.subr.bf16.mxu0 %v15396_v4  ;;  %v2159_v41 = vld [vmem:[%s21191_s0 + $0x202] sm:$0xff] }
  0x7e   :  { %13003 = vmatmul.mubr.msk.f32.gmra.mrb[14].mxu0 %vm269_vm0, %v2111_v6  ;;  %v198_v6 = vld [vmem:[%s21191_s0 + $0x129] sm:$0xff]  ;;  %v228_v2 = vld [vmem:[%s21191_s0 + $0x221] sm:$0xff] }
  0x7f   :  { %13005 = vmatprep.mubr.msk.f32.mxu0 %vm269_vm0, %v2112_v8  ;;  %v199_v8 = vld [vmem:[%s21191_s0 + $0x131] sm:$0xff] }
  0x80   :  { %12692 = vmatmul.mubr.msk.f32.gmra.mrb[24].mxu1 %vm269_vm0, %v186_v43  ;;  %v2160_v43 = vld [vmem:[%s21191_s0 + $0x20a] sm:$0xff] }
  0x81   :  { %12694 = vmatprep.mubr.msk.f32.mxu1 %vm269_vm0, %v187_v45  ;;  %v2161_v45 = vld [vmem:[%s21191_s0 + $0x212] sm:$0xff] }
  0x82   :  { %13006 = vmatmul.mubr.msk.f32.gmra.mrb[16].mxu0 %vm269_vm0, %v2113_v10  ;;  %v200_v10 = vld [vmem:[%s21191_s0 + $0x139] sm:$0xff] }
  0x83   :  { %13008 = vmatprep.mubr.msk.f32.mxu0 %vm269_vm0, %v2114_v12  ;;  %v201_v12 = vld [vmem:[%s21191_s0 + $0x141] sm:$0xff] }
  0x84   :  { %12695 = vmatmul.mubr.msk.f32.gmra.mrb[26].mxu1 %vm269_vm0, %v188_v47  ;;  %v2162_v47 = vld [vmem:[%s21191_s0 + $0x21a] sm:$0xff] }
  0x85   :  { %12697 = vmatprep.mubr.msk.f32.mxu1 %vm269_vm0, %v189_v49  ;;  %v2163_v49 = vld [vmem:[%s21191_s0 + $0x222] sm:$0xff] }
  0x86   :  { %13009 = vmatmul.mubr.msk.f32.gmra.mrb[18].mxu0 %vm269_vm0, %v2115_v14  ;;  %v202_v14 = vld [vmem:[%s21191_s0 + $0x149] sm:$0xff] }
  0x87   :  { %13011 = vmatprep.mubr.msk.f32.mxu0 %vm269_vm0, %v2116_v16  ;;  %v203_v16 = vld [vmem:[%s21191_s0 + $0x151] sm:$0xff] }
  0x88   :  { %12698 = vmatmul.mubr.msk.f32.gmra.mrb[28].mxu1 %vm269_vm0, %v190_v51  ;;  %v2164_v51 = vld [vmem:[%s21191_s0 + $0x22a] sm:$0xff] }
  0x89   :  { %12700 = vmatprep.mubr.msk.f32.mxu1 %vm269_vm0, %v191_v53  ;;  %v2165_v53 = vld [vmem:[%s21191_s0 + $0x232] sm:$0xff] }
  0x8a   :  { %13012 = vmatmul.mubr.msk.f32.gmra.mrb[20].mxu0 %vm269_vm0, %v2117_v18  ;;  %v204_v18 = vld [vmem:[%s21191_s0 + $0x159] sm:$0xff] }
  0x8b   :  { %13014 = vmatprep.mubr.msk.f32.mxu0 %vm269_vm0, %v2118_v20  ;;  %v205_v20 = vld [vmem:[%s21191_s0 + $0x161] sm:$0xff] }
  0x8c   :  { %12701 = vmatmul.mubr.msk.f32.gmra.mrb[30].mxu1 %vm269_vm0, %v192_v55  ;;  %v2166_v55 = vld [vmem:[%s21191_s0 + $0x23a] sm:$0xff] }
  0x8d   :  { %12703 = vmatprep.mubr.msk.f32.mxu1 %vm269_vm0, %v193_v57  ;;  %v2167_v57 = vld [vmem:[%s21191_s0 + $0x242] sm:$0xff] }
  0x8e   :  { %13015 = vmatmul.mubr.msk.f32.gmra.mrb[22].mxu0 %vm269_vm0, %v2119_v22  ;;  %v206_v22 = vld [vmem:[%s21191_s0 + $0x169] sm:$0xff] }
  0x8f   :  { %13017 = vmatprep.mubr.msk.f32.mxu0 %vm269_vm0, %v2120_v24  ;;  %v207_v24 = vld [vmem:[%s21191_s0 + $0x171] sm:$0xff] }
  0x90   :  { %12704 = vmatmul.mubr.msk.f32.gmra.mrb[32].mxu1 %vm269_vm0, %v194_v59  ;;  %v2168_v59 = vld [vmem:[%s21191_s0 + $0x24a] sm:$0xff] }
  0x91   :  { %12706 = vmatprep.mubr.msk.f32.mxu1 %vm269_vm0, %v195_v61  ;;  %v2169_v61 = vld [vmem:[%s21191_s0 + $0x252] sm:$0xff] }
  0x92   :  { %13018 = vmatmul.mubr.msk.f32.gmra.mrb[24].mxu0 %vm269_vm0, %v2121_v26  ;;  %v208_v26 = vld [vmem:[%s21191_s0 + $0x179] sm:$0xff] }
  0x93   :  { %13020 = vmatprep.mubr.msk.f32.mxu0 %vm269_vm0, %v2122_v28  ;;  %v209_v28 = vld [vmem:[%s21191_s0 + $0x181] sm:$0xff] }
  0x94   :  { %12707 = vmatmul.mubr.msk.f32.gmra.mrb[34].mxu1 %vm269_vm0, %v196_v63  ;;  %v2170_v63 = vld [vmem:[%s21191_s0 + $0x25a] sm:$0xff] }
  0x95   :  { %12709 = vmatprep.mubr.msk.f32.mxu1 %vm269_vm0, %v197_v5  ;;  %v229_v5 = vld [vmem:[%s21191_s0 + $0x229] sm:$0xff] }
  0x96   :  { %13021 = vmatmul.mubr.msk.f32.gmra.mrb[26].mxu0 %vm269_vm0, %v2123_v30  ;;  %v210_v30 = vld [vmem:[%s21191_s0 + $0x189] sm:$0xff] }
  0x97   :  { %13023 = vmatprep.mubr.msk.f32.mxu0 %vm269_vm0, %v2124_v32  ;;  %v211_v32 = vld [vmem:[%s21191_s0 + $0x191] sm:$0xff] }
  0x98   :  { %12710 = vmatmul.mubr.msk.f32.gmra.mrb[36].mxu1 %vm269_vm0, %v198_v6  ;;  %v2173_v6 = vld [vmem:[%s21191_s0 + $0x272] sm:$0xff] }
  0x99   :  { %12712 = vmatprep.mubr.msk.f32.mxu1 %vm269_vm0, %v199_v8  ;;  %v2174_v8 = vld [vmem:[%s21191_s0 + $0x27a] sm:$0xff] }
  0x9a   :  { %13024 = vmatmul.mubr.msk.f32.gmra.mrb[28].mxu0 %vm269_vm0, %v2125_v34  ;;  %v212_v34 = vld [vmem:[%s21191_s0 + $0x199] sm:$0xff] }
  0x9b   :  { %13026 = vmatprep.mubr.msk.f32.mxu0 %vm269_vm0, %v2126_v36  ;;  %v213_v36 = vld [vmem:[%s21191_s0 + $0x1a1] sm:$0xff] }
  0x9c   :  { %12713 = vmatmul.mubr.msk.f32.gmra.mrb[38].mxu1 %vm269_vm0, %v200_v10  ;;  %v2175_v10 = vld [vmem:[%s21191_s0 + $0x282] sm:$0xff] }
  0x9d   :  { %12715 = vmatprep.mubr.msk.f32.mxu1 %vm269_vm0, %v201_v12  ;;  %v2176_v12 = vld [vmem:[%s21191_s0 + $0x28a] sm:$0xff] }
  0x9e   :  { %13027 = vmatmul.mubr.msk.f32.gmra.mrb[30].mxu0 %vm269_vm0, %v2127_v38  ;;  %v214_v38 = vld [vmem:[%s21191_s0 + $0x1b1] sm:$0xff] }
  0x9f   :  { %13029 = vmatprep.mubr.msk.f32.mxu0 %vm269_vm0, %v2128_v40  ;;  %v215_v40 = vld [vmem:[%s21191_s0 + $0x1b9] sm:$0xff] }
  0xa0   :  { %12716 = vmatmul.mubr.msk.f32.gmra.mrb[40].mxu1 %vm269_vm0, %v202_v14  ;;  %v2177_v14 = vld [vmem:[%s21191_s0 + $0x292] sm:$0xff] }
  0xa1   :  { %12718 = vmatprep.mubr.msk.f32.mxu1 %vm269_vm0, %v203_v16  ;;  %v2178_v16 = vld [vmem:[%s21191_s0 + $0x29a] sm:$0xff] }
  0xa2   :  { %13030 = vmatmul.mubr.msk.f32.gmra.mrb[32].mxu0 %vm269_vm0, %v2129_v42  ;;  %v216_v42 = vld [vmem:[%s21191_s0 + $0x1c1] sm:$0xff] }
  0xa3   :  { %13032 = vmatprep.mubr.msk.f32.mxu0 %vm269_vm0, %v2130_v44  ;;  %v217_v44 = vld [vmem:[%s21191_s0 + $0x1c9] sm:$0xff] }
  0xa4   :  { %12719 = vmatmul.mubr.msk.f32.gmra.mrb[42].mxu1 %vm269_vm0, %v204_v18  ;;  %v2179_v18 = vld [vmem:[%s21191_s0 + $0x2a2] sm:$0xff] }
  0xa5   :  { %12721 = vmatprep.mubr.msk.f32.mxu1 %vm269_vm0, %v205_v20  ;;  %v2180_v20 = vld [vmem:[%s21191_s0 + $0x2aa] sm:$0xff] }
  0xa6   :  { %13033 = vmatmul.mubr.msk.f32.gmra.mrb[34].mxu0 %vm269_vm0, %v2131_v46  ;;  %v218_v46 = vld [vmem:[%s21191_s0 + $0x1d1] sm:$0xff] }
  0xa7   :  { %13035 = vmatprep.mubr.msk.f32.mxu0 %vm269_vm0, %v2132_v48  ;;  %v219_v48 = vld [vmem:[%s21191_s0 + $0x1d9] sm:$0xff] }
  0xa8   :  { %12722 = vmatmul.mubr.msk.f32.gmra.mrb[44].mxu1 %vm269_vm0, %v206_v22  ;;  %v2181_v22 = vld [vmem:[%s21191_s0 + $0x2b2] sm:$0xff] }
  0xa9   :  { %12724 = vmatprep.mubr.msk.f32.mxu1 %vm269_vm0, %v207_v24  ;;  %v2182_v24 = vld [vmem:[%s21191_s0 + $0x2ba] sm:$0xff] }
  0xaa   :  { %13036 = vmatmul.mubr.msk.f32.gmra.mrb[36].mxu0 %vm269_vm0, %v2133_v50  ;;  %v220_v50 = vld [vmem:[%s21191_s0 + $0x1e1] sm:$0xff] }
  0xab   :  { %13038 = vmatprep.mubr.msk.f32.mxu0 %vm269_vm0, %v2134_v52  ;;  %v221_v52 = vld [vmem:[%s21191_s0 + $0x1e9] sm:$0xff] }
  0xac   :  { %12725 = vmatmul.mubr.msk.f32.gmra.mrb[46].mxu1 %vm269_vm0, %v208_v26  ;;  %v2183_v26 = vld [vmem:[%s21191_s0 + $0x2c2] sm:$0xff] }
  0xad   :  { %12727 = vmatprep.mubr.msk.f32.mxu1 %vm269_vm0, %v209_v28  ;;  %v2184_v28 = vld [vmem:[%s21191_s0 + $0x2ca] sm:$0xff] }
  0xae   :  { %13039 = vmatmul.mubr.msk.f32.gmra.mrb[38].mxu0 %vm269_vm0, %v2135_v54  ;;  %v222_v54 = vld [vmem:[%s21191_s0 + $0x1f1] sm:$0xff] }
  0xaf   :  { %13041 = vmatprep.mubr.msk.f32.mxu0 %vm269_vm0, %v2136_v56  ;;  %v223_v56 = vld [vmem:[%s21191_s0 + $0x1f9] sm:$0xff] }
  0xb0   :  { %12728 = vmatmul.mubr.msk.f32.gmra.mrb[48].mxu1 %vm269_vm0, %v210_v30  ;;  %v2185_v30 = vld [vmem:[%s21191_s0 + $0x2d2] sm:$0xff] }
  0xb1   :  { %12730 = vmatprep.mubr.msk.f32.mxu1 %vm269_vm0, %v211_v32  ;;  %v2186_v32 = vld [vmem:[%s21191_s0 + $0x2da] sm:$0xff] }
  0xb2   :  { %13042 = vmatmul.mubr.msk.f32.gmra.mrb[40].mxu0 %vm269_vm0, %v2137_v58  ;;  %v224_v58 = vld [vmem:[%s21191_s0 + $0x201] sm:$0xff] }
  0xb3   :  { %13044 = vmatprep.mubr.msk.f32.mxu0 %vm269_vm0, %v2138_v60  ;;  %v225_v60 = vld [vmem:[%s21191_s0 + $0x209] sm:$0xff] }
  0xb4   :  { %12731 = vmatmul.mubr.msk.f32.gmra.mrb[50].mxu1 %vm269_vm0, %v212_v34  ;;  %v2187_v34 = vld [vmem:[%s21191_s0 + $0x2e2] sm:$0xff] }
  0xb5   :  { %12733 = vmatprep.mubr.msk.f32.mxu1 %vm269_vm0, %v213_v36  ;;  %v2188_v36 = vld [vmem:[%s21191_s0 + $0x2ea] sm:$0xff] }
  0xb6   :  { %13045 = vmatmul.mubr.msk.f32.gmra.mrb[42].mxu0 %vm269_vm0, %v2139_v62  ;;  %v226_v62 = vld [vmem:[%s21191_s0 + $0x211] sm:$0xff] }
  0xb7   :  { %13047 = vmatprep.mubr.msk.f32.mxu0 %vm269_vm0, %v2140_v0  ;;  %v227_v0 = vld [vmem:[%s21191_s0 + $0x219] sm:$0xff] }
  0xb8   :  { %12734 = vmatmul.mubr.msk.f32.gmra.mrb[52].mxu1 %vm269_vm0, %v214_v38  ;;  %v2189_v38 = vld [vmem:[%s21191_s0 + $0x2f2] sm:$0xff] }
  0xb9   :  { %12736 = vmatprep.mubr.msk.f32.mxu1 %vm269_vm0, %v215_v40  ;;  %v2190_v40 = vld [vmem:[%s21191_s0 + $0x2fa] sm:$0xff] }
  0xba   :  { %13048 = vmatmul.mubr.msk.f32.gmra.mrb[44].mxu0 %vm269_vm0, %v2141_v3  ;;  %v2172_v3 = vld [vmem:[%s21191_s0 + $0x26a] sm:$0xff] }
  0xbb   :  { %13050 = vmatprep.mubr.msk.f32.mxu0 %vm269_vm0, %v2142_v7  ;;  %v230_v7 = vld [vmem:[%s21191_s0 + $0x231] sm:$0xff] }
  0xbc   :  { %12737 = vmatmul.mubr.msk.f32.gmra.mrb[54].mxu1 %vm269_vm0, %v216_v42  ;;  %v2191_v42 = vld [vmem:[%s21191_s0 + $0x302] sm:$0xff] }
  0xbd   :  { %12739 = vmatprep.mubr.msk.f32.mxu1 %vm269_vm0, %v217_v44  ;;  %v2192_v44 = vld [vmem:[%s21191_s0 + $0x30a] sm:$0xff] }
  0xbe   :  { %13051 = vmatmul.mubr.msk.f32.gmra.mrb[46].mxu0 %vm269_vm0, %v2143_v9  ;;  %v231_v9 = vld [vmem:[%s21191_s0 + $0x239] sm:$0xff] }
  0xbf   :  { %13053 = vmatprep.mubr.msk.f32.mxu0 %vm269_vm0, %v2144_v11  ;;  %v232_v11 = vld [vmem:[%s21191_s0 + $0x241] sm:$0xff] }
  0xc0   :  { %12740 = vmatmul.mubr.msk.f32.gmra.mrb[56].mxu1 %vm269_vm0, %v218_v46  ;;  %v2193_v46 = vld [vmem:[%s21191_s0 + $0x312] sm:$0xff] }
  0xc1   :  { %12742 = vmatprep.mubr.msk.f32.mxu1 %vm269_vm0, %v219_v48  ;;  %v2194_v48 = vld [vmem:[%s21191_s0 + $0x31a] sm:$0xff] }
  0xc2   :  { %13054 = vmatmul.mubr.msk.f32.gmra.mrb[48].mxu0 %vm269_vm0, %v2145_v13  ;;  %v233_v13 = vld [vmem:[%s21191_s0 + $0x249] sm:$0xff] }
  0xc3   :  { %13056 = vmatprep.mubr.msk.f32.mxu0 %vm269_vm0, %v2146_v15  ;;  %v234_v15 = vld [vmem:[%s21191_s0 + $0x251] sm:$0xff] }
  0xc4   :  { %12743 = vmatmul.mubr.msk.f32.gmra.mrb[58].mxu1 %vm269_vm0, %v220_v50  ;;  %v2195_v50 = vld [vmem:[%s21191_s0 + $0x322] sm:$0xff] }
  0xc5   :  { %12745 = vmatprep.mubr.msk.f32.mxu1 %vm269_vm0, %v221_v52  ;;  %v2196_v52 = vld [vmem:[%s21191_s0 + $0x32a] sm:$0xff] }
  0xc6   :  { %13057 = vmatmul.mubr.msk.f32.gmra.mrb[50].mxu0 %vm269_vm0, %v2147_v17  ;;  %v235_v17 = vld [vmem:[%s21191_s0 + $0x259] sm:$0xff] }
  0xc7   :  { %13059 = vmatprep.mubr.msk.f32.mxu0 %vm269_vm0, %v2148_v19  ;;  %v236_v19 = vld [vmem:[%s21191_s0 + $0x261] sm:$0xff] }
  0xc8   :  { %12746 = vmatmul.mubr.msk.f32.gmra.mrb[60].mxu1 %vm269_vm0, %v222_v54  ;;  %v2197_v54 = vld [vmem:[%s21191_s0 + $0x332] sm:$0xff] }
  0xc9   :  { %12748 = vmatprep.mubr.msk.f32.mxu1 %vm269_vm0, %v223_v56  ;;  %v2198_v56 = vld [vmem:[%s21191_s0 + $0x33a] sm:$0xff] }
  0xca   :  { %13060 = vmatmul.mubr.msk.f32.gmra.mrb[52].mxu0 %vm269_vm0, %v2149_v21  ;;  %v237_v21 = vld [vmem:[%s21191_s0 + $0x269] sm:$0xff] }
  0xcb   :  { %13062 = vmatprep.mubr.msk.f32.mxu0 %vm269_vm0, %v2150_v23  ;;  %v238_v23 = vld [vmem:[%s21191_s0 + $0x271] sm:$0xff] }
  0xcc   :  { %12749 = vmatmul.mubr.msk.f32.gmra.mrb[62].mxu1 %vm269_vm0, %v224_v58  ;;  %v2199_v58 = vld [vmem:[%s21191_s0 + $0x342] sm:$0xff] }
  0xcd   :  { %12751 = vmatprep.mubr.msk.f32.mxu1 %vm269_vm0, %v225_v60  ;;  %v2200_v60 = vld [vmem:[%s21191_s0 + $0x34a] sm:$0xff] }
  0xce   :  { %13063 = vmatmul.mubr.msk.f32.gmra.mrb[54].mxu0 %vm269_vm0, %v2151_v25  ;;  %v239_v25 = vld [vmem:[%s21191_s0 + $0x279] sm:$0xff] }
  0xcf   :  { %13065 = vmatprep.mubr.msk.f32.mxu0 %vm269_vm0, %v2152_v27  ;;  %v240_v27 = vld [vmem:[%s21191_s0 + $0x281] sm:$0xff] }
  0xd0   :  { %12752 = vmatmul.mubr.msk.f32.gmra.mrb[64].mxu1 %vm269_vm0, %v226_v62  ;;  %v2201_v62 = vld [vmem:[%s21191_s0 + $0x352] sm:$0xff] }
  0xd1   :  { %12754 = vmatprep.mubr.msk.f32.mxu1 %vm269_vm0, %v227_v0  ;;  %v3223_v0 = vld [vmem:[%s21191_s0 + $0x3] sm:$0xff] }
  0xd2   :  { %13066 = vmatmul.mubr.msk.f32.gmra.mrb[56].mxu0 %vm269_vm0, %v2153_v29  ;;  %v241_v29 = vld [vmem:[%s21191_s0 + $0x289] sm:$0xff] }
  0xd3   :  { %13068 = vmatprep.mubr.msk.f32.mxu0 %vm269_vm0, %v2154_v31  ;;  %v242_v31 = vld [vmem:[%s21191_s0 + $0x291] sm:$0xff] }
  0xd4   :  { %12755 = vmatmul.mubr.msk.f32.gmra.mrb[66].mxu1 %vm269_vm0, %v228_v2  ;;  %v3224_v2 = vld [vmem:[%s21191_s0 + $0xb] sm:$0xff] }
  0xd5   :  { %12757 = vmatprep.mubr.msk.f32.mxu1 %vm269_vm0, %v229_v5  ;;  %v3225_v5 = vld [vmem:[%s21191_s0 + $0x13] sm:$0xff] }
  0xd6   :  { %13069 = vmatmul.mubr.msk.f32.gmra.mrb[58].mxu0 %vm269_vm0, %v2155_v33  ;;  %v243_v33 = vld [vmem:[%s21191_s0 + $0x299] sm:$0xff] }
  0xd7   :  { %13071 = vmatprep.mubr.msk.f32.mxu0 %vm269_vm0, %v2156_v35  ;;  %v244_v35 = vld [vmem:[%s21191_s0 + $0x2a1] sm:$0xff] }
  0xd8   :  { %12758 = vmatmul.mubr.msk.f32.gmra.mrb[68].mxu1 %vm269_vm0, %v230_v7  ;;  %v3226_v7 = vld [vmem:[%s21191_s0 + $0x1b] sm:$0xff] }
  0xd9   :  { %12760 = vmatprep.mubr.msk.f32.mxu1 %vm269_vm0, %v231_v9  ;;  %v3227_v9 = vld [vmem:[%s21191_s0 + $0x23] sm:$0xff] }
  0xda   :  { %13072 = vmatmul.mubr.msk.f32.gmra.mrb[60].mxu0 %vm269_vm0, %v2157_v37  ;;  %v245_v37 = vld [vmem:[%s21191_s0 + $0x2a9] sm:$0xff] }
  0xdb   :  { %13074 = vmatprep.mubr.msk.f32.mxu0 %vm269_vm0, %v2158_v39  ;;  %v246_v39 = vld [vmem:[%s21191_s0 + $0x2b1] sm:$0xff] }
  0xdc   :  { %12761 = vmatmul.mubr.msk.f32.gmra.mrb[70].mxu1 %vm269_vm0, %v232_v11  ;;  %v264_v11 = vld [vmem:[%s21191_s0 + $0x341] sm:$0xff] }
  0xdd   :  { %12763 = vmatprep.mubr.msk.f32.mxu1 %vm269_vm0, %v233_v13  ;;  %v265_v13 = vld [vmem:[%s21191_s0 + $0x349] sm:$0xff] }
  0xde   :  { %13075 = vmatmul.mubr.msk.f32.gmra.mrb[62].mxu0 %vm269_vm0, %v2159_v41  ;;  %v247_v41 = vld [vmem:[%s21191_s0 + $0x2b9] sm:$0xff] }
  0xdf   :  { %13077 = vmatprep.mubr.msk.f32.mxu0 %vm269_vm0, %v2160_v43  ;;  %v248_v43 = vld [vmem:[%s21191_s0 + $0x2c1] sm:$0xff] }
  0xe0   :  { %12764 = vmatmul.mubr.msk.f32.gmra.mrb[72].mxu1 %vm269_vm0, %v234_v15  ;;  %v266_v15 = vld [vmem:[%s21191_s0 + $0x351] sm:$0xff] }
  0xe1   :  { %12766 = vmatprep.mubr.msk.f32.mxu1 %vm269_vm0, %v235_v17  ;;  %v89_v17 = vld [vmem:[%s21191_s0 + $0x120] sm:$0xff] }
  0xe2   :  { %13078 = vmatmul.mubr.msk.f32.gmra.mrb[64].mxu0 %vm269_vm0, %v2161_v45  ;;  %v249_v45 = vld [vmem:[%s21191_s0 + $0x2c9] sm:$0xff] }
  0xe3   :  { %13080 = vmatprep.mubr.msk.f32.mxu0 %vm269_vm0, %v2162_v47  ;;  %v250_v47 = vld [vmem:[%s21191_s0 + $0x2d1] sm:$0xff] }
  0xe4   :  { %12767 = vmatmul.mubr.msk.f32.gmra.mrb[74].mxu1 %vm269_vm0, %v236_v19  ;;  %v90_v19 = vld [vmem:[%s21191_s0 + $0x128] sm:$0xff] }
  0xe5   :  { %12769 = vmatprep.mubr.msk.f32.mxu1 %vm269_vm0, %v237_v21  ;;  %v91_v21 = vld [vmem:[%s21191_s0 + $0x130] sm:$0xff] }
  0xe6   :  { %13081 = vmatmul.mubr.msk.f32.gmra.mrb[66].mxu0 %vm269_vm0, %v2163_v49  ;;  %v251_v49 = vld [vmem:[%s21191_s0 + $0x2d9] sm:$0xff] }
  0xe7   :  { %13083 = vmatprep.mubr.msk.f32.mxu0 %vm269_vm0, %v2164_v51  ;;  %v252_v51 = vld [vmem:[%s21191_s0 + $0x2e1] sm:$0xff] }
  0xe8   :  { %12770 = vmatmul.mubr.msk.f32.gmra.mrb[76].mxu1 %vm269_vm0, %v238_v23  ;;  %v92_v23 = vld [vmem:[%s21191_s0 + $0x138] sm:$0xff] }
  0xe9   :  { %12772 = vmatprep.mubr.msk.f32.mxu1 %vm269_vm0, %v239_v25  ;;  %v93_v25 = vld [vmem:[%s21191_s0 + $0x140] sm:$0xff] }
  0xea   :  { %13084 = vmatmul.mubr.msk.f32.gmra.mrb[68].mxu0 %vm269_vm0, %v2165_v53  ;;  %v253_v53 = vld [vmem:[%s21191_s0 + $0x2e9] sm:$0xff] }
  0xeb   :  { %13086 = vmatprep.mubr.msk.f32.mxu0 %vm269_vm0, %v2166_v55  ;;  %v254_v55 = vld [vmem:[%s21191_s0 + $0x2f1] sm:$0xff] }
  0xec   :  { %12773 = vmatmul.mubr.msk.f32.gmra.mrb[78].mxu1 %vm269_vm0, %v240_v27  ;;  %v94_v27 = vld [vmem:[%s21191_s0 + $0x148] sm:$0xff] }
  0xed   :  { %12775 = vmatprep.mubr.msk.f32.mxu1 %vm269_vm0, %v241_v29  ;;  %v95_v29 = vld [vmem:[%s21191_s0 + $0x150] sm:$0xff] }
  0xee   :  { %13087 = vmatmul.mubr.msk.f32.gmra.mrb[70].mxu0 %vm269_vm0, %v2167_v57  ;;  %v255_v57 = vld [vmem:[%s21191_s0 + $0x2f9] sm:$0xff] }
  0xef   :  { %13089 = vmatprep.mubr.msk.f32.mxu0 %vm269_vm0, %v2168_v59  ;;  %v256_v59 = vld [vmem:[%s21191_s0 + $0x301] sm:$0xff] }
  0xf0   :  { %12776 = vmatmul.mubr.msk.f32.gmra.mrb[80].mxu1 %vm269_vm0, %v242_v31  ;;  %v96_v31 = vld [vmem:[%s21191_s0 + $0x158] sm:$0xff] }
  0xf1   :  { %12778 = vmatprep.mubr.msk.f32.mxu1 %vm269_vm0, %v243_v33  ;;  %v97_v33 = vld [vmem:[%s21191_s0 + $0x160] sm:$0xff] }
  0xf2   :  { %13090 = vmatmul.mubr.msk.f32.gmra.mrb[72].mxu0 %vm269_vm0, %v2169_v61  ;;  %v257_v61 = vld [vmem:[%s21191_s0 + $0x309] sm:$0xff] }
  0xf3   :  { %13092 = vmatprep.mubr.msk.f32.mxu0 %vm269_vm0, %v2170_v63  ;;  %v258_v63 = vld [vmem:[%s21191_s0 + $0x311] sm:$0xff] }
  0xf4   :  { %12779 = vmatmul.mubr.msk.f32.gmra.mrb[82].mxu1 %vm269_vm0, %v244_v35  ;;  %v98_v35 = vld [vmem:[%s21191_s0 + $0x168] sm:$0xff] }
  0xf5   :  { %12781 = vmatprep.mubr.msk.f32.mxu1 %vm269_vm0, %v245_v37  ;;  %v99_v37 = vld [vmem:[%s21191_s0 + $0x170] sm:$0xff] }
  0xf6   :  { %13093 = vmatmul.mubr.msk.f32.gmra.mrb[74].mxu0 %vm269_vm0, %v2171_v1  ;;  %v259_v1 = vld [vmem:[%s21191_s0 + $0x319] sm:$0xff] }
  0xf7   :  { %13095 = vmatprep.mubr.msk.f32.mxu0 %vm269_vm0, %v2172_v3  ;;  %v260_v3 = vld [vmem:[%s21191_s0 + $0x321] sm:$0xff] }
  0xf8   :  { %12782 = vmatmul.mubr.msk.f32.gmra.mrb[84].mxu1 %vm269_vm0, %v246_v39  ;;  %v100_v39 = vld [vmem:[%s21191_s0 + $0x178] sm:$0xff] }
  0xf9   :  { %12784 = vmatprep.mubr.msk.f32.mxu1 %vm269_vm0, %v247_v41  ;;  %v101_v41 = vld [vmem:[%s21191_s0 + $0x180] sm:$0xff] }
  0xfa   :  { %13096 = vmatmul.mubr.msk.f32.gmra.mrb[76].mxu0 %vm269_vm0, %v2173_v6  ;;  %v261_v6 = vld [vmem:[%s21191_s0 + $0x329] sm:$0xff] }
  0xfb   :  { %13098 = vmatprep.mubr.msk.f32.mxu0 %vm269_vm0, %v2174_v8  ;;  %v262_v8 = vld [vmem:[%s21191_s0 + $0x331] sm:$0xff] }
  0xfc   :  { %12785 = vmatmul.mubr.msk.f32.gmra.mrb[86].mxu1 %vm269_vm0, %v248_v43  ;;  %v102_v43 = vld [vmem:[%s21191_s0 + $0x188] sm:$0xff] }
  0xfd   :  { %12787 = vmatprep.mubr.msk.f32.mxu1 %vm269_vm0, %v249_v45  ;;  %v103_v45 = vld [vmem:[%s21191_s0 + $0x190] sm:$0xff] }
  0xfe   :  { %13099 = vmatmul.mubr.msk.f32.gmra.mrb[78].mxu0 %vm269_vm0, %v2175_v10  ;;  %v3228_v10 = vld [vmem:[%s21191_s0 + $0x2b] sm:$0xff] }
  0xff   :  { %13101 = vmatprep.mubr.msk.f32.mxu0 %vm269_vm0, %v2176_v12  ;;  %v3229_v12 = vld [vmem:[%s21191_s0 + $0x33] sm:$0xff] }
 0x100   :  { %12788 = vmatmul.mubr.msk.f32.gmra.mrb[88].mxu1 %vm269_vm0, %v250_v47  ;;  %v104_v47 = vld [vmem:[%s21191_s0 + $0x198] sm:$0xff] }
 0x101   :  { %12790 = vmatprep.mubr.msk.f32.mxu1 %vm269_vm0, %v251_v49  ;;  %v105_v49 = vld [vmem:[%s21191_s0 + $0x1a0] sm:$0xff] }
 0x102   :  { %13102 = vmatmul.mubr.msk.f32.gmra.mrb[80].mxu0 %vm269_vm0, %v2177_v14  ;;  %v3230_v14 = vld [vmem:[%s21191_s0 + $0x3b] sm:$0xff] }
 0x103   :  { %13104 = vmatprep.mubr.msk.f32.mxu0 %vm269_vm0, %v2178_v16  ;;  %v3231_v16 = vld [vmem:[%s21191_s0 + $0x43] sm:$0xff] }
 0x104   :  { %12791 = vmatmul.mubr.msk.f32.gmra.mrb[90].mxu1 %vm269_vm0, %v252_v51  ;;  %v106_v51 = vld [vmem:[%s21191_s0 + $0x1b0] sm:$0xff] }
 0x105   :  { %12793 = vmatprep.mubr.msk.f32.mxu1 %vm269_vm0, %v253_v53  ;;  %v107_v53 = vld [vmem:[%s21191_s0 + $0x1b8] sm:$0xff] }
 0x106   :  { %13105 = vmatmul.mubr.msk.f32.gmra.mrb[82].mxu0 %vm269_vm0, %v2179_v18  ;;  %v3232_v18 = vld [vmem:[%s21191_s0 + $0x4b] sm:$0xff] }
 0x107   :  { %13107 = vmatprep.mubr.msk.f32.mxu0 %vm269_vm0, %v2180_v20  ;;  %v3233_v20 = vld [vmem:[%s21191_s0 + $0x53] sm:$0xff] }
 0x108   :  { %12794 = vmatmul.mubr.msk.f32.gmra.mrb[92].mxu1 %vm269_vm0, %v254_v55  ;;  %v108_v55 = vld [vmem:[%s21191_s0 + $0x1c0] sm:$0xff] }
 0x109   :  { %12796 = vmatprep.mubr.msk.f32.mxu1 %vm269_vm0, %v255_v57  ;;  %v109_v57 = vld [vmem:[%s21191_s0 + $0x1c8] sm:$0xff] }
 0x10a   :  { %13108 = vmatmul.mubr.msk.f32.gmra.mrb[84].mxu0 %vm269_vm0, %v2181_v22  ;;  %v3234_v22 = vld [vmem:[%s21191_s0 + $0x5b] sm:$0xff] }
 0x10b   :  { %13110 = vmatprep.mubr.msk.f32.mxu0 %vm269_vm0, %v2182_v24  ;;  %v3235_v24 = vld [vmem:[%s21191_s0 + $0x63] sm:$0xff] }
 0x10c   :  { %12797 = vmatmul.mubr.msk.f32.gmra.mrb[94].mxu1 %vm269_vm0, %v256_v59  ;;  %v110_v59 = vld [vmem:[%s21191_s0 + $0x1d0] sm:$0xff] }
 0x10d   :  { %12799 = vmatprep.mubr.msk.f32.mxu1 %vm269_vm0, %v257_v61  ;;  %v111_v61 = vld [vmem:[%s21191_s0 + $0x1d8] sm:$0xff] }
 0x10e   :  { %13111 = vmatmul.mubr.msk.f32.gmra.mrb[86].mxu0 %vm269_vm0, %v2183_v26  ;;  %v3236_v26 = vld [vmem:[%s21191_s0 + $0x6b] sm:$0xff] }
 0x10f   :  { %13113 = vmatprep.mubr.msk.f32.mxu0 %vm269_vm0, %v2184_v28  ;;  %v3237_v28 = vld [vmem:[%s21191_s0 + $0x73] sm:$0xff] }
 0x110   :  { %12800 = vmatmul.mubr.msk.f32.gmra.mrb[96].mxu1 %vm269_vm0, %v258_v63  ;;  %v112_v63 = vld [vmem:[%s21191_s0 + $0x1e0] sm:$0xff] }
 0x111   :  { %12802 = vmatprep.mubr.msk.f32.mxu1 %vm269_vm0, %v259_v1  ;;  %v113_v1 = vld [vmem:[%s21191_s0 + $0x1e8] sm:$0xff] }
 0x112   :  { %13114 = vmatmul.mubr.msk.f32.gmra.mrb[88].mxu0 %vm269_vm0, %v2185_v30  ;;  %v3238_v30 = vld [vmem:[%s21191_s0 + $0x7b] sm:$0xff] }
 0x113   :  { %13116 = vmatprep.mubr.msk.f32.mxu0 %vm269_vm0, %v2186_v32  ;;  %v3239_v32 = vld [vmem:[%s21191_s0 + $0x83] sm:$0xff] }
 0x114   :  { %12803 = vmatmul.mubr.msk.f32.gmra.mrb[98].mxu1 %vm269_vm0, %v260_v3  ;;  %v114_v3 = vld [vmem:[%s21191_s0 + $0x1f0] sm:$0xff] }
 0x115   :  { %12805 = vmatprep.mubr.msk.f32.mxu1 %vm269_vm0, %v261_v6  ;;  %v115_v6 = vld [vmem:[%s21191_s0 + $0x1f8] sm:$0xff] }
 0x116   :  { %13117 = vmatmul.mubr.msk.f32.gmra.mrb[90].mxu0 %vm269_vm0, %v2187_v34  ;;  %v3240_v34 = vld [vmem:[%s21191_s0 + $0x8b] sm:$0xff] }
 0x117   :  { %13119 = vmatprep.mubr.msk.f32.mxu0 %vm269_vm0, %v2188_v36  ;;  %v3241_v36 = vld [vmem:[%s21191_s0 + $0x93] sm:$0xff] }
 0x118   :  { %12806 = vmatmul.mubr.msk.f32.gmra.mrb[100].mxu1 %vm269_vm0, %v262_v8  ;;  %v116_v8 = vld [vmem:[%s21191_s0 + $0x200] sm:$0xff] }
 0x11a   :  { %13120 = vmatmul.mubr.msk.f32.gmra.mrb[92].mxu0 %vm269_vm0, %v2189_v38  ;;  %v3242_v38 = vld [vmem:[%s21191_s0 + $0x9b] sm:$0xff] }
 0x11b   :  { %13122 = vmatprep.mubr.msk.f32.mxu0 %vm269_vm0, %v2190_v40  ;;  %v3243_v40 = vld [vmem:[%s21191_s0 + $0xa3] sm:$0xff] }
 0x11e   :  { %13123 = vmatmul.mubr.msk.f32.gmra.mrb[94].mxu0 %vm269_vm0, %v2191_v42  ;;  %v3244_v42 = vld [vmem:[%s21191_s0 + $0xab] sm:$0xff] }
 0x11f   :  { %13125 = vmatprep.mubr.msk.f32.mxu0 %vm269_vm0, %v2192_v44  ;;  %v3245_v44 = vld [vmem:[%s21191_s0 + $0xb3] sm:$0xff] }
 0x122   :  { %13126 = vmatmul.mubr.msk.f32.gmra.mrb[96].mxu0 %vm269_vm0, %v2193_v46  ;;  %v3246_v46 = vld [vmem:[%s21191_s0 + $0xbb] sm:$0xff] }
 0x123   :  { %13128 = vmatprep.mubr.msk.f32.mxu0 %vm269_vm0, %v2194_v48  ;;  %v3247_v48 = vld [vmem:[%s21191_s0 + $0xc3] sm:$0xff] }
 0x126   :  { %13129 = vmatmul.mubr.msk.f32.gmra.mrb[98].mxu0 %vm269_vm0, %v2195_v50  ;;  %v3248_v50 = vld [vmem:[%s21191_s0 + $0xcb] sm:$0xff] }
 0x127   :  { %13131 = vmatprep.mubr.msk.f32.mxu0 %vm269_vm0, %v2196_v52  ;;  %v3249_v52 = vld [vmem:[%s21191_s0 + $0xd3] sm:$0xff] }
 0x12a   :  { %13132 = vmatmul.mubr.msk.f32.gmra.mrb[100].mxu0 %vm269_vm0, %v2197_v54  ;;  %v3250_v54 = vld [vmem:[%s21191_s0 + $0xdb] sm:$0xff] }
 0x12b   :  { %13134 = vmatprep.mubr.msk.f32.mxu0 %vm269_vm0, %v2198_v56  ;;  %v3251_v56 = vld [vmem:[%s21191_s0 + $0xe3] sm:$0xff] }
 0x12e   :  { %13135 = vmatmul.mubr.msk.f32.gmra.mrb[102].mxu0 %vm269_vm0, %v2199_v58  ;;  %v3252_v58 = vld [vmem:[%s21191_s0 + $0xeb] sm:$0xff] }
 0x12f   :  { %13137 = vmatprep.mubr.msk.f32.mxu0 %vm269_vm0, %v2200_v60  ;;  %v3253_v60 = vld [vmem:[%s21191_s0 + $0xf3] sm:$0xff] }
 0x132   :  { %13138 = vmatmul.mubr.msk.f32.gmra.mrb[104].mxu0 %vm269_vm0, %v2201_v62  ;;  %v3254_v62 = vld [vmem:[%s21191_s0 + $0xfb] sm:$0xff] }
 0x133   :  { %13144 = vmatprep.mubr.msk.f32.mxu0 %vm269_vm0, %v3223_v0  ;;  %v3255_v0 = vld [vmem:[%s21191_s0 + $0x103] sm:$0xff] }
 0x136   :  { %13145 = vmatmul.mubr.msk.f32.vlgmr.msra.gmra.mrb[0].mxu0 %vm269_vm0, %v3224_v2  ;;  %v3256_v2 = vld [vmem:[%s21191_s0 + $0x10b] sm:$0xff] }
 0x137   :  { %13961 = vmatpush3.bf16.msra.mxu0 %v15396_v4  ;;  %13147 = vmatprep.mubr.msk.f32.mxu0 %vm269_vm0, %v3225_v5  ;;  %v263_v4 = vld [vmem:[%s21191_s0 + $0x339] sm:$0xff] }
 0x138   :  { %12808 = vmatprep.mubr.msk.f32.mxu1 %vm269_vm0, %v263_v4  ;;  %v3257_v5 = vld [vmem:[%s21191_s0 + $0x113] sm:$0xff]  ;;  %v117_v4 = vld [vmem:[%s21191_s0 + $0x208] sm:$0xff] }
 0x139   :  { %12809 = vmatmul.mubr.msk.f32.gmra.mrb[102].mxu1 %vm269_vm0, %v264_v11  ;;  %v118_v11 = vld [vmem:[%s21191_s0 + $0x210] sm:$0xff] }
 0x13a   :  { %13148 = vmatmul.mubr.msk.f32.gmra.mrb[2].mxu0 %vm269_vm0, %v3226_v7  ;;  %12811 = vmatprep.mubr.msk.f32.mxu1 %vm269_vm0, %v265_v13  ;;  %v3258_v7 = vld [vmem:[%s21191_s0 + $0x11b] sm:$0xff] }
 0x13b   :  { %13150 = vmatprep.mubr.msk.f32.mxu0 %vm269_vm0, %v3227_v9  ;;  %v3259_v9 = vld [vmem:[%s21191_s0 + $0x123] sm:$0xff]  ;;  %v119_v13 = vld [vmem:[%s21191_s0 + $0x218] sm:$0xff] }
 0x13d   :  { %12812 = vmatmul.mubr.msk.f32.gmra.mrb[104].mxu1 %vm269_vm0, %v266_v15  ;;  %v120_v15 = vld [vmem:[%s21191_s0 + $0x220] sm:$0xff] }
 0x13e   :  { %13151 = vmatmul.mubr.msk.f32.gmra.mrb[4].mxu0 %vm269_vm0, %v3228_v10  ;;  %12872 = vmatprep.mubr.msk.f32.mxu1 %vm269_vm0, %v89_v17  ;;  %v3260_v10 = vld [vmem:[%s21191_s0 + $0x12b] sm:$0xff] }
 0x13f   :  { %13153 = vmatprep.mubr.msk.f32.mxu0 %vm269_vm0, %v3229_v12  ;;  %v3261_v12 = vld [vmem:[%s21191_s0 + $0x133] sm:$0xff]  ;;  %v121_v17 = vld [vmem:[%s21191_s0 + $0x228] sm:$0xff] }
 0x141   :  { %12873 = vmatmul.mubr.msk.f32.vlgmr.msra.gmra.mrb[36].mxu1 %vm269_vm0, %v90_v19  ;;  %v122_v19 = vld [vmem:[%s21191_s0 + $0x230] sm:$0xff] }
 0x142   :  { %13154 = vmatmul.mubr.msk.f32.gmra.mrb[6].mxu0 %vm269_vm0, %v3230_v14  ;;  %12875 = vmatprep.mubr.msk.f32.mxu1 %vm269_vm0, %v91_v21  ;;  %v3262_v14 = vld [vmem:[%s21191_s0 + $0x13b] sm:$0xff] }
 0x143   :  { %13156 = vmatprep.mubr.msk.f32.mxu0 %vm269_vm0, %v3231_v16  ;;  %v3263_v16 = vld [vmem:[%s21191_s0 + $0x143] sm:$0xff]  ;;  %v123_v21 = vld [vmem:[%s21191_s0 + $0x238] sm:$0xff] }
 0x145   :  { %12876 = vmatmul.mubr.msk.f32.gmra.mrb[38].mxu1 %vm269_vm0, %v92_v23  ;;  %v124_v23 = vld [vmem:[%s21191_s0 + $0x240] sm:$0xff] }
 0x146   :  { %13157 = vmatmul.mubr.msk.f32.gmra.mrb[8].mxu0 %vm269_vm0, %v3232_v18  ;;  %12878 = vmatprep.mubr.msk.f32.mxu1 %vm269_vm0, %v93_v25  ;;  %v3264_v18 = vld [vmem:[%s21191_s0 + $0x14b] sm:$0xff] }
 0x147   :  { %13159 = vmatprep.mubr.msk.f32.mxu0 %vm269_vm0, %v3233_v20  ;;  %v3265_v20 = vld [vmem:[%s21191_s0 + $0x153] sm:$0xff]  ;;  %v125_v25 = vld [vmem:[%s21191_s0 + $0x248] sm:$0xff] }
 0x149   :  { %12879 = vmatmul.mubr.msk.f32.gmra.mrb[40].mxu1 %vm269_vm0, %v94_v27  ;;  %v126_v27 = vld [vmem:[%s21191_s0 + $0x250] sm:$0xff] }
 0x14a   :  { %13160 = vmatmul.mubr.msk.f32.gmra.mrb[10].mxu0 %vm269_vm0, %v3234_v22  ;;  %12881 = vmatprep.mubr.msk.f32.mxu1 %vm269_vm0, %v95_v29  ;;  %v3266_v22 = vld [vmem:[%s21191_s0 + $0x15b] sm:$0xff] }
 0x14b   :  { %13162 = vmatprep.mubr.msk.f32.mxu0 %vm269_vm0, %v3235_v24  ;;  %v3267_v24 = vld [vmem:[%s21191_s0 + $0x163] sm:$0xff]  ;;  %v127_v29 = vld [vmem:[%s21191_s0 + $0x258] sm:$0xff] }
 0x14d   :  { %12882 = vmatmul.mubr.msk.f32.gmra.mrb[42].mxu1 %vm269_vm0, %v96_v31  ;;  %v128_v31 = vld [vmem:[%s21191_s0 + $0x260] sm:$0xff] }
 0x14e   :  { %13163 = vmatmul.mubr.msk.f32.gmra.mrb[12].mxu0 %vm269_vm0, %v3236_v26  ;;  %12884 = vmatprep.mubr.msk.f32.mxu1 %vm269_vm0, %v97_v33  ;;  %v3268_v26 = vld [vmem:[%s21191_s0 + $0x16b] sm:$0xff] }
 0x14f   :  { %13165 = vmatprep.mubr.msk.f32.mxu0 %vm269_vm0, %v3237_v28  ;;  %v3269_v28 = vld [vmem:[%s21191_s0 + $0x173] sm:$0xff]  ;;  %v129_v33 = vld [vmem:[%s21191_s0 + $0x268] sm:$0xff] }
 0x151   :  { %12885 = vmatmul.mubr.msk.f32.gmra.mrb[44].mxu1 %vm269_vm0, %v98_v35  ;;  %v130_v35 = vld [vmem:[%s21191_s0 + $0x270] sm:$0xff] }
 0x152   :  { %13166 = vmatmul.mubr.msk.f32.gmra.mrb[14].mxu0 %vm269_vm0, %v3238_v30  ;;  %12887 = vmatprep.mubr.msk.f32.mxu1 %vm269_vm0, %v99_v37  ;;  %v3270_v30 = vld [vmem:[%s21191_s0 + $0x17b] sm:$0xff] }
 0x153   :  { %13168 = vmatprep.mubr.msk.f32.mxu0 %vm269_vm0, %v3239_v32  ;;  %v3271_v32 = vld [vmem:[%s21191_s0 + $0x183] sm:$0xff]  ;;  %v131_v37 = vld [vmem:[%s21191_s0 + $0x278] sm:$0xff] }
 0x155   :  { %12888 = vmatmul.mubr.msk.f32.gmra.mrb[46].mxu1 %vm269_vm0, %v100_v39  ;;  %v132_v39 = vld [vmem:[%s21191_s0 + $0x280] sm:$0xff] }
 0x156   :  { %13169 = vmatmul.mubr.msk.f32.gmra.mrb[16].mxu0 %vm269_vm0, %v3240_v34  ;;  %12890 = vmatprep.mubr.msk.f32.mxu1 %vm269_vm0, %v101_v41  ;;  %v3272_v34 = vld [vmem:[%s21191_s0 + $0x18b] sm:$0xff] }
 0x157   :  { %13171 = vmatprep.mubr.msk.f32.mxu0 %vm269_vm0, %v3241_v36  ;;  %v3273_v36 = vld [vmem:[%s21191_s0 + $0x193] sm:$0xff]  ;;  %v133_v41 = vld [vmem:[%s21191_s0 + $0x288] sm:$0xff] }
 0x159   :  { %12891 = vmatmul.mubr.msk.f32.gmra.mrb[48].mxu1 %vm269_vm0, %v102_v43  ;;  %v134_v43 = vld [vmem:[%s21191_s0 + $0x290] sm:$0xff] }
 0x15a   :  { %13172 = vmatmul.mubr.msk.f32.gmra.mrb[18].mxu0 %vm269_vm0, %v3242_v38  ;;  %12893 = vmatprep.mubr.msk.f32.mxu1 %vm269_vm0, %v103_v45  ;;  %v3274_v38 = vld [vmem:[%s21191_s0 + $0x19b] sm:$0xff] }
 0x15b   :  { %13174 = vmatprep.mubr.msk.f32.mxu0 %vm269_vm0, %v3243_v40  ;;  %v3275_v40 = vld [vmem:[%s21191_s0 + $0x1a3] sm:$0xff]  ;;  %v135_v45 = vld [vmem:[%s21191_s0 + $0x298] sm:$0xff] }
 0x15d   :  { %12894 = vmatmul.mubr.msk.f32.gmra.mrb[50].mxu1 %vm269_vm0, %v104_v47  ;;  %v136_v47 = vld [vmem:[%s21191_s0 + $0x2a0] sm:$0xff] }
 0x15e   :  { %13175 = vmatmul.mubr.msk.f32.gmra.mrb[20].mxu0 %vm269_vm0, %v3244_v42  ;;  %12896 = vmatprep.mubr.msk.f32.mxu1 %vm269_vm0, %v105_v49  ;;  %v3276_v42 = vld [vmem:[%s21191_s0 + $0x1b3] sm:$0xff]  ;;  %v137_v49 = vld [vmem:[%s21191_s0 + $0x2a8] sm:$0xff] }
 0x15f   :  { %13177 = vmatprep.mubr.msk.f32.mxu0 %vm269_vm0, %v3245_v44  ;;  %v3277_v44 = vld [vmem:[%s21191_s0 + $0x1bb] sm:$0xff] }
 0x161   :  { %12897 = vmatmul.mubr.msk.f32.gmra.mrb[52].mxu1 %vm269_vm0, %v106_v51  ;;  %v138_v51 = vld [vmem:[%s21191_s0 + $0x2b0] sm:$0xff] }
 0x162   :  { %13178 = vmatmul.mubr.msk.f32.gmra.mrb[22].mxu0 %vm269_vm0, %v3246_v46  ;;  %12899 = vmatprep.mubr.msk.f32.mxu1 %vm269_vm0, %v107_v53  ;;  %v3278_v46 = vld [vmem:[%s21191_s0 + $0x1c3] sm:$0xff]  ;;  %v139_v53 = vld [vmem:[%s21191_s0 + $0x2b8] sm:$0xff] }
 0x163   :  { %13180 = vmatprep.mubr.msk.f32.mxu0 %vm269_vm0, %v3247_v48  ;;  %v3279_v48 = vld [vmem:[%s21191_s0 + $0x1cb] sm:$0xff] }
 0x165   :  { %12900 = vmatmul.mubr.msk.f32.gmra.mrb[54].mxu1 %vm269_vm0, %v108_v55  ;;  %v140_v55 = vld [vmem:[%s21191_s0 + $0x2c0] sm:$0xff] }
 0x166   :  { %13181 = vmatmul.mubr.msk.f32.gmra.mrb[24].mxu0 %vm269_vm0, %v3248_v50  ;;  %12902 = vmatprep.mubr.msk.f32.mxu1 %vm269_vm0, %v109_v57  ;;  %v3280_v50 = vld [vmem:[%s21191_s0 + $0x1d3] sm:$0xff]  ;;  %v141_v57 = vld [vmem:[%s21191_s0 + $0x2c8] sm:$0xff] }
 0x167   :  { %13183 = vmatprep.mubr.msk.f32.mxu0 %vm269_vm0, %v3249_v52  ;;  %v3281_v52 = vld [vmem:[%s21191_s0 + $0x1db] sm:$0xff] }
 0x169   :  { %12903 = vmatmul.mubr.msk.f32.gmra.mrb[56].mxu1 %vm269_vm0, %v110_v59  ;;  %v142_v59 = vld [vmem:[%s21191_s0 + $0x2d0] sm:$0xff] }
 0x16a   :  { %13184 = vmatmul.mubr.msk.f32.gmra.mrb[26].mxu0 %vm269_vm0, %v3250_v54  ;;  %12905 = vmatprep.mubr.msk.f32.mxu1 %vm269_vm0, %v111_v61  ;;  %v3282_v54 = vld [vmem:[%s21191_s0 + $0x1e3] sm:$0xff]  ;;  %v143_v61 = vld [vmem:[%s21191_s0 + $0x2d8] sm:$0xff] }
 0x16b   :  { %13186 = vmatprep.mubr.msk.f32.mxu0 %vm269_vm0, %v3251_v56  ;;  %v3283_v56 = vld [vmem:[%s21191_s0 + $0x1eb] sm:$0xff] }
 0x16d   :  { %12906 = vmatmul.mubr.msk.f32.gmra.mrb[58].mxu1 %vm269_vm0, %v112_v63  ;;  %v144_v63 = vld [vmem:[%s21191_s0 + $0x2e0] sm:$0xff] }
 0x16e   :  { %13187 = vmatmul.mubr.msk.f32.gmra.mrb[28].mxu0 %vm269_vm0, %v3252_v58  ;;  %12908 = vmatprep.mubr.msk.f32.mxu1 %vm269_vm0, %v113_v1  ;;  %v3284_v58 = vld [vmem:[%s21191_s0 + $0x1f3] sm:$0xff]  ;;  %v145_v1 = vld [vmem:[%s21191_s0 + $0x2e8] sm:$0xff] }
 0x16f   :  { %13189 = vmatprep.mubr.msk.f32.mxu0 %vm269_vm0, %v3253_v60  ;;  %v3285_v60 = vld [vmem:[%s21191_s0 + $0x1fb] sm:$0xff] }
 0x171   :  { %12909 = vmatmul.mubr.msk.f32.gmra.mrb[60].mxu1 %vm269_vm0, %v114_v3  ;;  %v146_v3 = vld [vmem:[%s21191_s0 + $0x2f0] sm:$0xff] }
 0x172   :  { %13190 = vmatmul.mubr.msk.f32.gmra.mrb[30].mxu0 %vm269_vm0, %v3254_v62  ;;  %12911 = vmatprep.mubr.msk.f32.mxu1 %vm269_vm0, %v115_v6  ;;  %v3286_v62 = vld [vmem:[%s21191_s0 + $0x203] sm:$0xff]  ;;  %v147_v6 = vld [vmem:[%s21191_s0 + $0x2f8] sm:$0xff] }
 0x173   :  { %13192 = vmatprep.mubr.msk.f32.mxu0 %vm269_vm0, %v3255_v0  ;;  %v3287_v0 = vld [vmem:[%s21191_s0 + $0x20b] sm:$0xff] }
 0x175   :  { %12912 = vmatmul.mubr.msk.f32.gmra.mrb[62].mxu1 %vm269_vm0, %v116_v8  ;;  %v148_v8 = vld [vmem:[%s21191_s0 + $0x300] sm:$0xff] }
 0x176   :  { %13193 = vmatmul.mubr.msk.f32.gmra.mrb[32].mxu0 %vm269_vm0, %v3256_v2  ;;  %12914 = vmatprep.mubr.msk.f32.mxu1 %vm269_vm0, %v117_v4  ;;  %v3288_v2 = vld [vmem:[%s21191_s0 + $0x213] sm:$0xff]  ;;  %v149_v4 = vld [vmem:[%s21191_s0 + $0x308] sm:$0xff] }
 0x177   :  { %13195 = vmatprep.mubr.msk.f32.mxu0 %vm269_vm0, %v3257_v5  ;;  %v3289_v5 = vld [vmem:[%s21191_s0 + $0x21b] sm:$0xff] }
 0x179   :  { %12915 = vmatmul.mubr.msk.f32.gmra.mrb[64].mxu1 %vm269_vm0, %v118_v11  ;;  %v150_v11 = vld [vmem:[%s21191_s0 + $0x310] sm:$0xff] }
 0x17a   :  { %13196 = vmatmul.mubr.msk.f32.gmra.mrb[34].mxu0 %vm269_vm0, %v3258_v7  ;;  %12917 = vmatprep.mubr.msk.f32.mxu1 %vm269_vm0, %v119_v13  ;;  %v3290_v7 = vld [vmem:[%s21191_s0 + $0x223] sm:$0xff]  ;;  %v151_v13 = vld [vmem:[%s21191_s0 + $0x318] sm:$0xff] }
 0x17b   :  { %13198 = vmatprep.mubr.msk.f32.mxu0 %vm269_vm0, %v3259_v9  ;;  %v3291_v9 = vld [vmem:[%s21191_s0 + $0x22b] sm:$0xff] }
 0x17d   :  { %12918 = vmatmul.mubr.msk.f32.gmra.mrb[66].mxu1 %vm269_vm0, %v120_v15  ;;  %v152_v15 = vld [vmem:[%s21191_s0 + $0x320] sm:$0xff] }
 0x17e   :  { %13199 = vmatmul.mubr.msk.f32.gmra.mrb[36].mxu0 %vm269_vm0, %v3260_v10  ;;  %12920 = vmatprep.mubr.msk.f32.mxu1 %vm269_vm0, %v121_v17  ;;  %v3292_v10 = vld [vmem:[%s21191_s0 + $0x233] sm:$0xff]  ;;  %v153_v17 = vld [vmem:[%s21191_s0 + $0x328] sm:$0xff] }
 0x17f   :  { %13201 = vmatprep.mubr.msk.f32.mxu0 %vm269_vm0, %v3261_v12  ;;  %v3293_v12 = vld [vmem:[%s21191_s0 + $0x23b] sm:$0xff] }
 0x181   :  { %12921 = vmatmul.mubr.msk.f32.gmra.mrb[68].mxu1 %vm269_vm0, %v122_v19  ;;  %v154_v19 = vld [vmem:[%s21191_s0 + $0x330] sm:$0xff] }
 0x182   :  { %13202 = vmatmul.mubr.msk.f32.gmra.mrb[38].mxu0 %vm269_vm0, %v3262_v14  ;;  %12923 = vmatprep.mubr.msk.f32.mxu1 %vm269_vm0, %v123_v21  ;;  %v3294_v14 = vld [vmem:[%s21191_s0 + $0x243] sm:$0xff]  ;;  %v155_v21 = vld [vmem:[%s21191_s0 + $0x338] sm:$0xff] }
 0x183   :  { %13204 = vmatprep.mubr.msk.f32.mxu0 %vm269_vm0, %v3263_v16  ;;  %v3295_v16 = vld [vmem:[%s21191_s0 + $0x24b] sm:$0xff] }
 0x185   :  { %12924 = vmatmul.mubr.msk.f32.gmra.mrb[70].mxu1 %vm269_vm0, %v124_v23  ;;  %v156_v23 = vld [vmem:[%s21191_s0 + $0x340] sm:$0xff] }
 0x186   :  { %13205 = vmatmul.mubr.msk.f32.gmra.mrb[40].mxu0 %vm269_vm0, %v3264_v18  ;;  %12926 = vmatprep.mubr.msk.f32.mxu1 %vm269_vm0, %v125_v25  ;;  %v3296_v18 = vld [vmem:[%s21191_s0 + $0x253] sm:$0xff]  ;;  %v157_v25 = vld [vmem:[%s21191_s0 + $0x348] sm:$0xff] }
 0x187   :  { %13207 = vmatprep.mubr.msk.f32.mxu0 %vm269_vm0, %v3265_v20  ;;  %v3297_v20 = vld [vmem:[%s21191_s0 + $0x25b] sm:$0xff] }
 0x189   :  { %12927 = vmatmul.mubr.msk.f32.gmra.mrb[72].mxu1 %vm269_vm0, %v126_v27  ;;  %v158_v27 = vld [vmem:[%s21191_s0 + $0x350] sm:$0xff] }
 0x18a   :  { %13208 = vmatmul.mubr.msk.f32.gmra.mrb[42].mxu0 %vm269_vm0, %v3266_v22  ;;  %12929 = vmatprep.mubr.msk.f32.mxu1 %vm269_vm0, %v127_v29  ;;  %v3298_v22 = vld [vmem:[%s21191_s0 + $0x263] sm:$0xff]  ;;  %v16516_v29 = vpop.f32.mrb[0].mxu1 }
 0x18b   :  { %13210 = vmatprep.mubr.msk.f32.mxu0 %vm269_vm0, %v3267_v24  ;;  %v3299_v24 = vld [vmem:[%s21191_s0 + $0x26b] sm:$0xff] }
 0x18d   :  { %12930 = vmatmul.mubr.msk.f32.gmra.mrb[74].mxu1 %vm269_vm0, %v128_v31  ;;  %v16522_v31 = vpop.f32.mrb[1].mxu1 }
 0x18e   :  { %13211 = vmatmul.mubr.msk.f32.gmra.mrb[44].mxu0 %vm269_vm0, %v3268_v26  ;;  %12932 = vmatprep.mubr.msk.f32.mxu1 %vm269_vm0, %v129_v33  ;;  %v3300_v26 = vld [vmem:[%s21191_s0 + $0x273] sm:$0xff]  ;;  %v16528_v33 = vpop.f32.mrb[2].mxu1 }
 0x18f   :  { %13213 = vmatprep.mubr.msk.f32.mxu0 %vm269_vm0, %v3269_v28  ;;  %v3301_v28 = vld [vmem:[%s21191_s0 + $0x27b] sm:$0xff] }
 0x191   :  { %12933 = vmatmul.mubr.msk.f32.gmra.mrb[76].mxu1 %vm269_vm0, %v130_v35  ;;  %v16534_v35 = vpop.f32.mrb[3].mxu1 }
 0x192   :  { %13214 = vmatmul.mubr.msk.f32.gmra.mrb[46].mxu0 %vm269_vm0, %v3270_v30  ;;  %12935 = vmatprep.mubr.msk.f32.mxu1 %vm269_vm0, %v131_v37  ;;  %v3302_v30 = vld [vmem:[%s21191_s0 + $0x283] sm:$0xff]  ;;  %v16540_v37 = vpop.f32.mrb[4].mxu1 }
 0x193   :  { %13216 = vmatprep.mubr.msk.f32.mxu0 %vm269_vm0, %v3271_v32  ;;  %v3303_v32 = vld [vmem:[%s21191_s0 + $0x28b] sm:$0xff] }
 0x195   :  { %12936 = vmatmul.mubr.msk.f32.gmra.mrb[78].mxu1 %vm269_vm0, %v132_v39  ;;  %v16546_v39 = vpop.f32.mrb[5].mxu1 }
 0x196   :  { %13217 = vmatmul.mubr.msk.f32.gmra.mrb[48].mxu0 %vm269_vm0, %v3272_v34  ;;  %12938 = vmatprep.mubr.msk.f32.mxu1 %vm269_vm0, %v133_v41  ;;  %v3304_v34 = vld [vmem:[%s21191_s0 + $0x293] sm:$0xff]  ;;  %v16552_v41 = vpop.f32.mrb[6].mxu1 }
 0x197   :  { %13219 = vmatprep.mubr.msk.f32.mxu0 %vm269_vm0, %v3273_v36  ;;  %v3305_v36 = vld [vmem:[%s21191_s0 + $0x29b] sm:$0xff] }
 0x199   :  { %12939 = vmatmul.mubr.msk.f32.gmra.mrb[80].mxu1 %vm269_vm0, %v134_v43  ;;  %v16558_v43 = vpop.f32.mrb[7].mxu1 }
 0x19a   :  { %13220 = vmatmul.mubr.msk.f32.gmra.mrb[50].mxu0 %vm269_vm0, %v3274_v38  ;;  %12941 = vmatprep.mubr.msk.f32.mxu1 %vm269_vm0, %v135_v45  ;;  %v3306_v38 = vld [vmem:[%s21191_s0 + $0x2a3] sm:$0xff]  ;;  %v16564_v45 = vpop.f32.mrb[8].mxu1 }
 0x19b   :  { %13222 = vmatprep.mubr.msk.f32.mxu0 %vm269_vm0, %v3275_v40  ;;  %v3307_v40 = vld [vmem:[%s21191_s0 + $0x2ab] sm:$0xff] }
 0x19d   :  { %12942 = vmatmul.mubr.msk.f32.gmra.mrb[82].mxu1 %vm269_vm0, %v136_v47  ;;  %v16570_v47 = vpop.f32.mrb[9].mxu1 }
 0x19e   :  { %13223 = vmatmul.mubr.msk.f32.gmra.mrb[52].mxu0 %vm269_vm0, %v3276_v42  ;;  %12944 = vmatprep.mubr.msk.f32.mxu1 %vm269_vm0, %v137_v49  ;;  %v3308_v42 = vld [vmem:[%s21191_s0 + $0x2b3] sm:$0xff]  ;;  %v16576_v49 = vpop.f32.mrb[10].mxu1 }
 0x19f   :  { %13225 = vmatprep.mubr.msk.f32.mxu0 %vm269_vm0, %v3277_v44  ;;  %v3309_v44 = vld [vmem:[%s21191_s0 + $0x2bb] sm:$0xff] }
 0x1a1   :  { %12945 = vmatmul.mubr.msk.f32.gmra.mrb[84].mxu1 %vm269_vm0, %v138_v51  ;;  %v16582_v51 = vpop.f32.mrb[11].mxu1 }
 0x1a2   :  { %13226 = vmatmul.mubr.msk.f32.gmra.mrb[54].mxu0 %vm269_vm0, %v3278_v46  ;;  %12947 = vmatprep.mubr.msk.f32.mxu1 %vm269_vm0, %v139_v53  ;;  %v3310_v46 = vld [vmem:[%s21191_s0 + $0x2c3] sm:$0xff]  ;;  %v16588_v53 = vpop.f32.mrb[12].mxu1 }
 0x1a3   :  { %13228 = vmatprep.mubr.msk.f32.mxu0 %vm269_vm0, %v3279_v48  ;;  %v3311_v48 = vld [vmem:[%s21191_s0 + $0x2cb] sm:$0xff] }
 0x1a5   :  { %12948 = vmatmul.mubr.msk.f32.gmra.mrb[86].mxu1 %vm269_vm0, %v140_v55  ;;  %v16594_v55 = vpop.f32.mrb[13].mxu1 }
 0x1a6   :  { %13229 = vmatmul.mubr.msk.f32.gmra.mrb[56].mxu0 %vm269_vm0, %v3280_v50  ;;  %12950 = vmatprep.mubr.msk.f32.mxu1 %vm269_vm0, %v141_v57  ;;  %v3312_v50 = vld [vmem:[%s21191_s0 + $0x2d3] sm:$0xff]  ;;  %v16600_v57 = vpop.f32.mrb[14].mxu1 }
 0x1a7   :  { %13231 = vmatprep.mubr.msk.f32.mxu0 %vm269_vm0, %v3281_v52  ;;  %v3313_v52 = vld [vmem:[%s21191_s0 + $0x2db] sm:$0xff] }
 0x1a9   :  { %12951 = vmatmul.mubr.msk.f32.gmra.mrb[88].mxu1 %vm269_vm0, %v142_v59  ;;  %v16606_v59 = vpop.f32.mrb[15].mxu1 }
 0x1aa   :  { %13232 = vmatmul.mubr.msk.f32.gmra.mrb[58].mxu0 %vm269_vm0, %v3282_v54  ;;  %12953 = vmatprep.mubr.msk.f32.mxu1 %vm269_vm0, %v143_v61  ;;  %v3314_v54 = vld [vmem:[%s21191_s0 + $0x2e3] sm:$0xff]  ;;  %v16612_v61 = vpop.f32.mrb[16].mxu1 }
 0x1ab   :  { %13234 = vmatprep.mubr.msk.f32.mxu0 %vm269_vm0, %v3283_v56  ;;  %v3315_v56 = vld [vmem:[%s21191_s0 + $0x2eb] sm:$0xff] }
 0x1ad   :  { %12954 = vmatmul.mubr.msk.f32.gmra.mrb[90].mxu1 %vm269_vm0, %v144_v63  ;;  %v16618_v63 = vpop.f32.mrb[17].mxu1 }
 0x1ae   :  { %13235 = vmatmul.mubr.msk.f32.gmra.mrb[60].mxu0 %vm269_vm0, %v3284_v58  ;;  %12956 = vmatprep.mubr.msk.f32.mxu1 %vm269_vm0, %v145_v1  ;;  %v3316_v58 = vld [vmem:[%s21191_s0 + $0x2f3] sm:$0xff]  ;;  %v16624_v1 = vpop.f32.mrb[18].mxu1 }
 0x1af   :  { %13237 = vmatprep.mubr.msk.f32.mxu0 %vm269_vm0, %v3285_v60  ;;  %v3317_v60 = vld [vmem:[%s21191_s0 + $0x2fb] sm:$0xff] }
 0x1b1   :  { %12957 = vmatmul.mubr.msk.f32.gmra.mrb[92].mxu1 %vm269_vm0, %v146_v3  ;;  %v16630_v3 = vpop.f32.mrb[19].mxu1 }
 0x1b2   :  { %13238 = vmatmul.mubr.msk.f32.gmra.mrb[62].mxu0 %vm269_vm0, %v3286_v62  ;;  %12959 = vmatprep.mubr.msk.f32.mxu1 %vm269_vm0, %v147_v6  ;;  %v3318_v62 = vld [vmem:[%s21191_s0 + $0x303] sm:$0xff]  ;;  %v16636_v6 = vpop.f32.mrb[20].mxu1 }
 0x1b3   :  { %13240 = vmatprep.mubr.msk.f32.mxu0 %vm269_vm0, %v3287_v0  ;;  %v3319_v0 = vld [vmem:[%s21191_s0 + $0x30b] sm:$0xff] }
 0x1b5   :  { %12960 = vmatmul.mubr.msk.f32.gmra.mrb[94].mxu1 %vm269_vm0, %v148_v8  ;;  %v16642_v8 = vpop.f32.mrb[21].mxu1 }
 0x1b6   :  { %13241 = vmatmul.mubr.msk.f32.gmra.mrb[64].mxu0 %vm269_vm0, %v3288_v2  ;;  %12962 = vmatprep.mubr.msk.f32.mxu1 %vm269_vm0, %v149_v4  ;;  %v3320_v2 = vld [vmem:[%s21191_s0 + $0x313] sm:$0xff]  ;;  %v16648_v4 = vpop.f32.mrb[22].mxu1 }
 0x1b7   :  { %13243 = vmatprep.mubr.msk.f32.mxu0 %vm269_vm0, %v3289_v5  ;;  %v3321_v5 = vld [vmem:[%s21191_s0 + $0x31b] sm:$0xff] }
 0x1b9   :  { %12963 = vmatmul.mubr.msk.f32.gmra.mrb[96].mxu1 %vm269_vm0, %v150_v11  ;;  %v16654_v11 = vpop.f32.mrb[23].mxu1 }
 0x1ba   :  { %13244 = vmatmul.mubr.msk.f32.gmra.mrb[66].mxu0 %vm269_vm0, %v3290_v7  ;;  %12965 = vmatprep.mubr.msk.f32.mxu1 %vm269_vm0, %v151_v13  ;;  %v3322_v7 = vld [vmem:[%s21191_s0 + $0x323] sm:$0xff]  ;;  %v16660_v13 = vpop.f32.mrb[24].mxu1 }
 0x1bb   :  { %13246 = vmatprep.mubr.msk.f32.mxu0 %vm269_vm0, %v3291_v9  ;;  %v3323_v9 = vld [vmem:[%s21191_s0 + $0x32b] sm:$0xff] }
 0x1bd   :  { %12966 = vmatmul.mubr.msk.f32.gmra.mrb[98].mxu1 %vm269_vm0, %v152_v15  ;;  %v16666_v15 = vpop.f32.mrb[25].mxu1 }
 0x1be   :  { %13247 = vmatmul.mubr.msk.f32.gmra.mrb[68].mxu0 %vm269_vm0, %v3292_v10  ;;  %12968 = vmatprep.mubr.msk.f32.mxu1 %vm269_vm0, %v153_v17  ;;  %v3324_v10 = vld [vmem:[%s21191_s0 + $0x333] sm:$0xff]  ;;  %v16672_v17 = vpop.f32.mrb[26].mxu1 }
 0x1bf   :  { %13249 = vmatprep.mubr.msk.f32.mxu0 %vm269_vm0, %v3293_v12  ;;  %v3325_v12 = vld [vmem:[%s21191_s0 + $0x33b] sm:$0xff] }
 0x1c1   :  { %12969 = vmatmul.mubr.msk.f32.gmra.mrb[100].mxu1 %vm269_vm0, %v154_v19  ;;  %v16678_v19 = vpop.f32.mrb[27].mxu1 }
 0x1c2   :  { %13250 = vmatmul.mubr.msk.f32.gmra.mrb[70].mxu0 %vm269_vm0, %v3294_v14  ;;  %12971 = vmatprep.mubr.msk.f32.mxu1 %vm269_vm0, %v155_v21  ;;  %v3326_v14 = vld [vmem:[%s21191_s0 + $0x343] sm:$0xff]  ;;  %v16684_v21 = vpop.f32.mrb[28].mxu1 }
 0x1c3   :  { %13252 = vmatprep.mubr.msk.f32.mxu0 %vm269_vm0, %v3295_v16  ;;  %v3327_v16 = vld [vmem:[%s21191_s0 + $0x34b] sm:$0xff] }
 0x1c5   :  { %12972 = vmatmul.mubr.msk.f32.gmra.mrb[102].mxu1 %vm269_vm0, %v156_v23  ;;  %v16690_v23 = vpop.f32.mrb[29].mxu1 }
 0x1c6   :  { %13253 = vmatmul.mubr.msk.f32.gmra.mrb[72].mxu0 %vm269_vm0, %v3296_v18  ;;  %12974 = vmatprep.mubr.msk.f32.mxu1 %vm269_vm0, %v157_v25  ;;  %v3328_v18 = vld [vmem:[%s21191_s0 + $0x353] sm:$0xff]  ;;  %v16696_v25 = vpop.f32.mrb[30].mxu1 }
 0x1c7   :  { %13255 = vmatprep.mubr.msk.f32.mxu0 %vm269_vm0, %v3297_v20  ;;  %v4350_v20 = vld [vmem:[%s21191_s0 + $0x4] sm:$0xff] }
 0x1c9   :  { %12975 = vmatmul.mubr.msk.f32.gmra.mrb[104].mxu1 %vm269_vm0, %v158_v27  ;;  %v16702_v27 = vpop.f32.mrb[31].mxu1 }
 0x1ca   :  { %13256 = vmatmul.mubr.msk.f32.gmra.mrb[74].mxu0 %vm269_vm0, %v3298_v22  ;;  %v4351_v22 = vld [vmem:[%s21191_s0 + $0xc] sm:$0xff] }
 0x1cb   :  { %13258 = vmatprep.mubr.msk.f32.mxu0 %vm269_vm0, %v3299_v24  ;;  %v4352_v24 = vld [vmem:[%s21191_s0 + $0x14] sm:$0xff] }
 0x1ce   :  { %13259 = vmatmul.mubr.msk.f32.gmra.mrb[76].mxu0 %vm269_vm0, %v3300_v26  ;;  %v4353_v26 = vld [vmem:[%s21191_s0 + $0x1c] sm:$0xff] }
 0x1cf   :  { %13261 = vmatprep.mubr.msk.f32.mxu0 %vm269_vm0, %v3301_v28  ;;  %v4354_v28 = vld [vmem:[%s21191_s0 + $0x24] sm:$0xff] }
 0x1d2   :  { %13262 = vmatmul.mubr.msk.f32.gmra.mrb[78].mxu0 %vm269_vm0, %v3302_v30  ;;  %v16708_v30 = vpop.f32.mrb[32].mxu1 }
 0x1d3   :  { %13264 = vmatprep.mubr.msk.f32.mxu0 %vm269_vm0, %v3303_v32  ;;  %v4355_v32 = vld [vmem:[%s21191_s0 + $0x2c] sm:$0xff] }
 0x1d6   :  { %13265 = vmatmul.mubr.msk.f32.gmra.mrb[80].mxu0 %vm269_vm0, %v3304_v34  ;;  %v16714_v34 = vpop.f32.mrb[33].mxu1 }
 0x1d7   :  { %13267 = vmatprep.mubr.msk.f32.mxu0 %vm269_vm0, %v3305_v36  ;;  %v4356_v36 = vld [vmem:[%s21191_s0 + $0x34] sm:$0xff] }
 0x1da   :  { %13268 = vmatmul.mubr.msk.f32.gmra.mrb[82].mxu0 %vm269_vm0, %v3306_v38  ;;  %v16720_v38 = vpop.f32.mrb[34].mxu1 }
 0x1db   :  { %13270 = vmatprep.mubr.msk.f32.mxu0 %vm269_vm0, %v3307_v40  ;;  %v4357_v40 = vld [vmem:[%s21191_s0 + $0x3c] sm:$0xff] }
 0x1de   :  { %13271 = vmatmul.mubr.msk.f32.gmra.mrb[84].mxu0 %vm269_vm0, %v3308_v42  ;;  %v16726_v42 = vpop.f32.mrb[35].mxu1 }
 0x1df   :  { %13273 = vmatprep.mubr.msk.f32.mxu0 %vm269_vm0, %v3309_v44  ;;  %v4358_v44 = vld [vmem:[%s21191_s0 + $0x44] sm:$0xff] }
 0x1e2   :  { %13274 = vmatmul.mubr.msk.f32.gmra.mrb[86].mxu0 %vm269_vm0, %v3310_v46  ;;  %v4359_v46 = vld [vmem:[%s21191_s0 + $0x4c] sm:$0xff] }
 0x1e3   :  { %13276 = vmatprep.mubr.msk.f32.mxu0 %vm269_vm0, %v3311_v48  ;;  %v4360_v48 = vld [vmem:[%s21191_s0 + $0x54] sm:$0xff] }
 0x1e6   :  { %13277 = vmatmul.mubr.msk.f32.gmra.mrb[88].mxu0 %vm269_vm0, %v3312_v50 }
 0x1e7   :  { %13279 = vmatprep.mubr.msk.f32.mxu0 %vm269_vm0, %v3313_v52 }
 0x1ea   :  { %13280 = vmatmul.mubr.msk.f32.gmra.mrb[90].mxu0 %vm269_vm0, %v3314_v54  ;;  %v4361_v54 = vld [vmem:[%s21191_s0 + $0x5c] sm:$0xff] }
 0x1eb   :  { %13282 = vmatprep.mubr.msk.f32.mxu0 %vm269_vm0, %v3315_v56  ;;  %v4362_v56 = vld [vmem:[%s21191_s0 + $0x64] sm:$0xff] }
 0x1ee   :  { %13283 = vmatmul.mubr.msk.f32.gmra.mrb[92].mxu0 %vm269_vm0, %v3316_v58 }
 0x1ef   :  { %13285 = vmatprep.mubr.msk.f32.mxu0 %vm269_vm0, %v3317_v60 }
 0x1f2   :  { %13286 = vmatmul.mubr.msk.f32.gmra.mrb[94].mxu0 %vm269_vm0, %v3318_v62  ;;  %v4363_v62 = vld [vmem:[%s21191_s0 + $0x6c] sm:$0xff] }
 0x1f3   :  { %13288 = vmatprep.mubr.msk.f32.mxu0 %vm269_vm0, %v3319_v0  ;;  %v4364_v0 = vld [vmem:[%s21191_s0 + $0x74] sm:$0xff] }
 0x1f6   :  { %13289 = vmatmul.mubr.msk.f32.gmra.mrb[96].mxu0 %vm269_vm0, %v3320_v2 }
 0x1f7   :  { %13291 = vmatprep.mubr.msk.f32.mxu0 %vm269_vm0, %v3321_v5 }
 0x1fa   :  { %13292 = vmatmul.mubr.msk.f32.gmra.mrb[98].mxu0 %vm269_vm0, %v3322_v7  ;;  %v4365_v7 = vld [vmem:[%s21191_s0 + $0x7c] sm:$0xff] }
 0x1fb   :  { %13294 = vmatprep.mubr.msk.f32.mxu0 %vm269_vm0, %v3323_v9  ;;  %v4366_v9 = vld [vmem:[%s21191_s0 + $0x84] sm:$0xff] }
 0x1fe   :  { %13295 = vmatmul.mubr.msk.f32.gmra.mrb[100].mxu0 %vm269_vm0, %v3324_v10 }
 0x1ff   :  { %13297 = vmatprep.mubr.msk.f32.mxu0 %vm269_vm0, %v3325_v12 }
 0x202   :  { %13298 = vmatmul.mubr.msk.f32.gmra.mrb[102].mxu0 %vm269_vm0, %v3326_v14  ;;  %v4367_v14 = vld [vmem:[%s21191_s0 + $0x8c] sm:$0xff] }
 0x203   :  { %13300 = vmatprep.mubr.msk.f32.mxu0 %vm269_vm0, %v3327_v16  ;;  %v4368_v16 = vld [vmem:[%s21191_s0 + $0x94] sm:$0xff] }
 0x206   :  { %13301 = vmatmul.mubr.msk.f32.gmra.mrb[104].mxu0 %vm269_vm0, %v3328_v18 }
 0x207   :  { %13307 = vmatprep.mubr.msk.f32.mxu0 %vm269_vm0, %v4350_v20 }
 0x20a   :  { %13308 = vmatmul.mubr.msk.f32.vlgmr.msra.gmra.mrb[0].mxu0 %vm269_vm0, %v4351_v22  ;;  %v4369_v22 = vld [vmem:[%s21191_s0 + $0x9c] sm:$0xff] }
 0x20b   :  { %13310 = vmatprep.mubr.msk.f32.mxu0 %vm269_vm0, %v4352_v24  ;;  %v4370_v24 = vld [vmem:[%s21191_s0 + $0xa4] sm:$0xff] }
 0x20e   :  { %13311 = vmatmul.mubr.msk.f32.gmra.mrb[2].mxu0 %vm269_vm0, %v4353_v26 }
 0x20f   :  { %13313 = vmatprep.mubr.msk.f32.mxu0 %vm269_vm0, %v4354_v28 }
 0x212   :  { %13314 = vmatmul.mubr.msk.f32.gmra.mrb[4].mxu0 %vm269_vm0, %v4355_v32  ;;  %v4371_v32 = vld [vmem:[%s21191_s0 + $0xac] sm:$0xff] }
 0x213   :  { %13316 = vmatprep.mubr.msk.f32.mxu0 %vm269_vm0, %v4356_v36  ;;  %v4372_v36 = vld [vmem:[%s21191_s0 + $0xb4] sm:$0xff] }
 0x214   :  { %v16739_v50 = vpop.f32.mrb[36].mxu1 }
 0x215   :  { %v16741_v52 = vpop.f32.mrb[37].mxu1 }
 0x216   :  { %13317 = vmatmul.mubr.msk.f32.gmra.mrb[6].mxu0 %vm269_vm0, %v4357_v40 }
 0x217   :  { %13319 = vmatprep.mubr.msk.f32.mxu0 %vm269_vm0, %v4358_v44 }
 0x218   :  { %v16751_v58 = vpop.f32.mrb[38].mxu1 }
 0x219   :  { %v16753_v60 = vpop.f32.mrb[39].mxu1 }
 0x21a   :  { %13320 = vmatmul.mubr.msk.f32.gmra.mrb[8].mxu0 %vm269_vm0, %v4359_v46  ;;  %v4373_v46 = vld [vmem:[%s21191_s0 + $0xbc] sm:$0xff] }
 0x21b   :  { %13322 = vmatprep.mubr.msk.f32.mxu0 %vm269_vm0, %v4360_v48  ;;  %v4374_v48 = vld [vmem:[%s21191_s0 + $0xc4] sm:$0xff] }
 0x21c   :  { %v16763_v2 = vpop.f32.mrb[40].mxu1 }
 0x21d   :  { %v16765_v5 = vpop.f32.mrb[41].mxu1 }
 0x21e   :  { %13323 = vmatmul.mubr.msk.f32.gmra.mrb[10].mxu0 %vm269_vm0, %v4361_v54 }
 0x21f   :  { %13325 = vmatprep.mubr.msk.f32.mxu0 %vm269_vm0, %v4362_v56 }
 0x220   :  { %v16775_v10 = vpop.f32.mrb[42].mxu1 }
 0x221   :  { %v16777_v12 = vpop.f32.mrb[43].mxu1 }
 0x222   :  { %13326 = vmatmul.mubr.msk.f32.gmra.mrb[12].mxu0 %vm269_vm0, %v4363_v62  ;;  %v4375_v62 = vld [vmem:[%s21191_s0 + $0xcc] sm:$0xff] }
 0x223   :  { %13328 = vmatprep.mubr.msk.f32.mxu0 %vm269_vm0, %v4364_v0  ;;  %v4376_v0 = vld [vmem:[%s21191_s0 + $0xd4] sm:$0xff] }
 0x224   :  { %v16787_v18 = vpop.f32.mrb[44].mxu1 }
 0x225   :  { %v16789_v20 = vpop.f32.mrb[45].mxu1 }
 0x226   :  { %13329 = vmatmul.mubr.msk.f32.gmra.mrb[14].mxu0 %vm269_vm0, %v4365_v7 }
 0x227   :  { %13331 = vmatprep.mubr.msk.f32.mxu0 %vm269_vm0, %v4366_v9 }
 0x228   :  { %v16799_v26 = vpop.f32.mrb[46].mxu1 }
 0x229   :  { %v16801_v28 = vpop.f32.mrb[47].mxu1 }
 0x22a   :  { %13332 = vmatmul.mubr.msk.f32.gmra.mrb[16].mxu0 %vm269_vm0, %v4367_v14  ;;  %v4377_v14 = vld [vmem:[%s21191_s0 + $0xdc] sm:$0xff] }
 0x22b   :  { %13334 = vmatprep.mubr.msk.f32.mxu0 %vm269_vm0, %v4368_v16  ;;  %v4378_v16 = vld [vmem:[%s21191_s0 + $0xe4] sm:$0xff] }
 0x22c   :  { %v16811_v40 = vpop.f32.mrb[48].mxu1 }
 0x22d   :  { %v16813_v44 = vpop.f32.mrb[49].mxu1 }
 0x22e   :  { %13335 = vmatmul.mubr.msk.f32.gmra.mrb[18].mxu0 %vm269_vm0, %v4369_v22 }
 0x22f   :  { %13337 = vmatprep.mubr.msk.f32.mxu0 %vm269_vm0, %v4370_v24 }
 0x230   :  { %v16823_v54 = vpop.f32.mrb[50].mxu1 }
 0x231   :  { %21406 = vst [vmem:[#allocation12_spill] sm:$0xff] %v16823_v54  ;;  %v16825_v56 = vpop.f32.mrb[51].mxu1 }
 0x232   :  { %13338 = vmatmul.mubr.msk.f32.gmra.mrb[20].mxu0 %vm269_vm0, %v4371_v32  ;;  %21407 = vst [vmem:[#allocation13_spill] sm:$0xff] %v16825_v56  ;;  %v4379_v32 = vld [vmem:[%s21191_s0 + $0xec] sm:$0xff] }
 0x233   :  { %13340 = vmatprep.mubr.msk.f32.mxu0 %vm269_vm0, %v4372_v36  ;;  %v4380_v36 = vld [vmem:[%s21191_s0 + $0xf4] sm:$0xff] }
 0x234   :  { %v16835_v7 = vpop.f32.mrb[52].mxu1 }
 0x235   :  { %21408 = vst [vmem:[#allocation14_spill] sm:$0xff] %v16835_v7  ;;  %v16837_v9 = vpop.f32.mrb[53].mxu1 }
 0x236   :  { %13341 = vmatmul.mubr.msk.f32.gmra.mrb[22].mxu0 %vm269_vm0, %v4373_v46  ;;  %21409 = vst [vmem:[#allocation15_spill] sm:$0xff] %v16837_v9 }
 0x237   :  { %13343 = vmatprep.mubr.msk.f32.mxu0 %vm269_vm0, %v4374_v48 }
 0x238   :  { %v16847_v22 = vpop.f32.mrb[54].mxu1 }
 0x239   :  { %21410 = vst [vmem:[#allocation16_spill] sm:$0xff] %v16847_v22  ;;  %v16849_v24 = vpop.f32.mrb[55].mxu1 }
 0x23a   :  { %13344 = vmatmul.mubr.msk.f32.gmra.mrb[24].mxu0 %vm269_vm0, %v4375_v62  ;;  %21411 = vst [vmem:[#allocation17_spill] sm:$0xff] %v16849_v24  ;;  %v4381_v62 = vld [vmem:[%s21191_s0 + $0xfc] sm:$0xff] }
 0x23b   :  { %13346 = vmatprep.mubr.msk.f32.mxu0 %vm269_vm0, %v4376_v0  ;;  %v4382_v0 = vld [vmem:[%s21191_s0 + $0x104] sm:$0xff] }
 0x23c   :  { %v16859_v46 = vpop.f32.mrb[56].mxu1 }
 0x23d   :  { %21412 = vst [vmem:[#allocation18_spill] sm:$0xff] %v16859_v46  ;;  %v16861_v48 = vpop.f32.mrb[57].mxu1 }
 0x23e   :  { %13347 = vmatmul.mubr.msk.f32.gmra.mrb[26].mxu0 %vm269_vm0, %v4377_v14  ;;  %21413 = vst [vmem:[#allocation19_spill] sm:$0xff] %v16861_v48 }
 0x23f   :  { %13349 = vmatprep.mubr.msk.f32.mxu0 %vm269_vm0, %v4378_v16 }
 0x240   :  { %v16871_v14 = vpop.f32.mrb[58].mxu1 }
 0x241   :  { %21414 = vst [vmem:[#allocation20_spill] sm:$0xff] %v16871_v14  ;;  %v16873_v16 = vpop.f32.mrb[59].mxu1 }
 0x242   :  { %13350 = vmatmul.mubr.msk.f32.gmra.mrb[28].mxu0 %vm269_vm0, %v4379_v32  ;;  %21415 = vst [vmem:[#allocation21_spill] sm:$0xff] %v16873_v16  ;;  %v4383_v32 = vld [vmem:[%s21191_s0 + $0x10c] sm:$0xff] }
 0x243   :  { %13352 = vmatprep.mubr.msk.f32.mxu0 %vm269_vm0, %v4380_v36  ;;  %v4384_v36 = vld [vmem:[%s21191_s0 + $0x114] sm:$0xff] }
 0x244   :  { %v16883_v48 = vpop.f32.mrb[60].mxu1 }
 0x245   :  { %21416 = vst [vmem:[#allocation22_spill] sm:$0xff] %v16883_v48  ;;  %v16885_v46 = vpop.f32.mrb[61].mxu1 }
 0x246   :  { %13353 = vmatmul.mubr.msk.f32.gmra.mrb[30].mxu0 %vm269_vm0, %v4381_v62  ;;  %21417 = vst [vmem:[#allocation23_spill] sm:$0xff] %v16885_v46  ;;  %v4385_v62 = vld [vmem:[%s21191_s0 + $0x11c] sm:$0xff] }
 0x247   :  { %13355 = vmatprep.mubr.msk.f32.mxu0 %vm269_vm0, %v4382_v0  ;;  %v4386_v0 = vld [vmem:[%s21191_s0 + $0x124] sm:$0xff] }
 0x248   :  { %v16895_v16 = vpop.f32.mrb[62].mxu1 }
 0x249   :  { %21418 = vst [vmem:[#allocation24_spill] sm:$0xff] %v16895_v16  ;;  %v16897_v14 = vpop.f32.mrb[63].mxu1 }
 0x24a   :  { %13356 = vmatmul.mubr.msk.f32.gmra.mrb[32].mxu0 %vm269_vm0, %v4383_v32  ;;  %21419 = vst [vmem:[#allocation25_spill] sm:$0xff] %v16897_v14  ;;  %v4387_v32 = vld [vmem:[%s21191_s0 + $0x12c] sm:$0xff] }
 0x24b   :  { %13358 = vmatprep.mubr.msk.f32.mxu0 %vm269_vm0, %v4384_v36  ;;  %v4388_v36 = vld [vmem:[%s21191_s0 + $0x134] sm:$0xff] }
 0x24c   :  { %v16907_v46 = vpop.f32.mrb[64].mxu1 }
 0x24d   :  { %21420 = vst [vmem:[#allocation26_spill] sm:$0xff] %v16907_v46  ;;  %v16909_v48 = vpop.f32.mrb[65].mxu1 }
 0x24e   :  { %13359 = vmatmul.mubr.msk.f32.gmra.mrb[34].mxu0 %vm269_vm0, %v4385_v62  ;;  %21421 = vst [vmem:[#allocation27_spill] sm:$0xff] %v16909_v48  ;;  %v4389_v62 = vld [vmem:[%s21191_s0 + $0x13c] sm:$0xff] }
 0x24f   :  { %13361 = vmatprep.mubr.msk.f32.mxu0 %vm269_vm0, %v4386_v0  ;;  %v4390_v0 = vld [vmem:[%s21191_s0 + $0x144] sm:$0xff] }
 0x250   :  { %v16919_v14 = vpop.f32.mrb[66].mxu1 }
 0x251   :  { %21422 = vst [vmem:[#allocation28_spill] sm:$0xff] %v16919_v14  ;;  %v16921_v16 = vpop.f32.mrb[67].mxu1 }
 0x252   :  { %13362 = vmatmul.mubr.msk.f32.gmra.mrb[36].mxu0 %vm269_vm0, %v4387_v32  ;;  %21423 = vst [vmem:[#allocation29_spill] sm:$0xff] %v16921_v16  ;;  %v4391_v32 = vld [vmem:[%s21191_s0 + $0x14c] sm:$0xff] }
 0x253   :  { %13364 = vmatprep.mubr.msk.f32.mxu0 %vm269_vm0, %v4388_v36  ;;  %v4392_v36 = vld [vmem:[%s21191_s0 + $0x154] sm:$0xff] }
 0x254   :  { %v16931_v48 = vpop.f32.mrb[68].mxu1 }
 0x255   :  { %21424 = vst [vmem:[#allocation30_spill] sm:$0xff] %v16931_v48  ;;  %v16933_v46 = vpop.f32.mrb[69].mxu1 }
 0x256   :  { %13365 = vmatmul.mubr.msk.f32.gmra.mrb[38].mxu0 %vm269_vm0, %v4389_v62  ;;  %21425 = vst [vmem:[#allocation31_spill] sm:$0xff] %v16933_v46  ;;  %v4393_v62 = vld [vmem:[%s21191_s0 + $0x15c] sm:$0xff] }
 0x257   :  { %13367 = vmatprep.mubr.msk.f32.mxu0 %vm269_vm0, %v4390_v0  ;;  %v4394_v0 = vld [vmem:[%s21191_s0 + $0x164] sm:$0xff] }
 0x258   :  { %v16943_v16 = vpop.f32.mrb[70].mxu1 }
 0x259   :  { %21426 = vst [vmem:[#allocation32_spill] sm:$0xff] %v16943_v16  ;;  %v16945_v14 = vpop.f32.mrb[71].mxu1 }
 0x25a   :  { %13368 = vmatmul.mubr.msk.f32.gmra.mrb[40].mxu0 %vm269_vm0, %v4391_v32  ;;  %21427 = vst [vmem:[#allocation33_spill] sm:$0xff] %v16945_v14  ;;  %v4395_v32 = vld [vmem:[%s21191_s0 + $0x16c] sm:$0xff] }
 0x25b   :  { %13370 = vmatprep.mubr.msk.f32.mxu0 %vm269_vm0, %v4392_v36  ;;  %v4396_v36 = vld [vmem:[%s21191_s0 + $0x174] sm:$0xff] }
 0x25c   :  { %v16955_v46 = vpop.f32.mrb[72].mxu1 }
 0x25d   :  { %21428 = vst [vmem:[#allocation34_spill] sm:$0xff] %v16955_v46  ;;  %v16957_v48 = vpop.f32.mrb[73].mxu1 }
 0x25e   :  { %13371 = vmatmul.mubr.msk.f32.gmra.mrb[42].mxu0 %vm269_vm0, %v4393_v62  ;;  %21429 = vst [vmem:[#allocation35_spill] sm:$0xff] %v16957_v48  ;;  %v4397_v62 = vld [vmem:[%s21191_s0 + $0x17c] sm:$0xff] }
 0x25f   :  { %13373 = vmatprep.mubr.msk.f32.mxu0 %vm269_vm0, %v4394_v0  ;;  %v4398_v0 = vld [vmem:[%s21191_s0 + $0x184] sm:$0xff] }
 0x260   :  { %v16967_v14 = vpop.f32.mrb[74].mxu1 }
 0x261   :  { %21430 = vst [vmem:[#allocation36_spill] sm:$0xff] %v16967_v14  ;;  %v16969_v16 = vpop.f32.mrb[75].mxu1 }
 0x262   :  { %13374 = vmatmul.mubr.msk.f32.gmra.mrb[44].mxu0 %vm269_vm0, %v4395_v32  ;;  %21431 = vst [vmem:[#allocation37_spill] sm:$0xff] %v16969_v16  ;;  %v4399_v32 = vld [vmem:[%s21191_s0 + $0x18c] sm:$0xff] }
 0x263   :  { %13376 = vmatprep.mubr.msk.f32.mxu0 %vm269_vm0, %v4396_v36  ;;  %v4400_v36 = vld [vmem:[%s21191_s0 + $0x194] sm:$0xff] }
 0x264   :  { %v16979_v48 = vpop.f32.mrb[76].mxu1 }
 0x265   :  { %21432 = vst [vmem:[#allocation38_spill] sm:$0xff] %v16979_v48  ;;  %v16981_v46 = vpop.f32.mrb[77].mxu1 }
 0x266   :  { %13377 = vmatmul.mubr.msk.f32.gmra.mrb[46].mxu0 %vm269_vm0, %v4397_v62  ;;  %21433 = vst [vmem:[#allocation39_spill] sm:$0xff] %v16981_v46  ;;  %v4401_v62 = vld [vmem:[%s21191_s0 + $0x19c] sm:$0xff] }
 0x267   :  { %13379 = vmatprep.mubr.msk.f32.mxu0 %vm269_vm0, %v4398_v0  ;;  %v4402_v0 = vld [vmem:[%s21191_s0 + $0x1a4] sm:$0xff] }
 0x268   :  { %v16991_v16 = vpop.f32.mrb[78].mxu1 }
 0x269   :  { %21434 = vst [vmem:[#allocation40_spill] sm:$0xff] %v16991_v16  ;;  %v16993_v14 = vpop.f32.mrb[79].mxu1 }
 0x26a   :  { %13380 = vmatmul.mubr.msk.f32.gmra.mrb[48].mxu0 %vm269_vm0, %v4399_v32  ;;  %21435 = vst [vmem:[#allocation41_spill] sm:$0xff] %v16993_v14  ;;  %v4403_v32 = vld [vmem:[%s21191_s0 + $0x1b4] sm:$0xff] }
 0x26b   :  { %13382 = vmatprep.mubr.msk.f32.mxu0 %vm269_vm0, %v4400_v36  ;;  %v4404_v36 = vld [vmem:[%s21191_s0 + $0x1bc] sm:$0xff] }
 0x26c   :  { %v17003_v46 = vpop.f32.mrb[80].mxu1 }
 0x26d   :  { %21436 = vst [vmem:[#allocation42_spill] sm:$0xff] %v17003_v46  ;;  %v17005_v48 = vpop.f32.mrb[81].mxu1 }
 0x26e   :  { %13383 = vmatmul.mubr.msk.f32.gmra.mrb[50].mxu0 %vm269_vm0, %v4401_v62  ;;  %21437 = vst [vmem:[#allocation43_spill] sm:$0xff] %v17005_v48  ;;  %v4405_v62 = vld [vmem:[%s21191_s0 + $0x1c4] sm:$0xff] }
 0x26f   :  { %13385 = vmatprep.mubr.msk.f32.mxu0 %vm269_vm0, %v4402_v0  ;;  %v4406_v0 = vld [vmem:[%s21191_s0 + $0x1cc] sm:$0xff] }
 0x270   :  { %v17015_v14 = vpop.f32.mrb[82].mxu1 }
 0x271   :  { %21438 = vst [vmem:[#allocation44_spill] sm:$0xff] %v17015_v14  ;;  %v17017_v16 = vpop.f32.mrb[83].mxu1 }
 0x272   :  { %13386 = vmatmul.mubr.msk.f32.gmra.mrb[52].mxu0 %vm269_vm0, %v4403_v32  ;;  %21439 = vst [vmem:[#allocation45_spill] sm:$0xff] %v17017_v16  ;;  %v4407_v32 = vld [vmem:[%s21191_s0 + $0x1d4] sm:$0xff] }
 0x273   :  { %13388 = vmatprep.mubr.msk.f32.mxu0 %vm269_vm0, %v4404_v36  ;;  %v4408_v36 = vld [vmem:[%s21191_s0 + $0x1dc] sm:$0xff] }
 0x274   :  { %v17027_v48 = vpop.f32.mrb[84].mxu1 }
 0x275   :  { %21440 = vst [vmem:[#allocation46_spill] sm:$0xff] %v17027_v48  ;;  %v17029_v46 = vpop.f32.mrb[85].mxu1 }
 0x276   :  { %13389 = vmatmul.mubr.msk.f32.gmra.mrb[54].mxu0 %vm269_vm0, %v4405_v62  ;;  %21441 = vst [vmem:[#allocation47_spill] sm:$0xff] %v17029_v46  ;;  %v4409_v62 = vld [vmem:[%s21191_s0 + $0x1e4] sm:$0xff] }
 0x277   :  { %13391 = vmatprep.mubr.msk.f32.mxu0 %vm269_vm0, %v4406_v0  ;;  %v4410_v0 = vld [vmem:[%s21191_s0 + $0x1ec] sm:$0xff] }
 0x278   :  { %v17039_v16 = vpop.f32.mrb[86].mxu1 }
 0x279   :  { %21442 = vst [vmem:[#allocation48_spill] sm:$0xff] %v17039_v16  ;;  %v17041_v14 = vpop.f32.mrb[87].mxu1 }
 0x27a   :  { %13392 = vmatmul.mubr.msk.f32.gmra.mrb[56].mxu0 %vm269_vm0, %v4407_v32  ;;  %21443 = vst [vmem:[#allocation49_spill] sm:$0xff] %v17041_v14  ;;  %v4411_v32 = vld [vmem:[%s21191_s0 + $0x1f4] sm:$0xff] }
 0x27b   :  { %13394 = vmatprep.mubr.msk.f32.mxu0 %vm269_vm0, %v4408_v36  ;;  %v4412_v36 = vld [vmem:[%s21191_s0 + $0x1fc] sm:$0xff] }
 0x27c   :  { %v17051_v46 = vpop.f32.mrb[88].mxu1 }
 0x27d   :  { %21444 = vst [vmem:[#allocation50_spill] sm:$0xff] %v17051_v46  ;;  %v17053_v48 = vpop.f32.mrb[89].mxu1 }
 0x27e   :  { %13395 = vmatmul.mubr.msk.f32.gmra.mrb[58].mxu0 %vm269_vm0, %v4409_v62  ;;  %21445 = vst [vmem:[#allocation51_spill] sm:$0xff] %v17053_v48  ;;  %v4413_v62 = vld [vmem:[%s21191_s0 + $0x204] sm:$0xff] }
 0x27f   :  { %13397 = vmatprep.mubr.msk.f32.mxu0 %vm269_vm0, %v4410_v0  ;;  %v4414_v0 = vld [vmem:[%s21191_s0 + $0x20c] sm:$0xff] }
 0x280   :  { %v17063_v14 = vpop.f32.mrb[90].mxu1 }
 0x281   :  { %21446 = vst [vmem:[#allocation52_spill] sm:$0xff] %v17063_v14  ;;  %v17065_v16 = vpop.f32.mrb[91].mxu1 }
 0x282   :  { %13398 = vmatmul.mubr.msk.f32.gmra.mrb[60].mxu0 %vm269_vm0, %v4411_v32  ;;  %21447 = vst [vmem:[#allocation53_spill] sm:$0xff] %v17065_v16  ;;  %v4415_v32 = vld [vmem:[%s21191_s0 + $0x214] sm:$0xff] }
 0x283   :  { %13400 = vmatprep.mubr.msk.f32.mxu0 %vm269_vm0, %v4412_v36  ;;  %v4416_v36 = vld [vmem:[%s21191_s0 + $0x21c] sm:$0xff] }
 0x284   :  { %v17075_v48 = vpop.f32.mrb[92].mxu1 }
 0x285   :  { %21448 = vst [vmem:[#allocation54_spill] sm:$0xff] %v17075_v48  ;;  %v17077_v46 = vpop.f32.mrb[93].mxu1 }
 0x286   :  { %13401 = vmatmul.mubr.msk.f32.gmra.mrb[62].mxu0 %vm269_vm0, %v4413_v62  ;;  %21449 = vst [vmem:[#allocation55_spill] sm:$0xff] %v17077_v46  ;;  %v4417_v62 = vld [vmem:[%s21191_s0 + $0x224] sm:$0xff] }
 0x287   :  { %13403 = vmatprep.mubr.msk.f32.mxu0 %vm269_vm0, %v4414_v0  ;;  %v4418_v0 = vld [vmem:[%s21191_s0 + $0x22c] sm:$0xff] }
 0x288   :  { %v17087_v16 = vpop.f32.mrb[94].mxu1 }
 0x289   :  { %21450 = vst [vmem:[#allocation56_spill] sm:$0xff] %v17087_v16  ;;  %v17089_v14 = vpop.f32.mrb[95].mxu1 }
 0x28a   :  { %13404 = vmatmul.mubr.msk.f32.gmra.mrb[64].mxu0 %vm269_vm0, %v4415_v32  ;;  %21451 = vst [vmem:[#allocation57_spill] sm:$0xff] %v17089_v14  ;;  %v4419_v32 = vld [vmem:[%s21191_s0 + $0x234] sm:$0xff] }
 0x28b   :  { %13406 = vmatprep.mubr.msk.f32.mxu0 %vm269_vm0, %v4416_v36  ;;  %v4420_v36 = vld [vmem:[%s21191_s0 + $0x23c] sm:$0xff] }
 0x28c   :  { %v17099_v46 = vpop.f32.mrb[96].mxu1 }
 0x28d   :  { %21452 = vst [vmem:[#allocation58_spill] sm:$0xff] %v17099_v46  ;;  %v17101_v48 = vpop.f32.mrb[97].mxu1 }
 0x28e   :  { %13407 = vmatmul.mubr.msk.f32.gmra.mrb[66].mxu0 %vm269_vm0, %v4417_v62  ;;  %21453 = vst [vmem:[#allocation59_spill] sm:$0xff] %v17101_v48  ;;  %v4421_v62 = vld [vmem:[%s21191_s0 + $0x244] sm:$0xff] }
 0x28f   :  { %13409 = vmatprep.mubr.msk.f32.mxu0 %vm269_vm0, %v4418_v0  ;;  %v4422_v0 = vld [vmem:[%s21191_s0 + $0x24c] sm:$0xff] }
 0x290   :  { %v17111_v14 = vpop.f32.mrb[98].mxu1 }
 0x291   :  { %21454 = vst [vmem:[#allocation60_spill] sm:$0xff] %v17111_v14  ;;  %v17113_v16 = vpop.f32.mrb[99].mxu1 }
 0x292   :  { %13410 = vmatmul.mubr.msk.f32.gmra.mrb[68].mxu0 %vm269_vm0, %v4419_v32  ;;  %21455 = vst [vmem:[#allocation61_spill] sm:$0xff] %v17113_v16  ;;  %v4423_v32 = vld [vmem:[%s21191_s0 + $0x254] sm:$0xff] }
 0x293   :  { %13412 = vmatprep.mubr.msk.f32.mxu0 %vm269_vm0, %v4420_v36  ;;  %v4424_v36 = vld [vmem:[%s21191_s0 + $0x25c] sm:$0xff] }
 0x294   :  { %v17123_v48 = vpop.f32.mrb[100].mxu1 }
 0x295   :  { %21456 = vst [vmem:[#allocation62_spill] sm:$0xff] %v17123_v48  ;;  %v17125_v46 = vpop.f32.mrb[101].mxu1 }
 0x296   :  { %13413 = vmatmul.mubr.msk.f32.gmra.mrb[70].mxu0 %vm269_vm0, %v4421_v62  ;;  %21457 = vst [vmem:[#allocation63_spill] sm:$0xff] %v17125_v46  ;;  %v4425_v62 = vld [vmem:[%s21191_s0 + $0x264] sm:$0xff] }
 0x297   :  { %13415 = vmatprep.mubr.msk.f32.mxu0 %vm269_vm0, %v4422_v0  ;;  %v4426_v0 = vld [vmem:[%s21191_s0 + $0x26c] sm:$0xff] }
 0x298   :  { %v17135_v16 = vpop.f32.mrb[102].mxu1 }
 0x299   :  { %21458 = vst [vmem:[#allocation64_spill] sm:$0xff] %v17135_v16  ;;  %v17137_v14 = vpop.f32.mrb[103].mxu1 }
 0x29a   :  { %13416 = vmatmul.mubr.msk.f32.gmra.mrb[72].mxu0 %vm269_vm0, %v4423_v32  ;;  %21459 = vst [vmem:[#allocation65_spill] sm:$0xff] %v17137_v14  ;;  %v4427_v32 = vld [vmem:[%s21191_s0 + $0x274] sm:$0xff] }
 0x29b   :  { %13418 = vmatprep.mubr.msk.f32.mxu0 %vm269_vm0, %v4424_v36  ;;  %v4428_v36 = vld [vmem:[%s21191_s0 + $0x27c] sm:$0xff] }
 0x29c   :  { %v17147_v46 = vpop.f32.mrb[104].mxu1 }
 0x29d   :  { %21460 = vst [vmem:[#allocation66_spill] sm:$0xff] %v17147_v46  ;;  %v17149_v48 = vpop.f32.mrb[105].mxu1 }
 0x29e   :  { %13419 = vmatmul.mubr.msk.f32.gmra.mrb[74].mxu0 %vm269_vm0, %v4425_v62  ;;  %21461 = vst [vmem:[#allocation67_spill] sm:$0xff] %v17149_v48  ;;  %v4429_v62 = vld [vmem:[%s21191_s0 + $0x284] sm:$0xff]  ;;  %v4431_v48 = vld [vmem:[%s21191_s0 + $0x294] sm:$0xff] }
 0x29f   :  { %13421 = vmatprep.mubr.msk.f32.mxu0 %vm269_vm0, %v4426_v0  ;;  %v4430_v0 = vld [vmem:[%s21191_s0 + $0x28c] sm:$0xff] }
 0x2a2   :  { %13422 = vmatmul.mubr.msk.f32.gmra.mrb[76].mxu0 %vm269_vm0, %v4427_v32  ;;  %v4432_v32 = vld [vmem:[%s21191_s0 + $0x29c] sm:$0xff] }
 0x2a3   :  { %13424 = vmatprep.mubr.msk.f32.mxu0 %vm269_vm0, %v4428_v36  ;;  %v4433_v36 = vld [vmem:[%s21191_s0 + $0x2a4] sm:$0xff] }
 0x2a6   :  { %13425 = vmatmul.mubr.msk.f32.gmra.mrb[78].mxu0 %vm269_vm0, %v4429_v62  ;;  %v4434_v62 = vld [vmem:[%s21191_s0 + $0x2ac] sm:$0xff] }
 0x2a7   :  { %13427 = vmatprep.mubr.msk.f32.mxu0 %vm269_vm0, %v4430_v0  ;;  %v4435_v0 = vld [vmem:[%s21191_s0 + $0x2b4] sm:$0xff] }
 0x2aa   :  { %13428 = vmatmul.mubr.msk.f32.gmra.mrb[80].mxu0 %vm269_vm0, %v4431_v48  ;;  %v4436_v48 = vld [vmem:[%s21191_s0 + $0x2bc] sm:$0xff] }
 0x2ab   :  { %13430 = vmatprep.mubr.msk.f32.mxu0 %vm269_vm0, %v4432_v32  ;;  %v4437_v32 = vld [vmem:[%s21191_s0 + $0x2c4] sm:$0xff] }
 0x2ae   :  { %13431 = vmatmul.mubr.msk.f32.gmra.mrb[82].mxu0 %vm269_vm0, %v4433_v36  ;;  %v4438_v36 = vld [vmem:[%s21191_s0 + $0x2cc] sm:$0xff] }
 0x2af   :  { %13433 = vmatprep.mubr.msk.f32.mxu0 %vm269_vm0, %v4434_v62  ;;  %v4439_v62 = vld [vmem:[%s21191_s0 + $0x2d4] sm:$0xff] }
 0x2b2   :  { %13434 = vmatmul.mubr.msk.f32.gmra.mrb[84].mxu0 %vm269_vm0, %v4435_v0  ;;  %v4440_v0 = vld [vmem:[%s21191_s0 + $0x2dc] sm:$0xff] }
 0x2b3   :  { %13436 = vmatprep.mubr.msk.f32.mxu0 %vm269_vm0, %v4436_v48  ;;  %v4441_v48 = vld [vmem:[%s21191_s0 + $0x2e4] sm:$0xff] }
 0x2b6   :  { %13437 = vmatmul.mubr.msk.f32.gmra.mrb[86].mxu0 %vm269_vm0, %v4437_v32  ;;  %v4442_v32 = vld [vmem:[%s21191_s0 + $0x2ec] sm:$0xff] }
 0x2b7   :  { %13439 = vmatprep.mubr.msk.f32.mxu0 %vm269_vm0, %v4438_v36  ;;  %v4443_v36 = vld [vmem:[%s21191_s0 + $0x2f4] sm:$0xff] }
 0x2ba   :  { %13440 = vmatmul.mubr.msk.f32.gmra.mrb[88].mxu0 %vm269_vm0, %v4439_v62  ;;  %v4444_v62 = vld [vmem:[%s21191_s0 + $0x2fc] sm:$0xff] }
 0x2bb   :  { %13442 = vmatprep.mubr.msk.f32.mxu0 %vm269_vm0, %v4440_v0  ;;  %v4445_v0 = vld [vmem:[%s21191_s0 + $0x304] sm:$0xff] }
 0x2be   :  { %13443 = vmatmul.mubr.msk.f32.gmra.mrb[90].mxu0 %vm269_vm0, %v4441_v48  ;;  %v4446_v48 = vld [vmem:[%s21191_s0 + $0x30c] sm:$0xff] }
 0x2bf   :  { %13445 = vmatprep.mubr.msk.f32.mxu0 %vm269_vm0, %v4442_v32  ;;  %v4447_v32 = vld [vmem:[%s21191_s0 + $0x314] sm:$0xff] }
 0x2c2   :  { %13446 = vmatmul.mubr.msk.f32.gmra.mrb[92].mxu0 %vm269_vm0, %v4443_v36  ;;  %v4448_v36 = vld [vmem:[%s21191_s0 + $0x31c] sm:$0xff] }
 0x2c3   :  { %13448 = vmatprep.mubr.msk.f32.mxu0 %vm269_vm0, %v4444_v62  ;;  %v4449_v62 = vld [vmem:[%s21191_s0 + $0x324] sm:$0xff] }
 0x2c6   :  { %13449 = vmatmul.mubr.msk.f32.gmra.mrb[94].mxu0 %vm269_vm0, %v4445_v0  ;;  %v4450_v0 = vld [vmem:[%s21191_s0 + $0x32c] sm:$0xff] }
 0x2c7   :  { %13451 = vmatprep.mubr.msk.f32.mxu0 %vm269_vm0, %v4446_v48  ;;  %v4451_v48 = vld [vmem:[%s21191_s0 + $0x334] sm:$0xff] }
 0x2ca   :  { %13452 = vmatmul.mubr.msk.f32.gmra.mrb[96].mxu0 %vm269_vm0, %v4447_v32  ;;  %v4452_v32 = vld [vmem:[%s21191_s0 + $0x33c] sm:$0xff] }
 0x2cb   :  { %13454 = vmatprep.mubr.msk.f32.mxu0 %vm269_vm0, %v4448_v36  ;;  %v4453_v36 = vld [vmem:[%s21191_s0 + $0x344] sm:$0xff] }
 0x2ce   :  { %13455 = vmatmul.mubr.msk.f32.gmra.mrb[98].mxu0 %vm269_vm0, %v4449_v62  ;;  %v4454_v62 = vld [vmem:[%s21191_s0 + $0x34c] sm:$0xff] }
 0x2cf   :  { %13457 = vmatprep.mubr.msk.f32.mxu0 %vm269_vm0, %v4450_v0  ;;  %v4455_v0 = vld [vmem:[%s21191_s0 + $0x354] sm:$0xff] }
 0x2d2   :  { %13458 = vmatmul.mubr.msk.f32.gmra.mrb[100].mxu0 %vm269_vm0, %v4451_v48 }
 0x2d3   :  { %13460 = vmatprep.mubr.msk.f32.mxu0 %vm269_vm0, %v4452_v32  ;;  %v17264_v32 = vld [vmem:[%s21193_s2] ss:$0 sm:$0xff] }
 0x2d6   :  { %13461 = vmatmul.mubr.msk.f32.gmra.mrb[102].mxu0 %vm269_vm0, %v4453_v36 }
 0x2d7   :  { %13463 = vmatprep.mubr.msk.f32.mxu0 %vm269_vm0, %v4454_v62 }
 0x2da   :  { %13464 = vmatmul.mubr.msk.f32.gmra.mrb[104].mxu0 %vm269_vm0, %v4455_v0 }
 0x2dd   :  { %v13309_v48 = vpop.f32.mrb[0].mxu0 }
 0x2de   :  { %v14252_v46 = vadd.f32 %v13309_v48, %v16516_v29  ;;  %v4842_v14 = vpop.f32.mrb[1].mxu0 }
 0x2df   :  { %v14253_v16 = vadd.f32 %v4842_v14, %v16522_v31 }
 0x2e0   :  { %v17269_v36 = vadd.f32 %v14252_v46, %v17264_v32 }
 0x2e1   :  { %v17272_v62 = vadd.f32 %v14253_v16, %v17264_v32  ;;  %v13312_v24 = vpop.f32.mrb[2].mxu0 }
 0x2e2   :  { %21462 = vst [vmem:[#allocation68_spill] sm:$0xff] %v17269_v36  ;;  %v14254_v0 = vadd.f32 %v13312_v24, %v16528_v33  ;;  %v4852_v22 = vpop.f32.mrb[3].mxu0  ;;  %v5701_v9 = vmul.f32 %v17269_v36, %v17269_v36 }
 0x2e3   :  { %v5700_v7 = vmul.f32 %v17272_v62, %v17272_v62  ;;  %v14255_v29 = vadd.f32 %v4852_v22, %v16534_v35  ;;  %v5588_v46 = vadd.f32 %v17269_v36, %v17272_v62 }
 0x2e4   :  { %v17281_v31 = vadd.f32 %v14254_v0, %v17264_v32 }
 0x2e5   :  { %v17286_v14 = vadd.f32 %v14255_v29, %v17264_v32  ;;  %v13315_v16 = vpop.f32.mrb[4].mxu0  ;;  %v5806_v48 = vadd.f32 %v5701_v9, %v5700_v7 }
 0x2e6   :  { %v14256_v33 = vadd.f32 %v13315_v16, %v16540_v37  ;;  %v4862_v24 = vpop.f32.mrb[5].mxu0  ;;  %v5703_v22 = vmul.f32 %v17281_v31, %v17281_v31 }
 0x2e7   :  { %21463 = vst [vmem:[#allocation69_spill] sm:$0xff] %v17286_v14  ;;  %v5589_v56 = vadd.f32 %v5588_v46, %v17286_v14  ;;  %v5702_v54 = vmul.f32 %v17286_v14, %v17286_v14  ;;  %v14257_v35 = vadd.f32 %v4862_v24, %v16546_v39 }
 0x2e8   :  { %v17297_v29 = vadd.f32 %v14256_v33, %v17264_v32 }
 0x2e9   :  { %v5590_v0 = vadd.f32 %v5589_v56, %v17281_v31  ;;  %v5807_v36 = vadd.f32 %v5806_v48, %v5702_v54  ;;  %v17300_v37 = vadd.f32 %v14257_v35, %v17264_v32  ;;  %v13318_v7 = vpop.f32.mrb[6].mxu0 }
 0x2ea   :  { %v14258_v9 = vadd.f32 %v13318_v7, %v16552_v41  ;;  %v4872_v46 = vpop.f32.mrb[7].mxu0  ;;  %v5705_v56 = vmul.f32 %v17297_v29, %v17297_v29 }
 0x2eb   :  { %v5808_v16 = vadd.f32 %v5807_v36, %v5703_v22  ;;  %v5591_v14 = vadd.f32 %v5590_v0, %v17300_v37  ;;  %v5704_v39 = vmul.f32 %v17300_v37, %v17300_v37  ;;  %v14259_v24 = vadd.f32 %v4872_v46, %v16558_v43 }
 0x2ec   :  { %v17308_v54 = vadd.f32 %v14258_v9, %v17264_v32 }
 0x2ed   :  { %v5592_v33 = vadd.f32 %v5591_v14, %v17297_v29  ;;  %v5809_v48 = vadd.f32 %v5808_v16, %v5704_v39  ;;  %v17314_v41 = vadd.f32 %v14259_v24, %v17264_v32  ;;  %v13321_v36 = vpop.f32.mrb[8].mxu0 }
 0x2ee   :  { %v14260_v35 = vadd.f32 %v13321_v36, %v16564_v45  ;;  %v4882_v22 = vpop.f32.mrb[9].mxu0  ;;  %v5707_v46 = vmul.f32 %v17308_v54, %v17308_v54 }
 0x2ef   :  { %v5810_v0 = vadd.f32 %v5809_v48, %v5705_v56  ;;  %v5593_v7 = vadd.f32 %v5592_v33, %v17314_v41  ;;  %v5706_v43 = vmul.f32 %v17314_v41, %v17314_v41  ;;  %v14261_v9 = vadd.f32 %v4882_v22, %v16570_v47 }
 0x2f0   :  { %v17325_v39 = vadd.f32 %v14260_v35, %v17264_v32 }
 0x2f1   :  { %v5594_v14 = vadd.f32 %v5593_v7, %v17308_v54  ;;  %v5811_v16 = vadd.f32 %v5810_v0, %v5706_v43  ;;  %v17328_v45 = vadd.f32 %v14261_v9, %v17264_v32  ;;  %v13324_v24 = vpop.f32.mrb[10].mxu0 }
 0x2f2   :  { %v14262_v56 = vadd.f32 %v13324_v24, %v16576_v49  ;;  %v4892_v33 = vpop.f32.mrb[11].mxu0  ;;  %v5709_v35 = vmul.f32 %v17325_v39, %v17325_v39 }
 0x2f3   :  { %v5812_v48 = vadd.f32 %v5811_v16, %v5707_v46  ;;  %v5595_v36 = vadd.f32 %v5594_v14, %v17328_v45  ;;  %v5708_v47 = vmul.f32 %v17328_v45, %v17328_v45  ;;  %v14263_v22 = vadd.f32 %v4892_v33, %v16582_v51 }
 0x2f4   :  { %v17336_v0 = vadd.f32 %v14262_v56, %v17264_v32 }
 0x2f5   :  { %v5596_v7 = vadd.f32 %v5595_v36, %v17325_v39  ;;  %v5813_v43 = vadd.f32 %v5812_v48, %v5708_v47  ;;  %v17342_v49 = vadd.f32 %v14263_v22, %v17264_v32  ;;  %v13327_v9 = vpop.f32.mrb[12].mxu0 }
 0x2f6   :  { %v14264_v46 = vadd.f32 %v13327_v9, %v16588_v53  ;;  %v4902_v14 = vpop.f32.mrb[13].mxu0  ;;  %v5711_v33 = vmul.f32 %v17336_v0, %v17336_v0 }
 0x2f7   :  { %v5814_v16 = vadd.f32 %v5813_v43, %v5709_v35  ;;  %v5597_v24 = vadd.f32 %v5596_v7, %v17342_v49  ;;  %v5710_v51 = vmul.f32 %v17342_v49, %v17342_v49  ;;  %v14265_v56 = vadd.f32 %v4902_v14, %v16594_v55 }
 0x2f8   :  { %v17353_v47 = vadd.f32 %v14264_v46, %v17264_v32 }
 0x2f9   :  { %v5598_v48 = vadd.f32 %v5597_v24, %v17336_v0  ;;  %v5815_v36 = vadd.f32 %v5814_v16, %v5710_v51  ;;  %v17356_v53 = vadd.f32 %v14265_v56, %v17264_v32  ;;  %v13330_v22 = vpop.f32.mrb[14].mxu0 }
 0x2fa   :  { %21464 = vst [vmem:[#allocation70_spill] sm:$0xff] %v17353_v47  ;;  %v14266_v35 = vadd.f32 %v13330_v22, %v16600_v57  ;;  %v4912_v7 = vpop.f32.mrb[15].mxu0  ;;  %v5713_v46 = vmul.f32 %v17353_v47, %v17353_v47 }
 0x2fb   :  { %21465 = vst [vmem:[#allocation71_spill] sm:$0xff] %v17356_v53  ;;  %v5816_v43 = vadd.f32 %v5815_v36, %v5711_v33  ;;  %v5599_v9 = vadd.f32 %v5598_v48, %v17356_v53  ;;  %v5712_v55 = vmul.f32 %v17356_v53, %v17356_v53  ;;  %v14267_v14 = vadd.f32 %v4912_v7, %v16606_v59  ;;  %v7470_v33 = vld [vmem:[%s21194_s3 + $0x80] sm:$0xff]  ;;  %v7471_v59 = vld [vmem:[%s21194_s3 + $0x88] sm:$0xff] }
 0x2fc   :  { %v17364_v16 = vadd.f32 %v14266_v35, %v17264_v32  ;;  %v13962_v22 = vpack.c.bf16 %v7471_v59, %v7470_v33 }
 0x2fd   :  { %v5600_v24 = vadd.f32 %v5599_v9, %v17353_v47  ;;  %v5817_v51 = vadd.f32 %v5816_v43, %v5712_v55  ;;  %v17370_v57 = vadd.f32 %v14267_v14, %v17264_v32  ;;  %v13333_v56 = vpop.f32.mrb[16].mxu0 }
 0x2fe   :  { %v14268_v48 = vadd.f32 %v13333_v56, %v16612_v61  ;;  %v4922_v36 = vpop.f32.mrb[17].mxu0  ;;  %v5715_v55 = vmul.f32 %v17364_v16, %v17364_v16  ;;  %13963 = vmatprep.subr.bf16.mxu1 %v13962_v22 }
 0x2ff   :  { %v5818_v35 = vadd.f32 %v5817_v51, %v5713_v46  ;;  %v5601_v7 = vadd.f32 %v5600_v24, %v17370_v57  ;;  %v5714_v43 = vmul.f32 %v17370_v57, %v17370_v57  ;;  %v14269_v9 = vadd.f32 %v4922_v36, %v16618_v63  ;;  %13965 = vmatpush3.bf16.msra.mxu1 %v13962_v22 }
 0x300   :  { %v17387_v53 = vadd.f32 %v14268_v48, %v17264_v32 }
 0x301   :  { %v5602_v14 = vadd.f32 %v5601_v7, %v17364_v16  ;;  %v5819_v47 = vadd.f32 %v5818_v35, %v5714_v43  ;;  %v17390_v61 = vadd.f32 %v14269_v9, %v17264_v32  ;;  %v13336_v46 = vpop.f32.mrb[18].mxu0 }
 0x302   :  { %v14270_v24 = vadd.f32 %v13336_v46, %v16624_v1  ;;  %v4932_v51 = vpop.f32.mrb[19].mxu0  ;;  %v5717_v48 = vmul.f32 %v17387_v53, %v17387_v53 }
 0x303   :  { %v5820_v56 = vadd.f32 %v5819_v47, %v5715_v55  ;;  %v5603_v63 = vadd.f32 %v5602_v14, %v17390_v61  ;;  %v5716_v33 = vmul.f32 %v17390_v61, %v17390_v61  ;;  %v14271_v59 = vadd.f32 %v4932_v51, %v16630_v3 }
 0x304   :  { %v17398_v36 = vadd.f32 %v14270_v24, %v17264_v32 }
 0x305   :  { %v5604_v35 = vadd.f32 %v5603_v63, %v17387_v53  ;;  %v5821_v22 = vadd.f32 %v5820_v56, %v5716_v33  ;;  %v17404_v1 = vadd.f32 %v14271_v59, %v17264_v32  ;;  %v13339_v47 = vpop.f32.mrb[20].mxu0 }
 0x306   :  { %v14272_v7 = vadd.f32 %v13339_v47, %v16636_v6  ;;  %v4942_v43 = vpop.f32.mrb[21].mxu0  ;;  %v5719_v46 = vmul.f32 %v17398_v36, %v17398_v36 }
 0x307   :  { %v5822_v9 = vadd.f32 %v5821_v22, %v5717_v48  ;;  %v5605_v55 = vadd.f32 %v5604_v35, %v17404_v1  ;;  %v5718_v3 = vmul.f32 %v17404_v1, %v17404_v1  ;;  %v14273_v14 = vadd.f32 %v4942_v43, %v16642_v8 }
 0x308   :  { %v17415_v56 = vadd.f32 %v14272_v7, %v17264_v32 }
 0x309   :  { %v5606_v24 = vadd.f32 %v5605_v55, %v17398_v36  ;;  %v5823_v51 = vadd.f32 %v5822_v9, %v5718_v3  ;;  %v17418_v6 = vadd.f32 %v14273_v14, %v17264_v32  ;;  %v13342_v63 = vpop.f32.mrb[22].mxu0 }
 0x30a   :  { %v14274_v33 = vadd.f32 %v13342_v63, %v16648_v4  ;;  %v4952_v59 = vpop.f32.mrb[23].mxu0  ;;  %v5721_v7 = vmul.f32 %v17415_v56, %v17415_v56 }
 0x30b   :  { %v5824_v48 = vadd.f32 %v5823_v51, %v5719_v46  ;;  %v5607_v35 = vadd.f32 %v5606_v24, %v17418_v6  ;;  %v5720_v8 = vmul.f32 %v17418_v6, %v17418_v6  ;;  %v14275_v22 = vadd.f32 %v4952_v59, %v16654_v11 }
 0x30c   :  { %v17426_v47 = vadd.f32 %v14274_v33, %v17264_v32 }
 0x30d   :  { %v5608_v43 = vadd.f32 %v5607_v35, %v17415_v56  ;;  %v5825_v9 = vadd.f32 %v5824_v48, %v5720_v8  ;;  %v17432_v4 = vadd.f32 %v14275_v22, %v17264_v32  ;;  %v13345_v55 = vpop.f32.mrb[24].mxu0  ;;  %v7472_v8 = vld [vmem:[%s21194_s3 + $0x90] sm:$0xff] }
 0x30e   :  { %v14276_v3 = vadd.f32 %v13345_v55, %v16660_v13  ;;  %v4962_v14 = vpop.f32.mrb[25].mxu0  ;;  %v5723_v63 = vmul.f32 %v17426_v47, %v17426_v47 }
 0x30f   :  { %v5826_v46 = vadd.f32 %v5825_v9, %v5721_v7  ;;  %v5609_v24 = vadd.f32 %v5608_v43, %v17432_v4  ;;  %v5722_v11 = vmul.f32 %v17432_v4, %v17432_v4  ;;  %v14277_v51 = vadd.f32 %v4962_v14, %v16666_v15  ;;  %v7473_v15 = vld [vmem:[%s21194_s3 + $0x98] sm:$0xff] }
 0x310   :  { %v17443_v48 = vadd.f32 %v14276_v3, %v17264_v32  ;;  %v13966_v43 = vpack.c.bf16 %v7473_v15, %v7472_v8 }
 0x311   :  { %v5610_v33 = vadd.f32 %v5609_v24, %v17426_v47  ;;  %v5827_v59 = vadd.f32 %v5826_v46, %v5722_v11  ;;  %v17446_v13 = vadd.f32 %v14277_v51, %v17264_v32  ;;  %v13348_v35 = vpop.f32.mrb[26].mxu0 }
 0x312   :  { %v14278_v22 = vadd.f32 %v13348_v35, %v16672_v17  ;;  %v4972_v7 = vpop.f32.mrb[27].mxu0  ;;  %13967 = vmatprep.subr.bf16.mxu1 %v13966_v43  ;;  %v5725_v24 = vmul.f32 %v17443_v48, %v17443_v48 }
 0x313   :  { %v5828_v9 = vadd.f32 %v5827_v59, %v5723_v63  ;;  %v5611_v55 = vadd.f32 %v5610_v33, %v17446_v13  ;;  %v5724_v3 = vmul.f32 %v17446_v13, %v17446_v13  ;;  %v14279_v14 = vadd.f32 %v4972_v7, %v16678_v19  ;;  %13969 = vmatpush3.bf16.msra.mxu1 %v13966_v43 }
 0x314   :  { %v17460_v46 = vadd.f32 %v14278_v22, %v17264_v32 }
 0x315   :  { %v5612_v11 = vadd.f32 %v5611_v55, %v17443_v48  ;;  %v5829_v17 = vadd.f32 %v5828_v9, %v5724_v3  ;;  %v17466_v51 = vadd.f32 %v14279_v14, %v17264_v32  ;;  %v13351_v63 = vpop.f32.mrb[28].mxu0 }
 0x316   :  { %v14280_v33 = vadd.f32 %v13351_v63, %v16684_v21  ;;  %v4982_v59 = vpop.f32.mrb[29].mxu0  ;;  %v5727_v22 = vmul.f32 %v17460_v46, %v17460_v46 }
 0x317   :  { %v5830_v35 = vadd.f32 %v5829_v17, %v5725_v24  ;;  %v5613_v19 = vadd.f32 %v5612_v11, %v17466_v51  ;;  %v5726_v8 = vmul.f32 %v17466_v51, %v17466_v51  ;;  %v14281_v15 = vadd.f32 %v4982_v59, %v16690_v23 }
 0x318   :  { %v17477_v55 = vadd.f32 %v14280_v33, %v17264_v32 }
 0x319   :  { %v5614_v7 = vadd.f32 %v5613_v19, %v17460_v46  ;;  %v5831_v9 = vadd.f32 %v5830_v35, %v5726_v8  ;;  %v17480_v21 = vadd.f32 %v14281_v15, %v17264_v32  ;;  %v13354_v43 = vpop.f32.mrb[30].mxu0 }
 0x31a   :  { %v14282_v3 = vadd.f32 %v13354_v43, %v16696_v25  ;;  %v4992_v14 = vpop.f32.mrb[31].mxu0  ;;  %v5729_v33 = vmul.f32 %v17477_v55, %v17477_v55 }
 0x31b   :  { %v5832_v24 = vadd.f32 %v5831_v9, %v5727_v22  ;;  %v5615_v11 = vadd.f32 %v5614_v7, %v17480_v21  ;;  %v5728_v23 = vmul.f32 %v17480_v21, %v17480_v21  ;;  %v14283_v17 = vadd.f32 %v4992_v14, %v16702_v27 }
 0x31c   :  { %v17488_v63 = vadd.f32 %v14282_v3, %v17264_v32 }
 0x31d   :  { %v5616_v59 = vadd.f32 %v5615_v11, %v17477_v55  ;;  %v5833_v35 = vadd.f32 %v5832_v24, %v5728_v23  ;;  %v17494_v25 = vadd.f32 %v14283_v17, %v17264_v32  ;;  %v13357_v19 = vpop.f32.mrb[32].mxu0  ;;  %v7474_v23 = vld [vmem:[%s21194_s3 + $0xa0] sm:$0xff] }
 0x31e   :  { %v14284_v8 = vadd.f32 %v13357_v19, %v16708_v30  ;;  %v5002_v15 = vpop.f32.mrb[33].mxu0  ;;  %v5731_v43 = vmul.f32 %v17488_v63, %v17488_v63 }
 0x31f   :  { %v5834_v22 = vadd.f32 %v5833_v35, %v5729_v33  ;;  %v5617_v7 = vadd.f32 %v5616_v59, %v17494_v25  ;;  %v5730_v27 = vmul.f32 %v17494_v25, %v17494_v25  ;;  %v14285_v9 = vadd.f32 %v5002_v15, %v16714_v34  ;;  %v7475_v34 = vld [vmem:[%s21194_s3 + $0xa8] sm:$0xff] }
 0x320   :  { %v17505_v24 = vadd.f32 %v14284_v8, %v17264_v32  ;;  %v13970_v59 = vpack.c.bf16 %v7475_v34, %v7474_v23 }
 0x321   :  { %v5618_v3 = vadd.f32 %v5617_v7, %v17488_v63  ;;  %v5835_v14 = vadd.f32 %v5834_v22, %v5730_v27  ;;  %v17508_v30 = vadd.f32 %v14285_v9, %v17264_v32  ;;  %v13360_v11 = vpop.f32.mrb[34].mxu0 }
 0x322   :  { %v14286_v17 = vadd.f32 %v13360_v11, %v16720_v38  ;;  %v5012_v33 = vpop.f32.mrb[35].mxu0  ;;  %13971 = vmatprep.subr.bf16.mxu1 %v13970_v59  ;;  %v5733_v7 = vmul.f32 %v17505_v24, %v17505_v24 }
 0x323   :  { %v5836_v35 = vadd.f32 %v5835_v14, %v5731_v43  ;;  %v5619_v19 = vadd.f32 %v5618_v3, %v17508_v30  ;;  %v5732_v8 = vmul.f32 %v17508_v30, %v17508_v30  ;;  %v14287_v15 = vadd.f32 %v5012_v33, %v16726_v42  ;;  %13973 = vmatpush3.bf16.msra.mxu1 %v13970_v59 }
 0x324   :  { %v17522_v22 = vadd.f32 %v14286_v17, %v17264_v32 }
 0x325   :  { %v5620_v27 = vadd.f32 %v5619_v19, %v17505_v24  ;;  %v5837_v38 = vadd.f32 %v5836_v35, %v5732_v8  ;;  %v17528_v9 = vadd.f32 %v14287_v15, %v17264_v32  ;;  %v13363_v43 = vpop.f32.mrb[36].mxu0 }
 0x326   :  { %v14288_v3 = vadd.f32 %v13363_v43, %v16739_v50  ;;  %v5022_v14 = vpop.f32.mrb[37].mxu0  ;;  %v5735_v17 = vmul.f32 %v17522_v22, %v17522_v22 }
 0x327   :  { %v5838_v11 = vadd.f32 %v5837_v38, %v5733_v7  ;;  %v5621_v42 = vadd.f32 %v5620_v27, %v17528_v9  ;;  %v5734_v23 = vmul.f32 %v17528_v9, %v17528_v9  ;;  %v14289_v34 = vadd.f32 %v5022_v14, %v16741_v52 }
 0x328   :  { %v17539_v19 = vadd.f32 %v14288_v3, %v17264_v32 }
 0x329   :  { %v5622_v33 = vadd.f32 %v5621_v42, %v17522_v22  ;;  %v5839_v35 = vadd.f32 %v5838_v11, %v5734_v23  ;;  %v17542_v50 = vadd.f32 %v14289_v34, %v17264_v32  ;;  %v13366_v59 = vpop.f32.mrb[38].mxu0 }
 0x32a   :  { %v14290_v8 = vadd.f32 %v13366_v59, %v16751_v58  ;;  %v5032_v15 = vpop.f32.mrb[39].mxu0  ;;  %v5737_v3 = vmul.f32 %v17539_v19, %v17539_v19 }
 0x32b   :  { %v5840_v7 = vadd.f32 %v5839_v35, %v5735_v17  ;;  %v5623_v27 = vadd.f32 %v5622_v33, %v17542_v50  ;;  %v5736_v52 = vmul.f32 %v17542_v50, %v17542_v50  ;;  %v14291_v38 = vadd.f32 %v5032_v15, %v16753_v60 }
 0x32c   :  { %v17550_v43 = vadd.f32 %v14290_v8, %v17264_v32 }
 0x32d   :  { %v5624_v14 = vadd.f32 %v5623_v27, %v17539_v19  ;;  %v5841_v11 = vadd.f32 %v5840_v7, %v5736_v52  ;;  %v17556_v58 = vadd.f32 %v14291_v38, %v17264_v32  ;;  %v13369_v42 = vpop.f32.mrb[40].mxu0 }
 0x32e   :  { %v14292_v23 = vadd.f32 %v13369_v42, %v16763_v2  ;;  %v5042_v34 = vpop.f32.mrb[41].mxu0  ;;  %v5739_v59 = vmul.f32 %v17550_v43, %v17550_v43 }
 0x32f   :  { %v5842_v17 = vadd.f32 %v5841_v11, %v5737_v3  ;;  %v5625_v33 = vadd.f32 %v5624_v14, %v17556_v58  ;;  %v5738_v60 = vmul.f32 %v17556_v58, %v17556_v58  ;;  %v14293_v35 = vadd.f32 %v5042_v34, %v16765_v5  ;;  %v7476_v5 = vld [vmem:[%s21194_s3 + $0xb0] sm:$0xff]  ;;  %v7477_v3 = vld [vmem:[%s21194_s3 + $0xb8] sm:$0xff] }
 0x330   :  { %v17567_v7 = vadd.f32 %v14292_v23, %v17264_v32 }
 0x331   :  { %v5626_v8 = vadd.f32 %v5625_v33, %v17550_v43  ;;  %v5843_v15 = vadd.f32 %v5842_v17, %v5738_v60  ;;  %v17570_v2 = vadd.f32 %v14293_v35, %v17264_v32  ;;  %v13372_v27 = vpop.f32.mrb[42].mxu0 }
 0x332   :  { %v14294_v52 = vadd.f32 %v13372_v27, %v16775_v10  ;;  %v5052_v38 = vpop.f32.mrb[43].mxu0  ;;  %v13974_v10 = vpack.c.bf16 %v7477_v3, %v7476_v5  ;;  %v5741_v17 = vmul.f32 %v17567_v7, %v17567_v7 }
 0x333   :  { %v5844_v14 = vadd.f32 %v5843_v15, %v5739_v59  ;;  %v5627_v11 = vadd.f32 %v5626_v8, %v17570_v2  ;;  %v5740_v42 = vmul.f32 %v17570_v2, %v17570_v2  ;;  %v14295_v23 = vadd.f32 %v5052_v38, %v16777_v12 }
 0x334   :  { %v17584_v34 = vadd.f32 %v14294_v52, %v17264_v32  ;;  %13975 = vmatprep.subr.bf16.mxu1 %v13974_v10 }
 0x335   :  { %v5628_v33 = vadd.f32 %v5627_v11, %v17567_v7  ;;  %v5845_v60 = vadd.f32 %v5844_v14, %v5740_v42  ;;  %v17590_v35 = vadd.f32 %v14295_v23, %v17264_v32  ;;  %v13375_v59 = vpop.f32.mrb[44].mxu0  ;;  %13977 = vmatpush3.bf16.msra.mxu1 %v13974_v10 }
 0x336   :  { %21466 = vst [vmem:[#allocation72_spill] sm:$0xff] %v17584_v34  ;;  %v14296_v8 = vadd.f32 %v13375_v59, %v16787_v18  ;;  %v5062_v15 = vpop.f32.mrb[45].mxu0  ;;  %v5743_v5 = vmul.f32 %v17584_v34, %v17584_v34 }
 0x337   :  { %v5846_v27 = vadd.f32 %v5845_v60, %v5741_v17  ;;  %v5629_v12 = vadd.f32 %v5628_v33, %v17590_v35  ;;  %v5742_v52 = vmul.f32 %v17590_v35, %v17590_v35  ;;  %v14297_v38 = vadd.f32 %v5062_v15, %v16789_v20 }
 0x338   :  { %v17601_v11 = vadd.f32 %v14296_v8, %v17264_v32 }
 0x339   :  { %v5630_v3 = vadd.f32 %v5629_v12, %v17584_v34  ;;  %v5847_v14 = vadd.f32 %v5846_v27, %v5742_v52  ;;  %v17604_v18 = vadd.f32 %v14297_v38, %v17264_v32  ;;  %v13378_v42 = vpop.f32.mrb[46].mxu0 }
 0x33a   :  { %21467 = vst [vmem:[#allocation73_spill] sm:$0xff] %v17601_v11  ;;  %v14298_v23 = vadd.f32 %v13378_v42, %v16799_v26  ;;  %v5072_v17 = vpop.f32.mrb[47].mxu0  ;;  %v5745_v8 = vmul.f32 %v17601_v11, %v17601_v11 }
 0x33b   :  { %21468 = vst [vmem:[#allocation74_spill] sm:$0xff] %v17604_v18  ;;  %v5848_v33 = vadd.f32 %v5847_v14, %v5743_v5  ;;  %v5631_v20 = vadd.f32 %v5630_v3, %v17604_v18  ;;  %v5744_v10 = vmul.f32 %v17604_v18, %v17604_v18  ;;  %v14299_v60 = vadd.f32 %v5072_v17, %v16801_v28 }
 0x33c   :  { %v17612_v59 = vadd.f32 %v14298_v23, %v17264_v32 }
 0x33d   :  { %v5632_v15 = vadd.f32 %v5631_v20, %v17601_v11  ;;  %v5849_v27 = vadd.f32 %v5848_v33, %v5744_v10  ;;  %v17618_v26 = vadd.f32 %v14299_v60, %v17264_v32  ;;  %v13381_v12 = vpop.f32.mrb[48].mxu0  ;;  %v21473_v10 = vld [vmem:[#allocation12_spill] sm:$0xff]  ;;  %v7484_v11 = vld [vmem:[%s21194_s3 + $0xf0] sm:$0xff] }
 0x33e   :  { %21469 = vst [vmem:[#allocation75_spill] sm:$0xff] %v17612_v59  ;;  %v14300_v52 = vadd.f32 %v13381_v12, %v16811_v40  ;;  %v5082_v38 = vpop.f32.mrb[49].mxu0  ;;  %v5747_v42 = vmul.f32 %v17612_v59, %v17612_v59  ;;  %v21474_v12 = vld [vmem:[#allocation13_spill] sm:$0xff] }
 0x33f   :  { %21470 = vst [vmem:[#allocation76_spill] sm:$0xff] %v17618_v26  ;;  %v5850_v5 = vadd.f32 %v5849_v27, %v5745_v8  ;;  %v5633_v3 = vadd.f32 %v5632_v15, %v17618_v26  ;;  %v5746_v28 = vmul.f32 %v17618_v26, %v17618_v26  ;;  %v14301_v14 = vadd.f32 %v5082_v38, %v16813_v44 }
 0x340   :  { %v17628_v17 = vadd.f32 %v14300_v52, %v17264_v32 }
 0x341   :  { %v5851_v23 = vadd.f32 %v5850_v5, %v5746_v28  ;;  %v17631_v33 = vadd.f32 %v14301_v14, %v17264_v32  ;;  %v5634_v40 = vadd.f32 %v5633_v3, %v17612_v59  ;;  %v13384_v20 = vpop.f32.mrb[50].mxu0 }
 0x342   :  { %21471 = vst [vmem:[#allocation77_spill] sm:$0xff] %v17628_v17  ;;  %v14302_v60 = vadd.f32 %v13384_v20, %v21473_v10  ;;  %v5092_v8 = vpop.f32.mrb[51].mxu0  ;;  %v5749_v5 = vmul.f32 %v17628_v17, %v17628_v17 }
 0x343   :  { %21472 = vst [vmem:[#allocation78_spill] sm:$0xff] %v17631_v33  ;;  %v5635_v15 = vadd.f32 %v5634_v40, %v17631_v33  ;;  %v5748_v44 = vmul.f32 %v17631_v33, %v17631_v33  ;;  %v5852_v27 = vadd.f32 %v5851_v23, %v5747_v42  ;;  %v14303_v38 = vadd.f32 %v5092_v8, %v21474_v12  ;;  %v21477_v40 = vld [vmem:[#allocation14_spill] sm:$0xff]  ;;  %v21478_v8 = vld [vmem:[#allocation15_spill] sm:$0xff] }
 0x344   :  { %v17640_v52 = vadd.f32 %v14302_v60, %v17264_v32 }
 0x345   :  { %v5853_v28 = vadd.f32 %v5852_v27, %v5748_v44  ;;  %v17645_v3 = vadd.f32 %v14303_v38, %v17264_v32  ;;  %v5636_v14 = vadd.f32 %v5635_v15, %v17628_v17  ;;  %v13387_v20 = vpop.f32.mrb[52].mxu0 }
 0x346   :  { %21475 = vst [vmem:[#allocation12_spill] sm:$0xff] %v17640_v52  ;;  %v14304_v10 = vadd.f32 %v13387_v20, %v21477_v40  ;;  %v5102_v59 = vpop.f32.mrb[53].mxu0  ;;  %v5751_v44 = vmul.f32 %v17640_v52, %v17640_v52 }
 0x347   :  { %21476 = vst [vmem:[#allocation13_spill] sm:$0xff] %v17645_v3  ;;  %v5637_v42 = vadd.f32 %v5636_v14, %v17645_v3  ;;  %v5750_v23 = vmul.f32 %v17645_v3, %v17645_v3  ;;  %v5854_v60 = vadd.f32 %v5853_v28, %v5749_v5  ;;  %v14305_v12 = vadd.f32 %v5102_v59, %v21478_v8  ;;  %v21481_v14 = vld [vmem:[#allocation16_spill] sm:$0xff]  ;;  %v21482_v8 = vld [vmem:[#allocation17_spill] sm:$0xff] }
 0x348   :  { %v17656_v38 = vadd.f32 %v14304_v10, %v17264_v32 }
 0x349   :  { %v5855_v27 = vadd.f32 %v5854_v60, %v5750_v23  ;;  %v17659_v15 = vadd.f32 %v14305_v12, %v17264_v32  ;;  %v5638_v20 = vadd.f32 %v5637_v42, %v17640_v52  ;;  %v13390_v40 = vpop.f32.mrb[54].mxu0 }
 0x34a   :  { %21479 = vst [vmem:[#allocation14_spill] sm:$0xff] %v17656_v38  ;;  %v14306_v17 = vadd.f32 %v13390_v40, %v21481_v14  ;;  %v5112_v33 = vpop.f32.mrb[55].mxu0  ;;  %v5753_v60 = vmul.f32 %v17656_v38, %v17656_v38 }
 0x34b   :  { %21480 = vst [vmem:[#allocation15_spill] sm:$0xff] %v17659_v15  ;;  %v5639_v5 = vadd.f32 %v5638_v20, %v17659_v15  ;;  %v5752_v59 = vmul.f32 %v17659_v15, %v17659_v15  ;;  %v5856_v28 = vadd.f32 %v5855_v27, %v5751_v44  ;;  %v14307_v23 = vadd.f32 %v5112_v33, %v21482_v8  ;;  %v21485_v20 = vld [vmem:[#allocation18_spill] sm:$0xff]  ;;  %v21486_v27 = vld [vmem:[#allocation19_spill] sm:$0xff] }
 0x34c   :  { %v17668_v10 = vadd.f32 %v14306_v17, %v17264_v32 }
 0x34d   :  { %v5857_v12 = vadd.f32 %v5856_v28, %v5752_v59  ;;  %v17673_v42 = vadd.f32 %v14307_v23, %v17264_v32  ;;  %v5640_v40 = vadd.f32 %v5639_v5, %v17656_v38  ;;  %v13393_v14 = vpop.f32.mrb[56].mxu0 }
 0x34e   :  { %21483 = vst [vmem:[#allocation16_spill] sm:$0xff] %v17668_v10  ;;  %v14308_v52 = vadd.f32 %v13393_v14, %v21485_v20  ;;  %v5122_v3 = vpop.f32.mrb[57].mxu0  ;;  %v5755_v59 = vmul.f32 %v17668_v10, %v17668_v10 }
 0x34f   :  { %21484 = vst [vmem:[#allocation17_spill] sm:$0xff] %v17673_v42  ;;  %v5641_v44 = vadd.f32 %v5640_v40, %v17673_v42  ;;  %v5754_v33 = vmul.f32 %v17673_v42, %v17673_v42  ;;  %v5858_v17 = vadd.f32 %v5857_v12, %v5753_v60  ;;  %v14309_v8 = vadd.f32 %v5122_v3, %v21486_v27  ;;  %v21489_v40 = vld [vmem:[#allocation20_spill] sm:$0xff]  ;;  %v21490_v27 = vld [vmem:[#allocation21_spill] sm:$0xff] }
 0x350   :  { %v17684_v23 = vadd.f32 %v14308_v52, %v17264_v32 }
 0x351   :  { %v5859_v28 = vadd.f32 %v5858_v17, %v5754_v33  ;;  %v17687_v5 = vadd.f32 %v14309_v8, %v17264_v32  ;;  %v5642_v14 = vadd.f32 %v5641_v44, %v17668_v10  ;;  %v13396_v20 = vpop.f32.mrb[58].mxu0 }
 0x352   :  { %21487 = vst [vmem:[#allocation18_spill] sm:$0xff] %v17684_v23  ;;  %v14310_v38 = vadd.f32 %v13396_v20, %v21489_v40  ;;  %v5132_v15 = vpop.f32.mrb[59].mxu0  ;;  %v5757_v17 = vmul.f32 %v17684_v23, %v17684_v23 }
 0x353   :  { %21488 = vst [vmem:[#allocation19_spill] sm:$0xff] %v17687_v5  ;;  %v5643_v60 = vadd.f32 %v5642_v14, %v17687_v5  ;;  %v5756_v3 = vmul.f32 %v17687_v5, %v17687_v5  ;;  %v5860_v12 = vadd.f32 %v5859_v28, %v5755_v59  ;;  %v14311_v33 = vadd.f32 %v5132_v15, %v21490_v27  ;;  %v21493_v14 = vld [vmem:[#allocation22_spill] sm:$0xff]  ;;  %v21494_v28 = vld [vmem:[#allocation23_spill] sm:$0xff] }
 0x354   :  { %v17696_v52 = vadd.f32 %v14310_v38, %v17264_v32 }
 0x355   :  { %v5861_v8 = vadd.f32 %v5860_v12, %v5756_v3  ;;  %v17701_v44 = vadd.f32 %v14311_v33, %v17264_v32  ;;  %v5644_v20 = vadd.f32 %v5643_v60, %v17684_v23  ;;  %v13399_v40 = vpop.f32.mrb[60].mxu0 }
 0x356   :  { %21491 = vst [vmem:[#allocation20_spill] sm:$0xff] %v17696_v52  ;;  %v14312_v10 = vadd.f32 %v13399_v40, %v21493_v14  ;;  %v5142_v42 = vpop.f32.mrb[61].mxu0  ;;  %v5759_v3 = vmul.f32 %v17696_v52, %v17696_v52 }
 0x357   :  { %21492 = vst [vmem:[#allocation21_spill] sm:$0xff] %v17701_v44  ;;  %v5645_v59 = vadd.f32 %v5644_v20, %v17701_v44  ;;  %v5758_v15 = vmul.f32 %v17701_v44, %v17701_v44  ;;  %v5862_v38 = vadd.f32 %v5861_v8, %v5757_v17  ;;  %v14313_v27 = vadd.f32 %v5142_v42, %v21494_v28  ;;  %v21497_v20 = vld [vmem:[#allocation24_spill] sm:$0xff]  ;;  %v21498_v28 = vld [vmem:[#allocation25_spill] sm:$0xff] }
 0x358   :  { %v17712_v33 = vadd.f32 %v14312_v10, %v17264_v32 }
 0x359   :  { %v5863_v12 = vadd.f32 %v5862_v38, %v5758_v15  ;;  %v17715_v60 = vadd.f32 %v14313_v27, %v17264_v32  ;;  %v5646_v40 = vadd.f32 %v5645_v59, %v17696_v52  ;;  %v13402_v14 = vpop.f32.mrb[62].mxu0 }
 0x35a   :  { %21495 = vst [vmem:[#allocation22_spill] sm:$0xff] %v17712_v33  ;;  %v14314_v23 = vadd.f32 %v13402_v14, %v21497_v20  ;;  %v5152_v5 = vpop.f32.mrb[63].mxu0  ;;  %v5761_v38 = vmul.f32 %v17712_v33, %v17712_v33 }
 0x35b   :  { %21496 = vst [vmem:[#allocation23_spill] sm:$0xff] %v17715_v60  ;;  %v5647_v17 = vadd.f32 %v5646_v40, %v17715_v60  ;;  %v5760_v42 = vmul.f32 %v17715_v60, %v17715_v60  ;;  %v5864_v8 = vadd.f32 %v5863_v12, %v5759_v3  ;;  %v14315_v15 = vadd.f32 %v5152_v5, %v21498_v28  ;;  %v21501_v40 = vld [vmem:[#allocation26_spill] sm:$0xff]  ;;  %v21502_v12 = vld [vmem:[#allocation27_spill] sm:$0xff] }
 0x35c   :  { %v17724_v10 = vadd.f32 %v14314_v23, %v17264_v32 }
 0x35d   :  { %v5865_v27 = vadd.f32 %v5864_v8, %v5760_v42  ;;  %v17729_v59 = vadd.f32 %v14315_v15, %v17264_v32  ;;  %v5648_v14 = vadd.f32 %v5647_v17, %v17712_v33  ;;  %v13405_v20 = vpop.f32.mrb[64].mxu0 }
 0x35e   :  { %21499 = vst [vmem:[#allocation24_spill] sm:$0xff] %v17724_v10  ;;  %v14316_v52 = vadd.f32 %v13405_v20, %v21501_v40  ;;  %v5162_v44 = vpop.f32.mrb[65].mxu0  ;;  %v5763_v42 = vmul.f32 %v17724_v10, %v17724_v10 }
 0x35f   :  { %21500 = vst [vmem:[#allocation25_spill] sm:$0xff] %v17729_v59  ;;  %v5649_v3 = vadd.f32 %v5648_v14, %v17729_v59  ;;  %v5762_v5 = vmul.f32 %v17729_v59, %v17729_v59  ;;  %v5866_v23 = vadd.f32 %v5865_v27, %v5761_v38  ;;  %v14317_v28 = vadd.f32 %v5162_v44, %v21502_v12  ;;  %v21505_v14 = vld [vmem:[#allocation28_spill] sm:$0xff]  ;;  %v21506_v12 = vld [vmem:[#allocation29_spill] sm:$0xff] }
 0x360   :  { %v17740_v15 = vadd.f32 %v14316_v52, %v17264_v32 }
 0x361   :  { %v5867_v8 = vadd.f32 %v5866_v23, %v5762_v5  ;;  %v17743_v17 = vadd.f32 %v14317_v28, %v17264_v32  ;;  %v5650_v20 = vadd.f32 %v5649_v3, %v17724_v10  ;;  %v13408_v40 = vpop.f32.mrb[66].mxu0 }
 0x362   :  { %21503 = vst [vmem:[#allocation26_spill] sm:$0xff] %v17740_v15  ;;  %v14318_v33 = vadd.f32 %v13408_v40, %v21505_v14  ;;  %v5172_v60 = vpop.f32.mrb[67].mxu0  ;;  %v5765_v23 = vmul.f32 %v17740_v15, %v17740_v15 }
 0x363   :  { %21504 = vst [vmem:[#allocation27_spill] sm:$0xff] %v17743_v17  ;;  %v5651_v38 = vadd.f32 %v5650_v20, %v17743_v17  ;;  %v5764_v44 = vmul.f32 %v17743_v17, %v17743_v17  ;;  %v5868_v27 = vadd.f32 %v5867_v8, %v5763_v42  ;;  %v14319_v5 = vadd.f32 %v5172_v60, %v21506_v12  ;;  %v21509_v20 = vld [vmem:[#allocation30_spill] sm:$0xff]  ;;  %v21510_v8 = vld [vmem:[#allocation31_spill] sm:$0xff] }
 0x364   :  { %v17752_v52 = vadd.f32 %v14318_v33, %v17264_v32 }
 0x365   :  { %v5869_v28 = vadd.f32 %v5868_v27, %v5764_v44  ;;  %v17757_v3 = vadd.f32 %v14319_v5, %v17264_v32  ;;  %v5652_v40 = vadd.f32 %v5651_v38, %v17740_v15  ;;  %v13411_v14 = vpop.f32.mrb[68].mxu0 }
 0x366   :  { %21507 = vst [vmem:[#allocation28_spill] sm:$0xff] %v17752_v52  ;;  %v14320_v10 = vadd.f32 %v13411_v14, %v21509_v20  ;;  %v5182_v59 = vpop.f32.mrb[69].mxu0  ;;  %v5767_v44 = vmul.f32 %v17752_v52, %v17752_v52 }
 0x367   :  { %21508 = vst [vmem:[#allocation29_spill] sm:$0xff] %v17757_v3  ;;  %v5653_v42 = vadd.f32 %v5652_v40, %v17757_v3  ;;  %v5766_v60 = vmul.f32 %v17757_v3, %v17757_v3  ;;  %v5870_v33 = vadd.f32 %v5869_v28, %v5765_v23  ;;  %v14321_v12 = vadd.f32 %v5182_v59, %v21510_v8  ;;  %v21513_v40 = vld [vmem:[#allocation32_spill] sm:$0xff]  ;;  %v21514_v8 = vld [vmem:[#allocation33_spill] sm:$0xff] }
 0x368   :  { %v17768_v5 = vadd.f32 %v14320_v10, %v17264_v32 }
 0x369   :  { %v5871_v27 = vadd.f32 %v5870_v33, %v5766_v60  ;;  %v17771_v38 = vadd.f32 %v14321_v12, %v17264_v32  ;;  %v5654_v14 = vadd.f32 %v5653_v42, %v17752_v52  ;;  %v13414_v20 = vpop.f32.mrb[70].mxu0 }
 0x36a   :  { %21511 = vst [vmem:[#allocation30_spill] sm:$0xff] %v17768_v5  ;;  %v14322_v15 = vadd.f32 %v13414_v20, %v21513_v40  ;;  %v5192_v17 = vpop.f32.mrb[71].mxu0  ;;  %v5769_v33 = vmul.f32 %v17768_v5, %v17768_v5 }
 0x36b   :  { %21512 = vst [vmem:[#allocation31_spill] sm:$0xff] %v17771_v38  ;;  %v5655_v23 = vadd.f32 %v5654_v14, %v17771_v38  ;;  %v5768_v59 = vmul.f32 %v17771_v38, %v17771_v38  ;;  %v5872_v28 = vadd.f32 %v5871_v27, %v5767_v44  ;;  %v14323_v60 = vadd.f32 %v5192_v17, %v21514_v8  ;;  %v21517_v14 = vld [vmem:[#allocation34_spill] sm:$0xff]  ;;  %v21518_v27 = vld [vmem:[#allocation35_spill] sm:$0xff] }
 0x36c   :  { %v17780_v10 = vadd.f32 %v14322_v15, %v17264_v32 }
 0x36d   :  { %v5873_v12 = vadd.f32 %v5872_v28, %v5768_v59  ;;  %v17785_v42 = vadd.f32 %v14323_v60, %v17264_v32  ;;  %v5656_v20 = vadd.f32 %v5655_v23, %v17768_v5  ;;  %v13417_v40 = vpop.f32.mrb[72].mxu0 }
 0x36e   :  { %21515 = vst [vmem:[#allocation32_spill] sm:$0xff] %v17780_v10  ;;  %v14324_v52 = vadd.f32 %v13417_v40, %v21517_v14  ;;  %v5202_v3 = vpop.f32.mrb[73].mxu0  ;;  %v5771_v59 = vmul.f32 %v17780_v10, %v17780_v10 }
 0x36f   :  { %21516 = vst [vmem:[#allocation33_spill] sm:$0xff] %v17785_v42  ;;  %v5657_v44 = vadd.f32 %v5656_v20, %v17785_v42  ;;  %v5770_v17 = vmul.f32 %v17785_v42, %v17785_v42  ;;  %v5874_v15 = vadd.f32 %v5873_v12, %v5769_v33  ;;  %v14325_v8 = vadd.f32 %v5202_v3, %v21518_v27  ;;  %v21521_v20 = vld [vmem:[#allocation36_spill] sm:$0xff]  ;;  %v21522_v27 = vld [vmem:[#allocation37_spill] sm:$0xff] }
 0x370   :  { %v17796_v60 = vadd.f32 %v14324_v52, %v17264_v32 }
 0x371   :  { %v5875_v28 = vadd.f32 %v5874_v15, %v5770_v17  ;;  %v17799_v23 = vadd.f32 %v14325_v8, %v17264_v32  ;;  %v5658_v40 = vadd.f32 %v5657_v44, %v17780_v10  ;;  %v13420_v14 = vpop.f32.mrb[74].mxu0 }
 0x372   :  { %21519 = vst [vmem:[#allocation34_spill] sm:$0xff] %v17796_v60  ;;  %v14326_v5 = vadd.f32 %v13420_v14, %v21521_v20  ;;  %v5212_v38 = vpop.f32.mrb[75].mxu0  ;;  %v5773_v15 = vmul.f32 %v17796_v60, %v17796_v60 }
 0x373   :  { %21520 = vst [vmem:[#allocation35_spill] sm:$0xff] %v17799_v23  ;;  %v5659_v33 = vadd.f32 %v5658_v40, %v17799_v23  ;;  %v5772_v3 = vmul.f32 %v17799_v23, %v17799_v23  ;;  %v5876_v12 = vadd.f32 %v5875_v28, %v5771_v59  ;;  %v14327_v17 = vadd.f32 %v5212_v38, %v21522_v27  ;;  %v21525_v40 = vld [vmem:[#allocation38_spill] sm:$0xff]  ;;  %v21526_v28 = vld [vmem:[#allocation39_spill] sm:$0xff] }
 0x374   :  { %v17808_v52 = vadd.f32 %v14326_v5, %v17264_v32 }
 0x375   :  { %v5877_v8 = vadd.f32 %v5876_v12, %v5772_v3  ;;  %v17813_v44 = vadd.f32 %v14327_v17, %v17264_v32  ;;  %v5660_v14 = vadd.f32 %v5659_v33, %v17796_v60  ;;  %v13423_v20 = vpop.f32.mrb[76].mxu0 }
 0x376   :  { %21523 = vst [vmem:[#allocation36_spill] sm:$0xff] %v17808_v52  ;;  %v14328_v10 = vadd.f32 %v13423_v20, %v21525_v40  ;;  %v5222_v42 = vpop.f32.mrb[77].mxu0  ;;  %v5775_v3 = vmul.f32 %v17808_v52, %v17808_v52 }
 0x377   :  { %21524 = vst [vmem:[#allocation37_spill] sm:$0xff] %v17813_v44  ;;  %v5661_v59 = vadd.f32 %v5660_v14, %v17813_v44  ;;  %v5774_v38 = vmul.f32 %v17813_v44, %v17813_v44  ;;  %v5878_v5 = vadd.f32 %v5877_v8, %v5773_v15  ;;  %v14329_v27 = vadd.f32 %v5222_v42, %v21526_v28  ;;  %v21529_v14 = vld [vmem:[#allocation40_spill] sm:$0xff]  ;;  %v21530_v28 = vld [vmem:[#allocation41_spill] sm:$0xff] }
 0x378   :  { %v17824_v17 = vadd.f32 %v14328_v10, %v17264_v32 }
 0x379   :  { %v5879_v12 = vadd.f32 %v5878_v5, %v5774_v38  ;;  %v17827_v33 = vadd.f32 %v14329_v27, %v17264_v32  ;;  %v5662_v20 = vadd.f32 %v5661_v59, %v17808_v52  ;;  %v13426_v40 = vpop.f32.mrb[78].mxu0 }
 0x37a   :  { %21527 = vst [vmem:[#allocation38_spill] sm:$0xff] %v17824_v17  ;;  %v14330_v60 = vadd.f32 %v13426_v40, %v21529_v14  ;;  %v5232_v23 = vpop.f32.mrb[79].mxu0  ;;  %v5777_v5 = vmul.f32 %v17824_v17, %v17824_v17 }
 0x37b   :  { %21528 = vst [vmem:[#allocation39_spill] sm:$0xff] %v17827_v33  ;;  %v5663_v15 = vadd.f32 %v5662_v20, %v17827_v33  ;;  %v5776_v42 = vmul.f32 %v17827_v33, %v17827_v33  ;;  %v5880_v8 = vadd.f32 %v5879_v12, %v5775_v3  ;;  %v14331_v38 = vadd.f32 %v5232_v23, %v21530_v28  ;;  %v21533_v20 = vld [vmem:[#allocation42_spill] sm:$0xff]  ;;  %v21534_v12 = vld [vmem:[#allocation43_spill] sm:$0xff] }
 0x37c   :  { %v17836_v10 = vadd.f32 %v14330_v60, %v17264_v32 }
 0x37d   :  { %v5881_v27 = vadd.f32 %v5880_v8, %v5776_v42  ;;  %v17841_v59 = vadd.f32 %v14331_v38, %v17264_v32  ;;  %v5664_v40 = vadd.f32 %v5663_v15, %v17824_v17  ;;  %v13429_v14 = vpop.f32.mrb[80].mxu0 }
 0x37e   :  { %21531 = vst [vmem:[#allocation40_spill] sm:$0xff] %v17836_v10  ;;  %v14332_v52 = vadd.f32 %v13429_v14, %v21533_v20  ;;  %v5242_v44 = vpop.f32.mrb[81].mxu0  ;;  %v5779_v42 = vmul.f32 %v17836_v10, %v17836_v10 }
 0x37f   :  { %21532 = vst [vmem:[#allocation41_spill] sm:$0xff] %v17841_v59  ;;  %v5665_v3 = vadd.f32 %v5664_v40, %v17841_v59  ;;  %v5778_v23 = vmul.f32 %v17841_v59, %v17841_v59  ;;  %v5882_v60 = vadd.f32 %v5881_v27, %v5777_v5  ;;  %v14333_v28 = vadd.f32 %v5242_v44, %v21534_v12  ;;  %v21537_v40 = vld [vmem:[#allocation44_spill] sm:$0xff]  ;;  %v21538_v12 = vld [vmem:[#allocation45_spill] sm:$0xff] }
 0x380   :  { %v17852_v38 = vadd.f32 %v14332_v52, %v17264_v32 }
 0x381   :  { %v5883_v8 = vadd.f32 %v5882_v60, %v5778_v23  ;;  %v17855_v15 = vadd.f32 %v14333_v28, %v17264_v32  ;;  %v5666_v14 = vadd.f32 %v5665_v3, %v17836_v10  ;;  %v13432_v20 = vpop.f32.mrb[82].mxu0  ;;  %v17871_v3 = vld [vmem:[%s21193_s2] ss:$0 sm:$0xff] }
 0x382   :  { %21535 = vst [vmem:[#allocation42_spill] sm:$0xff] %v17852_v38  ;;  %v14334_v17 = vadd.f32 %v13432_v20, %v21537_v40  ;;  %v5252_v33 = vpop.f32.mrb[83].mxu0  ;;  %v5781_v60 = vmul.f32 %v17852_v38, %v17852_v38 }
 0x383   :  { %21536 = vst [vmem:[#allocation43_spill] sm:$0xff] %v17855_v15  ;;  %v5667_v5 = vadd.f32 %v5666_v14, %v17855_v15  ;;  %v5780_v44 = vmul.f32 %v17855_v15, %v17855_v15  ;;  %v5884_v27 = vadd.f32 %v5883_v8, %v5779_v42  ;;  %v14335_v23 = vadd.f32 %v5252_v33, %v21538_v12  ;;  %v21541_v8 = vld [vmem:[#allocation46_spill] sm:$0xff] }
 0x384   :  { %v17864_v52 = vadd.f32 %v14334_v17, %v17264_v32 }
 0x385   :  { %v5885_v28 = vadd.f32 %v5884_v27, %v5780_v44  ;;  %v17874_v14 = vadd.f32 %v17871_v3, %v14335_v23  ;;  %v5668_v20 = vadd.f32 %v5667_v5, %v17852_v38  ;;  %v13435_v42 = vpop.f32.mrb[84].mxu0  ;;  %v21542_v27 = vld [vmem:[#allocation47_spill] sm:$0xff] }
 0x386   :  { %21539 = vst [vmem:[#allocation44_spill] sm:$0xff] %v17864_v52  ;;  %v14336_v33 = vadd.f32 %v13435_v42, %v21541_v8  ;;  %v5262_v40 = vpop.f32.mrb[85].mxu0  ;;  %v5783_v15 = vmul.f32 %v17864_v52, %v17864_v52 }
 0x387   :  { %21540 = vst [vmem:[#allocation45_spill] sm:$0xff] %v17874_v14  ;;  %v5669_v32 = vadd.f32 %v5668_v20, %v17874_v14  ;;  %v5782_v17 = vmul.f32 %v17874_v14, %v17874_v14  ;;  %v5886_v44 = vadd.f32 %v5885_v28, %v5781_v60  ;;  %v14337_v12 = vadd.f32 %v5262_v40, %v21542_v27  ;;  %v21545_v20 = vld [vmem:[#allocation48_spill] sm:$0xff]  ;;  %v21546_v27 = vld [vmem:[#allocation49_spill] sm:$0xff] }
 0x388   :  { %v17885_v23 = vadd.f32 %v17871_v3, %v14336_v33 }
 0x389   :  { %v5887_v10 = vadd.f32 %v5886_v44, %v5782_v17  ;;  %v17888_v5 = vadd.f32 %v17871_v3, %v14337_v12  ;;  %v5670_v42 = vadd.f32 %v5669_v32, %v17864_v52  ;;  %v13438_v8 = vpop.f32.mrb[86].mxu0 }
 0x38a   :  { %21543 = vst [vmem:[#allocation46_spill] sm:$0xff] %v17885_v23  ;;  %v14338_v38 = vadd.f32 %v13438_v8, %v21545_v20  ;;  %v5272_v59 = vpop.f32.mrb[87].mxu0  ;;  %v5785_v44 = vmul.f32 %v17885_v23, %v17885_v23 }
 0x38b   :  { %21544 = vst [vmem:[#allocation47_spill] sm:$0xff] %v17888_v5  ;;  %v5671_v60 = vadd.f32 %v5670_v42, %v17888_v5  ;;  %v5784_v28 = vmul.f32 %v17888_v5, %v17888_v5  ;;  %v5888_v40 = vadd.f32 %v5887_v10, %v5783_v15  ;;  %v14339_v17 = vadd.f32 %v5272_v59, %v21546_v27  ;;  %v21549_v42 = vld [vmem:[#allocation50_spill] sm:$0xff]  ;;  %v21550_v15 = vld [vmem:[#allocation51_spill] sm:$0xff] }
 0x38c   :  { %v17897_v33 = vadd.f32 %v17871_v3, %v14338_v38 }
 0x38d   :  { %v5889_v12 = vadd.f32 %v5888_v40, %v5784_v28  ;;  %v17902_v32 = vadd.f32 %v17871_v3, %v14339_v17  ;;  %v5672_v8 = vadd.f32 %v5671_v60, %v17885_v23  ;;  %v13441_v20 = vpop.f32.mrb[88].mxu0 }
 0x38e   :  { %21547 = vst [vmem:[#allocation48_spill] sm:$0xff] %v17897_v33  ;;  %v14340_v52 = vadd.f32 %v13441_v20, %v21549_v42  ;;  %v5282_v14 = vpop.f32.mrb[89].mxu0  ;;  %v5787_v28 = vmul.f32 %v17897_v33, %v17897_v33 }
 0x38f   :  { %21548 = vst [vmem:[#allocation49_spill] sm:$0xff] %v17902_v32  ;;  %v5673_v10 = vadd.f32 %v5672_v8, %v17902_v32  ;;  %v5786_v59 = vmul.f32 %v17902_v32, %v17902_v32  ;;  %v5890_v38 = vadd.f32 %v5889_v12, %v5785_v44  ;;  %v14341_v27 = vadd.f32 %v5282_v14, %v21550_v15  ;;  %v21553_v8 = vld [vmem:[#allocation52_spill] sm:$0xff]  ;;  %v21554_v15 = vld [vmem:[#allocation53_spill] sm:$0xff] }
 0x390   :  { %v17913_v17 = vadd.f32 %v17871_v3, %v14340_v52 }
 0x391   :  { %v5891_v40 = vadd.f32 %v5890_v38, %v5786_v59  ;;  %v17916_v60 = vadd.f32 %v17871_v3, %v14341_v27  ;;  %v5674_v20 = vadd.f32 %v5673_v10, %v17897_v33  ;;  %v13444_v42 = vpop.f32.mrb[90].mxu0 }
 0x392   :  { %21551 = vst [vmem:[#allocation50_spill] sm:$0xff] %v17913_v17  ;;  %v14342_v23 = vadd.f32 %v13444_v42, %v21553_v8  ;;  %v5292_v5 = vpop.f32.mrb[91].mxu0  ;;  %v5789_v38 = vmul.f32 %v17913_v17, %v17913_v17 }
 0x393   :  { %21552 = vst [vmem:[#allocation51_spill] sm:$0xff] %v17916_v60  ;;  %v5675_v44 = vadd.f32 %v5674_v20, %v17916_v60  ;;  %v5788_v14 = vmul.f32 %v17916_v60, %v17916_v60  ;;  %v5892_v12 = vadd.f32 %v5891_v40, %v5787_v28  ;;  %v14343_v59 = vadd.f32 %v5292_v5, %v21554_v15  ;;  %v21557_v20 = vld [vmem:[#allocation54_spill] sm:$0xff]  ;;  %v21558_v40 = vld [vmem:[#allocation55_spill] sm:$0xff] }
 0x394   :  { %v17925_v52 = vadd.f32 %v17871_v3, %v14342_v23 }
 0x395   :  { %v5893_v27 = vadd.f32 %v5892_v12, %v5788_v14  ;;  %v17930_v10 = vadd.f32 %v17871_v3, %v14343_v59  ;;  %v5676_v42 = vadd.f32 %v5675_v44, %v17913_v17  ;;  %v13447_v8 = vpop.f32.mrb[92].mxu0 }
 0x396   :  { %21555 = vst [vmem:[#allocation52_spill] sm:$0xff] %v17925_v52  ;;  %v14344_v33 = vadd.f32 %v13447_v8, %v21557_v20  ;;  %v5302_v32 = vpop.f32.mrb[93].mxu0  ;;  %v5791_v14 = vmul.f32 %v17925_v52, %v17925_v52 }
 0x397   :  { %21556 = vst [vmem:[#allocation53_spill] sm:$0xff] %v17930_v10  ;;  %v5677_v28 = vadd.f32 %v5676_v42, %v17930_v10  ;;  %v5790_v5 = vmul.f32 %v17930_v10, %v17930_v10  ;;  %v5894_v23 = vadd.f32 %v5893_v27, %v5789_v38  ;;  %v14345_v15 = vadd.f32 %v5302_v32, %v21558_v40  ;;  %v21561_v42 = vld [vmem:[#allocation56_spill] sm:$0xff]  ;;  %v21562_v40 = vld [vmem:[#allocation57_spill] sm:$0xff] }
 0x398   :  { %v17941_v59 = vadd.f32 %v17871_v3, %v14344_v33 }
 0x399   :  { %v5895_v12 = vadd.f32 %v5894_v23, %v5790_v5  ;;  %v17944_v44 = vadd.f32 %v17871_v3, %v14345_v15  ;;  %v5678_v8 = vadd.f32 %v5677_v28, %v17925_v52  ;;  %v13450_v20 = vpop.f32.mrb[94].mxu0 }
 0x39a   :  { %21559 = vst [vmem:[#allocation54_spill] sm:$0xff] %v17941_v59  ;;  %v14346_v17 = vadd.f32 %v13450_v20, %v21561_v42  ;;  %v5312_v60 = vpop.f32.mrb[95].mxu0  ;;  %v5793_v23 = vmul.f32 %v17941_v59, %v17941_v59 }
 0x39b   :  { %21560 = vst [vmem:[#allocation55_spill] sm:$0xff] %v17944_v44  ;;  %v5679_v38 = vadd.f32 %v5678_v8, %v17944_v44  ;;  %v5792_v32 = vmul.f32 %v17944_v44, %v17944_v44  ;;  %v5896_v27 = vadd.f32 %v5895_v12, %v5791_v14  ;;  %v14347_v5 = vadd.f32 %v5312_v60, %v21562_v40  ;;  %v21565_v8 = vld [vmem:[#allocation58_spill] sm:$0xff]  ;;  %v21566_v12 = vld [vmem:[#allocation59_spill] sm:$0xff] }
 0x39c   :  { %v17953_v33 = vadd.f32 %v17871_v3, %v14346_v17 }
 0x39d   :  { %v5897_v15 = vadd.f32 %v5896_v27, %v5792_v32  ;;  %v17958_v28 = vadd.f32 %v17871_v3, %v14347_v5  ;;  %v5680_v20 = vadd.f32 %v5679_v38, %v17941_v59  ;;  %v13453_v42 = vpop.f32.mrb[96].mxu0 }
 0x39e   :  { %21563 = vst [vmem:[#allocation56_spill] sm:$0xff] %v17953_v33  ;;  %v14348_v52 = vadd.f32 %v13453_v42, %v21565_v8  ;;  %v5322_v10 = vpop.f32.mrb[97].mxu0  ;;  %v5795_v32 = vmul.f32 %v17953_v33, %v17953_v33 }
 0x39f   :  { %21564 = vst [vmem:[#allocation57_spill] sm:$0xff] %v17958_v28  ;;  %v5681_v14 = vadd.f32 %v5680_v20, %v17958_v28  ;;  %v5794_v60 = vmul.f32 %v17958_v28, %v17958_v28  ;;  %v5898_v17 = vadd.f32 %v5897_v15, %v5793_v23  ;;  %v14349_v40 = vadd.f32 %v5322_v10, %v21566_v12  ;;  %v21569_v20 = vld [vmem:[#allocation60_spill] sm:$0xff]  ;;  %v21570_v12 = vld [vmem:[#allocation61_spill] sm:$0xff] }
 0x3a0   :  { %v17969_v5 = vadd.f32 %v17871_v3, %v14348_v52 }
 0x3a1   :  { %v5899_v27 = vadd.f32 %v5898_v17, %v5794_v60  ;;  %v17972_v38 = vadd.f32 %v17871_v3, %v14349_v40  ;;  %v5682_v42 = vadd.f32 %v5681_v14, %v17953_v33  ;;  %v13456_v8 = vpop.f32.mrb[98].mxu0 }
 0x3a2   :  { %21567 = vst [vmem:[#allocation58_spill] sm:$0xff] %v17969_v5  ;;  %v14350_v59 = vadd.f32 %v13456_v8, %v21569_v20  ;;  %v5332_v44 = vpop.f32.mrb[99].mxu0  ;;  %v5797_v17 = vmul.f32 %v17969_v5, %v17969_v5 }
 0x3a3   :  { %21568 = vst [vmem:[#allocation59_spill] sm:$0xff] %v17972_v38  ;;  %v5683_v23 = vadd.f32 %v5682_v42, %v17972_v38  ;;  %v5796_v10 = vmul.f32 %v17972_v38, %v17972_v38  ;;  %v5900_v15 = vadd.f32 %v5899_v27, %v5795_v32  ;;  %v14351_v60 = vadd.f32 %v5332_v44, %v21570_v12  ;;  %v21573_v42 = vld [vmem:[#allocation62_spill] sm:$0xff]  ;;  %v21574_v27 = vld [vmem:[#allocation63_spill] sm:$0xff] }
 0x3a4   :  { %v17981_v52 = vadd.f32 %v17871_v3, %v14350_v59 }
 0x3a5   :  { %v5901_v40 = vadd.f32 %v5900_v15, %v5796_v10  ;;  %v17986_v14 = vadd.f32 %v17871_v3, %v14351_v60  ;;  %v5684_v8 = vadd.f32 %v5683_v23, %v17969_v5  ;;  %v13459_v20 = vpop.f32.mrb[100].mxu0 }
 0x3a6   :  { %21571 = vst [vmem:[#allocation60_spill] sm:$0xff] %v17981_v52  ;;  %v14352_v33 = vadd.f32 %v13459_v20, %v21573_v42  ;;  %v5342_v28 = vpop.f32.mrb[101].mxu0  ;;  %v5799_v10 = vmul.f32 %v17981_v52, %v17981_v52 }
 0x3a7   :  { %21572 = vst [vmem:[#allocation61_spill] sm:$0xff] %v17986_v14  ;;  %v5685_v32 = vadd.f32 %v5684_v8, %v17986_v14  ;;  %v5798_v44 = vmul.f32 %v17986_v14, %v17986_v14  ;;  %v5902_v59 = vadd.f32 %v5901_v40, %v5797_v17  ;;  %v14353_v12 = vadd.f32 %v5342_v28, %v21574_v27  ;;  %v21577_v8 = vld [vmem:[#allocation64_spill] sm:$0xff]  ;;  %v21578_v27 = vld [vmem:[#allocation65_spill] sm:$0xff] }
 0x3a8   :  { %v17997_v60 = vadd.f32 %v17871_v3, %v14352_v33  ;;  %v7482_v14 = vld [vmem:[%s21194_s3 + $0xe0] sm:$0xff] }
 0x3a9   :  { %v5903_v15 = vadd.f32 %v5902_v59, %v5798_v44  ;;  %v18000_v23 = vadd.f32 %v17871_v3, %v14353_v12  ;;  %v5686_v20 = vadd.f32 %v5685_v32, %v17981_v52  ;;  %v13462_v42 = vpop.f32.mrb[102].mxu0 }
 0x3aa   :  { %21575 = vst [vmem:[#allocation62_spill] sm:$0xff] %v17997_v60  ;;  %v14354_v5 = vadd.f32 %v13462_v42, %v21577_v8  ;;  %v5352_v38 = vpop.f32.mrb[103].mxu0  ;;  %v5801_v59 = vmul.f32 %v17997_v60, %v17997_v60 }
 0x3ab   :  { %21576 = vst [vmem:[#allocation63_spill] sm:$0xff] %v18000_v23  ;;  %v5687_v17 = vadd.f32 %v5686_v20, %v18000_v23  ;;  %v5800_v28 = vmul.f32 %v18000_v23, %v18000_v23  ;;  %v5904_v40 = vadd.f32 %v5903_v15, %v5799_v10  ;;  %v14355_v44 = vadd.f32 %v5352_v38, %v21578_v27  ;;  %v7478_v20 = vld [vmem:[%s21194_s3 + $0xc0] sm:$0xff]  ;;  %v7479_v38 = vld [vmem:[%s21194_s3 + $0xc8] sm:$0xff]  ;;  %v21582_v23 = vld [vmem:[#allocation67_spill] sm:$0xff] }
 0x3ac   :  { %v18009_v33 = vadd.f32 %v17871_v3, %v14354_v5  ;;  %v7480_v5 = vld [vmem:[%s21194_s3 + $0xd0] sm:$0xff] }
 0x3ad   :  { %v5905_v12 = vadd.f32 %v5904_v40, %v5800_v28  ;;  %v18014_v32 = vadd.f32 %v17871_v3, %v14355_v44  ;;  %v5688_v42 = vadd.f32 %v5687_v17, %v17997_v60  ;;  %v13465_v8 = vpop.f32.mrb[104].mxu0  ;;  %v21581_v10 = vld [vmem:[#allocation66_spill] sm:$0xff]  ;;  %v13978_v40 = vpack.c.bf16 %v7479_v38, %v7478_v20  ;;  %v7481_v17 = vld [vmem:[%s21194_s3 + $0xd8] sm:$0xff] }
 0x3ae   :  { %21579 = vst [vmem:[#allocation64_spill] sm:$0xff] %v18009_v33  ;;  %v14356_v15 = vadd.f32 %v13465_v8, %v21581_v10  ;;  %v5362_v28 = vpop.f32.mrb[105].mxu0  ;;  %v7483_v8 = vld [vmem:[%s21194_s3 + $0xe8] sm:$0xff]  ;;  %v5803_v20 = vmul.f32 %v18009_v33, %v18009_v33  ;;  %v13982_v38 = vpack.c.bf16 %v7481_v17, %v7480_v5 }
 0x3af   :  { %21580 = vst [vmem:[#allocation65_spill] sm:$0xff] %v18014_v32  ;;  %v5689_v27 = vadd.f32 %v5688_v42, %v18014_v32  ;;  %v5802_v44 = vmul.f32 %v18014_v32, %v18014_v32  ;;  %v5906_v60 = vadd.f32 %v5905_v12, %v5801_v59  ;;  %v14357_v52 = vadd.f32 %v5362_v28, %v21582_v23 }
 0x3b0   :  { %13979 = vmatprep.subr.bf16.mxu1 %v13978_v40  ;;  %v18043_v10 = vadd.f32 %v17871_v3, %v14356_v15  ;;  %v13986_v12 = vpack.c.bf16 %v7483_v8, %v7482_v14 }
 0x3b1   :  { %v5907_v42 = vadd.f32 %v5906_v60, %v5802_v44  ;;  %v5586_v59 = vadd.f32 %v17871_v3, %v14357_v52  ;;  %v5690_v23 = vadd.f32 %v5689_v27, %v18009_v33  ;;  %13981 = vmatpush3.bf16.msra.mxu1 %v13978_v40  ;;  %v7485_v60 = vld [vmem:[%s21194_s3 + $0xf8] sm:$0xff] }
 0x3b2   :  { %13983 = vmatprep.subr.bf16.mxu1 %v13982_v38  ;;  %v5805_v5 = vmul.f32 %v18043_v10, %v18043_v10  ;;  %v13990_v14 = vpack.c.bf16 %v7485_v60, %v7484_v11  ;;  %v7133_v11 = vld [vmem:[%s21194_s3] sm:$0xff] }
 0x3b3   :  { %v5691_v28 = vadd.f32 %v5690_v23, %v5586_v59  ;;  %v5804_v32 = vmul.f32 %v5586_v59, %v5586_v59  ;;  %v5908_v26 = vadd.f32 %v5907_v42, %v5803_v20 }
 0x3b5   :  { %v5692_v3 = vadd.f32 %v5691_v28, %v18043_v10  ;;  %v5909_v52 = vadd.f32 %v5908_v26, %v5804_v32  ;;  %13985 = vmatpush3.bf16.msra.mxu1 %v13982_v38  ;;  %v7134_v32 = vld [vmem:[%s21194_s3 + $0x8] sm:$0xff] }
 0x3b6   :  { %13987 = vmatprep.subr.bf16.mxu1 %v13986_v12  ;;  %v18062_v60 = vpack.c.bf16 %v7134_v32, %v7133_v11 }
 0x3b7   :  { %v5693_v15 = vrot.slane %v5692_v3, 4  ;;  %v5910_v40 = vadd.f32 %v5909_v52, %v5805_v5 }
 0x3b8   :  { %21583 = vst [vmem:[#allocation66_spill] sm:$0xff] %v18062_v60 }
 0x3b9   :  { %v5694_v17 = vadd.f32 %v5693_v15, %v5692_v3  ;;  %v5911_v27 = vrot.slane %v5910_v40, 4  ;;  %13989 = vmatpush3.bf16.msra.mxu1 %v13986_v12  ;;  %v5921_v15 = vld [vmem:[%s21193_s2 + $0x1] sm:$0x1] }
 0x3ba   :  { %13991 = vmatprep.subr.bf16.mxu1 %v13990_v14 }
 0x3bb   :  { %v5695_v44 = vrot.slane %v5694_v17, 2  ;;  %v5912_v8 = vadd.f32 %v5911_v27, %v5910_v40 }
 0x3bd   :  { %v5696_v20 = vadd.f32 %v5695_v44, %v5694_v17  ;;  %v5913_v42 = vrot.slane %v5912_v8, 2  ;;  %13993 = vmatpush3.bf16.msra.mxu1 %v13990_v14 }
 0x3be   :  { %13995 = vmatprep.subr.bf16.mxu1 %v18062_v60  ;;  %v21605_v60 = vld [vmem:[#allocation17_spill] sm:$0xff] }
 0x3bf   :  { %v5697_v23 = vrot.slane %v5696_v20, 1  ;;  %v5914_v33 = vadd.f32 %v5913_v42, %v5912_v8  ;;  %v5925_v8 = vld [vmem:[%s21193_s2 + $0x2] sm:$0x1] }
 0x3c1   :  { %v5698_v18 = vadd.f32 %v5697_v23, %v5696_v20  ;;  %v5915_v34 = vrot.slane %v5914_v33, 1 }
 0x3c3   :  { %v5699_v28 = vmul.f32 0.0011792453, %v5698_v18  ;;  %v5916_v26 = vadd.f32 %v5915_v34, %v5914_v33  ;;  %v5928_v18 = vlaneseq  ;;  %v14808_v33 = vmov 1983009808  }
 0x3c4   :  { %v6685_v14 = vunpack.c.l.s4 %v14808_v33  ;;  %v21588_v33 = vld [vmem:[#allocation71_spill] sm:$0xff] }
 0x3c5   :  { %v5917_v38 = vmul.f32 0.0011792453, %v5916_v26  ;;  %v5918_v12 = vmul.f32 %v5699_v28, %v5699_v28  ;;  %v5929_v34 = vshrl.u32 %v5928_v18, 7 }
 0x3c6   :  { %v6686_v27 = vunpack.c.0.s8 %v6685_v14 }
 0x3c7   :  { %v5919_v5 = vsub.f32 %v5917_v38, %v5918_v12  ;;  %v18068_v40 = vsub.s32 0, %v5929_v34  ;;  %v21586_v38 = vld [vmem:[#allocation68_spill] sm:$0xff] }
 0x3c8   :  { %v18076_v23 = vsub.s32 %v6686_v27, %v5929_v34 }
 0x3c9   :  { %v5920_v3 = vmax.f32 %v5919_v5, 0.0  ;;  %21584 = vst [vmem:[#allocation67_spill] sm:$0xff] %v18068_v40  ;;  %v21587_v5 = vld [vmem:[#allocation69_spill] sm:$0xff] }
 0x3ca   :  { %21585 = vst [vmem:[#allocation79_spill] sm:$0xff] %v18076_v23  ;;  %v21607_v23 = vld [vmem:[#allocation16_spill] sm:$0xff] }
 0x3cb   :  { %v5922_v52 = vadd.f32 1e-05, %v5920_v3 }
 0x3cd   :  { %14748 = vrsqrt.f32 %v5922_v52 }
 0x3d7   :  { %v14749_v17 = vpop.eup %14748 }
 0x3d8   :  { %v5924_v44 = vmul.f32 %v14749_v17, %v5921_v15 }
 0x3da   :  { %v5926_v20 = vmul.f32 %v5924_v44, %v5699_v28  ;;  %v18074_v42 = vrot.slane %v5924_v44, %v18068_v40 }
 0x3dc   :  { %v5927_v26 = vsub.f32 %v5925_v8, %v5926_v20  ;;  %v6036_v11 = vmul.f32 %v18074_v42, %v5586_v59  ;;  %v18081_v32 = vmul.f32 %v18074_v42, %v17272_v62  ;;  %v18085_v12 = vmul.f32 %v18074_v42, %v21586_v38  ;;  %v21590_v8 = vld [vmem:[#allocation72_spill] sm:$0xff]  ;;  %v21591_v20 = vld [vmem:[#allocation74_spill] sm:$0xff]  ;;  %v21594_v38 = vld [vmem:[#allocation75_spill] sm:$0xff] }
 0x3dd   :  { %v18089_v3 = vmul.f32 %v18074_v42, %v21587_v5  ;;  %v18093_v28 = vmul.f32 %v18074_v42, %v17281_v31  ;;  %v18097_v52 = vmul.f32 %v18074_v42, %v17300_v37  ;;  %v18101_v62 = vmul.f32 %v18074_v42, %v17297_v29  ;;  %v21595_v5 = vld [vmem:[#allocation78_spill] sm:$0xff] }
 0x3de   :  { %v18104_v59 = vrot.slane %v5927_v26, %v18068_v40  ;;  %v18108_v18 = vmul.f32 %v18074_v42, %v17314_v41  ;;  %v18112_v34 = vmul.f32 %v18074_v42, %v17308_v54  ;;  %v18116_v31 = vmul.f32 %v18074_v42, %v17328_v45  ;;  %v21589_v45 = vld [vmem:[#allocation70_spill] sm:$0xff]  ;;  %v21592_v26 = vld [vmem:[#allocation73_spill] sm:$0xff] }
 0x3df   :  { %v18120_v37 = vmul.f32 %v18074_v42, %v17325_v39  ;;  %v18124_v29 = vmul.f32 %v18074_v42, %v17342_v49  ;;  %v18128_v41 = vmul.f32 %v18074_v42, %v17336_v0  ;;  %v18132_v54 = vmul.f32 %v18074_v42, %v21588_v33  ;;  %v21603_v40 = vld [vmem:[#allocation14_spill] sm:$0xff] }
 0x3e0   :  { %v6146_v14 = vadd.f32 %v18104_v59, %v6036_v11  ;;  %v18137_v15 = vmul.f32 %v18074_v42, %v21589_v45  ;;  %v18141_v39 = vmul.f32 %v18074_v42, %v17370_v57  ;;  %v18145_v49 = vmul.f32 %v18074_v42, %v17364_v16  ;;  %v21593_v11 = vld [vmem:[#allocation76_spill] sm:$0xff] }
 0x3e1   :  { %v18149_v0 = vmul.f32 %v18074_v42, %v17390_v61  ;;  %v18153_v17 = vmul.f32 %v18074_v42, %v17387_v53  ;;  %v18157_v27 = vmul.f32 %v18074_v42, %v17404_v1  ;;  %v18161_v57 = vmul.f32 %v18074_v42, %v17398_v36 }
 0x3e2   :  { %v6252_v44 = vmax.f32 %v6146_v14, 0.0  ;;  %v18165_v16 = vmul.f32 %v18074_v42, %v17418_v6  ;;  %v18169_v61 = vmul.f32 %v18074_v42, %v17415_v56  ;;  %v18173_v53 = vmul.f32 %v18074_v42, %v17432_v4  ;;  %v21596_v14 = vld [vmem:[#allocation77_spill] sm:$0xff] }
 0x3e3   :  { %v18177_v1 = vmul.f32 %v18074_v42, %v17426_v47  ;;  %v18181_v36 = vmul.f32 %v18074_v42, %v17446_v13  ;;  %v18185_v6 = vmul.f32 %v18074_v42, %v17443_v48  ;;  %v18189_v56 = vmul.f32 %v18074_v42, %v17466_v51 }
 0x3e4   :  { %6358 = vst [vmem:[#allocation2 + $0x340] sm:$0xff] %v6252_v44  ;;  %v18193_v4 = vmul.f32 %v18074_v42, %v17460_v46  ;;  %v18197_v47 = vmul.f32 %v18074_v42, %v17480_v21  ;;  %v18201_v13 = vmul.f32 %v18074_v42, %v17477_v55  ;;  %v18205_v48 = vmul.f32 %v18074_v42, %v17494_v25  ;;  %v21597_v44 = vld [vmem:[#allocation13_spill] sm:$0xff] }
 0x3e5   :  { %v18209_v51 = vmul.f32 %v18074_v42, %v17488_v63  ;;  %v18213_v46 = vmul.f32 %v18074_v42, %v17508_v30  ;;  %v18217_v21 = vmul.f32 %v18074_v42, %v17505_v24  ;;  %v18221_v55 = vmul.f32 %v18074_v42, %v17528_v9 }
 0x3e6   :  { %v18225_v25 = vmul.f32 %v18074_v42, %v17522_v22  ;;  %v18229_v63 = vmul.f32 %v18074_v42, %v17542_v50  ;;  %v18233_v30 = vmul.f32 %v18074_v42, %v17539_v19  ;;  %v18237_v24 = vmul.f32 %v18074_v42, %v17556_v58 }
 0x3e7   :  { %v18241_v9 = vmul.f32 %v18074_v42, %v17550_v43  ;;  %v18245_v22 = vmul.f32 %v18074_v42, %v17570_v2  ;;  %v18249_v50 = vmul.f32 %v18074_v42, %v17567_v7  ;;  %v18253_v19 = vmul.f32 %v18074_v42, %v17590_v35 }
 0x3e8   :  { %v18257_v58 = vmul.f32 %v18074_v42, %v21590_v8  ;;  %v18261_v43 = vmul.f32 %v18074_v42, %v21591_v20  ;;  %v18265_v2 = vmul.f32 %v18074_v42, %v21592_v26  ;;  %v18269_v7 = vmul.f32 %v18074_v42, %v21593_v11  ;;  %v21599_v20 = vld [vmem:[#allocation12_spill] sm:$0xff]  ;;  %v21601_v11 = vld [vmem:[#allocation15_spill] sm:$0xff] }
 0x3e9   :  { %v18273_v35 = vmul.f32 %v18074_v42, %v21594_v38  ;;  %v18277_v33 = vmul.f32 %v18074_v42, %v21595_v5  ;;  %v18281_v45 = vmul.f32 %v18074_v42, %v21596_v14  ;;  %v18285_v8 = vmul.f32 %v18074_v42, %v21597_v44 }
 0x3ea   :  { %v18289_v26 = vmul.f32 %v18074_v42, %v21599_v20  ;;  %v18293_v38 = vmul.f32 %v18074_v42, %v21601_v11  ;;  %v18297_v5 = vmul.f32 %v18074_v42, %v21603_v40  ;;  %v18301_v14 = vmul.f32 %v18074_v42, %v21605_v60 }
 0x3eb   :  { %21598 = vst [vmem:[#allocation68_spill] sm:$0xff] %v18285_v8  ;;  %v18305_v44 = vmul.f32 %v18074_v42, %v21607_v23  ;;  %v21609_v8 = vld [vmem:[#allocation19_spill] sm:$0xff] }
 0x3ec   :  { %21600 = vst [vmem:[#allocation69_spill] sm:$0xff] %v18289_v26  ;;  %21602 = vst [vmem:[#allocation71_spill] sm:$0xff] %v18293_v38  ;;  %v18309_v20 = vmul.f32 %v18074_v42, %v21609_v8  ;;  %v21611_v26 = vld [vmem:[#allocation18_spill] sm:$0xff]  ;;  %v21613_v38 = vld [vmem:[#allocation21_spill] sm:$0xff] }
 0x3ed   :  { %21604 = vst [vmem:[#allocation70_spill] sm:$0xff] %v18297_v5  ;;  %21606 = vst [vmem:[#allocation72_spill] sm:$0xff] %v18301_v14  ;;  %v18313_v11 = vmul.f32 %v18074_v42, %v21611_v26  ;;  %v18317_v40 = vmul.f32 %v18074_v42, %v21613_v38  ;;  %v21615_v5 = vld [vmem:[#allocation20_spill] sm:$0xff]  ;;  %v21617_v14 = vld [vmem:[#allocation23_spill] sm:$0xff] }
 0x3ee   :  { %21608 = vst [vmem:[#allocation74_spill] sm:$0xff] %v18305_v44  ;;  %21610 = vst [vmem:[#allocation73_spill] sm:$0xff] %v18309_v20  ;;  %v18321_v60 = vmul.f32 %v18074_v42, %v21615_v5  ;;  %v18325_v23 = vmul.f32 %v18074_v42, %v21617_v14  ;;  %v21619_v44 = vld [vmem:[#allocation22_spill] sm:$0xff]  ;;  %v21621_v20 = vld [vmem:[#allocation25_spill] sm:$0xff] }
 0x3ef   :  { %21612 = vst [vmem:[#allocation76_spill] sm:$0xff] %v18313_v11  ;;  %21614 = vst [vmem:[#allocation75_spill] sm:$0xff] %v18317_v40  ;;  %v18329_v8 = vmul.f32 %v18074_v42, %v21619_v44  ;;  %v18333_v26 = vmul.f32 %v18074_v42, %v21621_v20  ;;  %v21623_v11 = vld [vmem:[#allocation24_spill] sm:$0xff]  ;;  %v21625_v40 = vld [vmem:[#allocation27_spill] sm:$0xff] }
 0x3f0   :  { %21616 = vst [vmem:[#allocation78_spill] sm:$0xff] %v18321_v60  ;;  %21618 = vst [vmem:[#allocation77_spill] sm:$0xff] %v18325_v23  ;;  %v18337_v38 = vmul.f32 %v18074_v42, %v21623_v11  ;;  %v18341_v5 = vmul.f32 %v18074_v42, %v21625_v40  ;;  %v21627_v60 = vld [vmem:[#allocation26_spill] sm:$0xff]  ;;  %v21629_v23 = vld [vmem:[#allocation29_spill] sm:$0xff] }
 0x3f1   :  { %21620 = vst [vmem:[#allocation13_spill] sm:$0xff] %v18329_v8  ;;  %21622 = vst [vmem:[#allocation12_spill] sm:$0xff] %v18333_v26  ;;  %v18345_v14 = vmul.f32 %v18074_v42, %v21627_v60  ;;  %v18349_v44 = vmul.f32 %v18074_v42, %v21629_v23  ;;  %v21631_v8 = vld [vmem:[#allocation28_spill] sm:$0xff]  ;;  %v21633_v26 = vld [vmem:[#allocation31_spill] sm:$0xff] }
 0x3f2   :  { %21624 = vst [vmem:[#allocation15_spill] sm:$0xff] %v18337_v38  ;;  %21626 = vst [vmem:[#allocation14_spill] sm:$0xff] %v18341_v5  ;;  %v18353_v20 = vmul.f32 %v18074_v42, %v21631_v8  ;;  %v18357_v11 = vmul.f32 %v18074_v42, %v21633_v26  ;;  %v21635_v38 = vld [vmem:[#allocation30_spill] sm:$0xff]  ;;  %v21637_v5 = vld [vmem:[#allocation33_spill] sm:$0xff] }
 0x3f3   :  { %21628 = vst [vmem:[#allocation17_spill] sm:$0xff] %v18345_v14  ;;  %21630 = vst [vmem:[#allocation16_spill] sm:$0xff] %v18349_v44  ;;  %v18361_v40 = vmul.f32 %v18074_v42, %v21635_v38  ;;  %v18365_v60 = vmul.f32 %v18074_v42, %v21637_v5  ;;  %v21639_v14 = vld [vmem:[#allocation32_spill] sm:$0xff]  ;;  %v21641_v44 = vld [vmem:[#allocation35_spill] sm:$0xff] }
 0x3f4   :  { %21632 = vst [vmem:[#allocation19_spill] sm:$0xff] %v18353_v20  ;;  %21634 = vst [vmem:[#allocation18_spill] sm:$0xff] %v18357_v11  ;;  %v18369_v23 = vmul.f32 %v18074_v42, %v21639_v14  ;;  %v18373_v8 = vmul.f32 %v18074_v42, %v21641_v44  ;;  %v21643_v20 = vld [vmem:[#allocation34_spill] sm:$0xff]  ;;  %v21645_v11 = vld [vmem:[#allocation37_spill] sm:$0xff] }
 0x3f5   :  { %21636 = vst [vmem:[#allocation21_spill] sm:$0xff] %v18361_v40  ;;  %21638 = vst [vmem:[#allocation20_spill] sm:$0xff] %v18365_v60  ;;  %v18377_v26 = vmul.f32 %v18074_v42, %v21643_v20  ;;  %v18381_v38 = vmul.f32 %v18074_v42, %v21645_v11  ;;  %v21647_v40 = vld [vmem:[#allocation36_spill] sm:$0xff]  ;;  %v21649_v60 = vld [vmem:[#allocation39_spill] sm:$0xff] }
 0x3f6   :  { %21640 = vst [vmem:[#allocation23_spill] sm:$0xff] %v18369_v23  ;;  %21642 = vst [vmem:[#allocation22_spill] sm:$0xff] %v18373_v8  ;;  %v18385_v5 = vmul.f32 %v18074_v42, %v21647_v40  ;;  %v18389_v14 = vmul.f32 %v18074_v42, %v21649_v60  ;;  %v21651_v23 = vld [vmem:[#allocation38_spill] sm:$0xff]  ;;  %v21653_v8 = vld [vmem:[#allocation41_spill] sm:$0xff] }
 0x3f7   :  { %21644 = vst [vmem:[#allocation25_spill] sm:$0xff] %v18377_v26  ;;  %21646 = vst [vmem:[#allocation24_spill] sm:$0xff] %v18381_v38  ;;  %v18393_v44 = vmul.f32 %v18074_v42, %v21651_v23  ;;  %v18397_v20 = vmul.f32 %v18074_v42, %v21653_v8  ;;  %v21655_v26 = vld [vmem:[#allocation40_spill] sm:$0xff]  ;;  %v21657_v38 = vld [vmem:[#allocation43_spill] sm:$0xff] }
 0x3f8   :  { %21648 = vst [vmem:[#allocation27_spill] sm:$0xff] %v18385_v5  ;;  %21650 = vst [vmem:[#allocation26_spill] sm:$0xff] %v18389_v14  ;;  %v18401_v11 = vmul.f32 %v18074_v42, %v21655_v26  ;;  %v18405_v40 = vmul.f32 %v18074_v42, %v21657_v38  ;;  %v21659_v5 = vld [vmem:[#allocation42_spill] sm:$0xff]  ;;  %v21661_v14 = vld [vmem:[#allocation45_spill] sm:$0xff] }
 0x3f9   :  { %21652 = vst [vmem:[#allocation29_spill] sm:$0xff] %v18393_v44  ;;  %21654 = vst [vmem:[#allocation28_spill] sm:$0xff] %v18397_v20  ;;  %v18409_v60 = vmul.f32 %v18074_v42, %v21659_v5  ;;  %v18413_v23 = vmul.f32 %v18074_v42, %v21661_v14  ;;  %v21663_v44 = vld [vmem:[#allocation44_spill] sm:$0xff]  ;;  %v21665_v20 = vld [vmem:[#allocation47_spill] sm:$0xff] }
 0x3fa   :  { %21656 = vst [vmem:[#allocation31_spill] sm:$0xff] %v18401_v11  ;;  %21658 = vst [vmem:[#allocation30_spill] sm:$0xff] %v18405_v40  ;;  %v18417_v8 = vmul.f32 %v18074_v42, %v21663_v44  ;;  %v18421_v26 = vmul.f32 %v18074_v42, %v21665_v20  ;;  %v21667_v11 = vld [vmem:[#allocation46_spill] sm:$0xff]  ;;  %v21669_v40 = vld [vmem:[#allocation49_spill] sm:$0xff] }
 0x3fb   :  { %21660 = vst [vmem:[#allocation33_spill] sm:$0xff] %v18409_v60  ;;  %21662 = vst [vmem:[#allocation32_spill] sm:$0xff] %v18413_v23  ;;  %v18425_v38 = vmul.f32 %v18074_v42, %v21667_v11  ;;  %v18429_v5 = vmul.f32 %v18074_v42, %v21669_v40  ;;  %v21671_v60 = vld [vmem:[#allocation48_spill] sm:$0xff]  ;;  %v21673_v23 = vld [vmem:[#allocation51_spill] sm:$0xff] }
 0x3fc   :  { %21664 = vst [vmem:[#allocation35_spill] sm:$0xff] %v18417_v8  ;;  %21666 = vst [vmem:[#allocation34_spill] sm:$0xff] %v18421_v26  ;;  %v18433_v14 = vmul.f32 %v18074_v42, %v21671_v60  ;;  %v18437_v44 = vmul.f32 %v18074_v42, %v21673_v23  ;;  %v21675_v8 = vld [vmem:[#allocation50_spill] sm:$0xff]  ;;  %v21677_v26 = vld [vmem:[#allocation53_spill] sm:$0xff] }
 0x3fd   :  { %21668 = vst [vmem:[#allocation37_spill] sm:$0xff] %v18425_v38  ;;  %21670 = vst [vmem:[#allocation36_spill] sm:$0xff] %v18429_v5  ;;  %v18441_v20 = vmul.f32 %v18074_v42, %v21675_v8  ;;  %v18445_v11 = vmul.f32 %v18074_v42, %v21677_v26  ;;  %v21679_v38 = vld [vmem:[#allocation52_spill] sm:$0xff]  ;;  %v21681_v5 = vld [vmem:[#allocation55_spill] sm:$0xff] }
 0x3fe   :  { %21672 = vst [vmem:[#allocation39_spill] sm:$0xff] %v18433_v14  ;;  %21674 = vst [vmem:[#allocation38_spill] sm:$0xff] %v18437_v44  ;;  %v18449_v40 = vmul.f32 %v18074_v42, %v21679_v38  ;;  %v18453_v60 = vmul.f32 %v18074_v42, %v21681_v5  ;;  %v21683_v14 = vld [vmem:[#allocation54_spill] sm:$0xff]  ;;  %v21685_v44 = vld [vmem:[#allocation57_spill] sm:$0xff] }
 0x3ff   :  { %21676 = vst [vmem:[#allocation41_spill] sm:$0xff] %v18441_v20  ;;  %21678 = vst [vmem:[#allocation40_spill] sm:$0xff] %v18445_v11  ;;  %v18457_v23 = vmul.f32 %v18074_v42, %v21683_v14  ;;  %v18461_v8 = vmul.f32 %v18074_v42, %v21685_v44  ;;  %v21687_v20 = vld [vmem:[#allocation56_spill] sm:$0xff]  ;;  %v21689_v11 = vld [vmem:[#allocation59_spill] sm:$0xff] }
 0x400   :  { %21680 = vst [vmem:[#allocation43_spill] sm:$0xff] %v18449_v40  ;;  %21682 = vst [vmem:[#allocation42_spill] sm:$0xff] %v18453_v60  ;;  %v18465_v26 = vmul.f32 %v18074_v42, %v21687_v20  ;;  %v18469_v38 = vmul.f32 %v18074_v42, %v21689_v11  ;;  %v21691_v40 = vld [vmem:[#allocation58_spill] sm:$0xff]  ;;  %v21693_v60 = vld [vmem:[#allocation61_spill] sm:$0xff] }
 0x401   :  { %21684 = vst [vmem:[#allocation45_spill] sm:$0xff] %v18457_v23  ;;  %21686 = vst [vmem:[#allocation44_spill] sm:$0xff] %v18461_v8  ;;  %v18473_v5 = vmul.f32 %v18074_v42, %v21691_v40  ;;  %v18477_v14 = vmul.f32 %v18074_v42, %v21693_v60  ;;  %v21694_v23 = vld [vmem:[#allocation60_spill] sm:$0xff]  ;;  %v21695_v8 = vld [vmem:[#allocation63_spill] sm:$0xff] }
 0x402   :  { %21688 = vst [vmem:[#allocation47_spill] sm:$0xff] %v18465_v26  ;;  %21690 = vst [vmem:[#allocation46_spill] sm:$0xff] %v18469_v38  ;;  %v18481_v44 = vmul.f32 %v18074_v42, %v21694_v23  ;;  %v18485_v20 = vmul.f32 %v18074_v42, %v21695_v8  ;;  %v21696_v26 = vld [vmem:[#allocation62_spill] sm:$0xff]  ;;  %v21697_v38 = vld [vmem:[#allocation65_spill] sm:$0xff]  ;;  %v18501_v23 = vmul.f32 %v18074_v42, %v18043_v10 }
 0x403   :  { %21692 = vst [vmem:[#allocation49_spill] sm:$0xff] %v18473_v5  ;;  %v18489_v11 = vmul.f32 %v18074_v42, %v21696_v26  ;;  %v18493_v40 = vmul.f32 %v18074_v42, %v21697_v38  ;;  %v21698_v5 = vld [vmem:[#allocation64_spill] sm:$0xff]  ;;  %v18505_v8 = vadd.f32 %v18104_v59, %v18081_v32  ;;  %v18509_v26 = vadd.f32 %v18104_v59, %v18085_v12 }
 0x404   :  { %v18497_v60 = vmul.f32 %v18074_v42, %v21698_v5  ;;  %v18513_v38 = vadd.f32 %v18104_v59, %v18089_v3  ;;  %v18517_v5 = vadd.f32 %v18104_v59, %v18093_v28  ;;  %v18521_v10 = vadd.f32 %v18104_v59, %v18097_v52 }
 0x405   :  { %v18525_v42 = vadd.f32 %v18104_v59, %v18101_v62  ;;  %v18529_v32 = vadd.f32 %v18104_v59, %v18108_v18  ;;  %v18533_v12 = vadd.f32 %v18104_v59, %v18112_v34  ;;  %v18537_v3 = vadd.f32 %v18104_v59, %v18116_v31 }
 0x406   :  { %v18541_v28 = vadd.f32 %v18104_v59, %v18120_v37  ;;  %v18545_v52 = vadd.f32 %v18104_v59, %v18124_v29  ;;  %v18549_v62 = vadd.f32 %v18104_v59, %v18128_v41  ;;  %v18553_v18 = vadd.f32 %v18104_v59, %v18132_v54 }
 0x407   :  { %v18557_v34 = vadd.f32 %v18104_v59, %v18137_v15  ;;  %v18561_v31 = vadd.f32 %v18104_v59, %v18141_v39  ;;  %v18565_v37 = vadd.f32 %v18104_v59, %v18145_v49  ;;  %v18569_v29 = vadd.f32 %v18104_v59, %v18149_v0 }
 0x408   :  { %v18573_v41 = vadd.f32 %v18104_v59, %v18153_v17  ;;  %v18577_v54 = vadd.f32 %v18104_v59, %v18157_v27  ;;  %v18581_v15 = vadd.f32 %v18104_v59, %v18161_v57  ;;  %v18585_v39 = vadd.f32 %v18104_v59, %v18165_v16 }
 0x409   :  { %v18589_v49 = vadd.f32 %v18104_v59, %v18169_v61  ;;  %v18593_v0 = vadd.f32 %v18104_v59, %v18173_v53  ;;  %v18597_v17 = vadd.f32 %v18104_v59, %v18177_v1  ;;  %v18601_v27 = vadd.f32 %v18104_v59, %v18181_v36 }
 0x40a   :  { %v18605_v57 = vadd.f32 %v18104_v59, %v18185_v6  ;;  %v18609_v16 = vadd.f32 %v18104_v59, %v18189_v56  ;;  %v18613_v61 = vadd.f32 %v18104_v59, %v18193_v4  ;;  %v18617_v53 = vadd.f32 %v18104_v59, %v18197_v47 }
 0x40b   :  { %v18621_v1 = vadd.f32 %v18104_v59, %v18201_v13  ;;  %v18625_v36 = vadd.f32 %v18104_v59, %v18205_v48  ;;  %v18629_v6 = vadd.f32 %v18104_v59, %v18209_v51  ;;  %v18633_v56 = vadd.f32 %v18104_v59, %v18213_v46 }
 0x40c   :  { %v18637_v4 = vadd.f32 %v18104_v59, %v18217_v21  ;;  %v18641_v47 = vadd.f32 %v18104_v59, %v18221_v55  ;;  %v18645_v13 = vadd.f32 %v18104_v59, %v18225_v25  ;;  %v18649_v48 = vadd.f32 %v18104_v59, %v18229_v63 }
 0x40d   :  { %v18653_v51 = vadd.f32 %v18104_v59, %v18233_v30  ;;  %v18657_v46 = vadd.f32 %v18104_v59, %v18237_v24  ;;  %v18661_v21 = vadd.f32 %v18104_v59, %v18241_v9  ;;  %v18665_v55 = vadd.f32 %v18104_v59, %v18245_v22 }
 0x40e   :  { %v18669_v25 = vadd.f32 %v18104_v59, %v18249_v50  ;;  %v18673_v63 = vadd.f32 %v18104_v59, %v18253_v19  ;;  %v18677_v30 = vadd.f32 %v18104_v59, %v18257_v58  ;;  %v18681_v24 = vadd.f32 %v18104_v59, %v18261_v43  ;;  %v21704_v43 = vld [vmem:[#allocation68_spill] sm:$0xff] }
 0x40f   :  { %v18685_v9 = vadd.f32 %v18104_v59, %v18265_v2  ;;  %v18689_v22 = vadd.f32 %v18104_v59, %v18269_v7  ;;  %v18693_v50 = vadd.f32 %v18104_v59, %v18273_v35  ;;  %v18697_v19 = vadd.f32 %v18104_v59, %v18277_v33 }
 0x410   :  { %v18701_v58 = vadd.f32 %v18104_v59, %v18281_v45  ;;  %v18705_v2 = vadd.f32 %v18104_v59, %v21704_v43 }
 0x411   :  { %21699 = vst [vmem:[#allocation48_spill] sm:$0xff] %v18685_v9  ;;  %21700 = vst [vmem:[#allocation51_spill] sm:$0xff] %v18689_v22  ;;  %v21706_v9 = vld [vmem:[#allocation69_spill] sm:$0xff]  ;;  %v21708_v22 = vld [vmem:[#allocation71_spill] sm:$0xff] }
 0x412   :  { %21701 = vst [vmem:[#allocation50_spill] sm:$0xff] %v18693_v50  ;;  %21702 = vst [vmem:[#allocation53_spill] sm:$0xff] %v18697_v19  ;;  %v18709_v7 = vadd.f32 %v18104_v59, %v21706_v9  ;;  %v18713_v35 = vadd.f32 %v18104_v59, %v21708_v22  ;;  %v21710_v50 = vld [vmem:[#allocation70_spill] sm:$0xff]  ;;  %v21712_v19 = vld [vmem:[#allocation72_spill] sm:$0xff] }
 0x413   :  { %21703 = vst [vmem:[#allocation52_spill] sm:$0xff] %v18701_v58  ;;  %21705 = vst [vmem:[#allocation55_spill] sm:$0xff] %v18705_v2  ;;  %v18717_v33 = vadd.f32 %v18104_v59, %v21710_v50  ;;  %v18721_v45 = vadd.f32 %v18104_v59, %v21712_v19  ;;  %v21714_v58 = vld [vmem:[#allocation74_spill] sm:$0xff]  ;;  %v21716_v2 = vld [vmem:[#allocation73_spill] sm:$0xff] }
 0x414   :  { %21707 = vst [vmem:[#allocation54_spill] sm:$0xff] %v18709_v7  ;;  %21709 = vst [vmem:[#allocation57_spill] sm:$0xff] %v18713_v35  ;;  %v18725_v43 = vadd.f32 %v18104_v59, %v21714_v58  ;;  %v18729_v9 = vadd.f32 %v18104_v59, %v21716_v2  ;;  %v21718_v7 = vld [vmem:[#allocation76_spill] sm:$0xff]  ;;  %v21720_v35 = vld [vmem:[#allocation75_spill] sm:$0xff] }
 0x415   :  { %21711 = vst [vmem:[#allocation56_spill] sm:$0xff] %v18717_v33  ;;  %21713 = vst [vmem:[#allocation59_spill] sm:$0xff] %v18721_v45  ;;  %v18733_v22 = vadd.f32 %v18104_v59, %v21718_v7  ;;  %v18737_v50 = vadd.f32 %v18104_v59, %v21720_v35  ;;  %v21722_v33 = vld [vmem:[#allocation78_spill] sm:$0xff]  ;;  %v21724_v45 = vld [vmem:[#allocation77_spill] sm:$0xff] }
 0x416   :  { %21715 = vst [vmem:[#allocation58_spill] sm:$0xff] %v18725_v43  ;;  %21717 = vst [vmem:[#allocation61_spill] sm:$0xff] %v18729_v9  ;;  %v18741_v19 = vadd.f32 %v18104_v59, %v21722_v33  ;;  %v18745_v58 = vadd.f32 %v18104_v59, %v21724_v45  ;;  %v21726_v43 = vld [vmem:[#allocation13_spill] sm:$0xff]  ;;  %v21728_v9 = vld [vmem:[#allocation12_spill] sm:$0xff] }
 0x417   :  { %21719 = vst [vmem:[#allocation60_spill] sm:$0xff] %v18733_v22  ;;  %21721 = vst [vmem:[#allocation63_spill] sm:$0xff] %v18737_v50  ;;  %v18749_v2 = vadd.f32 %v18104_v59, %v21726_v43  ;;  %v18753_v7 = vadd.f32 %v18104_v59, %v21728_v9  ;;  %v21730_v22 = vld [vmem:[#allocation15_spill] sm:$0xff]  ;;  %v21732_v50 = vld [vmem:[#allocation14_spill] sm:$0xff] }
 0x418   :  { %21723 = vst [vmem:[#allocation62_spill] sm:$0xff] %v18741_v19  ;;  %21725 = vst [vmem:[#allocation65_spill] sm:$0xff] %v18745_v58  ;;  %v18757_v35 = vadd.f32 %v18104_v59, %v21730_v22  ;;  %v18761_v33 = vadd.f32 %v18104_v59, %v21732_v50  ;;  %v21734_v19 = vld [vmem:[#allocation17_spill] sm:$0xff]  ;;  %v21736_v58 = vld [vmem:[#allocation16_spill] sm:$0xff] }
 0x419   :  { %21727 = vst [vmem:[#allocation64_spill] sm:$0xff] %v18749_v2  ;;  %21729 = vst [vmem:[#allocation68_spill] sm:$0xff] %v18753_v7  ;;  %v18765_v45 = vadd.f32 %v18104_v59, %v21734_v19  ;;  %v18769_v43 = vadd.f32 %v18104_v59, %v21736_v58  ;;  %v21738_v2 = vld [vmem:[#allocation19_spill] sm:$0xff]  ;;  %v21740_v7 = vld [vmem:[#allocation18_spill] sm:$0xff] }
 0x41a   :  { %21731 = vst [vmem:[#allocation69_spill] sm:$0xff] %v18757_v35  ;;  %21733 = vst [vmem:[#allocation71_spill] sm:$0xff] %v18761_v33  ;;  %v18773_v9 = vadd.f32 %v18104_v59, %v21738_v2  ;;  %v18777_v22 = vadd.f32 %v18104_v59, %v21740_v7  ;;  %v21742_v35 = vld [vmem:[#allocation21_spill] sm:$0xff]  ;;  %v21744_v33 = vld [vmem:[#allocation20_spill] sm:$0xff] }
 0x41b   :  { %21735 = vst [vmem:[#allocation70_spill] sm:$0xff] %v18765_v45  ;;  %21737 = vst [vmem:[#allocation72_spill] sm:$0xff] %v18769_v43  ;;  %v18781_v50 = vadd.f32 %v18104_v59, %v21742_v35  ;;  %v18785_v19 = vadd.f32 %v18104_v59, %v21744_v33  ;;  %v21746_v45 = vld [vmem:[#allocation23_spill] sm:$0xff]  ;;  %v21748_v43 = vld [vmem:[#allocation22_spill] sm:$0xff] }
 0x41c   :  { %21739 = vst [vmem:[#allocation74_spill] sm:$0xff] %v18773_v9  ;;  %21741 = vst [vmem:[#allocation73_spill] sm:$0xff] %v18777_v22  ;;  %v18789_v58 = vadd.f32 %v18104_v59, %v21746_v45  ;;  %v18793_v2 = vadd.f32 %v18104_v59, %v21748_v43  ;;  %v21750_v9 = vld [vmem:[#allocation25_spill] sm:$0xff]  ;;  %v21752_v22 = vld [vmem:[#allocation24_spill] sm:$0xff] }
 0x41d   :  { %21743 = vst [vmem:[#allocation76_spill] sm:$0xff] %v18781_v50  ;;  %21745 = vst [vmem:[#allocation75_spill] sm:$0xff] %v18785_v19  ;;  %v18797_v7 = vadd.f32 %v18104_v59, %v21750_v9  ;;  %v18801_v35 = vadd.f32 %v18104_v59, %v21752_v22  ;;  %v21754_v50 = vld [vmem:[#allocation27_spill] sm:$0xff]  ;;  %v21756_v19 = vld [vmem:[#allocation26_spill] sm:$0xff] }
 0x41e   :  { %21747 = vst [vmem:[#allocation78_spill] sm:$0xff] %v18789_v58  ;;  %21749 = vst [vmem:[#allocation77_spill] sm:$0xff] %v18793_v2  ;;  %v18805_v33 = vadd.f32 %v18104_v59, %v21754_v50  ;;  %v18809_v45 = vadd.f32 %v18104_v59, %v21756_v19  ;;  %v21758_v58 = vld [vmem:[#allocation29_spill] sm:$0xff]  ;;  %v21760_v2 = vld [vmem:[#allocation28_spill] sm:$0xff] }
 0x41f   :  { %21751 = vst [vmem:[#allocation13_spill] sm:$0xff] %v18797_v7  ;;  %21753 = vst [vmem:[#allocation12_spill] sm:$0xff] %v18801_v35  ;;  %v18813_v43 = vadd.f32 %v18104_v59, %v21758_v58  ;;  %v18817_v9 = vadd.f32 %v18104_v59, %v21760_v2  ;;  %v21762_v7 = vld [vmem:[#allocation31_spill] sm:$0xff]  ;;  %v21764_v35 = vld [vmem:[#allocation30_spill] sm:$0xff] }
 0x420   :  { %21755 = vst [vmem:[#allocation15_spill] sm:$0xff] %v18805_v33  ;;  %21757 = vst [vmem:[#allocation14_spill] sm:$0xff] %v18809_v45  ;;  %v18821_v22 = vadd.f32 %v18104_v59, %v21762_v7  ;;  %v18825_v50 = vadd.f32 %v18104_v59, %v21764_v35  ;;  %v21766_v33 = vld [vmem:[#allocation33_spill] sm:$0xff]  ;;  %v21768_v45 = vld [vmem:[#allocation32_spill] sm:$0xff] }
 0x421   :  { %21759 = vst [vmem:[#allocation17_spill] sm:$0xff] %v18813_v43  ;;  %21761 = vst [vmem:[#allocation16_spill] sm:$0xff] %v18817_v9  ;;  %v18829_v19 = vadd.f32 %v18104_v59, %v21766_v33  ;;  %v18833_v58 = vadd.f32 %v18104_v59, %v21768_v45  ;;  %v21770_v43 = vld [vmem:[#allocation35_spill] sm:$0xff]  ;;  %v21772_v9 = vld [vmem:[#allocation34_spill] sm:$0xff] }
 0x422   :  { %21763 = vst [vmem:[#allocation19_spill] sm:$0xff] %v18821_v22  ;;  %21765 = vst [vmem:[#allocation18_spill] sm:$0xff] %v18825_v50  ;;  %v18837_v2 = vadd.f32 %v18104_v59, %v21770_v43  ;;  %v18841_v7 = vadd.f32 %v18104_v59, %v21772_v9  ;;  %v21774_v22 = vld [vmem:[#allocation37_spill] sm:$0xff]  ;;  %v21776_v50 = vld [vmem:[#allocation36_spill] sm:$0xff] }
 0x423   :  { %21767 = vst [vmem:[#allocation21_spill] sm:$0xff] %v18829_v19  ;;  %21769 = vst [vmem:[#allocation20_spill] sm:$0xff] %v18833_v58  ;;  %v18845_v35 = vadd.f32 %v18104_v59, %v21774_v22  ;;  %v18849_v33 = vadd.f32 %v18104_v59, %v21776_v50  ;;  %v21778_v19 = vld [vmem:[#allocation39_spill] sm:$0xff]  ;;  %v21780_v58 = vld [vmem:[#allocation38_spill] sm:$0xff] }
 0x424   :  { %21771 = vst [vmem:[#allocation23_spill] sm:$0xff] %v18837_v2  ;;  %21773 = vst [vmem:[#allocation22_spill] sm:$0xff] %v18841_v7  ;;  %v18853_v45 = vadd.f32 %v18104_v59, %v21778_v19  ;;  %v18857_v43 = vadd.f32 %v18104_v59, %v21780_v58  ;;  %v21782_v2 = vld [vmem:[#allocation41_spill] sm:$0xff]  ;;  %v21784_v7 = vld [vmem:[#allocation40_spill] sm:$0xff] }
 0x425   :  { %21775 = vst [vmem:[#allocation25_spill] sm:$0xff] %v18845_v35  ;;  %21777 = vst [vmem:[#allocation24_spill] sm:$0xff] %v18849_v33  ;;  %v18861_v9 = vadd.f32 %v18104_v59, %v21782_v2  ;;  %v18865_v22 = vadd.f32 %v18104_v59, %v21784_v7  ;;  %v21786_v35 = vld [vmem:[#allocation43_spill] sm:$0xff]  ;;  %v21788_v33 = vld [vmem:[#allocation42_spill] sm:$0xff] }
 0x426   :  { %21779 = vst [vmem:[#allocation27_spill] sm:$0xff] %v18853_v45  ;;  %21781 = vst [vmem:[#allocation26_spill] sm:$0xff] %v18857_v43  ;;  %v18869_v50 = vadd.f32 %v18104_v59, %v21786_v35  ;;  %v18873_v19 = vadd.f32 %v18104_v59, %v21788_v33  ;;  %v21789_v45 = vld [vmem:[#allocation45_spill] sm:$0xff]  ;;  %v21790_v43 = vld [vmem:[#allocation44_spill] sm:$0xff] }
 0x427   :  { %21783 = vst [vmem:[#allocation29_spill] sm:$0xff] %v18861_v9  ;;  %21785 = vst [vmem:[#allocation28_spill] sm:$0xff] %v18865_v22  ;;  %v18877_v58 = vadd.f32 %v18104_v59, %v21789_v45  ;;  %v18881_v2 = vadd.f32 %v18104_v59, %v21790_v43  ;;  %v21791_v9 = vld [vmem:[#allocation47_spill] sm:$0xff]  ;;  %v21792_v22 = vld [vmem:[#allocation46_spill] sm:$0xff]  ;;  %v18897_v45 = vadd.f32 %v18104_v59, %v18477_v14 }
 0x428   :  { %21787 = vst [vmem:[#allocation31_spill] sm:$0xff] %v18869_v50  ;;  %v18885_v7 = vadd.f32 %v18104_v59, %v21791_v9  ;;  %v18889_v35 = vadd.f32 %v18104_v59, %v21792_v22  ;;  %v21793_v50 = vld [vmem:[#allocation49_spill] sm:$0xff]  ;;  %v18901_v43 = vadd.f32 %v18104_v59, %v18481_v44  ;;  %v18905_v9 = vadd.f32 %v18104_v59, %v18485_v20 }
 0x429   :  { %v18893_v33 = vadd.f32 %v18104_v59, %v21793_v50  ;;  %v18909_v22 = vadd.f32 %v18104_v59, %v18489_v11  ;;  %v18913_v50 = vadd.f32 %v18104_v59, %v18493_v40  ;;  %v18917_v14 = vadd.f32 %v18104_v59, %v18497_v60 }
 0x42a   :  { %21794 = vst [vmem:[#allocation30_spill] sm:$0xff] %v18901_v43  ;;  %21795 = vst [vmem:[#allocation33_spill] sm:$0xff] %v18905_v9  ;;  %v18921_v44 = vadd.f32 %v18104_v59, %v18501_v23  ;;  %v6148_v43 = vmax.f32 %v18505_v8, 0.0  ;;  %v6149_v20 = vmax.f32 %v18509_v26, 0.0  ;;  %v6150_v9 = vmax.f32 %v18513_v38, 0.0 }
 0x42b   :  { %21796 = vst [vmem:[#allocation32_spill] sm:$0xff] %v18909_v22  ;;  %21797 = vst [vmem:[#allocation35_spill] sm:$0xff] %v18913_v50  ;;  %v6151_v11 = vmax.f32 %v18517_v5, 0.0  ;;  %v6152_v22 = vmax.f32 %v18521_v10, 0.0  ;;  %v6153_v40 = vmax.f32 %v18525_v42, 0.0  ;;  %v6154_v50 = vmax.f32 %v18529_v32, 0.0 }
 0x42c   :  { %21798 = vst [vmem:[#allocation34_spill] sm:$0xff] %v18917_v14  ;;  %v6155_v60 = vmax.f32 %v18533_v12, 0.0  ;;  %v6156_v14 = vmax.f32 %v18537_v3, 0.0  ;;  %6254 = vst [vmem:[#allocation2] sm:$0xff] %v6148_v43  ;;  %v6157_v59 = vmax.f32 %v18541_v28, 0.0  ;;  %v6158_v23 = vmax.f32 %v18545_v52, 0.0 }
 0x42d   :  { %v6159_v8 = vmax.f32 %v18549_v62, 0.0  ;;  %v6160_v26 = vmax.f32 %v18553_v18, 0.0  ;;  %6255 = vst [vmem:[#allocation2 + $0x8] sm:$0xff] %v6149_v20  ;;  %6256 = vst [vmem:[#allocation2 + $0x10] sm:$0xff] %v6150_v9  ;;  %v6161_v38 = vmax.f32 %v18557_v34, 0.0  ;;  %v6162_v5 = vmax.f32 %v18561_v31, 0.0 }
 0x42e   :  { %6257 = vst [vmem:[#allocation2 + $0x18] sm:$0xff] %v6151_v11  ;;  %6258 = vst [vmem:[#allocation2 + $0x20] sm:$0xff] %v6152_v22  ;;  %v6163_v10 = vmax.f32 %v18565_v37, 0.0  ;;  %v6164_v42 = vmax.f32 %v18569_v29, 0.0  ;;  %v6165_v32 = vmax.f32 %v18573_v41, 0.0  ;;  %v6166_v12 = vmax.f32 %v18577_v54, 0.0 }
 0x42f   :  { %6259 = vst [vmem:[#allocation2 + $0x28] sm:$0xff] %v6153_v40  ;;  %6260 = vst [vmem:[#allocation2 + $0x30] sm:$0xff] %v6154_v50  ;;  %v6167_v3 = vmax.f32 %v18581_v15, 0.0  ;;  %v6168_v28 = vmax.f32 %v18585_v39, 0.0  ;;  %v6169_v52 = vmax.f32 %v18589_v49, 0.0  ;;  %v6170_v62 = vmax.f32 %v18593_v0, 0.0 }
 0x430   :  { %6261 = vst [vmem:[#allocation2 + $0x38] sm:$0xff] %v6155_v60  ;;  %6262 = vst [vmem:[#allocation2 + $0x40] sm:$0xff] %v6156_v14  ;;  %v6171_v18 = vmax.f32 %v18597_v17, 0.0  ;;  %v6172_v34 = vmax.f32 %v18601_v27, 0.0  ;;  %v6173_v31 = vmax.f32 %v18605_v57, 0.0  ;;  %v6174_v37 = vmax.f32 %v18609_v16, 0.0 }
 0x431   :  { %6263 = vst [vmem:[#allocation2 + $0x48] sm:$0xff] %v6157_v59  ;;  %6264 = vst [vmem:[#allocation2 + $0x50] sm:$0xff] %v6158_v23  ;;  %v6175_v29 = vmax.f32 %v18613_v61, 0.0  ;;  %v6176_v41 = vmax.f32 %v18617_v53, 0.0  ;;  %v6177_v54 = vmax.f32 %v18621_v1, 0.0  ;;  %v6178_v15 = vmax.f32 %v18625_v36, 0.0 }
 0x432   :  { %6265 = vst [vmem:[#allocation2 + $0x58] sm:$0xff] %v6159_v8  ;;  %6266 = vst [vmem:[#allocation2 + $0x60] sm:$0xff] %v6160_v26  ;;  %v6179_v39 = vmax.f32 %v18629_v6, 0.0  ;;  %v6180_v49 = vmax.f32 %v18633_v56, 0.0  ;;  %v6181_v0 = vmax.f32 %v18637_v4, 0.0  ;;  %v6182_v17 = vmax.f32 %v18641_v47, 0.0 }
 0x433   :  { %6267 = vst [vmem:[#allocation2 + $0x68] sm:$0xff] %v6161_v38  ;;  %6268 = vst [vmem:[#allocation2 + $0x70] sm:$0xff] %v6162_v5  ;;  %v6183_v27 = vmax.f32 %v18645_v13, 0.0  ;;  %v6184_v57 = vmax.f32 %v18649_v48, 0.0  ;;  %v6185_v16 = vmax.f32 %v18653_v51, 0.0  ;;  %v6186_v61 = vmax.f32 %v18657_v46, 0.0 }
 0x434   :  { %6269 = vst [vmem:[#allocation2 + $0x78] sm:$0xff] %v6163_v10  ;;  %6270 = vst [vmem:[#allocation2 + $0x80] sm:$0xff] %v6164_v42  ;;  %v6187_v53 = vmax.f32 %v18661_v21, 0.0  ;;  %v6188_v1 = vmax.f32 %v18665_v55, 0.0  ;;  %v6189_v36 = vmax.f32 %v18669_v25, 0.0  ;;  %v6190_v6 = vmax.f32 %v18673_v63, 0.0 }
 0x435   :  { %6271 = vst [vmem:[#allocation2 + $0x88] sm:$0xff] %v6165_v32  ;;  %6272 = vst [vmem:[#allocation2 + $0x90] sm:$0xff] %v6166_v12  ;;  %v6191_v56 = vmax.f32 %v18677_v30, 0.0  ;;  %v6192_v4 = vmax.f32 %v18681_v24, 0.0  ;;  %v21799_v47 = vld [vmem:[#allocation48_spill] sm:$0xff]  ;;  %v21800_v48 = vld [vmem:[#allocation51_spill] sm:$0xff] }
 0x436   :  { %6273 = vst [vmem:[#allocation2 + $0x98] sm:$0xff] %v6167_v3  ;;  %6274 = vst [vmem:[#allocation2 + $0xa0] sm:$0xff] %v6168_v28  ;;  %v6193_v13 = vmax.f32 %v21799_v47, 0.0  ;;  %v6194_v51 = vmax.f32 %v21800_v48, 0.0  ;;  %v21801_v46 = vld [vmem:[#allocation50_spill] sm:$0xff]  ;;  %v21802_v55 = vld [vmem:[#allocation53_spill] sm:$0xff] }
 0x437   :  { %6275 = vst [vmem:[#allocation2 + $0xa8] sm:$0xff] %v6169_v52  ;;  %6276 = vst [vmem:[#allocation2 + $0xb0] sm:$0xff] %v6170_v62  ;;  %v6195_v21 = vmax.f32 %v21801_v46, 0.0  ;;  %v6196_v43 = vmax.f32 %v21802_v55, 0.0  ;;  %v21803_v25 = vld [vmem:[#allocation52_spill] sm:$0xff]  ;;  %v21804_v30 = vld [vmem:[#allocation55_spill] sm:$0xff] }
 0x438   :  { %6277 = vst [vmem:[#allocation2 + $0xb8] sm:$0xff] %v6171_v18  ;;  %6278 = vst [vmem:[#allocation2 + $0xc0] sm:$0xff] %v6172_v34  ;;  %v6197_v63 = vmax.f32 %v21803_v25, 0.0  ;;  %v6198_v24 = vmax.f32 %v21804_v30, 0.0  ;;  %v21805_v9 = vld [vmem:[#allocation54_spill] sm:$0xff]  ;;  %v21806_v50 = vld [vmem:[#allocation57_spill] sm:$0xff] }
 0x439   :  { %6279 = vst [vmem:[#allocation2 + $0xc8] sm:$0xff] %v6173_v31  ;;  %6280 = vst [vmem:[#allocation2 + $0xd0] sm:$0xff] %v6174_v37  ;;  %v6199_v22 = vmax.f32 %v21805_v9, 0.0  ;;  %v6200_v14 = vmax.f32 %v21806_v50, 0.0  ;;  %v21807_v20 = vld [vmem:[#allocation56_spill] sm:$0xff]  ;;  %v21808_v40 = vld [vmem:[#allocation59_spill] sm:$0xff] }
 0x43a   :  { %6281 = vst [vmem:[#allocation2 + $0xd8] sm:$0xff] %v6175_v29  ;;  %6282 = vst [vmem:[#allocation2 + $0xe0] sm:$0xff] %v6176_v41  ;;  %v6201_v11 = vmax.f32 %v21807_v20, 0.0  ;;  %v6202_v60 = vmax.f32 %v21808_v40, 0.0  ;;  %v21809_v59 = vld [vmem:[#allocation58_spill] sm:$0xff]  ;;  %v21810_v8 = vld [vmem:[#allocation61_spill] sm:$0xff] }
 0x43b   :  { %6283 = vst [vmem:[#allocation2 + $0xe8] sm:$0xff] %v6177_v54  ;;  %6284 = vst [vmem:[#allocation2 + $0xf0] sm:$0xff] %v6178_v15  ;;  %v6203_v23 = vmax.f32 %v21809_v59, 0.0  ;;  %v6204_v26 = vmax.f32 %v21810_v8, 0.0  ;;  %v21811_v38 = vld [vmem:[#allocation60_spill] sm:$0xff]  ;;  %v21812_v10 = vld [vmem:[#allocation63_spill] sm:$0xff] }
 0x43c   :  { %6285 = vst [vmem:[#allocation2 + $0xf8] sm:$0xff] %v6179_v39  ;;  %6286 = vst [vmem:[#allocation2 + $0x100] sm:$0xff] %v6180_v49  ;;  %v6205_v5 = vmax.f32 %v21811_v38, 0.0  ;;  %v6206_v42 = vmax.f32 %v21812_v10, 0.0  ;;  %v21813_v32 = vld [vmem:[#allocation62_spill] sm:$0xff]  ;;  %v21814_v3 = vld [vmem:[#allocation65_spill] sm:$0xff] }
 0x43d   :  { %6287 = vst [vmem:[#allocation2 + $0x108] sm:$0xff] %v6181_v0  ;;  %6288 = vst [vmem:[#allocation2 + $0x110] sm:$0xff] %v6182_v17  ;;  %v6207_v12 = vmax.f32 %v21813_v32, 0.0  ;;  %v6208_v28 = vmax.f32 %v21814_v3, 0.0  ;;  %v21815_v52 = vld [vmem:[#allocation64_spill] sm:$0xff]  ;;  %v21817_v31 = vld [vmem:[#allocation69_spill] sm:$0xff] }
 0x43e   :  { %6289 = vst [vmem:[#allocation2 + $0x118] sm:$0xff] %v6183_v27  ;;  %6290 = vst [vmem:[#allocation2 + $0x120] sm:$0xff] %v6184_v57  ;;  %v6209_v62 = vmax.f32 %v21815_v52, 0.0  ;;  %v21816_v18 = vld [vmem:[#allocation68_spill] sm:$0xff]  ;;  %v6211_v37 = vmax.f32 %v21817_v31, 0.0  ;;  %v21818_v29 = vld [vmem:[#allocation71_spill] sm:$0xff] }
 0x43f   :  { %6291 = vst [vmem:[#allocation2 + $0x128] sm:$0xff] %v6185_v16  ;;  %6292 = vst [vmem:[#allocation2 + $0x130] sm:$0xff] %v6186_v61  ;;  %v6210_v34 = vmax.f32 %v21816_v18, 0.0  ;;  %v6212_v41 = vmax.f32 %v21818_v29, 0.0  ;;  %v21819_v54 = vld [vmem:[#allocation70_spill] sm:$0xff]  ;;  %v21820_v39 = vld [vmem:[#allocation72_spill] sm:$0xff] }
 0x440   :  { %6293 = vst [vmem:[#allocation2 + $0x138] sm:$0xff] %v6187_v53  ;;  %6294 = vst [vmem:[#allocation2 + $0x140] sm:$0xff] %v6188_v1  ;;  %v6213_v15 = vmax.f32 %v21819_v54, 0.0  ;;  %v6214_v49 = vmax.f32 %v21820_v39, 0.0  ;;  %v21821_v0 = vld [vmem:[#allocation74_spill] sm:$0xff]  ;;  %v21822_v27 = vld [vmem:[#allocation73_spill] sm:$0xff] }
 0x441   :  { %6295 = vst [vmem:[#allocation2 + $0x148] sm:$0xff] %v6189_v36  ;;  %6296 = vst [vmem:[#allocation2 + $0x150] sm:$0xff] %v6190_v6  ;;  %v6215_v17 = vmax.f32 %v21821_v0, 0.0  ;;  %v6216_v57 = vmax.f32 %v21822_v27, 0.0  ;;  %v21823_v16 = vld [vmem:[#allocation76_spill] sm:$0xff]  ;;  %v21824_v53 = vld [vmem:[#allocation75_spill] sm:$0xff] }
 0x442   :  { %6297 = vst [vmem:[#allocation2 + $0x158] sm:$0xff] %v6191_v56  ;;  %6298 = vst [vmem:[#allocation2 + $0x160] sm:$0xff] %v6192_v4  ;;  %v6217_v61 = vmax.f32 %v21823_v16, 0.0  ;;  %v6218_v1 = vmax.f32 %v21824_v53, 0.0  ;;  %v21825_v36 = vld [vmem:[#allocation78_spill] sm:$0xff]  ;;  %v21826_v56 = vld [vmem:[#allocation77_spill] sm:$0xff] }
 0x443   :  { %6299 = vst [vmem:[#allocation2 + $0x168] sm:$0xff] %v6193_v13  ;;  %6300 = vst [vmem:[#allocation2 + $0x170] sm:$0xff] %v6194_v51  ;;  %v6219_v6 = vmax.f32 %v21825_v36, 0.0  ;;  %v6220_v4 = vmax.f32 %v21826_v56, 0.0  ;;  %v21827_v47 = vld [vmem:[#allocation13_spill] sm:$0xff]  ;;  %v21828_v48 = vld [vmem:[#allocation12_spill] sm:$0xff] }
 0x444   :  { %6301 = vst [vmem:[#allocation2 + $0x178] sm:$0xff] %v6195_v21  ;;  %6302 = vst [vmem:[#allocation2 + $0x180] sm:$0xff] %v6196_v43  ;;  %v6221_v13 = vmax.f32 %v21827_v47, 0.0  ;;  %v6222_v51 = vmax.f32 %v21828_v48, 0.0  ;;  %v21829_v46 = vld [vmem:[#allocation15_spill] sm:$0xff]  ;;  %v21830_v55 = vld [vmem:[#allocation14_spill] sm:$0xff] }
 0x445   :  { %6303 = vst [vmem:[#allocation2 + $0x188] sm:$0xff] %v6197_v63  ;;  %6304 = vst [vmem:[#allocation2 + $0x190] sm:$0xff] %v6198_v24  ;;  %v6223_v21 = vmax.f32 %v21829_v46, 0.0  ;;  %v6224_v43 = vmax.f32 %v21830_v55, 0.0  ;;  %v21831_v25 = vld [vmem:[#allocation17_spill] sm:$0xff]  ;;  %v21832_v30 = vld [vmem:[#allocation16_spill] sm:$0xff] }
 0x446   :  { %6305 = vst [vmem:[#allocation2 + $0x198] sm:$0xff] %v6199_v22  ;;  %6306 = vst [vmem:[#allocation2 + $0x1a0] sm:$0xff] %v6200_v14  ;;  %v6225_v63 = vmax.f32 %v21831_v25, 0.0  ;;  %v6226_v24 = vmax.f32 %v21832_v30, 0.0  ;;  %v21833_v9 = vld [vmem:[#allocation19_spill] sm:$0xff]  ;;  %v21834_v50 = vld [vmem:[#allocation18_spill] sm:$0xff] }
 0x447   :  { %6307 = vst [vmem:[#allocation2 + $0x1a8] sm:$0xff] %v6201_v11  ;;  %6308 = vst [vmem:[#allocation2 + $0x1b0] sm:$0xff] %v6202_v60  ;;  %v6227_v22 = vmax.f32 %v21833_v9, 0.0  ;;  %v6228_v14 = vmax.f32 %v21834_v50, 0.0  ;;  %v21835_v20 = vld [vmem:[#allocation21_spill] sm:$0xff]  ;;  %v21836_v40 = vld [vmem:[#allocation20_spill] sm:$0xff] }
 0x448   :  { %6309 = vst [vmem:[#allocation2 + $0x1b8] sm:$0xff] %v6203_v23  ;;  %6310 = vst [vmem:[#allocation2 + $0x1c0] sm:$0xff] %v6204_v26  ;;  %v6229_v11 = vmax.f32 %v21835_v20, 0.0  ;;  %v6230_v60 = vmax.f32 %v21836_v40, 0.0  ;;  %v21837_v59 = vld [vmem:[#allocation23_spill] sm:$0xff]  ;;  %v21838_v8 = vld [vmem:[#allocation22_spill] sm:$0xff] }
 0x449   :  { %6311 = vst [vmem:[#allocation2 + $0x1c8] sm:$0xff] %v6205_v5  ;;  %6312 = vst [vmem:[#allocation2 + $0x1d0] sm:$0xff] %v6206_v42  ;;  %v6231_v23 = vmax.f32 %v21837_v59, 0.0  ;;  %v6232_v26 = vmax.f32 %v21838_v8, 0.0  ;;  %v21839_v38 = vld [vmem:[#allocation25_spill] sm:$0xff]  ;;  %v21840_v10 = vld [vmem:[#allocation24_spill] sm:$0xff] }
 0x44a   :  { %6313 = vst [vmem:[#allocation2 + $0x1d8] sm:$0xff] %v6207_v12  ;;  %6314 = vst [vmem:[#allocation2 + $0x1e0] sm:$0xff] %v6208_v28  ;;  %v6233_v5 = vmax.f32 %v21839_v38, 0.0  ;;  %v6234_v42 = vmax.f32 %v21840_v10, 0.0  ;;  %v21841_v32 = vld [vmem:[#allocation27_spill] sm:$0xff]  ;;  %v21842_v3 = vld [vmem:[#allocation26_spill] sm:$0xff] }
 0x44b   :  { %6315 = vst [vmem:[#allocation2 + $0x1e8] sm:$0xff] %v6209_v62  ;;  %6316 = vst [vmem:[#allocation2 + $0x1f0] sm:$0xff] %v6210_v34  ;;  %v6235_v12 = vmax.f32 %v21841_v32, 0.0  ;;  %v6236_v28 = vmax.f32 %v21842_v3, 0.0  ;;  %v19012_v52 = vld [vmem:[#allocation2] ss:$4 sm:$0xff] }
 0x44c   :  { %6317 = vst [vmem:[#allocation2 + $0x1f8] sm:$0xff] %v6211_v37  ;;  %6318 = vst [vmem:[#allocation2 + $0x200] sm:$0xff] %v6212_v41  ;;  %v19014_v62 = vld [vmem:[#allocation2 + $0x20] ss:$4 sm:$0xff]  ;;  %v19016_v18 = vld [vmem:[#allocation2 + $0x1] ss:$4 sm:$0xff] }
 0x44d   :  { %6319 = vst [vmem:[#allocation2 + $0x208] sm:$0xff] %v6213_v15  ;;  %6320 = vst [vmem:[#allocation2 + $0x210] sm:$0xff] %v6214_v49  ;;  %v19018_v34 = vld [vmem:[#allocation2 + $0x21] ss:$4 sm:$0xff]  ;;  %v19020_v31 = vld [vmem:[#allocation2 + $0x40] ss:$4 sm:$0xff]  ;;  %v6467_v9 = vmax.f32 %v19012_v52, %v19016_v18 }
 0x44e   :  { %6321 = vst [vmem:[#allocation2 + $0x218] sm:$0xff] %v6215_v17  ;;  %6322 = vst [vmem:[#allocation2 + $0x220] sm:$0xff] %v6216_v57  ;;  %v19022_v37 = vld [vmem:[#allocation2 + $0x41] ss:$4 sm:$0xff]  ;;  %v6240_v0 = vmax.f32 %v18873_v19, 0.0  ;;  %v6242_v36 = vmax.f32 %v18881_v2, 0.0 }
 0x44f   :  { %6323 = vst [vmem:[#allocation2 + $0x228] sm:$0xff] %v6217_v61  ;;  %6324 = vst [vmem:[#allocation2 + $0x230] sm:$0xff] %v6218_v1  ;;  %v21843_v29 = vld [vmem:[#allocation29_spill] sm:$0xff]  ;;  %v21844_v54 = vld [vmem:[#allocation28_spill] sm:$0xff]  ;;  %v6241_v1 = vmax.f32 %v18877_v58, 0.0  ;;  %v6244_v56 = vmax.f32 %v18889_v35, 0.0  ;;  %v6469_v50 = vmax.f32 %v19020_v31, %v19022_v37 }
 0x450   :  { %6325 = vst [vmem:[#allocation2 + $0x238] sm:$0xff] %v6219_v6  ;;  %6326 = vst [vmem:[#allocation2 + $0x240] sm:$0xff] %v6220_v4  ;;  %v6237_v41 = vmax.f32 %v21843_v29, 0.0  ;;  %v6238_v15 = vmax.f32 %v21844_v54, 0.0  ;;  %v21845_v39 = vld [vmem:[#allocation31_spill] sm:$0xff]  ;;  %v7137_v16 = vld [vmem:[%s21194_s3 + $0x20] sm:$0xff] }
 0x451   :  { %6327 = vst [vmem:[#allocation2 + $0x248] sm:$0xff] %v6221_v13  ;;  %6328 = vst [vmem:[#allocation2 + $0x250] sm:$0xff] %v6222_v51  ;;  %v6239_v49 = vmax.f32 %v21845_v39, 0.0  ;;  %v19028_v17 = vld [vmem:[#allocation2 + $0x60] ss:$4 sm:$0xff]  ;;  %v6243_v6 = vmax.f32 %v18885_v7, 0.0 }
 0x452   :  { %6329 = vst [vmem:[#allocation2 + $0x258] sm:$0xff] %v6223_v21  ;;  %6330 = vst [vmem:[#allocation2 + $0x260] sm:$0xff] %v6224_v43  ;;  %v7135_v27 = vld [vmem:[%s21194_s3 + $0x10] sm:$0xff]  ;;  %v7136_v57 = vld [vmem:[%s21194_s3 + $0x18] sm:$0xff]  ;;  %v6245_v47 = vmax.f32 %v18893_v33, 0.0  ;;  %v6246_v13 = vmax.f32 %v18897_v45, 0.0 }
 0x453   :  { %6331 = vst [vmem:[#allocation2 + $0x268] sm:$0xff] %v6225_v63  ;;  %6332 = vst [vmem:[#allocation2 + $0x270] sm:$0xff] %v6226_v24  ;;  %v7138_v19 = vld [vmem:[%s21194_s3 + $0x28] sm:$0xff]  ;;  %v7139_v61 = vld [vmem:[%s21194_s3 + $0x30] sm:$0xff]  ;;  %v6253_v25 = vmax.f32 %v18921_v44, 0.0  ;;  %v6468_v44 = vmax.f32 %v19014_v62, %v19018_v34 }
 0x454   :  { %6333 = vst [vmem:[#allocation2 + $0x278] sm:$0xff] %v6227_v22  ;;  %6334 = vst [vmem:[#allocation2 + $0x280] sm:$0xff] %v6228_v14  ;;  %v7140_v53 = vld [vmem:[%s21194_s3 + $0x38] sm:$0xff]  ;;  %v21846_v48 = vld [vmem:[#allocation30_spill] sm:$0xff]  ;;  %v19081_v10 = vpack.c.bf16 %v7138_v19, %v7137_v16 }
 0x455   :  { %6335 = vst [vmem:[#allocation2 + $0x288] sm:$0xff] %v6229_v11  ;;  %6336 = vst [vmem:[#allocation2 + $0x290] sm:$0xff] %v6230_v60  ;;  %v6420_v4 = vld [vmem:[#allocation2 + $0x61] ss:$4 sm:$0xff]  ;;  %v6247_v51 = vmax.f32 %v21846_v48, 0.0 }
 0x456   :  { %6337 = vst [vmem:[#allocation2 + $0x298] sm:$0xff] %v6231_v23  ;;  %6338 = vst [vmem:[#allocation2 + $0x2a0] sm:$0xff] %v6232_v26  ;;  %v21847_v46 = vld [vmem:[#allocation33_spill] sm:$0xff]  ;;  %v21848_v7 = vld [vmem:[#allocation32_spill] sm:$0xff]  ;;  %v6470_v20 = vmax.f32 %v19028_v17, %v6420_v4 }
 0x457   :  { %6339 = vst [vmem:[#allocation2 + $0x2a8] sm:$0xff] %v6233_v5  ;;  %6340 = vst [vmem:[#allocation2 + $0x2b0] sm:$0xff] %v6234_v42  ;;  %v6248_v21 = vmax.f32 %v21847_v46, 0.0  ;;  %v7141_v58 = vld [vmem:[%s21194_s3 + $0x40] sm:$0xff]  ;;  %v7142_v2 = vld [vmem:[%s21194_s3 + $0x48] sm:$0xff]  ;;  %v6249_v35 = vmax.f32 %v21848_v7, 0.0  ;;  %v19079_v5 = vpack.c.bf16 %v7136_v57, %v7135_v27  ;;  %v19083_v42 = vpack.c.bf16 %v7140_v53, %v7139_v61 }
 0x458   :  { %6341 = vst [vmem:[#allocation2 + $0x2b8] sm:$0xff] %v6235_v12  ;;  %6342 = vst [vmem:[#allocation2 + $0x2c0] sm:$0xff] %v6236_v28  ;;  %v21849_v33 = vld [vmem:[#allocation35_spill] sm:$0xff]  ;;  %v21850_v55 = vld [vmem:[#allocation34_spill] sm:$0xff] }
 0x459   :  { %6343 = vst [vmem:[#allocation2 + $0x2c8] sm:$0xff] %v6237_v41  ;;  %6344 = vst [vmem:[#allocation2 + $0x2d0] sm:$0xff] %v6238_v15  ;;  %v6250_v45 = vmax.f32 %v21849_v33, 0.0  ;;  %v6251_v43 = vmax.f32 %v21850_v55, 0.0  ;;  %v6495_v63 = vld [vmem:[#allocation2 + $0x2] ss:$4 sm:$0xff]  ;;  %v19087_v15 = vpack.c.bf16 %v7142_v2, %v7141_v58 }
 0x45a   :  { %6345 = vst [vmem:[#allocation2 + $0x2d8] sm:$0xff] %v6239_v49  ;;  %6346 = vst [vmem:[#allocation2 + $0x2e0] sm:$0xff] %v6240_v0  ;;  %v6368_v24 = vld [vmem:[#allocation2 + $0x80] ss:$4 sm:$0xff]  ;;  %v6497_v22 = vld [vmem:[#allocation2 + $0x22] ss:$4 sm:$0xff]  ;;  %v6548_v32 = vmax.f32 %v6467_v9, %v6495_v63 }
 0x45b   :  { %6347 = vst [vmem:[#allocation2 + $0x2e8] sm:$0xff] %v6241_v1  ;;  %6348 = vst [vmem:[#allocation2 + $0x2f0] sm:$0xff] %v6242_v36  ;;  %v6499_v14 = vld [vmem:[#allocation2 + $0x42] ss:$4 sm:$0xff]  ;;  %v6422_v11 = vld [vmem:[#allocation2 + $0x81] ss:$4 sm:$0xff]  ;;  %v6549_v12 = vmax.f32 %v6468_v44, %v6497_v22 }
 0x45c   :  { %6349 = vst [vmem:[#allocation2 + $0x2f8] sm:$0xff] %v6243_v6  ;;  %6350 = vst [vmem:[#allocation2 + $0x300] sm:$0xff] %v6244_v56  ;;  %v6576_v40 = vld [vmem:[#allocation2 + $0x3] ss:$4 sm:$0xff]  ;;  %v6501_v23 = vld [vmem:[#allocation2 + $0x62] ss:$4 sm:$0xff]  ;;  %v6471_v8 = vmax.f32 %v6368_v24, %v6422_v11  ;;  %v6550_v3 = vmax.f32 %v6469_v50, %v6499_v14 }
 0x45d   :  { %6351 = vst [vmem:[#allocation2 + $0x308] sm:$0xff] %v6245_v47  ;;  %6352 = vst [vmem:[#allocation2 + $0x310] sm:$0xff] %v6246_v13  ;;  %v6578_v60 = vld [vmem:[#allocation2 + $0x23] ss:$4 sm:$0xff]  ;;  %v6370_v26 = vld [vmem:[#allocation2 + $0xa0] ss:$4 sm:$0xff]  ;;  %v6551_v28 = vmax.f32 %v6470_v20, %v6501_v23  ;;  %v6629_v39 = vmax.f32 %v6548_v32, %v6576_v40 }
 0x45e   :  { %6353 = vst [vmem:[#allocation2 + $0x318] sm:$0xff] %v6247_v51  ;;  %6354 = vst [vmem:[#allocation2 + $0x320] sm:$0xff] %v6248_v21  ;;  %v6580_v59 = vld [vmem:[#allocation2 + $0x43] ss:$4 sm:$0xff]  ;;  %v6424_v38 = vld [vmem:[#allocation2 + $0xa1] ss:$4 sm:$0xff]  ;;  %v6630_v49 = vmax.f32 %v6549_v12, %v6578_v60 }
 0x45f   :  { %6355 = vst [vmem:[#allocation2 + $0x328] sm:$0xff] %v6249_v35  ;;  %6356 = vst [vmem:[#allocation2 + $0x330] sm:$0xff] %v6250_v45  ;;  %v6503_v52 = vld [vmem:[#allocation2 + $0x82] ss:$4 sm:$0xff]  ;;  %v6372_v62 = vld [vmem:[#allocation2 + $0xc0] ss:$4 sm:$0xff]  ;;  %v6472_v29 = vmax.f32 %v6370_v26, %v6424_v38  ;;  %v6631_v0 = vmax.f32 %v6550_v3, %v6580_v59  ;;  %v6683_v36 = vcombine.high %v6629_v39, %v6629_v39 }
 0x460   :  { %6357 = vst [vmem:[#allocation2 + $0x338] sm:$0xff] %v6251_v43  ;;  %6359 = vst [vmem:[#allocation2 + $0x348] sm:$0xff] %v6253_v25  ;;  %v6426_v18 = vld [vmem:[#allocation2 + $0xc1] ss:$4 sm:$0xff]  ;;  %v6582_v34 = vld [vmem:[#allocation2 + $0x63] ss:$4 sm:$0xff]  ;;  %v6552_v31 = vmax.f32 %v6471_v8, %v6503_v52  ;;  %v6700_v4 = vcombine.high %v6630_v49, %v6630_v49 }
 0x461   :  { %v6584_v37 = vld [vmem:[#allocation2 + $0x83] ss:$4 sm:$0xff]  ;;  %v6473_v41 = vmax.f32 %v6372_v62, %v6426_v18  ;;  %v19085_v54 = vld [vmem:[#allocation2 + $0xe0] ss:$4 sm:$0xff]  ;;  %v19089_v17 = vmax.f32 %v6551_v28, %v6582_v34  ;;  %v6505_v27 = vld [vmem:[#allocation2 + $0xa2] ss:$4 sm:$0xff]  ;;  %v6717_v48 = vcombine.high %v6631_v0, %v6631_v0 }
 0x462   :  { %v6507_v57 = vld [vmem:[#allocation2 + $0xc2] ss:$4 sm:$0xff]  ;;  %v19091_v16 = vld [vmem:[#allocation2 + $0xe1] ss:$4 sm:$0xff]  ;;  %v19093_v19 = vmax.f32 %v6552_v31, %v6584_v37  ;;  %v19095_v61 = vmax.f32 %v6472_v29, %v6505_v27  ;;  %v21855_v35 = vmov 0 }
 0x463   :  { %v19097_v53 = vmax.f32 %v6473_v41, %v6507_v57  ;;  %v6474_v1 = vmax.f32 %v19085_v54, %v19091_v16  ;;  %v21853_v6 = vld [vmem:[#allocation79_spill] sm:$0xff]  ;;  %v6734_v46 = vcombine.high %v19089_v17, %v19089_v17  ;;  %v21856_v35 = vsel %vm19131_vm7, 4294967295, %v21855_v35 }
 0x464   :  { %v19102_v56 = vrot.slane %v6629_v39, %v21853_v6  ;;  %v19105_v47 = vrot.slane %v6630_v49, %v21853_v6  ;;  %v19111_v13 = vrot.slane %v6631_v0, %v21853_v6  ;;  %v19115_v51 = vrot.slane %v19089_v17, %v21853_v6  ;;  %21857 = vst [vmem:[#allocation36_spill] sm:$0xff] %v21856_v35 }
 0x465   :  { %v19120_v21 = vrot.slane %v6683_v36, %v21853_v6  ;;  %v19127_v2 = vrot.slane %v6700_v4, %v21853_v6  ;;  %v19142_v43 = vrot.slane %v6717_v48, %v21853_v6 }
 0x466   :  { %v19124_v58 = vcombine.high %v19102_v56, %v19102_v56  ;;  %v11841_v7 = vrot.slane %v19102_v56, 9  ;;  %v7167_v33 = vrot.slane %v19105_v47, 7  ;;  %v19138_v45 = vcombine.high %v19105_v47, %v19105_v47 }
 0x467   :  { %21854 = vst [vmem:[#allocation37_spill] sm:$0xff] %v19120_v21  ;;  %v7179_v55 = vrot.slane %v19111_v13, 7  ;;  %v19146_v25 = vcombine.high %v19120_v21, %v19120_v21  ;;  %v7161_v30 = vrot.slane %v19120_v21, 7  ;;  %v19152_v24 = vcombine.high %v19127_v2, %v19127_v2 }
 0x468   :  { %v7158_v63 = vrot.slane %v19124_v58, 7  ;;  %v7169_v9 = vrot.slane %v7167_v33, 2  ;;  %v7170_v44 = vrot.slane %v19138_v45, 7  ;;  %v7173_v22 = vrot.slane %v19127_v2, 7 }
 0x469   :  { %v19158_v50 = vcombine.high %v19111_v13, %v19111_v13  ;;  %v7163_v11 = vrot.slane %v7161_v30, 2  ;;  %v7164_v40 = vrot.slane %v19146_v25, 7  ;;  %v7176_v8 = vrot.slane %v19152_v24, 7 }
 0x46a   :  { %v7159_v14 = vsel %vm19131_vm7, %v11841_v7, %v7158_v63  ;;  %v7160_v20 = vrot.slane %v7158_v63, 2  ;;  %v7171_v60 = vsel %vm19131_vm7, %v7169_v9, %v7170_v44  ;;  %v7172_v59 = vrot.slane %v7170_v44, 2 }
 0x46b   :  { %v7175_v23 = vrot.slane %v7173_v22, 2  ;;  %v7165_v38 = vsel %vm19131_vm7, %v7163_v11, %v7164_v40  ;;  %v7166_v32 = vrot.slane %v7164_v40, 2  ;;  %v19172_v12 = vcombine.high %v19142_v43, %v19142_v43 }
 0x46c   :  { %v7162_v26 = vsel %vm19131_vm7, %v7160_v20, %v7161_v30  ;;  %v7174_v28 = vsel %vm19131_vm7, %v7172_v59, %v7173_v22  ;;  %v7178_v62 = vrot.slane %v7176_v8, 2  ;;  %v7181_v31 = vrot.slane %v7179_v55, 2 }
 0x46d   :  { %v7486_v3 = vcombine.low %v7159_v14, %v7162_v26  ;;  %v7177_v52 = vsel %vm19131_vm7, %v7175_v23, %v7176_v8  ;;  %v7168_v18 = vsel %vm19131_vm7, %v7166_v32, %v7167_v33  ;;  %v7503_v34 = vcombine.low %v7171_v60, %v7174_v28  ;;  %v6586_v26 = vld [vmem:[#allocation2 + $0xa3] ss:$4 sm:$0xff] }
 0x46e   :  { %v7182_v37 = vrot.slane %v19158_v50, 7  ;;  %v7487_v29 = vcombine.low %v7165_v38, %v7168_v18  ;;  %v7180_v39 = vsel %vm19131_vm7, %v7178_v62, %v7179_v55  ;;  %v7185_v49 = vrot.slane %v19142_v43, 7 }
 0x46f   :  { %v7494_v41 = vrot.slane %v7486_v3, %v21853_v6  ;;  %v7504_v0 = vcombine.low %v7177_v52, %v7180_v39  ;;  %v7511_v17 = vrot.slane %v7503_v34, %v21853_v6  ;;  %v7188_v48 = vrot.slane %v19172_v12, 7  ;;  %v21858_v52 = vld [vmem:[#allocation66_spill] sm:$0xff] }
 0x470   :  { %v7183_v27 = vsel %vm19131_vm7, %v7181_v31, %v7182_v37  ;;  %v7184_v57 = vrot.slane %v7182_v37, 2  ;;  %v7501_v36 = vrot.slane %v7487_v29, %v21853_v6  ;;  %v7187_v4 = vrot.slane %v7185_v49, 2 }
 0x471   :  { %v7191_v7 = vrot.slane %v19115_v51, 7  ;;  %v7518_v33 = vrot.slane %v7504_v0, %v21853_v6  ;;  %v19195_v63 = vrot.slane %v6734_v46, %v21853_v6  ;;  %v19199_v30 = vcombine.high %v19115_v51, %v19115_v51 }
 0x472   :  { %v7186_v55 = vsel %vm19131_vm7, %v7184_v57, %v7185_v49  ;;  %v7502_v9 = vcombine.low %v7494_v41, %v7501_v36  ;;  %v7189_v44 = vsel %vm19131_vm7, %v7187_v4, %v7188_v48  ;;  %v7190_v22 = vrot.slane %v7188_v48, 2 }
 0x473   :  { %v7520_v14 = vcombine.low %v7183_v27, %v7186_v55  ;;  %v7519_v20 = vcombine.low %v7511_v17, %v7518_v33  ;;  %v19205_v11 = vcombine.high %v19195_v63, %v19195_v63  ;;  %v19209_v40 = vrot.slane %v19093_v19, %v21853_v6  ;;  %v6588_v55 = vld [vmem:[#allocation2 + $0xc3] ss:$4 sm:$0xff] }
 0x474   :  { %v7193_v46 = vrot.slane %v7191_v7, 2  ;;  %13498 = vmatprep.mubr.f32.mxu1 %v7502_v9  ;;  %v7192_v60 = vsel %vm19131_vm7, %v7190_v22, %v7191_v7  ;;  %v7194_v23 = vrot.slane %v19199_v30, 7  ;;  %v7197_v8 = vrot.slane %v19195_v63, 7 }
 0x475   :  { %v7528_v59 = vrot.slane %v7520_v14, %v21853_v6  ;;  %13499 = vmatmul.mubr.f32.vlgmr.msra.gmra.mrb[106].mxu1 %v7519_v20  ;;  %v7521_v38 = vcombine.low %v7189_v44, %v7192_v60  ;;  %v7200_v32 = vrot.slane %v19205_v11, 7  ;;  %v7203_v3 = vrot.slane %v19209_v40, 7 }
 0x476   :  { %v6634_v28 = vmax.f32 %v19095_v61, %v6586_v26  ;;  %13997 = vmatpush3.bf16.msra.mxu1 %v21858_v52  ;;  %v7195_v62 = vsel %vm19131_vm7, %v7193_v46, %v7194_v23  ;;  %v7196_v18 = vrot.slane %v7194_v23, 2  ;;  %v7199_v34 = vrot.slane %v7197_v8, 2  ;;  %v6509_v52 = vld [vmem:[#allocation2 + $0xe2] ss:$4 sm:$0xff] }
 0x477   :  { %v6751_v31 = vcombine.high %v19093_v19, %v19093_v19  ;;  %v7535_v37 = vrot.slane %v7521_v38, %v21853_v6  ;;  %v7202_v29 = vrot.slane %v7200_v32, 2  ;;  %v19227_v41 = vcombine.high %v19209_v40, %v19209_v40  ;;  %13999 = vmatprep.subr.bf16.mxu1 %v19079_v5 }
 0x478   :  { %v19230_v39 = vrot.slane %v6634_v28, %v21853_v6  ;;  %v7198_v61 = vsel %vm19131_vm7, %v7196_v18, %v7197_v8  ;;  %v7201_v49 = vsel %vm19131_vm7, %v7199_v34, %v7200_v32  ;;  %v7205_v0 = vrot.slane %v7203_v3, 2 }
 0x479   :  { %v19238_v19 = vrot.slane %v6751_v31, %v21853_v6  ;;  %v7536_v17 = vcombine.low %v7528_v59, %v7535_v37  ;;  %v7204_v27 = vsel %vm19131_vm7, %v7202_v29, %v7203_v3  ;;  %v7537_v57 = vcombine.low %v7195_v62, %v7198_v61  ;;  %v6376_v61 = vld [vmem:[#allocation2 + $0x100] ss:$4 sm:$0xff] }
 0x47a   :  { %v7206_v36 = vrot.slane %v19227_v41, 7  ;;  %v7538_v4 = vcombine.low %v7201_v49, %v7204_v27  ;;  %v7215_v33 = vrot.slane %v19230_v39, 7  ;;  %14001 = vmatpush3.bf16.msra.mxu1 %v19079_v5  ;;  %v6635_v14 = vmax.f32 %v19097_v53, %v6588_v55  ;;  %v6430_v49 = vld [vmem:[#allocation2 + $0x101] ss:$4 sm:$0xff] }
 0x47b   :  { %v19245_v48 = vcombine.high %v19238_v19, %v19238_v19  ;;  %v7209_v7 = vrot.slane %v19238_v19, 7  ;;  %13501 = vmatprep.mubr.f32.mxu1 %v7536_v17  ;;  %v7545_v9 = vrot.slane %v7537_v57, %v21853_v6  ;;  %14003 = vmatprep.subr.bf16.mxu1 %v19081_v10  ;;  %v6768_v59 = vcombine.high %v6634_v28, %v6634_v28  ;;  %v6590_v17 = vld [vmem:[#allocation2 + $0xe3] ss:$4 sm:$0xff] }
 0x47c   :  { %v7207_v44 = vsel %vm19131_vm7, %v7205_v0, %v7206_v36  ;;  %v7208_v22 = vrot.slane %v7206_v36, 2  ;;  %v7552_v20 = vrot.slane %v7538_v4, %v21853_v6  ;;  %v19261_v23 = vcombine.high %v19230_v39, %v19230_v39 }
 0x47d   :  { %v7211_v46 = vrot.slane %v7209_v7, 2  ;;  %v7212_v60 = vrot.slane %v19245_v48, 7  ;;  %v19264_v8 = vrot.slane %v6635_v14, %v21853_v6  ;;  %v7217_v26 = vrot.slane %v7215_v33, 2 }
 0x47e   :  { %v7210_v5 = vsel %vm19131_vm7, %v7208_v22, %v7209_v7  ;;  %v7553_v53 = vcombine.low %v7545_v9, %v7552_v20  ;;  %14005 = vmatpush3.bf16.msra.mxu1 %v19081_v10  ;;  %v19270_v28 = vrot.slane %v6768_v59, %v21853_v6  ;;  %v7218_v62 = vrot.slane %v19261_v23, 7 }
 0x47f   :  { %v7213_v38 = vsel %vm19131_vm7, %v7211_v46, %v7212_v60  ;;  %v7214_v32 = vrot.slane %v7212_v60, 2  ;;  %v7554_v3 = vcombine.low %v7207_v44, %v7210_v5  ;;  %v7227_v18 = vrot.slane %v19264_v8, 7  ;;  %14007 = vmatprep.subr.bf16.mxu1 %v19083_v42 }
 0x480   :  { %v6555_v34 = vmax.f32 %v6474_v1, %v6509_v52  ;;  %13502 = vmatmul.mubr.f32.gmra.mrb[108].mxu1 %v7553_v53  ;;  %v6785_v10 = vcombine.high %v6635_v14, %v6635_v14  ;;  %v19283_v29 = vcombine.high %v19264_v8, %v19264_v8  ;;  %v19287_v54 = vcombine.high %v19270_v28, %v19270_v28 }
 0x481   :  { %v7216_v31 = vsel %vm19131_vm7, %v7214_v32, %v7215_v33  ;;  %v7562_v37 = vrot.slane %v7554_v3, %v21853_v6  ;;  %v7219_v16 = vsel %vm19131_vm7, %v7217_v26, %v7218_v62  ;;  %v7220_v1 = vrot.slane %v7218_v62, 2  ;;  %v6511_v32 = vld [vmem:[#allocation2 + $0x102] ss:$4 sm:$0xff] }
 0x482   :  { %v7555_v0 = vcombine.low %v7213_v38, %v7216_v31  ;;  %v7221_v27 = vrot.slane %v19270_v28, 7  ;;  %v6636_v57 = vmax.f32 %v6555_v34, %v6590_v17  ;;  %v19293_v36 = vrot.slane %v6785_v10, %v21853_v6  ;;  %14009 = vmatpush3.bf16.msra.mxu1 %v19083_v42  ;;  %v6432_v17 = vld [vmem:[#allocation2 + $0x121] ss:$4 sm:$0xff] }
 0x483   :  { %v7229_v4 = vrot.slane %v7227_v18, 2  ;;  %v7224_v33 = vrot.slane %v19287_v54, 7  ;;  %v7230_v55 = vrot.slane %v19283_v29, 7  ;;  %v6475_v9 = vmax.f32 %v6376_v61, %v6430_v49  ;;  %14011 = vmatprep.subr.bf16.mxu1 %v19087_v15  ;;  %v6592_v49 = vld [vmem:[#allocation2 + $0x103] ss:$4 sm:$0xff] }
 0x484   :  { %v7569_v7 = vrot.slane %v7555_v0, %v21853_v6  ;;  %v7222_v44 = vsel %vm19131_vm7, %v7220_v1, %v7221_v27  ;;  %v7223_v22 = vrot.slane %v7221_v27, 2  ;;  %v19304_v14 = vcombine.high %v19293_v36, %v19293_v36 }
 0x485   :  { %v19307_v20 = vrot.slane %v6636_v57, %v21853_v6  ;;  %v7226_v46 = vrot.slane %v7224_v33, 2  ;;  %v7571_v60 = vcombine.low %v7219_v16, %v7222_v44  ;;  %v7231_v59 = vsel %vm19131_vm7, %v7229_v4, %v7230_v55 }
 0x486   :  { %v7570_v42 = vcombine.low %v7562_v37, %v7569_v7  ;;  %v7225_v5 = vsel %vm19131_vm7, %v7223_v22, %v7224_v33  ;;  %v7232_v26 = vrot.slane %v7230_v55, 2  ;;  %v7233_v53 = vrot.slane %v19293_v36, 7  ;;  %14013 = vmatpush3.bf16.msra.mxu1 %v19087_v15 }
 0x487   :  { %v7236_v38 = vrot.slane %v19304_v14, 7  ;;  %v7228_v3 = vsel %vm19131_vm7, %v7226_v46, %v7227_v18  ;;  %v7579_v52 = vrot.slane %v7571_v60, %v21853_v6  ;;  %v7239_v62 = vrot.slane %v19307_v20, 7  ;;  %v6378_v18 = vld [vmem:[#allocation2 + $0x120] ss:$4 sm:$0xff] }
 0x488   :  { %13504 = vmatprep.mubr.f32.mxu1 %v7570_v42  ;;  %v6556_v34 = vmax.f32 %v6475_v9, %v6511_v32  ;;  %v7572_v31 = vcombine.low %v7225_v5, %v7228_v3  ;;  %v7234_v37 = vsel %vm19131_vm7, %v7232_v26, %v7233_v53  ;;  %v7235_v10 = vrot.slane %v7233_v53, 2 }
 0x489   :  { %v7238_v61 = vrot.slane %v7236_v38, 2  ;;  %v7588_v0 = vcombine.low %v7231_v59, %v7234_v37  ;;  %v6802_v1 = vcombine.high %v6636_v57, %v6636_v57  ;;  %v19324_v15 = vcombine.high %v19307_v20, %v19307_v20 }
 0x48a   :  { %v6637_v16 = vmax.f32 %v6556_v34, %v6592_v49  ;;  %v7586_v27 = vrot.slane %v7572_v31, %v21853_v6  ;;  %v7237_v4 = vsel %vm19131_vm7, %v7235_v10, %v7236_v38  ;;  %v7241_v33 = vrot.slane %v7239_v62, 2  ;;  %v6513_v38 = vld [vmem:[#allocation2 + $0x122] ss:$4 sm:$0xff]  ;;  %v6380_v49 = vld [vmem:[#allocation2 + $0x140] ss:$4 sm:$0xff] }
 0x48b   :  { %21859 = vst [vmem:[#allocation39_spill] sm:$0xff] %v19324_v15  ;;  %v7240_v7 = vsel %vm19131_vm7, %v7238_v61, %v7239_v62  ;;  %v7596_v9 = vrot.slane %v7588_v0, %v21853_v6  ;;  %v19333_v57 = vrot.slane %v6802_v1, %v21853_v6  ;;  %v7242_v42 = vrot.slane %v19324_v15, 7  ;;  %v6594_v62 = vld [vmem:[#allocation2 + $0x123] ss:$4 sm:$0xff]  ;;  %v6434_v0 = vld [vmem:[#allocation2 + $0x141] ss:$4 sm:$0xff] }
 0x48c   :  { %v7589_v55 = vcombine.low %v7237_v4, %v7240_v7  ;;  %v19336_v44 = vrot.slane %v6637_v16, %v21853_v6  ;;  %v7587_v22 = vcombine.low %v7579_v52, %v7586_v27  ;;  %v6476_v46 = vmax.f32 %v6378_v18, %v6432_v17 }
 0x48d   :  { %21860 = vst [vmem:[#allocation38_spill] sm:$0xff] %v19333_v57  ;;  %v6819_v60 = vcombine.high %v6637_v16, %v6637_v16  ;;  %v19342_v5 = vcombine.high %v19333_v57, %v19333_v57  ;;  %v7245_v26 = vrot.slane %v19333_v57, 7  ;;  %v7243_v32 = vsel %vm19131_vm7, %v7241_v33, %v7242_v42 }
 0x48e   :  { %21861 = vst [vmem:[#allocation41_spill] sm:$0xff] %v19336_v44  ;;  %v7603_v59 = vrot.slane %v7589_v55, %v21853_v6  ;;  %v7251_v53 = vrot.slane %v19336_v44, 7  ;;  %13505 = vmatmul.mubr.f32.gmra.mrb[110].mxu1 %v7587_v22  ;;  %v7244_v3 = vrot.slane %v7242_v42, 2  ;;  %v6557_v52 = vmax.f32 %v6476_v46, %v6513_v38 }
 0x48f   :  { %v19349_v34 = vrot.slane %v6819_v60, %v21853_v6  ;;  %v7247_v37 = vrot.slane %v7245_v26, 2  ;;  %v7248_v10 = vrot.slane %v19342_v5, 7  ;;  %v19354_v61 = vcombine.high %v19336_v44, %v19336_v44 }
 0x490   :  { %v7604_v31 = vcombine.low %v7596_v9, %v7603_v59  ;;  %v7246_v16 = vsel %vm19131_vm7, %v7244_v3, %v7245_v26  ;;  %v6638_v1 = vmax.f32 %v6557_v52, %v6594_v62  ;;  %v7253_v17 = vrot.slane %v7251_v53, 2  ;;  %v6515_v62 = vld [vmem:[#allocation2 + $0x142] ss:$4 sm:$0xff] }
 0x491   :  { %21862 = vst [vmem:[#allocation40_spill] sm:$0xff] %v19349_v34  ;;  %21863 = vst [vmem:[#allocation43_spill] sm:$0xff] %v19354_v61  ;;  %v19360_v18 = vcombine.high %v19349_v34, %v19349_v34  ;;  %v7249_v27 = vsel %vm19131_vm7, %v7247_v37, %v7248_v10  ;;  %v7250_v4 = vrot.slane %v7248_v10, 2  ;;  %v7605_v7 = vcombine.low %v7243_v32, %v7246_v16 }
 0x492   :  { %13507 = vmatprep.mubr.f32.mxu1 %v7604_v31  ;;  %v7254_v33 = vrot.slane %v19354_v61, 7  ;;  %v19366_v55 = vrot.slane %v6638_v1, %v21853_v6  ;;  %v7257_v9 = vrot.slane %v19349_v34, 7  ;;  %v6477_v42 = vmax.f32 %v6380_v49, %v6434_v0  ;;  %v6382_v49 = vld [vmem:[#allocation2 + $0x160] ss:$4 sm:$0xff]  ;;  %v6436_v0 = vld [vmem:[#allocation2 + $0x161] ss:$4 sm:$0xff] }
 0x493   :  { %21864 = vst [vmem:[#allocation42_spill] sm:$0xff] %v19360_v18  ;;  %v7260_v22 = vrot.slane %v19360_v18, 7  ;;  %v7252_v46 = vsel %vm19131_vm7, %v7250_v4, %v7251_v53  ;;  %v7613_v60 = vrot.slane %v7605_v7, %v21853_v6  ;;  %v6836_v10 = vcombine.high %v6638_v1, %v6638_v1  ;;  %v6596_v7 = vld [vmem:[#allocation2 + $0x143] ss:$4 sm:$0xff] }
 0x494   :  { %21865 = vst [vmem:[#allocation45_spill] sm:$0xff] %v19366_v55  ;;  %v7255_v59 = vsel %vm19131_vm7, %v7253_v17, %v7254_v33  ;;  %v7256_v26 = vrot.slane %v7254_v33, 2  ;;  %v7606_v38 = vcombine.low %v7249_v27, %v7252_v46  ;;  %v7259_v32 = vrot.slane %v7257_v9, 2 }
 0x495   :  { %v7262_v3 = vrot.slane %v7260_v22, 2  ;;  %v7263_v52 = vrot.slane %v19366_v55, 7  ;;  %v6558_v37 = vmax.f32 %v6477_v42, %v6515_v62  ;;  %v19380_v53 = vcombine.high %v19366_v55, %v19366_v55 }
 0x496   :  { %v7258_v31 = vsel %vm19131_vm7, %v7256_v26, %v7257_v9  ;;  %v7620_v16 = vrot.slane %v7606_v38, %v21853_v6  ;;  %v7261_v17 = vsel %vm19131_vm7, %v7259_v32, %v7260_v22  ;;  %v19388_v1 = vrot.slane %v6836_v10, %v21853_v6 }
 0x497   :  { %21866 = vst [vmem:[#allocation44_spill] sm:$0xff] %v19380_v53  ;;  %v7264_v27 = vsel %vm19131_vm7, %v7262_v3, %v7263_v52  ;;  %v7622_v4 = vcombine.low %v7255_v59, %v7258_v31  ;;  %v6639_v9 = vmax.f32 %v6558_v37, %v6596_v7  ;;  %v7265_v42 = vrot.slane %v7263_v52, 2  ;;  %v6517_v3 = vld [vmem:[#allocation2 + $0x162] ss:$4 sm:$0xff] }
 0x498   :  { %v7623_v33 = vcombine.low %v7261_v17, %v7264_v27  ;;  %21867 = vst [vmem:[#allocation47_spill] sm:$0xff] %v19388_v1  ;;  %v7621_v46 = vcombine.low %v7613_v60, %v7620_v16  ;;  %v7266_v62 = vrot.slane %v19380_v53, 7  ;;  %v6478_v38 = vmax.f32 %v6382_v49, %v6436_v0  ;;  %v6598_v17 = vld [vmem:[#allocation2 + $0x163] ss:$4 sm:$0xff] }
 0x499   :  { %v7630_v26 = vrot.slane %v7622_v4, %v21853_v6  ;;  %v19395_v22 = vcombine.high %v19388_v1, %v19388_v1  ;;  %v19398_v59 = vrot.slane %v6639_v9, %v21853_v6  ;;  %v7269_v32 = vrot.slane %v19388_v1, 7  ;;  %v6519_v1 = vld [vmem:[#allocation2 + $0x182] ss:$4 sm:$0xff] }
 0x49a   :  { %v7637_v55 = vrot.slane %v7623_v33, %v21853_v6  ;;  %13508 = vmatmul.mubr.f32.gmra.mrb[112].mxu1 %v7621_v46  ;;  %v7267_v60 = vsel %vm19131_vm7, %v7265_v42, %v7266_v62  ;;  %v7268_v52 = vrot.slane %v7266_v62, 2  ;;  %v6559_v31 = vmax.f32 %v6478_v38, %v6517_v3  ;;  %v6384_v42 = vld [vmem:[#allocation2 + $0x180] ss:$4 sm:$0xff] }
 0x49b   :  { %21868 = vst [vmem:[#allocation46_spill] sm:$0xff] %v19395_v22  ;;  %21869 = vst [vmem:[#allocation49_spill] sm:$0xff] %v19398_v59  ;;  %v6853_v37 = vcombine.high %v6639_v9, %v6639_v9  ;;  %v7271_v49 = vrot.slane %v7269_v32, 2  ;;  %v7272_v0 = vrot.slane %v19395_v22, 7  ;;  %v7275_v16 = vrot.slane %v19398_v59, 7 }
 0x49c   :  { %v7638_v10 = vcombine.low %v7630_v26, %v7637_v55  ;;  %v7270_v27 = vsel %vm19131_vm7, %v7268_v52, %v7269_v32  ;;  %v6640_v4 = vmax.f32 %v6559_v31, %v6598_v17  ;;  %v19412_v33 = vcombine.high %v19398_v59, %v19398_v59  ;;  %v6438_v9 = vld [vmem:[#allocation2 + $0x181] ss:$4 sm:$0xff] }
 0x49d   :  { %v19408_v7 = vrot.slane %v6853_v37, %v21853_v6  ;;  %v7273_v55 = vsel %vm19131_vm7, %v7271_v49, %v7272_v0  ;;  %v7274_v46 = vrot.slane %v7272_v0, 2  ;;  %v7639_v26 = vcombine.low %v7267_v60, %v7270_v27  ;;  %v6386_v60 = vld [vmem:[#allocation2 + $0x1a0] ss:$4 sm:$0xff]  ;;  %v6440_v0 = vld [vmem:[#allocation2 + $0x1a1] ss:$4 sm:$0xff] }
 0x49e   :  { %21871 = vst [vmem:[#allocation51_spill] sm:$0xff] %v19412_v33  ;;  %13510 = vmatprep.mubr.f32.mxu1 %v7638_v10  ;;  %v7277_v62 = vrot.slane %v7275_v16, 2  ;;  %v19421_v32 = vrot.slane %v6640_v4, %v21853_v6  ;;  %v7278_v3 = vrot.slane %v19412_v33, 7  ;;  %v6479_v10 = vmax.f32 %v6384_v42, %v6438_v9  ;;  %v6600_v9 = vld [vmem:[#allocation2 + $0x183] ss:$4 sm:$0xff] }
 0x49f   :  { %21870 = vst [vmem:[#allocation48_spill] sm:$0xff] %v19408_v7  ;;  %v19418_v38 = vcombine.high %v19408_v7, %v19408_v7  ;;  %v7281_v52 = vrot.slane %v19408_v7, 7  ;;  %v7276_v31 = vsel %vm19131_vm7, %v7274_v46, %v7275_v16  ;;  %v7647_v37 = vrot.slane %v7639_v26, %v21853_v6 }
 0x4a0   :  { %21873 = vst [vmem:[#allocation53_spill] sm:$0xff] %v19421_v32  ;;  %v6870_v49 = vcombine.high %v6640_v4, %v6640_v4  ;;  %v7640_v17 = vcombine.low %v7273_v55, %v7276_v31  ;;  %v7279_v27 = vsel %vm19131_vm7, %v7277_v62, %v7278_v3  ;;  %v7280_v59 = vrot.slane %v7278_v3, 2 }
 0x4a1   :  { %21872 = vst [vmem:[#allocation50_spill] sm:$0xff] %v19418_v38  ;;  %v7283_v53 = vrot.slane %v7281_v52, 2  ;;  %v7284_v33 = vrot.slane %v19418_v38, 7  ;;  %v7287_v7 = vrot.slane %v19421_v32, 7  ;;  %v6560_v22 = vmax.f32 %v6479_v10, %v6519_v1 }
 0x4a2   :  { %v19433_v16 = vrot.slane %v6870_v49, %v21853_v6  ;;  %v7654_v42 = vrot.slane %v7640_v17, %v21853_v6  ;;  %v7282_v4 = vsel %vm19131_vm7, %v7280_v59, %v7281_v52  ;;  %v19440_v55 = vcombine.high %v19421_v32, %v19421_v32 }
 0x4a3   :  { %v6480_v46 = vmax.f32 %v6386_v60, %v6440_v0  ;;  %v7285_v26 = vsel %vm19131_vm7, %v7283_v53, %v7284_v33  ;;  %v7286_v62 = vrot.slane %v7284_v33, 2  ;;  %v7656_v3 = vcombine.low %v7279_v27, %v7282_v4  ;;  %v6521_v27 = vld [vmem:[#allocation2 + $0x1a2] ss:$4 sm:$0xff] }
 0x4a4   :  { %21874 = vst [vmem:[#allocation52_spill] sm:$0xff] %v19433_v16  ;;  %21875 = vst [vmem:[#allocation55_spill] sm:$0xff] %v19440_v55  ;;  %v6641_v1 = vmax.f32 %v6560_v22, %v6600_v9  ;;  %v7655_v31 = vcombine.low %v7647_v37, %v7654_v42  ;;  %v19446_v10 = vcombine.high %v19433_v16, %v19433_v16  ;;  %v7289_v49 = vrot.slane %v7287_v7, 2 }
 0x4a5   :  { %v7290_v59 = vrot.slane %v19440_v55, 7  ;;  %v7288_v52 = vsel %vm19131_vm7, %v7286_v62, %v7287_v7  ;;  %v7664_v17 = vrot.slane %v7656_v3, %v21853_v6  ;;  %v7293_v53 = vrot.slane %v19433_v16, 7 }
 0x4a6   :  { %21876 = vst [vmem:[#allocation54_spill] sm:$0xff] %v19446_v10  ;;  %v19453_v60 = vrot.slane %v6641_v1, %v21853_v6  ;;  %13511 = vmatmul.mubr.f32.gmra.mrb[114].mxu1 %v7655_v31  ;;  %v7657_v22 = vcombine.low %v7285_v26, %v7288_v52  ;;  %v7296_v0 = vrot.slane %v19446_v10, 7  ;;  %v6561_v7 = vmax.f32 %v6480_v46, %v6521_v27  ;;  %v6602_v31 = vld [vmem:[#allocation2 + $0x1a3] ss:$4 sm:$0xff]  ;;  %v6442_v27 = vld [vmem:[#allocation2 + $0x1c1] ss:$4 sm:$0xff] }
 0x4a7   :  { %v7291_v33 = vsel %vm19131_vm7, %v7289_v49, %v7290_v59  ;;  %v7292_v37 = vrot.slane %v7290_v59, 2  ;;  %v7295_v42 = vrot.slane %v7293_v53, 2  ;;  %v6887_v9 = vcombine.high %v6641_v1, %v6641_v1 }
 0x4a8   :  { %21877 = vst [vmem:[#allocation57_spill] sm:$0xff] %v19453_v60  ;;  %v7299_v4 = vrot.slane %v19453_v60, 7  ;;  %v7671_v62 = vrot.slane %v7657_v22, %v21853_v6  ;;  %v7298_v32 = vrot.slane %v7296_v0, 2  ;;  %v19465_v26 = vcombine.high %v19453_v60, %v19453_v60 }
 0x4a9   :  { %v7294_v3 = vsel %vm19131_vm7, %v7292_v37, %v7293_v53  ;;  %v7297_v49 = vsel %vm19131_vm7, %v7295_v42, %v7296_v0  ;;  %v6642_v52 = vmax.f32 %v6561_v7, %v6602_v31  ;;  %v19470_v55 = vrot.slane %v6887_v9, %v21853_v6  ;;  %v6388_v37 = vld [vmem:[#allocation2 + $0x1c0] ss:$4 sm:$0xff] }
 0x4aa   :  { %21878 = vst [vmem:[#allocation56_spill] sm:$0xff] %v19465_v26  ;;  %v7673_v59 = vcombine.low %v7291_v33, %v7294_v3  ;;  %v7672_v46 = vcombine.low %v7664_v17, %v7671_v62  ;;  %v7300_v1 = vsel %vm19131_vm7, %v7298_v32, %v7299_v4  ;;  %v7301_v22 = vrot.slane %v7299_v4, 2  ;;  %v6523_v3 = vld [vmem:[#allocation2 + $0x1c2] ss:$4 sm:$0xff] }
 0x4ab   :  { %21879 = vst [vmem:[#allocation59_spill] sm:$0xff] %v19470_v55  ;;  %v7302_v53 = vrot.slane %v19465_v26, 7  ;;  %v7674_v16 = vcombine.low %v7297_v49, %v7300_v1  ;;  %v19478_v0 = vcombine.high %v19470_v55, %v19470_v55  ;;  %v6904_v33 = vcombine.high %v6642_v52, %v6642_v52  ;;  %v6390_v1 = vld [vmem:[#allocation2 + $0x1e0] ss:$4 sm:$0xff] }
 0x4ac   :  { %v7681_v60 = vrot.slane %v7673_v59, %v21853_v6  ;;  %13513 = vmatprep.mubr.f32.mxu1 %v7672_v46  ;;  %v19481_v42 = vrot.slane %v6642_v52, %v21853_v6  ;;  %v7305_v4 = vrot.slane %v19470_v55, 7  ;;  %v6481_v62 = vmax.f32 %v6388_v37, %v6442_v27  ;;  %v6604_v27 = vld [vmem:[#allocation2 + $0x1c3] ss:$4 sm:$0xff] }
 0x4ad   :  { %21880 = vst [vmem:[#allocation58_spill] sm:$0xff] %v19478_v0  ;;  %v7303_v32 = vsel %vm19131_vm7, %v7301_v22, %v7302_v53  ;;  %v7304_v17 = vrot.slane %v7302_v53, 2  ;;  %v7688_v7 = vrot.slane %v7674_v16, %v21853_v6  ;;  %v7308_v9 = vrot.slane %v19478_v0, 7  ;;  %v6444_v22 = vld [vmem:[#allocation2 + $0x1e1] ss:$4 sm:$0xff] }
 0x4ae   :  { %21881 = vst [vmem:[#allocation61_spill] sm:$0xff] %v19481_v42  ;;  %v19489_v31 = vrot.slane %v6904_v33, %v21853_v6  ;;  %v7307_v59 = vrot.slane %v7305_v4, 2  ;;  %v7311_v52 = vrot.slane %v19481_v42, 7  ;;  %v19496_v46 = vcombine.high %v19481_v42, %v19481_v42  ;;  %v6392_v42 = vld [vmem:[#allocation2 + $0x200] ss:$4 sm:$0xff] }
 0x4af   :  { %v7306_v49 = vsel %vm19131_vm7, %v7304_v17, %v7305_v4  ;;  %v7689_v16 = vcombine.low %v7681_v60, %v7688_v7  ;;  %v7310_v53 = vrot.slane %v7308_v9, 2  ;;  %v6562_v37 = vmax.f32 %v6481_v62, %v6523_v3  ;;  %v6446_v0 = vld [vmem:[#allocation2 + $0x201] ss:$4 sm:$0xff]  ;;  %v6394_v3 = vld [vmem:[#allocation2 + $0x220] ss:$4 sm:$0xff] }
 0x4b0   :  { %21882 = vst [vmem:[#allocation60_spill] sm:$0xff] %v19489_v31  ;;  %21883 = vst [vmem:[#allocation63_spill] sm:$0xff] %v19496_v46  ;;  %v7690_v26 = vcombine.low %v7303_v32, %v7306_v49  ;;  %v7309_v33 = vsel %vm19131_vm7, %v7307_v59, %v7308_v9  ;;  %v19502_v17 = vcombine.high %v19489_v31, %v19489_v31  ;;  %v11842_v4 = vrot.slane %v19496_v46, 9  ;;  %v6448_v9 = vld [vmem:[#allocation2 + $0x221] ss:$4 sm:$0xff] }
 0x4b1   :  { %v7315_v55 = vrot.slane %v19489_v31, 7  ;;  %13514 = vmatmul.mubr.f32.gmra.mrb[116].mxu1 %v7689_v16  ;;  %v7312_v60 = vsel %vm19131_vm7, %v7310_v53, %v7311_v52  ;;  %v6643_v7 = vmax.f32 %v6562_v37, %v6604_v27  ;;  %v6482_v62 = vmax.f32 %v6390_v1, %v6444_v22  ;;  %v6525_v31 = vld [vmem:[#allocation2 + $0x1e2] ss:$4 sm:$0xff]  ;;  %v6606_v53 = vld [vmem:[#allocation2 + $0x1e3] ss:$4 sm:$0xff] }
 0x4b2   :  { %21884 = vst [vmem:[#allocation62_spill] sm:$0xff] %v19502_v17  ;;  %v7698_v32 = vrot.slane %v7690_v26, %v21853_v6  ;;  %v7691_v49 = vcombine.low %v7309_v33, %v7312_v60  ;;  %v7318_v46 = vrot.slane %v19502_v17, 7  ;;  %v6483_v52 = vmax.f32 %v6392_v42, %v6446_v0  ;;  %v6527_v60 = vld [vmem:[#allocation2 + $0x202] ss:$4 sm:$0xff] }
 0x4b3   :  { %v7316_v59 = vsel %vm19131_vm7, %v11842_v4, %v7315_v55  ;;  %v7317_v10 = vrot.slane %v7315_v55, 2  ;;  %v19513_v38 = vrot.slane %v6643_v7, %v21853_v6  ;;  %v6563_v16 = vmax.f32 %v6482_v62, %v6525_v31  ;;  %v6529_v31 = vld [vmem:[#allocation2 + $0x222] ss:$4 sm:$0xff] }
 0x4b4   :  { %v6921_v44 = vcombine.high %v6643_v7, %v6643_v7  ;;  %v7705_v26 = vrot.slane %v7691_v49, %v21853_v6  ;;  %v7320_v22 = vrot.slane %v7318_v46, 2  ;;  %v6484_v37 = vmax.f32 %v6394_v3, %v6448_v9  ;;  %v6608_v49 = vld [vmem:[#allocation2 + $0x203] ss:$4 sm:$0xff] }
 0x4b5   :  { %21885 = vst [vmem:[#allocation65_spill] sm:$0xff] %v19513_v38  ;;  %v7319_v1 = vsel %vm19131_vm7, %v7317_v10, %v7318_v46  ;;  %v19520_v55 = vcombine.high %v19513_v38, %v19513_v38  ;;  %v7321_v27 = vrot.slane %v19513_v38, 7  ;;  %v6644_v4 = vmax.f32 %v6563_v16, %v6606_v53  ;;  %v19737_v38 = vld [vmem:[#allocation2 + $0x320] ss:$4 sm:$0xff] }
 0x4b6   :  { %v7707_v33 = vcombine.low %v7316_v59, %v7319_v1  ;;  %v7706_v7 = vcombine.low %v7698_v32, %v7705_v26  ;;  %v19524_v0 = vrot.slane %v6921_v44, %v21853_v6  ;;  %v6564_v42 = vmax.f32 %v6483_v52, %v6527_v60  ;;  %v6610_v52 = vld [vmem:[#allocation2 + $0x223] ss:$4 sm:$0xff] }
 0x4b7   :  { %21886 = vst [vmem:[#allocation64_spill] sm:$0xff] %v19520_v55  ;;  %v6565_v62 = vmax.f32 %v6484_v37, %v6529_v31  ;;  %v7322_v10 = vsel %vm19131_vm7, %v7320_v22, %v7321_v27  ;;  %v7323_v46 = vrot.slane %v7321_v27, 2  ;;  %v7324_v3 = vrot.slane %v19520_v55, 7  ;;  %v6396_v55 = vld [vmem:[#allocation2 + $0x240] ss:$4 sm:$0xff] }
 0x4b8   :  { %21887 = vst [vmem:[#allocation68_spill] sm:$0xff] %v19524_v0  ;;  %v7715_v9 = vrot.slane %v7707_v33, %v21853_v6  ;;  %13516 = vmatprep.mubr.f32.mxu1 %v7706_v7  ;;  %v19532_v59 = vcombine.high %v19524_v0, %v19524_v0  ;;  %v19535_v32 = vrot.slane %v6644_v4, %v21853_v6  ;;  %v7327_v44 = vrot.slane %v19524_v0, 7  ;;  %v6450_v0 = vld [vmem:[#allocation2 + $0x241] ss:$4 sm:$0xff] }
 0x4b9   :  { %v6645_v16 = vmax.f32 %v6564_v42, %v6608_v49  ;;  %v7325_v26 = vsel %vm19131_vm7, %v7323_v46, %v7324_v3  ;;  %v7326_v1 = vrot.slane %v7324_v3, 2  ;;  %v6938_v22 = vcombine.high %v6644_v4, %v6644_v4 }
 0x4ba   :  { %21888 = vst [vmem:[#allocation69_spill] sm:$0xff] %v19532_v59  ;;  %21889 = vst [vmem:[#allocation71_spill] sm:$0xff] %v19535_v32  ;;  %v19540_v53 = vmax.f32 %v6565_v62, %v6610_v52  ;;  %v7708_v37 = vcombine.low %v7322_v10, %v7325_v26  ;;  %v19544_v27 = vcombine.high %v19535_v32, %v19535_v32  ;;  %v7329_v33 = vrot.slane %v7327_v44, 2 }
 0x4bb   :  { %v7330_v60 = vrot.slane %v19532_v59, 7  ;;  %v7328_v31 = vsel %vm19131_vm7, %v7326_v1, %v7327_v44  ;;  %v7333_v7 = vrot.slane %v19535_v32, 7  ;;  %v19551_v42 = vrot.slane %v6938_v22, %v21853_v6 }
 0x4bc   :  { %21890 = vst [vmem:[#allocation70_spill] sm:$0xff] %v19544_v27  ;;  %v19554_v4 = vrot.slane %v6645_v16, %v21853_v6  ;;  %v7722_v62 = vrot.slane %v7708_v37, %v21853_v6  ;;  %v7336_v3 = vrot.slane %v19544_v27, 7  ;;  %v6955_v32 = vcombine.high %v6645_v16, %v6645_v16 }
 0x4bd   :  { %21891 = vst [vmem:[#allocation72_spill] sm:$0xff] %v19551_v42  ;;  %v7331_v10 = vsel %vm19131_vm7, %v7329_v33, %v7330_v60  ;;  %v7332_v46 = vrot.slane %v7330_v60, 2  ;;  %v7335_v49 = vrot.slane %v7333_v7, 2  ;;  %v19562_v44 = vcombine.high %v19551_v42, %v19551_v42 }
 0x4be   :  { %21892 = vst [vmem:[#allocation74_spill] sm:$0xff] %v19554_v4  ;;  %v7724_v52 = vcombine.low %v7328_v31, %v7331_v10  ;;  %v19566_v26 = vcombine.high %v19554_v4, %v19554_v4  ;;  %v7723_v1 = vcombine.low %v7715_v9, %v7722_v62  ;;  %v7338_v37 = vrot.slane %v7336_v3, 2 }
 0x4bf   :  { %21893 = vst [vmem:[#allocation73_spill] sm:$0xff] %v19562_v44  ;;  %v7334_v22 = vsel %vm19131_vm7, %v7332_v46, %v7333_v7  ;;  %v7339_v33 = vrot.slane %v19551_v42, 7  ;;  %v7337_v60 = vsel %vm19131_vm7, %v7335_v49, %v7336_v3  ;;  %v7342_v10 = vrot.slane %v19562_v44, 7 }
 0x4c0   :  { %21894 = vst [vmem:[#allocation76_spill] sm:$0xff] %v19566_v26  ;;  %v7732_v31 = vrot.slane %v7724_v52, %v21853_v6  ;;  %v7345_v27 = vrot.slane %v19554_v4, 7  ;;  %13517 = vmatmul.mubr.f32.gmra.mrb[118].mxu1 %v7723_v1  ;;  %v7725_v59 = vcombine.low %v7334_v22, %v7337_v60  ;;  %v7348_v62 = vrot.slane %v19566_v26, 7 }
 0x4c1   :  { %v7340_v9 = vsel %vm19131_vm7, %v7338_v37, %v7339_v33  ;;  %v7341_v7 = vrot.slane %v7339_v33, 2  ;;  %v7344_v46 = vrot.slane %v7342_v10, 2  ;;  %v19581_v3 = vrot.slane %v19540_v53, %v21853_v6 }
 0x4c2   :  { %v7347_v42 = vrot.slane %v7345_v27, 2  ;;  %v7739_v49 = vrot.slane %v7725_v59, %v21853_v6  ;;  %v7350_v1 = vrot.slane %v7348_v62, 2  ;;  %v6485_v22 = vmax.f32 %v6396_v55, %v6450_v0 }
 0x4c3   :  { %21895 = vst [vmem:[#allocation75_spill] sm:$0xff] %v19581_v3  ;;  %v7343_v52 = vsel %vm19131_vm7, %v7341_v7, %v7342_v10  ;;  %v7346_v37 = vsel %vm19131_vm7, %v7344_v46, %v7345_v27  ;;  %v19591_v16 = vrot.slane %v6955_v32, %v21853_v6  ;;  %v19595_v59 = vcombine.high %v19581_v3, %v19581_v3  ;;  %v6531_v7 = vld [vmem:[#allocation2 + $0x242] ss:$4 sm:$0xff]  ;;  %v6612_v32 = vld [vmem:[#allocation2 + $0x243] ss:$4 sm:$0xff] }
 0x4c4   :  { %v7349_v33 = vsel %vm19131_vm7, %v7347_v42, %v7348_v62  ;;  %v7741_v60 = vcombine.low %v7340_v9, %v7343_v52  ;;  %v7740_v26 = vcombine.low %v7732_v31, %v7739_v49  ;;  %v7357_v10 = vrot.slane %v19581_v3, 7  ;;  %v6398_v49 = vld [vmem:[#allocation2 + $0x260] ss:$4 sm:$0xff]  ;;  %v6452_v52 = vld [vmem:[#allocation2 + $0x261] ss:$4 sm:$0xff] }
 0x4c5   :  { %21896 = vst [vmem:[#allocation78_spill] sm:$0xff] %v19591_v16  ;;  %v7742_v44 = vcombine.low %v7346_v37, %v7349_v33  ;;  %21897 = vst [vmem:[#allocation77_spill] sm:$0xff] %v19595_v59  ;;  %v19601_v0 = vcombine.high %v19591_v16, %v19591_v16  ;;  %v7351_v27 = vrot.slane %v19591_v16, 7  ;;  %v6566_v42 = vmax.f32 %v6485_v22, %v6531_v7 }
 0x4c6   :  { %v7749_v55 = vrot.slane %v7741_v60, %v21853_v6  ;;  %13519 = vmatprep.mubr.f32.mxu1 %v7740_v26  ;;  %v7359_v9 = vrot.slane %v7357_v10, 2  ;;  %v7360_v62 = vrot.slane %v19595_v59, 7  ;;  %v6972_v46 = vcombine.high %v19540_v53, %v19540_v53 }
 0x4c7   :  { %21898 = vst [vmem:[#allocation13_spill] sm:$0xff] %v19601_v0  ;;  %v7756_v31 = vrot.slane %v7742_v44, %v21853_v6  ;;  %v7352_v37 = vsel %vm19131_vm7, %v7350_v1, %v7351_v27  ;;  %v7353_v33 = vrot.slane %v7351_v27, 2  ;;  %v7354_v60 = vrot.slane %v19601_v0, 7 }
 0x4c8   :  { %v6647_v16 = vmax.f32 %v6566_v42, %v6612_v32  ;;  %v7361_v26 = vsel %vm19131_vm7, %v7359_v9, %v7360_v62  ;;  %v19614_v44 = vrot.slane %v6972_v46, %v21853_v6  ;;  %v7362_v7 = vrot.slane %v7360_v62, 2  ;;  %v6533_v32 = vld [vmem:[#allocation2 + $0x262] ss:$4 sm:$0xff] }
 0x4c9   :  { %v7757_v22 = vcombine.low %v7749_v55, %v7756_v31  ;;  %v7355_v53 = vsel %vm19131_vm7, %v7353_v33, %v7354_v60  ;;  %v7356_v59 = vrot.slane %v7354_v60, 2  ;;  %v6486_v1 = vmax.f32 %v6398_v49, %v6452_v52  ;;  %v7143_v9 = vld [vmem:[%s21194_s3 + $0x50] sm:$0xff] }
 0x4ca   :  { %21899 = vst [vmem:[#allocation12_spill] sm:$0xff] %v19614_v44  ;;  %v19619_v3 = vrot.slane %v6647_v16, %v21853_v6  ;;  %v7758_v27 = vcombine.low %v7352_v37, %v7355_v53  ;;  %v19623_v55 = vcombine.high %v19614_v44, %v19614_v44  ;;  %v7363_v42 = vrot.slane %v19614_v44, 7  ;;  %v7144_v37 = vld [vmem:[%s21194_s3 + $0x58] sm:$0xff] }
 0x4cb   :  { %13520 = vmatmul.mubr.f32.gmra.mrb[120].mxu1 %v7757_v22  ;;  %v6989_v31 = vcombine.high %v6647_v16, %v6647_v16  ;;  %v7358_v62 = vsel %vm19131_vm7, %v7356_v59, %v7357_v10  ;;  %v6567_v52 = vmax.f32 %v6486_v1, %v6533_v32  ;;  %v6400_v33 = vld [vmem:[#allocation2 + $0x280] ss:$4 sm:$0xff]  ;;  %v6454_v16 = vld [vmem:[#allocation2 + $0x281] ss:$4 sm:$0xff]  ;;  %v6614_v10 = vld [vmem:[#allocation2 + $0x263] ss:$4 sm:$0xff]  ;;  %v14014_v17 = vpack.c.bf16 %v7144_v37, %v7143_v9 }
 0x4cc   :  { %21900 = vst [vmem:[#allocation15_spill] sm:$0xff] %v19619_v3  ;;  %21901 = vst [vmem:[#allocation14_spill] sm:$0xff] %v19623_v55  ;;  %v19633_v46 = vcombine.high %v19619_v3, %v19619_v3  ;;  %v7369_v49 = vrot.slane %v19619_v3, 7  ;;  %v7759_v60 = vcombine.low %v7358_v62, %v7361_v26  ;;  %v7766_v22 = vrot.slane %v7758_v27, %v21853_v6 }
 0x4cd   :  { %v7364_v53 = vsel %vm19131_vm7, %v7362_v7, %v7363_v42  ;;  %v7365_v59 = vrot.slane %v7363_v42, 2  ;;  %v7366_v44 = vrot.slane %v19623_v55, 7  ;;  %v6648_v1 = vmax.f32 %v6567_v52, %v6614_v10  ;;  %14015 = vmatprep.subr.bf16.mxu1 %v14014_v17 }
 0x4ce   :  { %21902 = vst [vmem:[#allocation17_spill] sm:$0xff] %v19633_v46  ;;  %v7371_v0 = vrot.slane %v7369_v49, 2  ;;  %v7372_v3 = vrot.slane %v19633_v46, 7  ;;  %v7773_v32 = vrot.slane %v7759_v60, %v21853_v6  ;;  %v19646_v4 = vrot.slane %v6989_v31, %v21853_v6  ;;  %14017 = vmatpush3.bf16.msra.mxu1 %v14014_v17 }
 0x4cf   :  { %v6487_v26 = vmax.f32 %v6400_v33, %v6454_v16  ;;  %v7367_v27 = vsel %vm19131_vm7, %v7365_v59, %v7366_v44  ;;  %v7368_v62 = vrot.slane %v7366_v44, 2  ;;  %v19653_v42 = vrot.slane %v6648_v1, %v21853_v6  ;;  %v6535_v33 = vld [vmem:[#allocation2 + $0x282] ss:$4 sm:$0xff]  ;;  %v6456_v59 = vld [vmem:[#allocation2 + $0x2a1] ss:$4 sm:$0xff] }
 0x4d0   :  { %21903 = vst [vmem:[#allocation16_spill] sm:$0xff] %v19646_v4  ;;  %v7373_v7 = vsel %vm19131_vm7, %v7371_v0, %v7372_v3  ;;  %v7774_v55 = vcombine.low %v7766_v22, %v7773_v32  ;;  %v7775_v46 = vcombine.low %v7364_v53, %v7367_v27  ;;  %v19657_v52 = vcombine.high %v19646_v4, %v19646_v4  ;;  %v6402_v53 = vld [vmem:[#allocation2 + $0x2a0] ss:$4 sm:$0xff] }
 0x4d1   :  { %21904 = vst [vmem:[#allocation19_spill] sm:$0xff] %v19653_v42  ;;  %v7374_v31 = vrot.slane %v7372_v3, 2  ;;  %v7370_v9 = vsel %vm19131_vm7, %v7368_v62, %v7369_v49  ;;  %v19663_v44 = vcombine.high %v19653_v42, %v19653_v42  ;;  %v7375_v0 = vrot.slane %v19646_v4, 7  ;;  %v6616_v62 = vld [vmem:[#allocation2 + $0x283] ss:$4 sm:$0xff] }
 0x4d2   :  { %21905 = vst [vmem:[#allocation18_spill] sm:$0xff] %v19657_v52  ;;  %v7381_v37 = vrot.slane %v19653_v42, 7  ;;  %13522 = vmatprep.mubr.f32.mxu1 %v7774_v55  ;;  %v7776_v16 = vcombine.low %v7370_v9, %v7373_v7  ;;  %v7783_v60 = vrot.slane %v7775_v46, %v21853_v6  ;;  %v7378_v3 = vrot.slane %v19657_v52, 7  ;;  %v6462_v42 = vld [vmem:[#allocation2 + $0x301] ss:$4 sm:$0xff] }
 0x4d3   :  { %21906 = vst [vmem:[#allocation21_spill] sm:$0xff] %v19663_v44  ;;  %v6568_v22 = vmax.f32 %v6487_v26, %v6535_v33  ;;  %v7376_v49 = vsel %vm19131_vm7, %v7374_v31, %v7375_v0  ;;  %v7377_v10 = vrot.slane %v7375_v0, 2  ;;  %v7384_v27 = vrot.slane %v19663_v44, 7  ;;  %v7145_v31 = vld [vmem:[%s21194_s3 + $0x60] sm:$0xff]  ;;  %v7146_v0 = vld [vmem:[%s21194_s3 + $0x68] sm:$0xff] }
 0x4d4   :  { %v7383_v32 = vrot.slane %v7381_v37, 2  ;;  %v7790_v17 = vrot.slane %v7776_v16, %v21853_v6  ;;  %v7380_v4 = vrot.slane %v7378_v3, 2  ;;  %v7006_v7 = vcombine.high %v6648_v1, %v6648_v1 }
 0x4d5   :  { %v6649_v55 = vmax.f32 %v6568_v22, %v6616_v62  ;;  %v7379_v46 = vsel %vm19131_vm7, %v7377_v10, %v7378_v3  ;;  %v7386_v9 = vrot.slane %v7384_v27, 2  ;;  %v6488_v33 = vmax.f32 %v6402_v53, %v6456_v59  ;;  %v6537_v10 = vld [vmem:[#allocation2 + $0x2a2] ss:$4 sm:$0xff] }
 0x4d6   :  { %v7385_v26 = vsel %vm19131_vm7, %v7383_v32, %v7384_v27  ;;  %v7791_v16 = vcombine.low %v7783_v60, %v7790_v17  ;;  %v7382_v1 = vsel %vm19131_vm7, %v7380_v4, %v7381_v37  ;;  %v7792_v22 = vcombine.low %v7376_v49, %v7379_v46  ;;  %v6618_v37 = vld [vmem:[#allocation2 + $0x2a3] ss:$4 sm:$0xff] }
 0x4d7   :  { %v19686_v3 = vrot.slane %v7006_v7, %v21853_v6  ;;  %v7793_v32 = vcombine.low %v7382_v1, %v7385_v26  ;;  %v19689_v53 = vrot.slane %v6649_v55, %v21853_v6  ;;  %v6569_v59 = vmax.f32 %v6488_v33, %v6537_v10 }
 0x4d8   :  { %v7023_v27 = vcombine.high %v6649_v55, %v6649_v55  ;;  %13523 = vmatmul.mubr.f32.gmra.mrb[122].mxu1 %v7791_v16  ;;  %v7800_v62 = vrot.slane %v7792_v22, %v21853_v6  ;;  %v14018_v49 = vpack.c.bf16 %v7146_v0, %v7145_v31 }
 0x4d9   :  { %21907 = vst [vmem:[#allocation20_spill] sm:$0xff] %v19686_v3  ;;  %21908 = vst [vmem:[#allocation23_spill] sm:$0xff] %v19689_v53  ;;  %v19694_v60 = vcombine.high %v19686_v3, %v19686_v3  ;;  %v7387_v4 = vrot.slane %v19686_v3, 7  ;;  %v7807_v17 = vrot.slane %v7793_v32, %v21853_v6  ;;  %v19700_v7 = vcombine.high %v19689_v53, %v19689_v53 }
 0x4da   :  { %v7393_v46 = vrot.slane %v19689_v53, 7  ;;  %v6650_v55 = vmax.f32 %v6569_v59, %v6618_v37  ;;  %v19707_v1 = vrot.slane %v7023_v27, %v21853_v6  ;;  %14019 = vmatprep.subr.bf16.mxu1 %v14018_v49 }
 0x4db   :  { %21909 = vst [vmem:[#allocation22_spill] sm:$0xff] %v19694_v60  ;;  %21910 = vst [vmem:[#allocation25_spill] sm:$0xff] %v19700_v7  ;;  %v7388_v26 = vsel %vm19131_vm7, %v7386_v9, %v7387_v4  ;;  %v7389_v33 = vrot.slane %v7387_v4, 2  ;;  %v7390_v16 = vrot.slane %v19694_v60, 7  ;;  %v7808_v31 = vcombine.low %v7800_v62, %v7807_v17  ;;  %14021 = vmatpush3.bf16.msra.mxu1 %v14018_v49  ;;  %v6404_v17 = vld [vmem:[#allocation2 + $0x2c0] ss:$4 sm:$0xff] }
 0x4dc   :  { %21911 = vst [vmem:[#allocation24_spill] sm:$0xff] %v19707_v1  ;;  %v7395_v0 = vrot.slane %v7393_v46, 2  ;;  %v7396_v22 = vrot.slane %v19700_v7, 7  ;;  %v19711_v10 = vrot.slane %v6650_v55, %v21853_v6  ;;  %v19717_v9 = vcombine.high %v19707_v1, %v19707_v1  ;;  %v6458_v7 = vld [vmem:[#allocation2 + $0x2c1] ss:$4 sm:$0xff] }
 0x4dd   :  { %v7391_v32 = vsel %vm19131_vm7, %v7389_v33, %v7390_v16  ;;  %v7392_v59 = vrot.slane %v7390_v16, 2  ;;  %v7399_v27 = vrot.slane %v19707_v1, 7  ;;  %13525 = vmatprep.mubr.f32.mxu1 %v7808_v31  ;;  %v6460_v60 = vld [vmem:[#allocation2 + $0x2e1] ss:$4 sm:$0xff]  ;;  %v6489_v52 = vmax.f32 %v6404_v17, %v6458_v7 }
 0x4de   :  { %21912 = vst [vmem:[#allocation27_spill] sm:$0xff] %v19711_v10  ;;  %21913 = vst [vmem:[#allocation26_spill] sm:$0xff] %v19717_v9  ;;  %v7397_v62 = vsel %vm19131_vm7, %v7395_v0, %v7396_v22  ;;  %v7809_v4 = vcombine.low %v7388_v26, %v7391_v32  ;;  %v19724_v37 = vcombine.high %v19711_v10, %v19711_v10  ;;  %v7398_v49 = vrot.slane %v7396_v22, 2  ;;  %v6539_v32 = vld [vmem:[#allocation2 + $0x2c2] ss:$4 sm:$0xff] }
 0x4df   :  { %v7394_v33 = vsel %vm19131_vm7, %v7392_v59, %v7393_v46  ;;  %v7401_v16 = vrot.slane %v7399_v27, 2  ;;  %v7402_v44 = vrot.slane %v19717_v9, 7  ;;  %v7405_v1 = vrot.slane %v19711_v10, 7  ;;  %v6406_v22 = vld [vmem:[#allocation2 + $0x2e0] ss:$4 sm:$0xff] }
 0x4e0   :  { %21914 = vst [vmem:[#allocation29_spill] sm:$0xff] %v19724_v37  ;;  %v7810_v31 = vcombine.low %v7394_v33, %v7397_v62  ;;  %v7817_v3 = vrot.slane %v7809_v4, %v21853_v6  ;;  %v7400_v26 = vsel %vm19131_vm7, %v7398_v49, %v7399_v27  ;;  %v7408_v0 = vrot.slane %v19724_v37, 7  ;;  %v6408_v9 = vld [vmem:[#allocation2 + $0x300] ss:$4 sm:$0xff]  ;;  %v19739_v27 = vld [vmem:[#allocation2 + $0x321] ss:$4 sm:$0xff] }
 0x4e1   :  { %v7403_v53 = vsel %vm19131_vm7, %v7401_v16, %v7402_v44  ;;  %v7404_v46 = vrot.slane %v7402_v44, 2  ;;  %v7407_v59 = vrot.slane %v7405_v1, 2  ;;  %v7040_v4 = vcombine.high %v6650_v55, %v6650_v55  ;;  %v7147_v7 = vld [vmem:[%s21194_s3 + $0x70] sm:$0xff] }
 0x4e2   :  { %v7824_v62 = vrot.slane %v7810_v31, %v21853_v6  ;;  %v7826_v33 = vcombine.low %v7400_v26, %v7403_v53  ;;  %v7410_v10 = vrot.slane %v7408_v0, 2  ;;  %v6570_v44 = vmax.f32 %v6489_v52, %v6539_v32  ;;  %v7148_v53 = vld [vmem:[%s21194_s3 + $0x78] sm:$0xff] }
 0x4e3   :  { %v7406_v49 = vsel %vm19131_vm7, %v7404_v46, %v7405_v1  ;;  %v7409_v16 = vsel %vm19131_vm7, %v7407_v59, %v7408_v0  ;;  %v6490_v37 = vmax.f32 %v6406_v22, %v6460_v60  ;;  %v6620_v26 = vld [vmem:[#allocation2 + $0x2c3] ss:$4 sm:$0xff]  ;;  %v19753_v1 = vrot.slane %v7040_v4, %v21853_v6  ;;  %v6541_v46 = vld [vmem:[#allocation2 + $0x2e2] ss:$4 sm:$0xff] }
 0x4e4   :  { %v7825_v55 = vcombine.low %v7817_v3, %v7824_v62  ;;  %v7827_v17 = vcombine.low %v7406_v49, %v7409_v16  ;;  %v7834_v31 = vrot.slane %v7826_v33, %v21853_v6  ;;  %v6651_v0 = vmax.f32 %v6570_v44, %v6620_v26  ;;  %v6622_v62 = vld [vmem:[#allocation2 + $0x2e3] ss:$4 sm:$0xff]  ;;  %v6543_v33 = vld [vmem:[#allocation2 + $0x302] ss:$4 sm:$0xff] }
 0x4e5   :  { %21915 = vst [vmem:[#allocation28_spill] sm:$0xff] %v19753_v1  ;;  %v6571_v52 = vmax.f32 %v6490_v37, %v6541_v46  ;;  %v6491_v60 = vmax.f32 %v6408_v9, %v6462_v42  ;;  %v19760_v3 = vcombine.high %v19753_v1, %v19753_v1  ;;  %v7411_v59 = vrot.slane %v19753_v1, 7 }
 0x4e6   :  { %13526 = vmatmul.mubr.f32.gmra.mrb[124].mxu1 %v7825_v55  ;;  %v7841_v22 = vrot.slane %v7827_v17, %v21853_v6  ;;  %v14022_v4 = vpack.c.bf16 %v7148_v53, %v7147_v7  ;;  %v19764_v49 = vrot.slane %v6651_v0, %v21853_v6  ;;  %v7057_v42 = vcombine.high %v6651_v0, %v6651_v0 }
 0x4e7   :  { %21916 = vst [vmem:[#allocation31_spill] sm:$0xff] %v19760_v3  ;;  %v6652_v37 = vmax.f32 %v6571_v52, %v6622_v62  ;;  %v6572_v9 = vmax.f32 %v6491_v60, %v6543_v33  ;;  %v7412_v44 = vsel %vm19131_vm7, %v7410_v10, %v7411_v59  ;;  %v7413_v55 = vrot.slane %v7411_v59, 2 }
 0x4e8   :  { %21917 = vst [vmem:[#allocation30_spill] sm:$0xff] %v19764_v49  ;;  %v7842_v16 = vcombine.low %v7834_v31, %v7841_v22  ;;  %v7414_v17 = vrot.slane %v19760_v3, 7  ;;  %14023 = vmatprep.subr.bf16.mxu1 %v14022_v4  ;;  %v19771_v26 = vcombine.high %v19764_v49, %v19764_v49  ;;  %v7417_v7 = vrot.slane %v19764_v49, 7  ;;  %v6624_v31 = vld [vmem:[#allocation2 + $0x303] ss:$4 sm:$0xff] }
 0x4e9   :  { %v19775_v53 = vrot.slane %v7057_v42, %v21853_v6  ;;  %v19778_v46 = vrot.slane %v6652_v37, %v21853_v6  ;;  %14025 = vmatpush3.bf16.msra.mxu1 %v14022_v4  ;;  %v6653_v52 = vmax.f32 %v6572_v9, %v6624_v31  ;;  %v7074_v60 = vcombine.high %v6652_v37, %v6652_v37 }
 0x4ea   :  { %21918 = vst [vmem:[#allocation33_spill] sm:$0xff] %v19771_v26  ;;  %13528 = vmatprep.mubr.f32.mxu1 %v7842_v16  ;;  %v7415_v10 = vsel %vm19131_vm7, %v7413_v55, %v7414_v17  ;;  %v7416_v0 = vrot.slane %v7414_v17, 2  ;;  %v7419_v22 = vrot.slane %v7417_v7, 2  ;;  %v7420_v59 = vrot.slane %v19771_v26, 7 }
 0x4eb   :  { %21919 = vst [vmem:[#allocation32_spill] sm:$0xff] %v19775_v53  ;;  %21920 = vst [vmem:[#allocation35_spill] sm:$0xff] %v19778_v46  ;;  %v7843_v62 = vcombine.low %v7412_v44, %v7415_v10  ;;  %v19785_v33 = vcombine.high %v19775_v53, %v19775_v53  ;;  %v19791_v4 = vcombine.high %v19778_v46, %v19778_v46  ;;  %v7423_v16 = vrot.slane %v19775_v53, 7 }
 0x4ec   :  { %v7418_v42 = vsel %vm19131_vm7, %v7416_v0, %v7417_v7  ;;  %v7429_v9 = vrot.slane %v19778_v46, 7  ;;  %v7421_v37 = vsel %vm19131_vm7, %v7419_v22, %v7420_v59  ;;  %v7422_v55 = vrot.slane %v7420_v59, 2  ;;  %v6466_v46 = vld [vmem:[#allocation2 + $0x341] ss:$4 sm:$0xf] }
 0x4ed   :  { %21921 = vst [vmem:[#allocation34_spill] sm:$0xff] %v19785_v33  ;;  %21922 = vst [vmem:[#allocation79_spill] sm:$0xff] %v19791_v4  ;;  %v7851_v44 = vrot.slane %v7843_v62, %v21853_v6  ;;  %v7426_v17 = vrot.slane %v19785_v33, 7  ;;  %v7844_v31 = vcombine.low %v7418_v42, %v7421_v37  ;;  %v7425_v10 = vrot.slane %v7423_v16, 2 }
 0x4ee   :  { %v7431_v32 = vrot.slane %v7429_v9, 2  ;;  %v7432_v7 = vrot.slane %v19791_v4, 7  ;;  %v7424_v0 = vsel %vm19131_vm7, %v7422_v55, %v7423_v16  ;;  %v19803_v53 = vrot.slane %v7074_v60, %v21853_v6 }
 0x4ef   :  { %v7428_v26 = vrot.slane %v7426_v17, 2  ;;  %v19806_v1 = vrot.slane %v6653_v52, %v21853_v6  ;;  %v7858_v22 = vrot.slane %v7844_v31, %v21853_v6  ;;  %v7427_v59 = vsel %vm19131_vm7, %v7425_v10, %v7426_v17  ;;  %v6545_v31 = vld [vmem:[#allocation2 + $0x322] ss:$4 sm:$0xff]  ;;  %v6412_v10 = vld [vmem:[#allocation2 + $0x340] ss:$4 sm:$0xf] }
 0x4f0   :  { %21923 = vst [vmem:[#allocation66_spill] sm:$0xff] %v19803_v53  ;;  %v7433_v62 = vsel %vm19131_vm7, %v7431_v32, %v7432_v7  ;;  %v7434_v42 = vrot.slane %v7432_v7, 2  ;;  %v7860_v16 = vcombine.low %v7424_v0, %v7427_v59  ;;  %v19817_v60 = vcombine.high %v19803_v53, %v19803_v53 }
 0x4f1   :  { %21924 = vst [vmem:[#allocation80_spill] sm:$0xff] %v19806_v1  ;;  %v7430_v37 = vsel %vm19131_vm7, %v7428_v26, %v7429_v9  ;;  %v19821_v55 = vcombine.high %v19806_v1, %v19806_v1  ;;  %v7859_v4 = vcombine.low %v7851_v44, %v7858_v22  ;;  %v7435_v17 = vrot.slane %v19803_v53, 7  ;;  %v6626_v53 = vld [vmem:[#allocation2 + $0x323] ss:$4 sm:$0xff] }
 0x4f2   :  { %21925 = vst [vmem:[#allocation81_spill] sm:$0xff] %v19817_v60  ;;  %v7861_v33 = vcombine.low %v7430_v37, %v7433_v62  ;;  %v7441_v32 = vrot.slane %v19806_v1, 7  ;;  %v7868_v7 = vrot.slane %v7860_v16, %v21853_v6  ;;  %v7438_v26 = vrot.slane %v19817_v60, 7 }
 0x4f3   :  { %21926 = vst [vmem:[#allocation82_spill] sm:$0xff] %v19821_v55  ;;  %v7444_v9 = vrot.slane %v19821_v55, 7  ;;  %v21927_v0 = vmax.f32 %v19737_v38, %v19739_v27  ;;  %13529 = vmatmul.mubr.f32.gmra.mrb[126].mxu1 %v7859_v4  ;;  %v7436_v22 = vsel %vm19131_vm7, %v7434_v42, %v7435_v17  ;;  %v7437_v62 = vrot.slane %v7435_v17, 2 }
 0x4f4   :  { %v7875_v44 = vrot.slane %v7861_v33, %v21853_v6  ;;  %v7443_v37 = vrot.slane %v7441_v32, 2  ;;  %v7440_v1 = vrot.slane %v7438_v26, 2  ;;  %v7091_v3 = vcombine.high %v6653_v52, %v6653_v52 }
 0x4f5   :  { %v6573_v59 = vmax.f32 %v21927_v0, %v6545_v31  ;;  %v7446_v60 = vrot.slane %v7444_v9, 2  ;;  %v7439_v55 = vsel %vm19131_vm7, %v7437_v62, %v7438_v26  ;;  %v6493_v27 = vmax.f32 %v6412_v10, %v6466_v46 }
 0x4f6   :  { %v7876_v49 = vcombine.low %v7868_v7, %v7875_v44  ;;  %v7445_v38 = vsel %vm19131_vm7, %v7443_v37, %v7444_v9  ;;  %v7442_v33 = vsel %vm19131_vm7, %v7440_v1, %v7441_v32  ;;  %v7877_v4 = vcombine.low %v7436_v22, %v7439_v55  ;;  %v6628_v55 = vld [vmem:[#allocation2 + $0x343] ss:$4 sm:$0xf] }
 0x4f7   :  { %v6654_v16 = vmax.f32 %v6573_v59, %v6626_v53  ;;  %v19841_v42 = vrot.slane %v7091_v3, %v21853_v6  ;;  %v6547_v53 = vld [vmem:[#allocation2 + $0x342] ss:$4 sm:$0xf]  ;;  %v7878_v52 = vcombine.low %v7442_v33, %v7445_v38 }
 0x4f8   :  { %13531 = vmatprep.mubr.f32.mxu1 %v7876_v49  ;;  %v6574_v17 = vmax.f32 %v6493_v27, %v6547_v53  ;;  %v7885_v26 = vrot.slane %v7877_v4, %v21853_v6 }
 0x4f9   :  { %v19844_v31 = vrot.slane %v6654_v16, %v21853_v6  ;;  %v7108_v7 = vcombine.high %v6654_v16, %v6654_v16  ;;  %v19849_v46 = vcombine.high %v19841_v42, %v19841_v42  ;;  %v7447_v3 = vrot.slane %v19841_v42, 7 }
 0x4fa   :  { %v7892_v32 = vrot.slane %v7878_v52, %v21853_v6  ;;  %v6655_v10 = vmax.f32 %v6574_v17, %v6628_v55 }
 0x4fb   :  { %21928 = vst [vmem:[#allocation83_spill] sm:$0xff] %v19844_v31  ;;  %v19853_v1 = vcombine.high %v19844_v31, %v19844_v31  ;;  %v7453_v49 = vrot.slane %v19844_v31, 7  ;;  %v19859_v9 = vrot.slane %v7108_v7, %v21853_v6  ;;  %v7448_v0 = vsel %vm19131_vm7, %v7446_v60, %v7447_v3 }
 0x4fc   :  { %v7449_v59 = vrot.slane %v7447_v3, 2  ;;  %v7450_v44 = vrot.slane %v19849_v46, 7  ;;  %v7893_v62 = vcombine.low %v7885_v26, %v7892_v32  ;;  %v19870_v38 = vrot.slane %v6655_v10, %v21853_v6 }
 0x4fd   :  { %v7456_v22 = vrot.slane %v19853_v1, 7  ;;  %v7455_v37 = vrot.slane %v7453_v49, 2  ;;  %v19867_v16 = vcombine.high %v19859_v9, %v19859_v9  ;;  %v7459_v60 = vrot.slane %v19859_v9, 7 }
 0x4fe   :  { %v7451_v27 = vsel %vm19131_vm7, %v7449_v59, %v7450_v44  ;;  %v7452_v33 = vrot.slane %v7450_v44, 2  ;;  %13532 = vmatmul.mubr.f32.gmra.mrb[128].mxu1 %v7893_v62  ;;  %v19879_v17 = vcombine.high %v19870_v38, %v19870_v38  ;;  %v7465_v32 = vrot.slane %v19870_v38, 7 }
 0x4ff   :  { %v7458_v4 = vrot.slane %v7456_v22, 2  ;;  %v7457_v53 = vsel %vm19131_vm7, %v7455_v37, %v7456_v22  ;;  %v7894_v52 = vcombine.low %v7448_v0, %v7451_v27  ;;  %v7462_v7 = vrot.slane %v19867_v16, 7  ;;  %v8812_v0 = vld [vmem:[%s21194_s3 + $0x100] sm:$0xff]  ;;  %v8813_v22 = vld [vmem:[%s21194_s3 + $0x108] sm:$0xff] }
 0x500   :  { %21929 = vst [vmem:[#allocation84_spill] sm:$0xff] %v19879_v17  ;;  %v7454_v26 = vsel %vm19131_vm7, %v7452_v33, %v7453_v49  ;;  %v7461_v55 = vrot.slane %v7459_v60, 2  ;;  %v7468_v44 = vrot.slane %v19879_v17, 7  ;;  %v7467_v62 = vrot.slane %v7465_v32, 2 }
 0x501   :  { %v7460_v3 = vsel %vm19131_vm7, %v7458_v4, %v7459_v60  ;;  %v7895_v10 = vcombine.low %v7454_v26, %v7457_v53  ;;  %v7464_v59 = vrot.slane %v7462_v7, 2  ;;  %v8150_v37 = vcombine.low %v19120_v21, %v19146_v25 }
 0x502   :  { %v7463_v49 = vsel %vm19131_vm7, %v7461_v55, %v7462_v7  ;;  %v7902_v27 = vrot.slane %v7894_v52, %v21853_v6  ;;  %v7469_v53 = vsel %vm19131_vm7, %v7467_v62, %v7468_v44  ;;  %v8149_v26 = vcombine.low %v19102_v56, %v19124_v58 }
 0x503   :  { %v7909_v33 = vrot.slane %v7895_v10, %v21853_v6  ;;  %v7466_v4 = vsel %vm19131_vm7, %v7464_v59, %v7465_v32  ;;  %v7911_v60 = vcombine.low %v7460_v3, %v7463_v49  ;;  %v14026_v17 = vpack.c.bf16 %v8813_v22, %v8812_v0 }
 0x504   :  { %v7912_v55 = vcombine.low %v7466_v4, %v7469_v53  ;;  %v8167_v21 = vcombine.low %v19127_v2, %v19152_v24  ;;  %v8164_v52 = vrot.slane %v8150_v37, %v21853_v6  ;;  %v8184_v10 = vcombine.low %v19142_v43, %v19172_v12  ;;  %v8815_v4 = vld [vmem:[%s21194_s3 + $0x118] sm:$0xff] }
 0x505   :  { %v7910_v7 = vcombine.low %v7902_v27, %v7909_v33  ;;  %14027 = vmatprep.subr.bf16.mxu1 %v14026_v17  ;;  %v7919_v3 = vrot.slane %v7911_v60, %v21853_v6  ;;  %v8166_v56 = vcombine.low %v19105_v47, %v19138_v45  ;;  %v8157_v59 = vrot.slane %v8149_v26, %v21853_v6  ;;  %v8814_v33 = vld [vmem:[%s21194_s3 + $0x110] sm:$0xff] }
 0x506   :  { %v7926_v32 = vrot.slane %v7912_v55, %v21853_v6  ;;  %v8183_v44 = vcombine.low %v19111_v13, %v19158_v50  ;;  %v8181_v22 = vrot.slane %v8167_v21, %v21853_v6  ;;  %v8201_v49 = vcombine.low %v19195_v63, %v19205_v11 }
 0x507   :  { %13534 = vmatprep.mubr.f32.mxu1 %v7910_v7  ;;  %v8165_v62 = vcombine.low %v8157_v59, %v8164_v52  ;;  %v8198_v37 = vrot.slane %v8184_v10, %v21853_v6  ;;  %v8218_v27 = vcombine.low %v19238_v19, %v19245_v48  ;;  %v8174_v21 = vrot.slane %v8166_v56, %v21853_v6  ;;  %v8816_v59 = vld [vmem:[%s21194_s3 + $0x120] sm:$0xff] }
 0x508   :  { %v7927_v0 = vcombine.low %v7919_v3, %v7926_v32  ;;  %v8200_v60 = vcombine.low %v19115_v51, %v19199_v30  ;;  %v8191_v53 = vrot.slane %v8183_v44, %v21853_v6  ;;  %v8217_v26 = vcombine.low %v19209_v40, %v19227_v41  ;;  %v8817_v44 = vld [vmem:[%s21194_s3 + $0x128] sm:$0xff] }
 0x509   :  { %v8182_v7 = vcombine.low %v8174_v21, %v8181_v22  ;;  %v8215_v55 = vrot.slane %v8201_v49, %v21853_v6  ;;  %v14030_v52 = vpack.c.bf16 %v8815_v4, %v8814_v33  ;;  %v8235_v10 = vcombine.low %v19270_v28, %v19287_v54 }
 0x50a   :  { %13535 = vmatmul.mubr.f32.gmra.mrb[130].mxu1 %v7927_v0  ;;  %v8199_v3 = vcombine.low %v8191_v53, %v8198_v37  ;;  %v8232_v32 = vrot.slane %v8218_v27, %v21853_v6  ;;  %v8252_v56 = vcombine.low %v19293_v36, %v19304_v14  ;;  %v8208_v0 = vrot.slane %v8200_v60, %v21853_v6 }
 0x50b   :  { %13569 = vmatprep.mubr.f32.mxu1 %v8165_v62  ;;  %v8234_v22 = vcombine.low %v19230_v39, %v19261_v23  ;;  %v8225_v49 = vrot.slane %v8217_v26, %v21853_v6  ;;  %v8251_v62 = vcombine.low %v19264_v8, %v19283_v29  ;;  %v8249_v27 = vrot.slane %v8235_v10, %v21853_v6  ;;  %v8819_v26 = vld [vmem:[%s21194_s3 + $0x138] sm:$0xff] }
 0x50c   :  { %v8216_v37 = vcombine.low %v8208_v0, %v8215_v55  ;;  %v8269_v33 = vcombine.low %v19333_v57, %v19342_v5  ;;  %v14034_v4 = vpack.c.bf16 %v8817_v44, %v8816_v59  ;;  %v8266_v60 = vrot.slane %v8252_v56, %v21853_v6  ;;  %v21931_v44 = vld [vmem:[#allocation46_spill] sm:$0xff]  ;;  %v21932_v0 = vld [vmem:[#allocation47_spill] sm:$0xff] }
 0x50d   :  { %v8233_v21 = vcombine.low %v8225_v49, %v8232_v32  ;;  %v8286_v53 = vcombine.low %v19349_v34, %v19360_v18  ;;  %v8268_v55 = vcombine.low %v19307_v20, %v19324_v15  ;;  %v8259_v10 = vrot.slane %v8251_v62, %v21853_v6  ;;  %v21933_v34 = vld [vmem:[#allocation50_spill] sm:$0xff]  ;;  %v21934_v15 = vld [vmem:[#allocation48_spill] sm:$0xff] }
 0x50e   :  { %13570 = vmatmul.mubr.f32.vlgmr.msra.gmra.mrb[106].mxu1 %v8182_v7  ;;  %v8242_v7 = vrot.slane %v8234_v22, %v21853_v6  ;;  %v8283_v59 = vrot.slane %v8269_v33, %v21853_v6  ;;  %v8303_v49 = vcombine.low %v21932_v0, %v21931_v44  ;;  %v8821_v62 = vld [vmem:[%s21194_s3 + $0x148] sm:$0xff]  ;;  %v21935_v33 = vld [vmem:[#allocation44_spill] sm:$0xff] }
 0x50f   :  { %13572 = vmatprep.mubr.f32.mxu1 %v8199_v3  ;;  %14029 = vmatpush3.bf16.msra.mxu1 %v14026_v17  ;;  %v8818_v17 = vld [vmem:[%s21194_s3 + $0x130] sm:$0xff]  ;;  %v21930_v3 = vld [vmem:[#allocation41_spill] sm:$0xff]  ;;  %v8267_v35 = vcombine.low %v8259_v10, %v8266_v60  ;;  %v8300_v22 = vrot.slane %v8286_v53, %v21853_v6  ;;  %v21940_v44 = vld [vmem:[#allocation52_spill] sm:$0xff] }
 0x510   :  { %14031 = vmatprep.subr.bf16.mxu1 %v14030_v52  ;;  %v8285_v32 = vcombine.low %v21930_v3, %v19354_v61  ;;  %v8250_v56 = vcombine.low %v8242_v7, %v8249_v27  ;;  %v8276_v27 = vrot.slane %v8268_v55, %v21853_v6  ;;  %v21936_v7 = vld [vmem:[#allocation45_spill] sm:$0xff]  ;;  %v21937_v53 = vld [vmem:[#allocation51_spill] sm:$0xff]  ;;  %v8317_v0 = vrot.slane %v8303_v49, %v21853_v6  ;;  %v21941_v18 = vld [vmem:[#allocation58_spill] sm:$0xff] }
 0x511   :  { %v21943_v49 = vld [vmem:[#allocation55_spill] sm:$0xff] }
 0x512   :  { %13573 = vmatmul.mubr.f32.gmra.mrb[108].mxu1 %v8216_v37  ;;  %v14038_v37 = vpack.c.bf16 %v8819_v26, %v8818_v17  ;;  %v8302_v17 = vcombine.low %v21936_v7, %v21935_v33  ;;  %v8293_v60 = vrot.slane %v8285_v32, %v21853_v6  ;;  %v21938_v26 = vld [vmem:[#allocation49_spill] sm:$0xff]  ;;  %v21942_v33 = vld [vmem:[#allocation59_spill] sm:$0xff] }
 0x513   :  { %13575 = vmatprep.mubr.f32.mxu1 %v8233_v21  ;;  %14033 = vmatpush3.bf16.msra.mxu1 %v14030_v52  ;;  %v8320_v21 = vcombine.low %v21934_v15, %v21933_v34  ;;  %v8820_v52 = vld [vmem:[%s21194_s3 + $0x140] sm:$0xff]  ;;  %v8319_v10 = vcombine.low %v21938_v26, %v21937_v53  ;;  %v8284_v15 = vcombine.low %v8276_v27, %v8283_v59  ;;  %v21939_v34 = vld [vmem:[#allocation54_spill] sm:$0xff]  ;;  %v8823_v32 = vld [vmem:[%s21194_s3 + $0x158] sm:$0xff] }
 0x514   :  { %14035 = vmatprep.subr.bf16.mxu1 %v14034_v4  ;;  %v8337_v61 = vcombine.low %v21940_v44, %v21939_v34  ;;  %v8301_v57 = vcombine.low %v8293_v60, %v8300_v22  ;;  %v8310_v59 = vrot.slane %v8302_v17, %v21853_v6  ;;  %v21944_v27 = vld [vmem:[#allocation53_spill] sm:$0xff]  ;;  %v21948_v34 = vld [vmem:[#allocation62_spill] sm:$0xff]  ;;  %v21949_v7 = vld [vmem:[#allocation71_spill] sm:$0xff] }
 0x515   :  { %v8334_v55 = vrot.slane %v8320_v21, %v21853_v6  ;;  %v8327_v22 = vrot.slane %v8319_v10, %v21853_v6  ;;  %v21945_v21 = vld [vmem:[#allocation56_spill] sm:$0xff] }
 0x516   :  { %13576 = vmatmul.mubr.f32.gmra.mrb[110].mxu1 %v8250_v56  ;;  %v14042_v56 = vpack.c.bf16 %v8821_v62, %v8820_v52  ;;  %v8336_v52 = vcombine.low %v21944_v27, %v21943_v49  ;;  %v21946_v62 = vld [vmem:[#allocation57_spill] sm:$0xff]  ;;  %v8351_v44 = vrot.slane %v8337_v61, %v21853_v6  ;;  %v21957_v27 = vld [vmem:[#allocation75_spill] sm:$0xff] }
 0x517   :  { %13578 = vmatprep.mubr.f32.mxu1 %v8267_v35  ;;  %14037 = vmatpush3.bf16.msra.mxu1 %v14034_v4  ;;  %v8354_v35 = vcombine.low %v21942_v33, %v21941_v18  ;;  %v8822_v4 = vld [vmem:[%s21194_s3 + $0x150] sm:$0xff]  ;;  %v8353_v60 = vcombine.low %v21946_v62, %v21945_v21  ;;  %v8318_v33 = vcombine.low %v8310_v59, %v8317_v0  ;;  %v21947_v18 = vld [vmem:[#allocation65_spill] sm:$0xff] }
 0x518   :  { %14039 = vmatprep.subr.bf16.mxu1 %v14038_v37  ;;  %v8371_v53 = vcombine.low %v21948_v34, %v21947_v18  ;;  %v8335_v26 = vcombine.low %v8327_v22, %v8334_v55  ;;  %v21950_v49 = vld [vmem:[#allocation69_spill] sm:$0xff]  ;;  %v8344_v61 = vrot.slane %v8336_v52, %v21853_v6  ;;  %v21952_v59 = vld [vmem:[#allocation63_spill] sm:$0xff] }
 0x519   :  { %v8368_v17 = vrot.slane %v8354_v35, %v21853_v6  ;;  %v8824_v10 = vld [vmem:[%s21194_s3 + $0x160] sm:$0xff]  ;;  %v8825_v0 = vld [vmem:[%s21194_s3 + $0x168] sm:$0xff]  ;;  %v8361_v55 = vrot.slane %v8353_v60, %v21853_v6  ;;  %v8826_v60 = vld [vmem:[%s21194_s3 + $0x170] sm:$0xff] }
 0x51a   :  { %13579 = vmatmul.mubr.f32.gmra.mrb[112].mxu1 %v8284_v15  ;;  %v14046_v15 = vpack.c.bf16 %v8823_v32, %v8822_v4  ;;  %v21953_v35 = vld [vmem:[#allocation68_spill] sm:$0xff]  ;;  %v8385_v18 = vrot.slane %v8371_v53, %v21853_v6  ;;  %v21956_v34 = vld [vmem:[#allocation73_spill] sm:$0xff] }
 0x51b   :  { %13581 = vmatprep.mubr.f32.mxu1 %v8301_v57  ;;  %14041 = vmatpush3.bf16.msra.mxu1 %v14038_v37  ;;  %v8388_v57 = vcombine.low %v21950_v49, %v21949_v7  ;;  %v21951_v37 = vld [vmem:[#allocation60_spill] sm:$0xff]  ;;  %v8352_v7 = vcombine.low %v8344_v61, %v8351_v44  ;;  %v21955_v49 = vld [vmem:[#allocation74_spill] sm:$0xff]  ;;  %v8369_v62 = vcombine.low %v8361_v55, %v8368_v17 }
 0x51c   :  { %14043 = vmatprep.subr.bf16.mxu1 %v14042_v56  ;;  %v8370_v4 = vcombine.low %v21952_v59, %v21951_v37  ;;  %v21954_v32 = vld [vmem:[#allocation64_spill] sm:$0xff]  ;;  %v8405_v21 = vcombine.low %v21956_v34, %v21955_v49  ;;  %v21958_v59 = vld [vmem:[#allocation13_spill] sm:$0xff]  ;;  %v21960_v61 = vld [vmem:[#allocation70_spill] sm:$0xff] }
 0x51d   :  { %v8387_v22 = vcombine.low %v21954_v32, %v21953_v35  ;;  %v8402_v52 = vrot.slane %v8388_v57, %v21853_v6  ;;  %v8827_v44 = vld [vmem:[%s21194_s3 + $0x178] sm:$0xff]  ;;  %v21961_v57 = vld [vmem:[#allocation78_spill] sm:$0xff] }
 0x51e   :  { %13582 = vmatmul.mubr.f32.gmra.mrb[114].mxu1 %v8318_v33  ;;  %v14050_v33 = vpack.c.bf16 %v8825_v0, %v8824_v10  ;;  %v8378_v53 = vrot.slane %v8370_v4, %v21853_v6  ;;  %v21962_v0 = vld [vmem:[#allocation76_spill] sm:$0xff]  ;;  %v8419_v49 = vrot.slane %v8405_v21, %v21853_v6  ;;  %v21964_v34 = vld [vmem:[#allocation14_spill] sm:$0xff]  ;;  %v21965_v37 = vld [vmem:[#allocation19_spill] sm:$0xff] }
 0x51f   :  { %13584 = vmatprep.mubr.f32.mxu1 %v8335_v26  ;;  %14045 = vmatpush3.bf16.msra.mxu1 %v14042_v56  ;;  %v8422_v26 = vcombine.low %v21958_v59, %v21957_v27  ;;  %v21959_v56 = vld [vmem:[#allocation72_spill] sm:$0xff]  ;;  %v8395_v17 = vrot.slane %v8387_v22, %v21853_v6  ;;  %v8421_v55 = vcombine.low %v21962_v0, %v21961_v57  ;;  %v21963_v59 = vld [vmem:[#allocation15_spill] sm:$0xff]  ;;  %v21968_v0 = vld [vmem:[#allocation77_spill] sm:$0xff] }
 0x520   :  { %14047 = vmatprep.subr.bf16.mxu1 %v14046_v15  ;;  %v8404_v10 = vcombine.low %v21960_v61, %v21959_v56  ;;  %v8386_v27 = vcombine.low %v8378_v53, %v8385_v18  ;;  %v8439_v32 = vcombine.low %v21964_v34, %v21963_v59  ;;  %v21966_v56 = vld [vmem:[#allocation18_spill] sm:$0xff]  ;;  %v21967_v61 = vld [vmem:[#allocation12_spill] sm:$0xff]  ;;  %v21970_v53 = vld [vmem:[#allocation17_spill] sm:$0xff] }
 0x521   :  { %v8403_v35 = vcombine.low %v8395_v17, %v8402_v52  ;;  %v8436_v4 = vrot.slane %v8422_v26, %v21853_v6  ;;  %v8429_v18 = vrot.slane %v8421_v55, %v21853_v6  ;;  %v21969_v21 = vld [vmem:[#allocation16_spill] sm:$0xff]  ;;  %v21971_v26 = vld [vmem:[#allocation23_spill] sm:$0xff]  ;;  %v21976_v34 = vld [vmem:[#allocation21_spill] sm:$0xff] }
 0x522   :  { %13585 = vmatmul.mubr.f32.gmra.mrb[116].mxu1 %v8352_v7  ;;  %v14054_v7 = vpack.c.bf16 %v8827_v44, %v8826_v60  ;;  %v8412_v22 = vrot.slane %v8404_v10, %v21853_v6  ;;  %v8455_v59 = vcombine.low %v21970_v53, %v21969_v21  ;;  %v8453_v52 = vrot.slane %v8439_v32, %v21853_v6  ;;  %v21972_v44 = vld [vmem:[#allocation22_spill] sm:$0xff]  ;;  %v21975_v55 = vld [vmem:[#allocation20_spill] sm:$0xff] }
 0x523   :  { %13587 = vmatprep.mubr.f32.mxu1 %v8369_v62  ;;  %14049 = vmatpush3.bf16.msra.mxu1 %v14046_v15  ;;  %v8456_v62 = vcombine.low %v21966_v56, %v21965_v37  ;;  %v8438_v15 = vcombine.low %v21968_v0, %v21967_v61  ;;  %v8473_v17 = vcombine.low %v21972_v44, %v21971_v26  ;;  %v21973_v37 = vld [vmem:[#allocation27_spill] sm:$0xff]  ;;  %v21974_v56 = vld [vmem:[#allocation26_spill] sm:$0xff]  ;;  %v21977_v32 = vld [vmem:[#allocation24_spill] sm:$0xff] }
 0x524   :  { %14051 = vmatprep.subr.bf16.mxu1 %v14050_v33  ;;  %v8420_v60 = vcombine.low %v8412_v22, %v8419_v49  ;;  %v8490_v61 = vcombine.low %v21974_v56, %v21973_v37  ;;  %v8472_v53 = vcombine.low %v21976_v34, %v21975_v55  ;;  %v8463_v49 = vrot.slane %v8455_v59, %v21853_v6  ;;  %v21982_v56 = vld [vmem:[#allocation34_spill] sm:$0xff]  ;;  %v21983_v59 = vld [vmem:[#allocation28_spill] sm:$0xff]  ;;  %v21984_v55 = vld [vmem:[#allocation29_spill] sm:$0xff] }
 0x525   :  { %v8470_v10 = vrot.slane %v8456_v62, %v21853_v6  ;;  %v21979_v62 = vld [vmem:[#allocation30_spill] sm:$0xff]  ;;  %v8506_v34 = vcombine.low %v21984_v55, %v21983_v59 }
 0x526   :  { %13588 = vmatmul.mubr.f32.gmra.mrb[118].mxu1 %v8386_v27  ;;  %v8437_v27 = vcombine.low %v8429_v18, %v8436_v4  ;;  %v8487_v4 = vrot.slane %v8473_v17, %v21853_v6  ;;  %v21980_v18 = vld [vmem:[#allocation31_spill] sm:$0xff]  ;;  %v21986_v17 = vld [vmem:[#allocation33_spill] sm:$0xff] }
 0x527   :  { %13590 = vmatprep.mubr.f32.mxu1 %v8403_v35  ;;  %14053 = vmatpush3.bf16.msra.mxu1 %v14050_v33  ;;  %v8446_v35 = vrot.slane %v8438_v15, %v21853_v6  ;;  %v21978_v33 = vld [vmem:[#allocation25_spill] sm:$0xff]  ;;  %v8507_v44 = vcombine.low %v21980_v18, %v21979_v62  ;;  %v8471_v37 = vcombine.low %v8463_v49, %v8470_v10  ;;  %v21981_v15 = vld [vmem:[#allocation35_spill] sm:$0xff]  ;;  %v21987_v49 = vld [vmem:[#allocation80_spill] sm:$0xff] }
 0x528   :  { %14055 = vmatprep.subr.bf16.mxu1 %v14054_v7  ;;  %v8489_v22 = vcombine.low %v21978_v33, %v21977_v32  ;;  %v8524_v21 = vcombine.low %v21982_v56, %v21981_v15  ;;  %v21989_v15 = vld [vmem:[#allocation66_spill] sm:$0xff] }
 0x529   :  { %v8454_v26 = vcombine.low %v8446_v35, %v8453_v52  ;;  %v21985_v52 = vld [vmem:[#allocation32_spill] sm:$0xff]  ;;  %v8521_v10 = vrot.slane %v8507_v44, %v21853_v6  ;;  %v21991_v44 = vld [vmem:[#allocation82_spill] sm:$0xff] }
 0x52a   :  { %13591 = vmatmul.mubr.f32.gmra.mrb[120].mxu1 %v8420_v60  ;;  %v8504_v60 = vrot.slane %v8490_v61, %v21853_v6  ;;  %v8523_v35 = vcombine.low %v21986_v17, %v21985_v52  ;;  %v21988_v61 = vld [vmem:[#allocation81_spill] sm:$0xff] }
 0x52b   :  { %13593 = vmatprep.mubr.f32.mxu1 %v8437_v27  ;;  %14057 = vmatpush3.bf16.msra.mxu1 %v14054_v7  ;;  %v8480_v27 = vrot.slane %v8472_v53, %v21853_v6  ;;  %v8497_v7 = vrot.slane %v8489_v22, %v21853_v6  ;;  %v8541_v62 = vcombine.low %v21988_v61, %v21987_v49  ;;  %v21990_v22 = vld [vmem:[#allocation79_spill] sm:$0xff] }
 0x52c   :  { %v8558_v53 = vcombine.low %v19849_v46, %v19844_v31  ;;  %v8540_v56 = vcombine.low %v21990_v22, %v21989_v15 }
 0x52d   :  { %v8488_v33 = vcombine.low %v8480_v27, %v8487_v4  ;;  %v8505_v18 = vcombine.low %v8497_v7, %v8504_v60  ;;  %v8531_v4 = vrot.slane %v8523_v35, %v21853_v6  ;;  %v8557_v27 = vcombine.low %v21991_v44, %v19841_v42 }
 0x52e   :  { %13594 = vmatmul.mubr.f32.gmra.mrb[122].mxu1 %v8454_v26  ;;  %v8538_v26 = vrot.slane %v8524_v21, %v21853_v6  ;;  %v8555_v60 = vrot.slane %v8541_v62, %v21853_v6  ;;  %v8575_v21 = vcombine.low %v19867_v16, %v19870_v38  ;;  %v8574_v35 = vcombine.low %v19853_v1, %v19859_v9 }
 0x52f   :  { %13596 = vmatprep.mubr.f32.mxu1 %v8471_v37  ;;  %v8514_v37 = vrot.slane %v8506_v34, %v21853_v6  ;;  %v8829_v34 = vcombine.low %v19146_v25, %v19105_v47  ;;  %v8863_v25 = vcombine.low %v19172_v12, %v19115_v51  ;;  %v8897_v12 = vcombine.low %v19245_v48, %v19230_v39 }
 0x530   :  { %v8539_v7 = vcombine.low %v8531_v4, %v8538_v26  ;;  %v8589_v26 = vrot.slane %v8575_v21, %v21853_v6  ;;  %v8931_v48 = vcombine.low %v19304_v14, %v19307_v20  ;;  %v21993_v20 = vld [vmem:[#allocation45_spill] sm:$0xff] }
 0x531   :  { %v8522_v17 = vcombine.low %v8514_v37, %v8521_v10  ;;  %v8565_v10 = vrot.slane %v8557_v27, %v21853_v6  ;;  %v21992_v37 = vld [vmem:[#allocation37_spill] sm:$0xff]  ;;  %v8843_v47 = vrot.slane %v8829_v34, %v21853_v6  ;;  %v8862_v27 = vcombine.low %v19158_v50, %v19142_v43 }
 0x532   :  { %13597 = vmatmul.mubr.f32.gmra.mrb[124].mxu1 %v8488_v33  ;;  %v8572_v33 = vrot.slane %v8558_v53, %v21853_v6  ;;  %v8828_v62 = vcombine.low %v19124_v58, %v21992_v37  ;;  %v8846_v53 = vcombine.low %v19152_v24, %v19111_v13  ;;  %v8880_v24 = vcombine.low %v19205_v11, %v19209_v40 }
 0x533   :  { %13599 = vmatprep.mubr.f32.mxu1 %v8505_v18  ;;  %v8548_v18 = vrot.slane %v8540_v56, %v21853_v6  ;;  %v8582_v56 = vrot.slane %v8574_v35, %v21853_v6  ;;  %v8877_v51 = vrot.slane %v8863_v25, %v21853_v6  ;;  %v8870_v43 = vrot.slane %v8862_v27, %v21853_v6 }
 0x534   :  { %v8573_v4 = vcombine.low %v8565_v10, %v8572_v33  ;;  %v8836_v58 = vrot.slane %v8828_v62, %v21853_v6  ;;  %v8860_v13 = vrot.slane %v8846_v53, %v21853_v6  ;;  %v8896_v50 = vcombine.low %v19227_v41, %v19238_v19  ;;  %v21996_v10 = vld [vmem:[#allocation39_spill] sm:$0xff] }
 0x535   :  { %v8556_v31 = vcombine.low %v8548_v18, %v8555_v60  ;;  %v8590_v60 = vcombine.low %v8582_v56, %v8589_v26  ;;  %v8894_v11 = vrot.slane %v8880_v24, %v21853_v6  ;;  %v8914_v40 = vcombine.low %v19287_v54, %v19264_v8  ;;  %v21994_v18 = vld [vmem:[#allocation42_spill] sm:$0xff]  ;;  %v21998_v62 = vld [vmem:[#allocation43_spill] sm:$0xff]  ;;  %v22004_v24 = vld [vmem:[#allocation44_spill] sm:$0xff] }
 0x536   :  { %13600 = vmatmul.mubr.f32.gmra.mrb[126].mxu1 %v8522_v17  ;;  %v8845_v17 = vcombine.low %v19138_v45, %v19127_v2  ;;  %v8844_v21 = vcombine.low %v8836_v58, %v8843_v47  ;;  %v8879_v45 = vcombine.low %v19199_v30, %v19195_v63  ;;  %v8911_v39 = vrot.slane %v8897_v12, %v21853_v6  ;;  %v22002_v58 = vld [vmem:[#allocation50_spill] sm:$0xff]  ;;  %v22005_v12 = vld [vmem:[#allocation48_spill] sm:$0xff] }
 0x537   :  { %13602 = vmatprep.mubr.f32.mxu1 %v8539_v7  ;;  %v8878_v7 = vcombine.low %v8870_v43, %v8877_v51  ;;  %v8913_v30 = vcombine.low %v19261_v23, %v19270_v28  ;;  %v8904_v41 = vrot.slane %v8896_v50, %v21853_v6  ;;  %v8930_v19 = vcombine.low %v19283_v29, %v19293_v36  ;;  %v21995_v28 = vld [vmem:[#allocation38_spill] sm:$0xff]  ;;  %v21997_v36 = vld [vmem:[#allocation40_spill] sm:$0xff] }
 0x538   :  { %v8853_v2 = vrot.slane %v8845_v17, %v21853_v6  ;;  %v8887_v63 = vrot.slane %v8879_v45, %v21853_v6  ;;  %v8928_v8 = vrot.slane %v8914_v40, %v21853_v6  ;;  %v8948_v54 = vcombine.low %v19342_v5, %v21930_v3  ;;  %v21999_v3 = vld [vmem:[#allocation49_spill] sm:$0xff] }
 0x539   :  { %v8912_v34 = vcombine.low %v8904_v41, %v8911_v39  ;;  %v8945_v14 = vrot.slane %v8931_v48, %v21853_v6  ;;  %v8965_v35 = vcombine.low %v21994_v18, %v21993_v20  ;;  %v8921_v23 = vrot.slane %v8913_v30, %v21853_v6  ;;  %v22001_v17 = vld [vmem:[#allocation53_spill] sm:$0xff] }
 0x53a   :  { %13603 = vmatmul.mubr.f32.gmra.mrb[128].mxu1 %v8556_v31  ;;  %v8861_v31 = vcombine.low %v8853_v2, %v8860_v13  ;;  %v8895_v33 = vcombine.low %v8887_v63, %v8894_v11  ;;  %v8947_v37 = vcombine.low %v21996_v10, %v21995_v28  ;;  %v8938_v29 = vrot.slane %v8930_v19, %v21853_v6  ;;  %v22003_v13 = vld [vmem:[#allocation47_spill] sm:$0xff]  ;;  %v22008_v11 = vld [vmem:[#allocation54_spill] sm:$0xff]  ;;  %v22009_v48 = vld [vmem:[#allocation61_spill] sm:$0xff] }
 0x53b   :  { %13605 = vmatprep.mubr.f32.mxu1 %v8573_v4  ;;  %v8964_v26 = vcombine.low %v21998_v62, %v21997_v36  ;;  %v8929_v53 = vcombine.low %v8921_v23, %v8928_v8  ;;  %v8962_v5 = vrot.slane %v8948_v54, %v21853_v6  ;;  %v22000_v4 = vld [vmem:[#allocation46_spill] sm:$0xff]  ;;  %v8979_v56 = vrot.slane %v8965_v35, %v21853_v6  ;;  %v22006_v2 = vld [vmem:[#allocation51_spill] sm:$0xff]  ;;  %v22011_v19 = vld [vmem:[#allocation52_spill] sm:$0xff] }
 0x53c   :  { %v8982_v47 = vcombine.low %v22000_v4, %v21999_v3  ;;  %v8946_v25 = vcombine.low %v8938_v29, %v8945_v14  ;;  %v8999_v27 = vcombine.low %v22002_v58, %v22001_v17  ;;  %v8998_v45 = vcombine.low %v22006_v2, %v22005_v12  ;;  %v22010_v63 = vld [vmem:[#allocation58_spill] sm:$0xff]  ;;  %v22014_v14 = vld [vmem:[#allocation56_spill] sm:$0xff]  ;;  %v22017_v36 = vld [vmem:[#allocation69_spill] sm:$0xff] }
 0x53d   :  { %v8972_v51 = vrot.slane %v8964_v26, %v21853_v6  ;;  %v9033_v30 = vcombine.low %v22010_v63, %v22009_v48  ;;  %v22015_v23 = vld [vmem:[#allocation62_spill] sm:$0xff]  ;;  %v22016_v28 = vld [vmem:[#allocation60_spill] sm:$0xff]  ;;  %v22020_v3 = vld [vmem:[#allocation65_spill] sm:$0xff] }
 0x53e   :  { %13606 = vmatmul.mubr.f32.gmra.mrb[130].mxu1 %v8590_v60  ;;  %v8955_v60 = vrot.slane %v8947_v37, %v21853_v6  ;;  %v8996_v50 = vrot.slane %v8982_v47, %v21853_v6  ;;  %v9013_v39 = vrot.slane %v8999_v27, %v21853_v6  ;;  %v9006_v54 = vrot.slane %v8998_v45, %v21853_v6  ;;  %v22018_v62 = vld [vmem:[#allocation68_spill] sm:$0xff]  ;;  %v22025_v12 = vld [vmem:[#allocation13_spill] sm:$0xff]  ;;  %v22029_v63 = vld [vmem:[#allocation14_spill] sm:$0xff] }
 0x53f   :  { %13640 = vmatprep.mubr.f32.mxu1 %v8844_v21  ;;  %v8981_v21 = vcombine.low %v22004_v24, %v22003_v13  ;;  %v9049_v10 = vcombine.low %v22016_v28, %v22015_v23  ;;  %v9047_v29 = vrot.slane %v9033_v30, %v21853_v6  ;;  %v9066_v26 = vcombine.low %v22018_v62, %v22017_v36  ;;  %v22024_v13 = vld [vmem:[#allocation72_spill] sm:$0xff]  ;;  %v22036_v23 = vld [vmem:[#allocation19_spill] sm:$0xff] }
 0x540   :  { %v8963_v43 = vcombine.low %v8955_v60, %v8962_v5  ;;  %v9014_v37 = vcombine.low %v9006_v54, %v9013_v39  ;;  %v22019_v5 = vld [vmem:[#allocation64_spill] sm:$0xff]  ;;  %v22023_v60 = vld [vmem:[#allocation73_spill] sm:$0xff]  ;;  %v9100_v2 = vcombine.low %v21961_v57, %v22025_v12  ;;  %v22044_v12 = vld [vmem:[#allocation34_spill] sm:$0xff] }
 0x541   :  { %v8989_v41 = vrot.slane %v8981_v21, %v21853_v6  ;;  %v9050_v4 = vcombine.low %v22020_v3, %v22019_v5  ;;  %v9057_v27 = vrot.slane %v9049_v10, %v21853_v6  ;;  %v9083_v24 = vcombine.low %v22024_v13, %v22023_v60  ;;  %v22030_v30 = vld [vmem:[#allocation12_spill] sm:$0xff]  ;;  %v22039_v5 = vld [vmem:[#allocation26_spill] sm:$0xff] }
 0x542   :  { %13641 = vmatmul.mubr.f32.vlgmr.msra.gmra.mrb[106].mxu1 %v8861_v31  ;;  %v22007_v31 = vld [vmem:[#allocation57_spill] sm:$0xff]  ;;  %v9108_v57 = vrot.slane %v9100_v2, %v21853_v6  ;;  %v22038_v36 = vld [vmem:[#allocation20_spill] sm:$0xff]  ;;  %v9168_v3 = vcombine.low %v21977_v32, %v22039_v5  ;;  %v9202_v2 = vcombine.low %v21985_v52, %v22044_v12 }
 0x543   :  { %13643 = vmatprep.mubr.f32.mxu1 %v8878_v7  ;;  %v9016_v40 = vcombine.low %v22008_v11, %v22007_v31  ;;  %v8980_v7 = vcombine.low %v8972_v51, %v8979_v56  ;;  %v8997_v18 = vcombine.low %v8989_v41, %v8996_v50  ;;  %v22022_v56 = vld [vmem:[#allocation71_spill] sm:$0xff]  ;;  %v9074_v51 = vrot.slane %v9066_v26, %v21853_v6  ;;  %v22027_v50 = vld [vmem:[#allocation74_spill] sm:$0xff] }
 0x544   :  { %v9064_v45 = vrot.slane %v9050_v4, %v21853_v6  ;;  %v9091_v48 = vrot.slane %v9083_v24, %v21853_v6  ;;  %v9117_v41 = vcombine.low %v22030_v30, %v22029_v63  ;;  %v22043_v24 = vld [vmem:[#allocation31_spill] sm:$0xff]  ;;  %v9176_v32 = vrot.slane %v9168_v3, %v21853_v6 }
 0x545   :  { %v9030_v35 = vrot.slane %v9016_v40, %v21853_v6  ;;  %v22028_v40 = vld [vmem:[#allocation75_spill] sm:$0xff]  ;;  %v9210_v52 = vrot.slane %v9202_v2, %v21853_v6  ;;  %v9236_v63 = vcombine.low %v19841_v42, %v19849_v46 }
 0x546   :  { %13644 = vmatmul.mubr.f32.gmra.mrb[108].mxu1 %v8895_v33  ;;  %v22012_v33 = vld [vmem:[#allocation55_spill] sm:$0xff]  ;;  %v9065_v39 = vcombine.low %v9057_v27, %v9064_v45 }
 0x547   :  { %13646 = vmatprep.mubr.f32.mxu1 %v8912_v34  ;;  %v9015_v8 = vcombine.low %v22012_v33, %v22011_v19  ;;  %v22013_v34 = vld [vmem:[#allocation59_spill] sm:$0xff]  ;;  %v22031_v33 = vld [vmem:[#allocation18_spill] sm:$0xff]  ;;  %v9244_v42 = vrot.slane %v9236_v63, %v21853_v6 }
 0x548   :  { %v9032_v20 = vcombine.low %v22014_v14, %v22013_v34  ;;  %v22033_v14 = vld [vmem:[#allocation17_spill] sm:$0xff]  ;;  %v10053_v3 = vld [vmem:[%s21196_s5 + $0xd0] sm:$0xff] }
 0x54a   :  { %13647 = vmatmul.mubr.f32.gmra.mrb[110].mxu1 %v8929_v53  ;;  %v9023_v53 = vrot.slane %v9015_v8, %v21853_v6  ;;  %v9040_v47 = vrot.slane %v9032_v20, %v21853_v6  ;;  %v22032_v8 = vld [vmem:[#allocation16_spill] sm:$0xff]  ;;  %v22034_v20 = vld [vmem:[#allocation15_spill] sm:$0xff] }
 0x54b   :  { %13649 = vmatprep.mubr.f32.mxu1 %v8946_v25  ;;  %v22021_v25 = vld [vmem:[#allocation70_spill] sm:$0xff]  ;;  %v9134_v54 = vcombine.low %v22032_v8, %v22031_v33 }
 0x54c   :  { %v9067_v17 = vcombine.low %v22022_v56, %v22021_v25  ;;  %v9031_v58 = vcombine.low %v9023_v53, %v9030_v35  ;;  %v9048_v21 = vcombine.low %v9040_v47, %v9047_v29  ;;  %v22035_v35 = vld [vmem:[#allocation21_spill] sm:$0xff]  ;;  %v22037_v29 = vld [vmem:[#allocation22_spill] sm:$0xff]  ;;  %v22041_v25 = vld [vmem:[#allocation23_spill] sm:$0xff] }
 0x54d   :  { %v9135_v28 = vcombine.low %v22036_v23, %v22035_v35  ;;  %v9151_v62 = vcombine.low %v22038_v36, %v22037_v29  ;;  %v9142_v53 = vrot.slane %v9134_v54, %v21853_v6  ;;  %v22040_v47 = vld [vmem:[#allocation25_spill] sm:$0xff]  ;;  %v22049_v54 = vld [vmem:[#allocation84_spill] sm:$0xff]  ;;  %v10049_v29 = vld [vmem:[%s21196_s5 + $0xb0] sm:$0xff] }
 0x54e   :  { %13650 = vmatmul.mubr.f32.gmra.mrb[112].mxu1 %v8963_v43  ;;  %v22026_v43 = vld [vmem:[#allocation76_spill] sm:$0xff]  ;;  %v9081_v11 = vrot.slane %v9067_v17, %v21853_v6  ;;  %v9152_v56 = vcombine.low %v22041_v25, %v22040_v47 }
 0x54f   :  { %13652 = vmatprep.mubr.f32.mxu1 %v8980_v7  ;;  %v9084_v31 = vcombine.low %v22027_v50, %v22026_v43  ;;  %v9101_v7 = vcombine.low %v22028_v40, %v21968_v0  ;;  %v9149_v17 = vrot.slane %v9135_v28, %v21853_v6  ;;  %v9159_v13 = vrot.slane %v9151_v62, %v21853_v6  ;;  %v22045_v43 = vld [vmem:[#allocation33_spill] sm:$0xff]  ;;  %v22046_v50 = vld [vmem:[#allocation30_spill] sm:$0xff]  ;;  %v10046_v35 = vld [vmem:[%s21196_s5 + $0x98] sm:$0xff] }
 0x550   :  { %v9082_v19 = vcombine.low %v9074_v51, %v9081_v11  ;;  %v9166_v45 = vrot.slane %v9152_v56, %v21853_v6  ;;  %v22047_v11 = vld [vmem:[#allocation35_spill] sm:$0xff]  ;;  %v10047_v28 = vld [vmem:[%s21196_s5 + $0xa0] sm:$0xff]  ;;  %v10056_v56 = vld [vmem:[%s21196_s5 + $0xe8] sm:$0xff] }
 0x551   :  { %v9098_v34 = vrot.slane %v9084_v31, %v21853_v6  ;;  %v9115_v0 = vrot.slane %v9101_v7, %v21853_v6  ;;  %v9150_v51 = vcombine.low %v9142_v53, %v9149_v17  ;;  %v9186_v31 = vcombine.low %v22046_v50, %v22045_v43  ;;  %v10050_v36 = vld [vmem:[%s21196_s5 + $0xb8] sm:$0xff]  ;;  %v10052_v53 = vld [vmem:[%s21196_s5 + $0xc8] sm:$0xff]  ;;  %v10055_v25 = vld [vmem:[%s21196_s5 + $0xe0] sm:$0xff] }
 0x552   :  { %13653 = vmatmul.mubr.f32.gmra.mrb[114].mxu1 %v8997_v18  ;;  %v9118_v18 = vcombine.low %v22034_v20, %v22033_v14  ;;  %v9203_v40 = vcombine.low %v22047_v11, %v21990_v22  ;;  %v9167_v7 = vcombine.low %v9159_v13, %v9166_v45  ;;  %v14070_v62 = vpack.c.bf16 %v10050_v36, %v10049_v29 }
 0x553   :  { %13655 = vmatprep.mubr.f32.mxu1 %v9014_v37  ;;  %v9099_v10 = vcombine.low %v9091_v48, %v9098_v34  ;;  %v9125_v37 = vrot.slane %v9117_v41, %v21853_v6  ;;  %v9116_v26 = vcombine.low %v9108_v57, %v9115_v0  ;;  %v9200_v30 = vrot.slane %v9186_v31, %v21853_v6  ;;  %v9953_v31 = vld [vmem:[%s21196_s5] sm:$0xff] }
 0x554   :  { %v9132_v4 = vrot.slane %v9118_v18, %v21853_v6  ;;  %v9220_v41 = vcombine.low %v21987_v49, %v21991_v44  ;;  %v9217_v22 = vrot.slane %v9203_v40, %v21853_v6  ;;  %v9254_v49 = vcombine.low %v19870_v38, %v22049_v54  ;;  %v10044_v38 = vld [vmem:[%s21196_s5 + $0x88] sm:$0xff]  ;;  %v10045_v18 = vld [vmem:[%s21196_s5 + $0x90] sm:$0xff] }
 0x555   :  { %v14062_v23 = vpack.c.bf16 %v10046_v35, %v10045_v18  ;;  %v14082_v17 = vpack.c.bf16 %v10056_v56, %v10055_v25 }
 0x556   :  { %13656 = vmatmul.mubr.f32.gmra.mrb[116].mxu1 %v9031_v58  ;;  %v22042_v58 = vld [vmem:[#allocation27_spill] sm:$0xff]  ;;  %v9133_v60 = vcombine.low %v9125_v37, %v9132_v4  ;;  %v9218_v8 = vcombine.low %v9210_v52, %v9217_v22  ;;  %v9234_v46 = vrot.slane %v9220_v41, %v21853_v6  ;;  %v9268_v20 = vrot.slane %v9254_v49, %v21853_v6 }
 0x557   :  { %13658 = vmatprep.mubr.f32.mxu1 %v9048_v21  ;;  %v9169_v27 = vcombine.low %v22042_v58, %v21984_v55  ;;  %v9185_v21 = vcombine.low %v21983_v59, %v22043_v24  ;;  %v10054_v4 = vld [vmem:[%s21196_s5 + $0xd8] sm:$0xff]  ;;  %v10057_v58 = vld [vmem:[%s21196_s5 + $0xf0] sm:$0xff] }
 0x558   :  { %v14078_v47 = vpack.c.bf16 %v10054_v4, %v10053_v3 }
 0x559   :  { %v9183_v55 = vrot.slane %v9169_v27, %v21853_v6  ;;  %v9193_v59 = vrot.slane %v9185_v21, %v21853_v6  ;;  %v10058_v27 = vld [vmem:[%s21196_s5 + $0xf8] sm:$0xff] }
 0x55a   :  { %13659 = vmatmul.mubr.f32.gmra.mrb[118].mxu1 %v9065_v39  ;;  %v9219_v39 = vcombine.low %v21989_v15, %v21988_v61  ;;  %v9253_v61 = vcombine.low %v19859_v9, %v19867_v16  ;;  %v10043_v16 = vld [vmem:[%s21196_s5 + $0x80] sm:$0xff]  ;;  %v14086_v13 = vpack.c.bf16 %v10058_v27, %v10057_v58 }
 0x55b   :  { %13661 = vmatprep.mubr.f32.mxu1 %v9082_v19  ;;  %v9184_v48 = vcombine.low %v9176_v32, %v9183_v55  ;;  %v22048_v19 = vld [vmem:[#allocation83_spill] sm:$0xff]  ;;  %v9201_v33 = vcombine.low %v9193_v59, %v9200_v30  ;;  %v14058_v0 = vpack.c.bf16 %v10044_v38, %v10043_v16  ;;  %v9954_v55 = vld [vmem:[%s21196_s5 + $0x8] sm:$0xff] }
 0x55c   :  { %v9237_v57 = vcombine.low %v22048_v19, %v19853_v1  ;;  %v9227_v15 = vrot.slane %v9219_v39, %v21853_v6  ;;  %v9261_v1 = vrot.slane %v9253_v61, %v21853_v6 }
 0x55d   :  { %14059 = vmatprep.subr.bf16.mxu1 %v14058_v0 }
 0x55e   :  { %13662 = vmatmul.mubr.f32.gmra.mrb[120].mxu1 %v9099_v10  ;;  %v9251_v44 = vrot.slane %v9237_v57, %v21853_v6  ;;  %v9235_v34 = vcombine.low %v9227_v15, %v9234_v46  ;;  %v9269_v9 = vcombine.low %v9261_v1, %v9268_v20  ;;  %v10048_v10 = vld [vmem:[%s21196_s5 + $0xa8] sm:$0xff] }
 0x55f   :  { %13664 = vmatprep.mubr.f32.mxu1 %v9116_v26  ;;  %14061 = vmatpush3.bf16.msra.mxu1 %v14058_v0  ;;  %v14066_v37 = vpack.c.bf16 %v10048_v10, %v10047_v28  ;;  %v10051_v26 = vld [vmem:[%s21196_s5 + $0xc0] sm:$0xff] }
 0x560   :  { %v9252_v14 = vcombine.low %v9244_v42, %v9251_v44  ;;  %14063 = vmatprep.subr.bf16.mxu1 %v14062_v23  ;;  %v14074_v5 = vpack.c.bf16 %v10052_v53, %v10051_v26 }
 0x562   :  { %13665 = vmatmul.mubr.f32.gmra.mrb[122].mxu1 %v9133_v60  ;;  %v20309_v60 = vld [vmem:[%s21195_s4] ss:$0 sm:$0xff] }
 0x563   :  { %13667 = vmatprep.mubr.f32.mxu1 %v9150_v51  ;;  %14065 = vmatpush3.bf16.msra.mxu1 %v14062_v23 }
 0x564   :  { %14067 = vmatprep.subr.bf16.mxu1 %v14066_v37 }
 0x566   :  { %13668 = vmatmul.mubr.f32.gmra.mrb[124].mxu1 %v9167_v7  ;;  %v20335_v7 = vpack.c.bf16 %v9954_v55, %v9953_v31 }
 0x567   :  { %13670 = vmatprep.mubr.f32.mxu1 %v9184_v48  ;;  %14069 = vmatpush3.bf16.msra.mxu1 %v14066_v37 }
 0x568   :  { %14071 = vmatprep.subr.bf16.mxu1 %v14070_v62 }
 0x56a   :  { %13671 = vmatmul.mubr.f32.gmra.mrb[126].mxu1 %v9201_v33 }
 0x56b   :  { %13673 = vmatprep.mubr.f32.mxu1 %v9218_v8  ;;  %14073 = vmatpush3.bf16.msra.mxu1 %v14070_v62 }
 0x56c   :  { %14075 = vmatprep.subr.bf16.mxu1 %v14074_v5 }
 0x56e   :  { %13674 = vmatmul.mubr.f32.gmra.mrb[128].mxu1 %v9235_v34 }
 0x56f   :  { %13676 = vmatprep.mubr.f32.mxu1 %v9252_v14  ;;  %14077 = vmatpush3.bf16.msra.mxu1 %v14074_v5 }
 0x570   :  { %14079 = vmatprep.subr.bf16.mxu1 %v14078_v47 }
 0x572   :  { %13677 = vmatmul.mubr.f32.gmra.mrb[130].mxu1 %v9269_v9 }
 0x573   :  { %14081 = vmatpush3.bf16.msra.mxu1 %v14078_v47 }
 0x574   :  { %14083 = vmatprep.subr.bf16.mxu1 %v14082_v17 }
 0x577   :  { %14085 = vmatpush3.bf16.msra.mxu1 %v14082_v17 }
 0x578   :  { %14087 = vmatprep.subr.bf16.mxu1 %v14086_v13 }
 0x57b   :  { %14089 = vmatpush3.bf16.msra.mxu1 %v14086_v13 }
 0x57c   :  { %14091 = vmatprep.subr.bf16.mxu1 %v20335_v7 }
 0x615   :  { %v13642_v24 = vpop.f32.mrb[106].mxu1 }
 0x616   :  { %v20312_v21 = vadd.f32 %v13642_v24, %v20309_v60  ;;  %v9362_v51 = vpop.f32.mrb[107].mxu1 }
 0x617   :  { %v20315_v32 = vadd.f32 %v20309_v60, %v9362_v51 }
 0x618   :  { %v9581_v12 = vmul.f32 %v20312_v21, %v20312_v21 }
 0x619   :  { %v9580_v2 = vmul.f32 %v20315_v32, %v20315_v32  ;;  %v13645_v45 = vpop.f32.mrb[108].mxu1  ;;  %v9548_v11 = vadd.f32 %v20312_v21, %v20315_v32 }
 0x61a   :  { %v20322_v43 = vadd.f32 %v13645_v45, %v20309_v60  ;;  %v9372_v50 = vpop.f32.mrb[109].mxu1 }
 0x61b   :  { %v20333_v40 = vadd.f32 %v20309_v60, %v9372_v50  ;;  %v9606_v59 = vadd.f32 %v9581_v12, %v9580_v2 }
 0x61c   :  { %v9583_v63 = vmul.f32 %v20322_v43, %v20322_v43 }
 0x61d   :  { %v9549_v39 = vadd.f32 %v9548_v11, %v20333_v40  ;;  %v9582_v48 = vmul.f32 %v20333_v40, %v20333_v40  ;;  %v13648_v52 = vpop.f32.mrb[110].mxu1 }
 0x61e   :  { %v9382_v30 = vpop.f32.mrb[111].mxu1  ;;  %v20344_v22 = vadd.f32 %v13648_v52, %v20309_v60 }
 0x61f   :  { %v9607_v41 = vadd.f32 %v9606_v59, %v9582_v48  ;;  %v20347_v19 = vadd.f32 %v20309_v60, %v9382_v30  ;;  %v9550_v57 = vadd.f32 %v9549_v39, %v20322_v43 }
 0x620   :  { %v9585_v54 = vmul.f32 %v20344_v22, %v20344_v22 }
 0x621   :  { %v9551_v33 = vadd.f32 %v9550_v57, %v20347_v19  ;;  %v9584_v15 = vmul.f32 %v20347_v19, %v20347_v19  ;;  %v9608_v61 = vadd.f32 %v9607_v41, %v9583_v63  ;;  %v13651_v8 = vpop.f32.mrb[112].mxu1 }
 0x622   :  { %v20354_v42 = vadd.f32 %v13651_v8, %v20309_v60  ;;  %v9392_v46 = vpop.f32.mrb[113].mxu1 }
 0x623   :  { %v9609_v49 = vadd.f32 %v9608_v61, %v9584_v15  ;;  %v20359_v44 = vadd.f32 %v20309_v60, %v9392_v46  ;;  %v9552_v34 = vadd.f32 %v9551_v33, %v20344_v22 }
 0x624   :  { %v9587_v16 = vmul.f32 %v20354_v42, %v20354_v42 }
 0x625   :  { %v9553_v1 = vadd.f32 %v9552_v34, %v20359_v44  ;;  %v9586_v14 = vmul.f32 %v20359_v44, %v20359_v44  ;;  %v9610_v20 = vadd.f32 %v9609_v49, %v9585_v54  ;;  %v13654_v9 = vpop.f32.mrb[114].mxu1 }
 0x626   :  { %v9402_v38 = vpop.f32.mrb[115].mxu1  ;;  %v20368_v0 = vadd.f32 %v13654_v9, %v20309_v60 }
 0x627   :  { %v9611_v18 = vadd.f32 %v9610_v20, %v9586_v14  ;;  %v20371_v35 = vadd.f32 %v20309_v60, %v9402_v38  ;;  %v9554_v23 = vadd.f32 %v9553_v1, %v20354_v42 }
 0x628   :  { %v9589_v26 = vmul.f32 %v20368_v0, %v20368_v0 }
 0x629   :  { %v9555_v28 = vadd.f32 %v9554_v23, %v20371_v35  ;;  %v9588_v10 = vmul.f32 %v20371_v35, %v20371_v35  ;;  %v9612_v37 = vadd.f32 %v9611_v18, %v9587_v16  ;;  %v13657_v29 = vpop.f32.mrb[116].mxu1 }
 0x62a   :  { %v20378_v36 = vadd.f32 %v13657_v29, %v20309_v60  ;;  %v9412_v62 = vpop.f32.mrb[117].mxu1 }
 0x62b   :  { %v9613_v53 = vadd.f32 %v9612_v37, %v9588_v10  ;;  %v20383_v5 = vadd.f32 %v20309_v60, %v9412_v62  ;;  %v9556_v3 = vadd.f32 %v9555_v28, %v20368_v0 }
 0x62c   :  { %v9591_v17 = vmul.f32 %v20378_v36, %v20378_v36 }
 0x62d   :  { %v9557_v4 = vadd.f32 %v9556_v3, %v20383_v5  ;;  %v9590_v47 = vmul.f32 %v20383_v5, %v20383_v5  ;;  %v9614_v25 = vadd.f32 %v9613_v53, %v9589_v26  ;;  %v13660_v56 = vpop.f32.mrb[118].mxu1 }
 0x62e   :  { %v9422_v58 = vpop.f32.mrb[119].mxu1  ;;  %v20392_v13 = vadd.f32 %v13660_v56, %v20309_v60 }
 0x62f   :  { %v9615_v27 = vadd.f32 %v9614_v25, %v9590_v47  ;;  %v20395_v24 = vadd.f32 %v20309_v60, %v9422_v58  ;;  %v9558_v51 = vadd.f32 %v9557_v4, %v20378_v36 }
 0x630   :  { %v9593_v11 = vmul.f32 %v20392_v13, %v20392_v13 }
 0x631   :  { %v9559_v12 = vadd.f32 %v9558_v51, %v20395_v24  ;;  %v9592_v2 = vmul.f32 %v20395_v24, %v20395_v24  ;;  %v9616_v45 = vadd.f32 %v9615_v27, %v9591_v17  ;;  %v13663_v50 = vpop.f32.mrb[120].mxu1 }
 0x632   :  { %v20402_v31 = vadd.f32 %v13663_v50, %v20309_v60  ;;  %v9432_v55 = vpop.f32.mrb[121].mxu1 }
 0x633   :  { %v9617_v59 = vadd.f32 %v9616_v45, %v9592_v2  ;;  %v20407_v39 = vadd.f32 %v20309_v60, %v9432_v55  ;;  %v9560_v48 = vadd.f32 %v9559_v12, %v20392_v13 }
 0x634   :  { %v9595_v57 = vmul.f32 %v20402_v31, %v20402_v31 }
 0x635   :  { %v9561_v52 = vadd.f32 %v9560_v48, %v20407_v39  ;;  %v9594_v63 = vmul.f32 %v20407_v39, %v20407_v39  ;;  %v9618_v30 = vadd.f32 %v9617_v59, %v9593_v11  ;;  %v13666_v41 = vpop.f32.mrb[122].mxu1 }
 0x636   :  { %v9442_v33 = vpop.f32.mrb[123].mxu1  ;;  %v20416_v61 = vadd.f32 %v13666_v41, %v20309_v60 }
 0x637   :  { %v9619_v15 = vadd.f32 %v9618_v30, %v9594_v63  ;;  %v20419_v8 = vadd.f32 %v20309_v60, %v9442_v33  ;;  %v9562_v46 = vadd.f32 %v9561_v52, %v20402_v31 }
 0x638   :  { %v9597_v9 = vmul.f32 %v20416_v61, %v20416_v61 }
 0x639   :  { %v9563_v54 = vadd.f32 %v9562_v46, %v20419_v8  ;;  %v9596_v49 = vmul.f32 %v20419_v8, %v20419_v8  ;;  %v9620_v34 = vadd.f32 %v9619_v15, %v9595_v57  ;;  %v13669_v1 = vpop.f32.mrb[124].mxu1 }
 0x63a   :  { %v20426_v14 = vadd.f32 %v13669_v1, %v20309_v60  ;;  %v9452_v20 = vpop.f32.mrb[125].mxu1 }
 0x63b   :  { %v9621_v16 = vadd.f32 %v9620_v34, %v9596_v49  ;;  %v20431_v38 = vadd.f32 %v20309_v60, %v9452_v20  ;;  %v9564_v18 = vadd.f32 %v9563_v54, %v20416_v61 }
 0x63c   :  { %v9599_v29 = vmul.f32 %v20426_v14, %v20426_v14 }
 0x63d   :  { %v9565_v23 = vadd.f32 %v9564_v18, %v20431_v38  ;;  %v9598_v28 = vmul.f32 %v20431_v38, %v20431_v38  ;;  %v9622_v10 = vadd.f32 %v9621_v16, %v9597_v9  ;;  %v13672_v37 = vpop.f32.mrb[126].mxu1 }
 0x63e   :  { %v9462_v62 = vpop.f32.mrb[127].mxu1  ;;  %v20440_v53 = vadd.f32 %v13672_v37, %v20309_v60 }
 0x63f   :  { %v9623_v26 = vadd.f32 %v9622_v10, %v9598_v28  ;;  %v20443_v3 = vadd.f32 %v20309_v60, %v9462_v62  ;;  %v9566_v4 = vadd.f32 %v9565_v23, %v20426_v14 }
 0x640   :  { %v9601_v51 = vmul.f32 %v20440_v53, %v20440_v53 }
 0x641   :  { %v9567_v47 = vadd.f32 %v9566_v4, %v20443_v3  ;;  %v9600_v25 = vmul.f32 %v20443_v3, %v20443_v3  ;;  %v9624_v56 = vadd.f32 %v9623_v26, %v9599_v29  ;;  %v13675_v17 = vpop.f32.mrb[128].mxu1 }
 0x642   :  { %v20450_v58 = vadd.f32 %v13675_v17, %v20309_v60  ;;  %v9472_v27 = vpop.f32.mrb[129].mxu1 }
 0x643   :  { %v9625_v12 = vadd.f32 %v9624_v56, %v9600_v25  ;;  %v20455_v2 = vadd.f32 %v20309_v60, %v9472_v27  ;;  %v9568_v45 = vadd.f32 %v9567_v47, %v20440_v53 }
 0x644   :  { %v9603_v48 = vmul.f32 %v20450_v58, %v20450_v58 }
 0x645   :  { %v9569_v50 = vadd.f32 %v9568_v45, %v20455_v2  ;;  %v9602_v55 = vmul.f32 %v20455_v2, %v20455_v2  ;;  %v9626_v11 = vadd.f32 %v9625_v12, %v9601_v51  ;;  %v13678_v59 = vpop.f32.mrb[130].mxu1  ;;  %v9641_v51 = vld [vmem:[%s21195_s4 + $0x1] sm:$0x1] }
 0x646   :  { %v9482_v52 = vpop.f32.mrb[131].mxu1  ;;  %v20464_v30 = vadd.f32 %v13678_v59, %v20309_v60 }
 0x647   :  { %v9627_v63 = vadd.f32 %v9626_v11, %v9602_v55  ;;  %v9546_v41 = vadd.f32 %v20309_v60, %v9482_v52  ;;  %v9570_v57 = vadd.f32 %v9569_v50, %v20450_v58  ;;  %v9645_v50 = vld [vmem:[%s21195_s4 + $0x2] sm:$0x1]  ;;  %v22050_v11 = vld [vmem:[#allocation67_spill] sm:$0xff] }
 0x648   :  { %v9605_v54 = vmul.f32 %v20464_v30, %v20464_v30 }
 0x649   :  { %v9571_v33 = vadd.f32 %v9570_v57, %v9546_v41  ;;  %v9604_v15 = vmul.f32 %v9546_v41, %v9546_v41  ;;  %v9628_v46 = vadd.f32 %v9627_v63, %v9603_v48 }
 0x64b   :  { %v9572_v49 = vadd.f32 %v9571_v33, %v20464_v30  ;;  %v9629_v34 = vadd.f32 %v9628_v46, %v9604_v15 }
 0x64d   :  { %v9573_v1 = vrot.slane %v9572_v49, 4  ;;  %v9630_v20 = vadd.f32 %v9629_v34, %v9605_v54 }
 0x64f   :  { %v9574_v9 = vadd.f32 %v9573_v1, %v9572_v49  ;;  %v9631_v16 = vrot.slane %v9630_v20, 4 }
 0x651   :  { %v9575_v18 = vrot.slane %v9574_v9, 2  ;;  %v9632_v23 = vadd.f32 %v9631_v16, %v9630_v20 }
 0x653   :  { %v9576_v28 = vadd.f32 %v9575_v18, %v9574_v9  ;;  %v9633_v10 = vrot.slane %v9632_v23, 2 }
 0x655   :  { %v9577_v60 = vrot.slane %v9576_v28, 1  ;;  %v9634_v37 = vadd.f32 %v9633_v10, %v9632_v23 }
 0x657   :  { %v9578_v29 = vadd.f32 %v9577_v60, %v9576_v28  ;;  %v9635_v62 = vrot.slane %v9634_v37, 1 }
 0x659   :  { %v9579_v26 = vmul.f32 0.0048076925, %v9578_v29  ;;  %v9636_v4 = vadd.f32 %v9635_v62, %v9634_v37 }
 0x65b   :  { %v9637_v47 = vmul.f32 0.0048076925, %v9636_v4  ;;  %v9638_v25 = vmul.f32 %v9579_v26, %v9579_v26 }
 0x65d   :  { %v9639_v56 = vsub.f32 %v9637_v47, %v9638_v25 }
 0x65f   :  { %v9640_v17 = vmax.f32 %v9639_v56, 0.0 }
 0x661   :  { %v9642_v27 = vadd.f32 1e-05, %v9640_v17 }
 0x663   :  { %14750 = vrsqrt.f32 %v9642_v27 }
 0x66d   :  { %v14751_v12 = vpop.eup %14750 }
 0x66e   :  { %v9644_v45 = vmul.f32 %v14751_v12, %v9641_v51 }
 0x670   :  { %v9646_v55 = vmul.f32 %v9644_v45, %v9579_v26  ;;  %v20478_v59 = vrot.slane %v9644_v45, %v22050_v11 }
 0x672   :  { %v9647_v48 = vsub.f32 %v9645_v50, %v9646_v55  ;;  %v9676_v52 = vmul.f32 %v20478_v59, %v9546_v41  ;;  %v9652_v63 = vmul.f32 %v20478_v59, %v20315_v32  ;;  %v9653_v57 = vmul.f32 %v20478_v59, %v20312_v21 }
 0x673   :  { %v9654_v33 = vmul.f32 %v20478_v59, %v20333_v40  ;;  %v9655_v15 = vmul.f32 %v20478_v59, %v20322_v43  ;;  %v9656_v46 = vmul.f32 %v20478_v59, %v20347_v19  ;;  %v9657_v54 = vmul.f32 %v20478_v59, %v20344_v22 }
 0x674   :  { %v20494_v41 = vrot.slane %v9647_v48, %v22050_v11  ;;  %v9658_v32 = vmul.f32 %v20478_v59, %v20359_v44  ;;  %v9659_v21 = vmul.f32 %v20478_v59, %v20354_v42  ;;  %v9660_v40 = vmul.f32 %v20478_v59, %v20371_v35 }
 0x675   :  { %v9661_v43 = vmul.f32 %v20478_v59, %v20368_v0  ;;  %v9662_v19 = vmul.f32 %v20478_v59, %v20383_v5  ;;  %v9663_v22 = vmul.f32 %v20478_v59, %v20378_v36  ;;  %v9664_v49 = vmul.f32 %v20478_v59, %v20395_v24 }
 0x676   :  { %v9706_v44 = vadd.f32 %v20494_v41, %v9676_v52  ;;  %v9682_v34 = vadd.f32 %v20494_v41, %v9652_v63  ;;  %v9683_v42 = vadd.f32 %v20494_v41, %v9653_v57  ;;  %v9684_v35 = vadd.f32 %v20494_v41, %v9654_v33 }
 0x677   :  { %v9685_v1 = vadd.f32 %v20494_v41, %v9655_v15  ;;  %v9686_v0 = vadd.f32 %v20494_v41, %v9656_v46  ;;  %v9687_v5 = vadd.f32 %v20494_v41, %v9657_v54  ;;  %v9688_v20 = vadd.f32 %v20494_v41, %v9658_v32 }
 0x678   :  { %v9732_v36 = vmax.f32 %v9706_v44, 0.0  ;;  %v9689_v9 = vadd.f32 %v20494_v41, %v9659_v21  ;;  %v9708_v24 = vmax.f32 %v9682_v34, 0.0  ;;  %v9709_v16 = vmax.f32 %v9683_v42, 0.0 }
 0x679   :  { %v9710_v18 = vmax.f32 %v9684_v35, 0.0  ;;  %v9711_v23 = vmax.f32 %v9685_v1, 0.0  ;;  %v9712_v28 = vmax.f32 %v9686_v0, 0.0  ;;  %v9713_v10 = vmax.f32 %v9687_v5, 0.0  ;;  %v9957_v35 = vld [vmem:[%s21196_s5 + $0x20] sm:$0xff] }
 0x67a   :  { %9758 = vst [vmem:[#allocation3 + $0xc0] sm:$0xff] %v9732_v36  ;;  %v9714_v60 = vmax.f32 %v9688_v20, 0.0  ;;  %v9715_v37 = vmax.f32 %v9689_v9, 0.0  ;;  %9734 = vst [vmem:[#allocation3] sm:$0xff] %v9708_v24  ;;  %v9690_v29 = vadd.f32 %v20494_v41, %v9660_v40  ;;  %v9691_v62 = vadd.f32 %v20494_v41, %v9661_v43 }
 0x67b   :  { %9735 = vst [vmem:[#allocation3 + $0x8] sm:$0xff] %v9709_v16  ;;  %9736 = vst [vmem:[#allocation3 + $0x10] sm:$0xff] %v9710_v18  ;;  %v9692_v26 = vadd.f32 %v20494_v41, %v9662_v19  ;;  %v9693_v4 = vadd.f32 %v20494_v41, %v9663_v22  ;;  %v9665_v47 = vmul.f32 %v20478_v59, %v20392_v13 }
 0x67c   :  { %9737 = vst [vmem:[#allocation3 + $0x18] sm:$0xff] %v9711_v23  ;;  %9738 = vst [vmem:[#allocation3 + $0x20] sm:$0xff] %v9712_v28  ;;  %v9666_v25 = vmul.f32 %v20478_v59, %v20407_v39  ;;  %v9716_v56 = vmax.f32 %v9690_v29, 0.0  ;;  %v9717_v17 = vmax.f32 %v9691_v62, 0.0  ;;  %v9667_v27 = vmul.f32 %v20478_v59, %v20402_v31  ;;  %v9960_v23 = vld [vmem:[%s21196_s5 + $0x38] sm:$0xff] }
 0x67d   :  { %9739 = vst [vmem:[#allocation3 + $0x28] sm:$0xff] %v9713_v10  ;;  %9740 = vst [vmem:[#allocation3 + $0x30] sm:$0xff] %v9714_v60  ;;  %v9694_v51 = vadd.f32 %v20494_v41, %v9664_v49  ;;  %v9718_v12 = vmax.f32 %v9692_v26, 0.0  ;;  %v9719_v45 = vmax.f32 %v9693_v4, 0.0  ;;  %v9695_v50 = vadd.f32 %v20494_v41, %v9665_v47 }
 0x67e   :  { %9741 = vst [vmem:[#allocation3 + $0x38] sm:$0xff] %v9715_v37  ;;  %v9696_v55 = vadd.f32 %v20494_v41, %v9666_v25  ;;  %9742 = vst [vmem:[#allocation3 + $0x40] sm:$0xff] %v9716_v56  ;;  %v9697_v13 = vadd.f32 %v20494_v41, %v9667_v27  ;;  %v9668_v48 = vmul.f32 %v20478_v59, %v20419_v8  ;;  %v9962_v27 = vld [vmem:[%s21196_s5 + $0x48] sm:$0xff] }
 0x67f   :  { %9743 = vst [vmem:[#allocation3 + $0x48] sm:$0xff] %v9717_v17  ;;  %v9720_v39 = vmax.f32 %v9694_v51, 0.0  ;;  %v9669_v52 = vmul.f32 %v20478_v59, %v20416_v61  ;;  %9744 = vst [vmem:[#allocation3 + $0x50] sm:$0xff] %v9718_v12  ;;  %v9721_v31 = vmax.f32 %v9695_v50, 0.0  ;;  %v9670_v57 = vmul.f32 %v20478_v59, %v20431_v38  ;;  %v9955_v61 = vld [vmem:[%s21196_s5 + $0x10] sm:$0xff]  ;;  %v9961_v17 = vld [vmem:[%s21196_s5 + $0x40] sm:$0xff] }
 0x680   :  { %9745 = vst [vmem:[#allocation3 + $0x58] sm:$0xff] %v9719_v45  ;;  %v9722_v63 = vmax.f32 %v9696_v55, 0.0  ;;  %v9671_v33 = vmul.f32 %v20478_v59, %v20426_v14  ;;  %v9723_v15 = vmax.f32 %v9697_v13, 0.0  ;;  %v9698_v46 = vadd.f32 %v20494_v41, %v9668_v48 }
 0x681   :  { %9746 = vst [vmem:[#allocation3 + $0x60] sm:$0xff] %v9720_v39  ;;  %v9699_v54 = vadd.f32 %v20494_v41, %v9669_v52  ;;  %v9672_v8 = vmul.f32 %v20478_v59, %v20443_v3  ;;  %9747 = vst [vmem:[#allocation3 + $0x68] sm:$0xff] %v9721_v31  ;;  %v9700_v38 = vadd.f32 %v20494_v41, %v9670_v57  ;;  %v9956_v3 = vld [vmem:[%s21196_s5 + $0x18] sm:$0xff] }
 0x682   :  { %9748 = vst [vmem:[#allocation3 + $0x70] sm:$0xff] %v9722_v63  ;;  %v9701_v32 = vadd.f32 %v20494_v41, %v9671_v33  ;;  %v9673_v14 = vmul.f32 %v20478_v59, %v20440_v53  ;;  %v9674_v21 = vmul.f32 %v20478_v59, %v20455_v2  ;;  %9749 = vst [vmem:[#allocation3 + $0x78] sm:$0xff] %v9723_v15  ;;  %v9724_v5 = vmax.f32 %v9698_v46, 0.0 }
 0x683   :  { %v9760_v40 = vld [vmem:[#allocation3] ss:$4 sm:$0xff]  ;;  %v9774_v43 = vld [vmem:[#allocation3 + $0x1] ss:$4 sm:$0xff]  ;;  %v9675_v19 = vmul.f32 %v20478_v59, %v20450_v58  ;;  %v9702_v22 = vadd.f32 %v20494_v41, %v9672_v8  ;;  %v9677_v49 = vmul.f32 %v20478_v59, %v20464_v30  ;;  %v9795_v0 = vld [vmem:[#allocation3 + $0x2] ss:$4 sm:$0xff]  ;;  %v20577_v29 = vpack.c.bf16 %v9956_v3, %v9955_v61 }
 0x684   :  { %v9787_v34 = vmax.f32 %v9760_v40, %v9774_v43  ;;  %v9703_v2 = vadd.f32 %v20494_v41, %v9673_v14  ;;  %v9704_v42 = vadd.f32 %v20494_v41, %v9674_v21  ;;  %v9725_v58 = vmax.f32 %v9699_v54, 0.0  ;;  %v9958_v30 = vld [vmem:[%s21196_s5 + $0x28] sm:$0xff]  ;;  %v9959_v59 = vld [vmem:[%s21196_s5 + $0x30] sm:$0xff]  ;;  %9750 = vst [vmem:[#allocation3 + $0x80] sm:$0xff] %v9724_v5 }
 0x685   :  { %v9762_v44 = vld [vmem:[#allocation3 + $0x20] ss:$4 sm:$0xff]  ;;  %v9776_v53 = vld [vmem:[#allocation3 + $0x21] ss:$4 sm:$0xff]  ;;  %v9705_v20 = vadd.f32 %v20494_v41, %v9675_v19  ;;  %v9797_v36 = vld [vmem:[#allocation3 + $0x22] ss:$4 sm:$0xff]  ;;  %v9707_v62 = vadd.f32 %v20494_v41, %v9677_v49  ;;  %v20586_v41 = vpack.c.bf16 %v9958_v30, %v9957_v35  ;;  %v20591_v31 = vpack.c.bf16 %v9960_v23, %v9959_v59 }
 0x686   :  { %v9788_v1 = vmax.f32 %v9762_v44, %v9776_v53  ;;  %v9808_v9 = vmax.f32 %v9787_v34, %v9795_v0  ;;  %v9726_v24 = vmax.f32 %v9700_v38, 0.0  ;;  %v9727_v16 = vmax.f32 %v9701_v32, 0.0  ;;  %v9816_v10 = vld [vmem:[#allocation3 + $0x3] ss:$4 sm:$0xff]  ;;  %9751 = vst [vmem:[#allocation3 + $0x88] sm:$0xff] %v9725_v58 }
 0x687   :  { %v9728_v18 = vmax.f32 %v9702_v22, 0.0  ;;  %v9764_v60 = vld [vmem:[#allocation3 + $0x40] ss:$4 sm:$0xff]  ;;  %v9778_v37 = vld [vmem:[#allocation3 + $0x41] ss:$4 sm:$0xff]  ;;  %v9729_v25 = vmax.f32 %v9703_v2, 0.0  ;;  %v20596_v46 = vpack.c.bf16 %v9962_v27, %v9961_v17 }
 0x688   :  { %v9809_v28 = vmax.f32 %v9788_v1, %v9797_v36  ;;  %v9818_v26 = vld [vmem:[#allocation3 + $0x23] ss:$4 sm:$0xff]  ;;  %v9829_v4 = vmax.f32 %v9808_v9, %v9816_v10  ;;  %v9789_v47 = vmax.f32 %v9764_v60, %v9778_v37  ;;  %9752 = vst [vmem:[#allocation3 + $0x90] sm:$0xff] %v9726_v24  ;;  %9753 = vst [vmem:[#allocation3 + $0x98] sm:$0xff] %v9727_v16  ;;  %v9730_v56 = vmax.f32 %v9704_v42, 0.0 }
 0x689   :  { %9754 = vst [vmem:[#allocation3 + $0xa0] sm:$0xff] %v9728_v18  ;;  %v9799_v12 = vld [vmem:[#allocation3 + $0x42] ss:$4 sm:$0xff]  ;;  %v9731_v45 = vmax.f32 %v9705_v20, 0.0  ;;  %v9733_v50 = vmax.f32 %v9707_v62, 0.0  ;;  %9755 = vst [vmem:[#allocation3 + $0xa8] sm:$0xff] %v9729_v25 }
 0x68a   :  { %v9830_v51 = vmax.f32 %v9809_v28, %v9818_v26  ;;  %v9843_v55 = vcombine.high %v9829_v4, %v9829_v4  ;;  %v20589_v13 = vrot.slane %v9829_v4, %v21853_v6  ;;  %v9810_v39 = vmax.f32 %v9789_v47, %v9799_v12  ;;  %v9766_v48 = vld [vmem:[#allocation3 + $0x60] ss:$4 sm:$0xff]  ;;  %v9780_v52 = vld [vmem:[#allocation3 + $0x61] ss:$4 sm:$0xff]  ;;  %9756 = vst [vmem:[#allocation3 + $0xb0] sm:$0xff] %v9730_v56 }
 0x68b   :  { %v9820_v33 = vld [vmem:[#allocation3 + $0x43] ss:$4 sm:$0xff]  ;;  %v9790_v15 = vmax.f32 %v9766_v48, %v9780_v52  ;;  %9757 = vst [vmem:[#allocation3 + $0xb8] sm:$0xff] %v9731_v45  ;;  %9759 = vst [vmem:[#allocation3 + $0xc8] sm:$0xff] %v9733_v50  ;;  %v9801_v32 = vld [vmem:[#allocation3 + $0x62] ss:$4 sm:$0xff] }
 0x68c   :  { %v9860_v63 = vcombine.high %v9830_v51, %v9830_v51  ;;  %v20594_v57 = vrot.slane %v9830_v51, %v21853_v6  ;;  %v20599_v54 = vrot.slane %v9843_v55, %v21853_v6  ;;  %v20603_v8 = vcombine.high %v20589_v13, %v20589_v13  ;;  %v9822_v60 = vld [vmem:[#allocation3 + $0x63] ss:$4 sm:$0xff] }
 0x68d   :  { %v11844_v61 = vrot.slane %v20589_v13, 9  ;;  %v9831_v38 = vmax.f32 %v9810_v39, %v9820_v33  ;;  %v9811_v43 = vmax.f32 %v9790_v15, %v9801_v32 }
 0x68e   :  { %v20607_v14 = vrot.slane %v9860_v63, %v21853_v6  ;;  %v9980_v21 = vrot.slane %v20594_v57, 7  ;;  %v20612_v40 = vcombine.high %v20594_v57, %v20594_v57  ;;  %v20616_v3 = vcombine.high %v20599_v54, %v20599_v54 }
 0x68f   :  { %v9971_v19 = vrot.slane %v20603_v8, 7  ;;  %v9974_v22 = vrot.slane %v20599_v54, 7  ;;  %v20621_v49 = vrot.slane %v9831_v38, %v21853_v6  ;;  %v9832_v26 = vmax.f32 %v9811_v43, %v9822_v60  ;;  %v9768_v27 = vld [vmem:[#allocation3 + $0x80] ss:$4 sm:$0xff]  ;;  %v9782_v51 = vld [vmem:[#allocation3 + $0x81] ss:$4 sm:$0xff] }
 0x690   :  { %v9982_v44 = vrot.slane %v9980_v21, 2  ;;  %v20625_v53 = vcombine.high %v20607_v14, %v20607_v14  ;;  %v9983_v34 = vrot.slane %v20612_v40, 7  ;;  %v9986_v2 = vrot.slane %v20607_v14, 7 }
 0x691   :  { %v9972_v35 = vsel %vm19131_vm7, %v11844_v61, %v9971_v19  ;;  %v9973_v1 = vrot.slane %v9971_v19, 2  ;;  %v9976_v0 = vrot.slane %v9974_v22, 2  ;;  %v9977_v5 = vrot.slane %v20616_v3, 7 }
 0x692   :  { %v9984_v58 = vsel %vm19131_vm7, %v9982_v44, %v9983_v34  ;;  %v9985_v20 = vrot.slane %v9983_v34, 2  ;;  %v9988_v30 = vrot.slane %v9986_v2, 2  ;;  %v9989_v59 = vrot.slane %v20625_v53, 7  ;;  %v9770_v32 = vld [vmem:[#allocation3 + $0xa0] ss:$4 sm:$0xff] }
 0x693   :  { %v9975_v36 = vsel %vm19131_vm7, %v9973_v1, %v9974_v22  ;;  %v9978_v9 = vsel %vm19131_vm7, %v9976_v0, %v9977_v5  ;;  %v9979_v24 = vrot.slane %v9977_v5, 2  ;;  %v9992_v16 = vrot.slane %v20621_v49, 7  ;;  %v9803_v34 = vld [vmem:[#allocation3 + $0x82] ss:$4 sm:$0xff] }
 0x694   :  { %v10059_v18 = vcombine.low %v9972_v35, %v9975_v36  ;;  %v9987_v23 = vsel %vm19131_vm7, %v9985_v20, %v9986_v2  ;;  %v9990_v28 = vsel %vm19131_vm7, %v9988_v30, %v9989_v59  ;;  %v9991_v10 = vrot.slane %v9989_v59, 2 }
 0x695   :  { %v9981_v37 = vsel %vm19131_vm7, %v9979_v24, %v9980_v21  ;;  %v10076_v62 = vcombine.low %v9984_v58, %v9987_v23  ;;  %v9877_v4 = vcombine.high %v9831_v38, %v9831_v38  ;;  %v20651_v17 = vcombine.high %v20621_v49, %v20621_v49  ;;  %v9784_v21 = vld [vmem:[#allocation3 + $0xa1] ss:$4 sm:$0xff]  ;;  %v9824_v58 = vld [vmem:[#allocation3 + $0x83] ss:$4 sm:$0xff] }
 0x696   :  { %v10060_v47 = vcombine.low %v9978_v9, %v9981_v37  ;;  %v10067_v25 = vrot.slane %v10059_v18, %v21853_v6  ;;  %v9993_v56 = vsel %vm19131_vm7, %v9991_v10, %v9992_v16  ;;  %v9894_v55 = vcombine.high %v9832_v26, %v9832_v26  ;;  %v9805_v18 = vld [vmem:[#allocation3 + $0xa2] ss:$4 sm:$0xff] }
 0x697   :  { %v10077_v12 = vcombine.low %v9990_v28, %v9993_v56  ;;  %v10084_v45 = vrot.slane %v10076_v62, %v21853_v6  ;;  %v20655_v50 = vrot.slane %v9877_v4, %v21853_v6  ;;  %v20659_v48 = vrot.slane %v9832_v26, %v21853_v6  ;;  %v9772_v4 = vld [vmem:[#allocation3 + $0xc0] ss:$4 sm:$0xf] }
 0x698   :  { %v10074_v39 = vrot.slane %v10060_v47, %v21853_v6  ;;  %v9994_v52 = vrot.slane %v9992_v16, 2  ;;  %v9995_v63 = vrot.slane %v20651_v17, 7  ;;  %v9791_v38 = vmax.f32 %v9768_v27, %v9782_v51  ;;  %v9786_v47 = vld [vmem:[#allocation3 + $0xc1] ss:$4 sm:$0xf] }
 0x699   :  { %v10091_v33 = vrot.slane %v10077_v12, %v21853_v6  ;;  %v20665_v15 = vcombine.high %v20655_v50, %v20655_v50  ;;  %v9998_v61 = vrot.slane %v20655_v50, 7  ;;  %v10004_v44 = vrot.slane %v20659_v48, 7  ;;  %v9826_v12 = vld [vmem:[#allocation3 + $0xa3] ss:$4 sm:$0xff] }
 0x69a   :  { %v10075_v43 = vcombine.low %v10067_v25, %v10074_v39  ;;  %v9996_v19 = vsel %vm19131_vm7, %v9994_v52, %v9995_v63  ;;  %v9997_v22 = vrot.slane %v9995_v63, 2  ;;  %v9812_v0 = vmax.f32 %v9791_v38, %v9803_v34 }
 0x69b   :  { %v10092_v2 = vcombine.low %v10084_v45, %v10091_v33  ;;  %v10000_v35 = vrot.slane %v9998_v61, 2  ;;  %v10001_v1 = vrot.slane %v20665_v15, 7  ;;  %v20675_v20 = vrot.slane %v9894_v55, %v21853_v6 }
 0x69c   :  { %13711 = vmatprep.mubr.f32.mxu1 %v10075_v43  ;;  %v9999_v5 = vsel %vm19131_vm7, %v9997_v22, %v9998_v61  ;;  %v20679_v30 = vcombine.high %v20659_v48, %v20659_v48  ;;  %v9792_v59 = vmax.f32 %v9770_v32, %v9784_v21  ;;  %v9833_v16 = vmax.f32 %v9812_v0, %v9824_v58 }
 0x69d   :  { %13712 = vmatmul.mubr.f32.vlgmr.msra.gmra.mrb[132].mxu1 %v10092_v2  ;;  %v10002_v36 = vsel %vm19131_vm7, %v10000_v35, %v10001_v1  ;;  %v10003_v9 = vrot.slane %v10001_v1, 2  ;;  %v10093_v24 = vcombine.low %v9996_v19, %v9999_v5  ;;  %v20686_v23 = vcombine.high %v20675_v20, %v20675_v20 }
 0x69e   :  { %14093 = vmatpush3.bf16.msra.mxu1 %v20335_v7  ;;  %v11845_v28 = vrot.slane %v20679_v30, 9  ;;  %v10008_v10 = vrot.slane %v20675_v20, 7  ;;  %v9813_v60 = vmax.f32 %v9792_v59, %v9805_v18  ;;  %v20695_v26 = vrot.slane %v9833_v16, %v21853_v6 }
 0x69f   :  { %v10005_v37 = vsel %vm19131_vm7, %v10003_v9, %v10004_v44  ;;  %v10101_v62 = vrot.slane %v10093_v24, %v21853_v6  ;;  %14095 = vmatprep.subr.bf16.mxu1 %v20577_v29  ;;  %v9911_v7 = vcombine.high %v9833_v16, %v9833_v16  ;;  %v10011_v51 = vrot.slane %v20686_v23, 7  ;;  %v9807_v9 = vld [vmem:[#allocation3 + $0xc2] ss:$4 sm:$0xf] }
 0x6a0   :  { %v10094_v25 = vcombine.low %v10002_v36, %v10005_v37  ;;  %v10009_v56 = vsel %vm19131_vm7, %v11845_v28, %v10008_v10  ;;  %v10010_v27 = vrot.slane %v10008_v10, 2  ;;  %v20702_v45 = vcombine.high %v20695_v26, %v20695_v26  ;;  %v9963_v10 = vld [vmem:[%s21196_s5 + $0x50] sm:$0xff] }
 0x6a1   :  { %v10014_v55 = vrot.slane %v20695_v26, 7  ;;  %v9834_v39 = vmax.f32 %v9813_v60, %v9826_v12  ;;  %v20706_v52 = vrot.slane %v9911_v7, %v21853_v6  ;;  %v10013_v61 = vrot.slane %v10011_v51, 2  ;;  %v9828_v7 = vld [vmem:[#allocation3 + $0xc3] ss:$4 sm:$0xf] }
 0x6a2   :  { %v10108_v63 = vrot.slane %v10094_v25, %v21853_v6  ;;  %v10012_v33 = vsel %vm19131_vm7, %v10010_v27, %v10011_v51  ;;  %14097 = vmatpush3.bf16.msra.mxu1 %v20577_v29  ;;  %v9793_v38 = vmax.f32 %v9772_v4, %v9786_v47  ;;  %v10017_v21 = vrot.slane %v20702_v45, 7  ;;  %v9964_v4 = vld [vmem:[%s21196_s5 + $0x58] sm:$0xff] }
 0x6a3   :  { %v10016_v32 = vrot.slane %v10014_v55, 2  ;;  %v10110_v43 = vcombine.low %v10009_v56, %v10012_v33  ;;  %v20715_v19 = vcombine.high %v20706_v52, %v20706_v52  ;;  %14099 = vmatprep.subr.bf16.mxu1 %v20586_v41  ;;  %v10015_v44 = vsel %vm19131_vm7, %v10013_v61, %v10014_v55 }
 0x6a4   :  { %v10109_v22 = vcombine.low %v10101_v62, %v10108_v63  ;;  %v20721_v34 = vrot.slane %v9834_v39, %v21853_v6  ;;  %v10020_v29 = vrot.slane %v20706_v52, 7  ;;  %v10019_v1 = vrot.slane %v10017_v21, 2 }
 0x6a5   :  { %v10018_v2 = vsel %vm19131_vm7, %v10016_v32, %v10017_v21  ;;  %v10118_v35 = vrot.slane %v10110_v43, %v21853_v6  ;;  %v10023_v0 = vrot.slane %v20715_v19, 7  ;;  %v9814_v18 = vmax.f32 %v9793_v38, %v9807_v9  ;;  %v9965_v38 = vld [vmem:[%s21196_s5 + $0x60] sm:$0xff]  ;;  %v9966_v32 = vld [vmem:[%s21196_s5 + $0x68] sm:$0xff] }
 0x6a6   :  { %13714 = vmatprep.mubr.f32.mxu1 %v10109_v22  ;;  %v10111_v5 = vcombine.low %v10015_v44, %v10018_v2  ;;  %v20730_v58 = vcombine.high %v20721_v34, %v20721_v34  ;;  %v10022_v59 = vrot.slane %v10020_v29, 2  ;;  %v10026_v36 = vrot.slane %v20721_v34, 7  ;;  %14101 = vmatpush3.bf16.msra.mxu1 %v20586_v41 }
 0x6a7   :  { %v10021_v24 = vsel %vm19131_vm7, %v10019_v1, %v10020_v29  ;;  %v10025_v16 = vrot.slane %v10023_v0, 2  ;;  %v9928_v28 = vcombine.high %v9834_v39, %v9834_v39  ;;  %14103 = vmatprep.subr.bf16.mxu1 %v20591_v31  ;;  %v9835_v56 = vmax.f32 %v9814_v18, %v9828_v7  ;;  %v9968_v18 = vld [vmem:[%s21196_s5 + $0x78] sm:$0xff] }
 0x6a8   :  { %v10125_v60 = vrot.slane %v10111_v5, %v21853_v6  ;;  %v10024_v37 = vsel %vm19131_vm7, %v10022_v59, %v10023_v0  ;;  %v10028_v62 = vrot.slane %v10026_v36, 2  ;;  %v10029_v41 = vrot.slane %v20730_v58, 7 }
 0x6a9   :  { %v10027_v47 = vsel %vm19131_vm7, %v10025_v16, %v10026_v36  ;;  %v10127_v25 = vcombine.low %v10021_v24, %v10024_v37  ;;  %v20750_v27 = vrot.slane %v9928_v28, %v21853_v6  ;;  %v20760_v33 = vrot.slane %v9835_v56, %v21853_v6  ;;  %v9967_v16 = vld [vmem:[%s21196_s5 + $0x70] sm:$0xff] }
 0x6aa   :  { %v10126_v51 = vcombine.low %v10118_v35, %v10125_v60  ;;  %v10030_v12 = vsel %vm19131_vm7, %v10028_v62, %v10029_v41  ;;  %v10031_v55 = vrot.slane %v10029_v41, 2  ;;  %14105 = vmatpush3.bf16.msra.mxu1 %v20591_v31  ;;  %v14110_v61 = vpack.c.bf16 %v9964_v4, %v9963_v10 }
 0x6ab   :  { %v10128_v39 = vcombine.low %v10027_v47, %v10030_v12  ;;  %v20757_v63 = vcombine.high %v20750_v27, %v20750_v27  ;;  %14107 = vmatprep.subr.bf16.mxu1 %v20596_v46  ;;  %v10135_v31 = vrot.slane %v10127_v25, %v21853_v6  ;;  %v10032_v21 = vrot.slane %v20750_v27, 7  ;;  %v10465_v25 = vld [vmem:[%s21196_s5 + $0x100] sm:$0xff] }
 0x6ac   :  { %13715 = vmatmul.mubr.f32.gmra.mrb[134].mxu1 %v10126_v51  ;;  %v20774_v22 = vcombine.high %v20760_v33, %v20760_v33  ;;  %v10038_v29 = vrot.slane %v20760_v33, 7  ;;  %v10263_v1 = vcombine.low %v20599_v54, %v20616_v3  ;;  %v14114_v0 = vpack.c.bf16 %v9966_v32, %v9965_v38 }
 0x6ad   :  { %v10142_v43 = vrot.slane %v10128_v39, %v21853_v6  ;;  %v10035_v44 = vrot.slane %v20757_v63, 7  ;;  %v10033_v2 = vsel %vm19131_vm7, %v10031_v55, %v10032_v21  ;;  %v10034_v35 = vrot.slane %v10032_v21, 2 }
 0x6ae   :  { %14109 = vmatpush3.bf16.msra.mxu1 %v20596_v46  ;;  %v10040_v36 = vrot.slane %v10038_v29, 2  ;;  %v10041_v9 = vrot.slane %v20774_v22, 7  ;;  %v10262_v60 = vcombine.low %v20589_v13, %v20603_v8  ;;  %v10277_v62 = vrot.slane %v10263_v1, %v21853_v6  ;;  %v10466_v13 = vld [vmem:[%s21196_s5 + $0x108] sm:$0xff] }
 0x6af   :  { %v10143_v5 = vcombine.low %v10135_v31, %v10142_v43  ;;  %v10037_v59 = vrot.slane %v10035_v44, 2  ;;  %14111 = vmatprep.subr.bf16.mxu1 %v14110_v61  ;;  %v10036_v24 = vsel %vm19131_vm7, %v10034_v35, %v10035_v44  ;;  %v14118_v41 = vpack.c.bf16 %v9968_v18, %v9967_v16  ;;  %v10467_v43 = vld [vmem:[%s21196_s5 + $0x110] sm:$0xff]  ;;  %v10468_v44 = vld [vmem:[%s21196_s5 + $0x118] sm:$0xff]  ;;  %v10469_v16 = vld [vmem:[%s21196_s5 + $0x120] sm:$0xff] }
 0x6b0   :  { %v10042_v28 = vsel %vm19131_vm7, %v10040_v36, %v10041_v9  ;;  %v10144_v10 = vcombine.low %v10033_v2, %v10036_v24  ;;  %v10280_v7 = vcombine.low %v20607_v14, %v20625_v53  ;;  %v10297_v56 = vcombine.low %v20655_v50, %v20665_v15  ;;  %v10470_v18 = vld [vmem:[%s21196_s5 + $0x128] sm:$0xff] }
 0x6b1   :  { %13717 = vmatprep.mubr.f32.mxu1 %v10143_v5  ;;  %v10039_v46 = vsel %vm19131_vm7, %v10037_v59, %v10038_v29  ;;  %v10270_v51 = vrot.slane %v10262_v60, %v21853_v6  ;;  %v10279_v12 = vcombine.low %v20594_v57, %v20612_v40  ;;  %v10296_v39 = vcombine.low %v20621_v49, %v20651_v17 }
 0x6b2   :  { %v10145_v37 = vcombine.low %v10039_v46, %v10042_v28  ;;  %14113 = vmatpush3.bf16.msra.mxu1 %v14110_v61  ;;  %v10152_v4 = vrot.slane %v10144_v10, %v21853_v6  ;;  %v10294_v38 = vrot.slane %v10280_v7, %v21853_v6  ;;  %v14122_v32 = vpack.c.bf16 %v10466_v13, %v10465_v25  ;;  %v10472_v25 = vld [vmem:[%s21196_s5 + $0x138] sm:$0xff] }
 0x6b3   :  { %14115 = vmatprep.subr.bf16.mxu1 %v14114_v0  ;;  %v10278_v61 = vcombine.low %v10270_v51, %v10277_v62  ;;  %v10314_v31 = vcombine.low %v20686_v23, %v20695_v26  ;;  %v10311_v21 = vrot.slane %v10297_v56, %v21853_v6  ;;  %v10331_v29 = vcombine.low %v20715_v19, %v20721_v34 }
 0x6b4   :  { %v10159_v47 = vrot.slane %v10145_v37, %v21853_v6  ;;  %v10498_v2 = vcombine.low %v20612_v40, %v20607_v14  ;;  %v10499_v35 = vcombine.low %v20625_v53, %v20621_v49  ;;  %v10287_v1 = vrot.slane %v10279_v12, %v21853_v6  ;;  %v10473_v12 = vld [vmem:[%s21196_s5 + $0x140] sm:$0xff] }
 0x6b5   :  { %v10304_v5 = vrot.slane %v10296_v39, %v21853_v6  ;;  %v10330_v59 = vcombine.low %v20702_v45, %v20706_v52  ;;  %v10328_v49 = vrot.slane %v10314_v31, %v21853_v6  ;;  %v14126_v53 = vpack.c.bf16 %v10468_v44, %v10467_v43  ;;  %v10477_v31 = vld [vmem:[%s21196_s5 + $0x160] sm:$0xff]  ;;  %v10479_v44 = vld [vmem:[%s21196_s5 + $0x170] sm:$0xff] }
 0x6b6   :  { %v10160_v55 = vcombine.low %v10152_v4, %v10159_v47  ;;  %14117 = vmatpush3.bf16.msra.mxu1 %v14114_v0  ;;  %v10313_v0 = vcombine.low %v20679_v30, %v20675_v20  ;;  %v20839_v36 = vrot.slane %v10498_v2, %v21853_v6  ;;  %v20842_v14 = vrot.slane %v10499_v35, %v21853_v6  ;;  %v10471_v47 = vld [vmem:[%s21196_s5 + $0x130] sm:$0xff] }
 0x6b7   :  { %14119 = vmatprep.subr.bf16.mxu1 %v14118_v41  ;;  %v10295_v40 = vcombine.low %v10287_v1, %v10294_v38  ;;  %v10348_v30 = vcombine.low %v20757_v63, %v20760_v33  ;;  %v10312_v9 = vcombine.low %v10304_v5, %v10311_v21  ;;  %v10345_v24 = vrot.slane %v10331_v29, %v21853_v6  ;;  %v10476_v38 = vld [vmem:[%s21196_s5 + $0x158] sm:$0xff]  ;;  %v10478_v21 = vld [vmem:[%s21196_s5 + $0x168] sm:$0xff] }
 0x6b8   :  { %13718 = vmatmul.mubr.f32.gmra.mrb[136].mxu1 %v10160_v55  ;;  %v10482_v46 = vcombine.low %v20616_v3, %v20594_v57  ;;  %v10514_v28 = vcombine.low %v20839_v36, %v20842_v14  ;;  %v10321_v10 = vrot.slane %v10313_v0, %v21853_v6  ;;  %v10347_v60 = vcombine.low %v20730_v58, %v20750_v27  ;;  %v10474_v55 = vld [vmem:[%s21196_s5 + $0x148] sm:$0xff]  ;;  %v10480_v29 = vld [vmem:[%s21196_s5 + $0x178] sm:$0xff] }
 0x6b9   :  { %13752 = vmatprep.mubr.f32.mxu1 %v10278_v61  ;;  %v10338_v37 = vrot.slane %v10330_v59, %v21853_v6  ;;  %v10481_v62 = vcombine.low %v20603_v8, %v20599_v54  ;;  %v10362_v57 = vrot.slane %v10348_v30, %v21853_v6  ;;  %v14130_v3 = vpack.c.bf16 %v10470_v18, %v10469_v16  ;;  %v10475_v61 = vld [vmem:[%s21196_s5 + $0x150] sm:$0xff]  ;;  %v10856_v16 = vld [vmem:[%s21198_s7 + $0xa8] sm:$0xff] }
 0x6ba   :  { %14121 = vmatpush3.bf16.msra.mxu1 %v14118_v41  ;;  %v10329_v41 = vcombine.low %v10321_v10, %v10328_v49  ;;  %v10496_v4 = vrot.slane %v10482_v46, %v21853_v6  ;;  %v10355_v13 = vrot.slane %v10347_v60, %v21853_v6  ;;  %v14134_v56 = vpack.c.bf16 %v10472_v25, %v10471_v47  ;;  %v10857_v46 = vld [vmem:[%s21198_s7 + $0xb0] sm:$0xff]  ;;  %v10859_v60 = vld [vmem:[%s21198_s7 + $0xc0] sm:$0xff] }
 0x6bb   :  { %14123 = vmatprep.subr.bf16.mxu1 %v14122_v32  ;;  %v10346_v7 = vcombine.low %v10338_v37, %v10345_v24  ;;  %v10489_v54 = vrot.slane %v10481_v62, %v21853_v6  ;;  %v14138_v39 = vpack.c.bf16 %v10474_v55, %v10473_v12  ;;  %v14146_v43 = vpack.c.bf16 %v10478_v21, %v10477_v31  ;;  %v10855_v24 = vld [vmem:[%s21198_s7 + $0xa0] sm:$0xff]  ;;  %v10860_v37 = vld [vmem:[%s21198_s7 + $0xc8] sm:$0xff]  ;;  %v10865_v25 = vld [vmem:[%s21198_s7 + $0xf0] sm:$0xff] }
 0x6bc   :  { %v10363_v8 = vcombine.low %v10355_v13, %v10362_v57  ;;  %v14150_v2 = vpack.c.bf16 %v10480_v29, %v10479_v44  ;;  %v10516_v35 = vcombine.low %v20665_v15, %v20659_v48  ;;  %v10515_v1 = vcombine.low %v20651_v17, %v20655_v50  ;;  %v10862_v57 = vld [vmem:[%s21198_s7 + $0xd8] sm:$0xff] }
 0x6bd   :  { %13753 = vmatmul.mubr.f32.vlgmr.msra.gmra.mrb[132].mxu1 %v10295_v40  ;;  %v10497_v51 = vcombine.low %v10489_v54, %v10496_v4  ;;  %v10532_v0 = vcombine.low %v20675_v20, %v20686_v23  ;;  %v10549_v59 = vcombine.low %v20706_v52, %v20715_v19  ;;  %v10533_v36 = vcombine.low %v20695_v26, %v20702_v45  ;;  %v10864_v4 = vld [vmem:[%s21198_s7 + $0xe8] sm:$0xff]  ;;  %v10866_v13 = vld [vmem:[%s21198_s7 + $0xf8] sm:$0xff] }
 0x6be   :  { %13755 = vmatprep.mubr.f32.mxu1 %v10312_v9  ;;  %14125 = vmatpush3.bf16.msra.mxu1 %v14122_v32  ;;  %v14142_v32 = vpack.c.bf16 %v10476_v38, %v10475_v61  ;;  %v10530_v5 = vrot.slane %v10516_v35, %v21853_v6  ;;  %v10523_v14 = vrot.slane %v10515_v1, %v21853_v6  ;;  %v14809_v40 = vmov 0.0|0.0  }
 0x6bf   :  { %14127 = vmatprep.subr.bf16.mxu1 %v14126_v53  ;;  %v10550_v48 = vcombine.low %v20721_v34, %v20730_v58  ;;  %v10540_v17 = vrot.slane %v10532_v0, %v21853_v6  ;;  %v10566_v50 = vcombine.low %v20750_v27, %v20757_v63  ;;  %v10557_v20 = vrot.slane %v10549_v59, %v21853_v6  ;;  %v10851_v63 = vld [vmem:[%s21198_s7 + $0x80] sm:$0xff] }
 0x6c0   :  { %v10531_v15 = vcombine.low %v10523_v14, %v10530_v5  ;;  %v10547_v23 = vrot.slane %v10533_v36, %v21853_v6  ;;  %v10567_v26 = vcombine.low %v20760_v33, %v20774_v22  ;;  %v10852_v33 = vld [vmem:[%s21198_s7 + $0x88] sm:$0xff]  ;;  %v10853_v22 = vld [vmem:[%s21198_s7 + $0x90] sm:$0xff]  ;;  %v14811_v30 = vmov 0.0  }
 0x6c1   :  { %13756 = vmatmul.mubr.f32.gmra.mrb[134].mxu1 %v10329_v41  ;;  %v10564_v45 = vrot.slane %v10550_v48, %v21853_v6  ;;  %v10574_v19 = vrot.slane %v10566_v50, %v21853_v6  ;;  %v14155_v49 = vpack.c.bf16 %v10852_v33, %v10851_v63  ;;  %v14161_v18 = vpack.c.bf16 %v10856_v16, %v10855_v24  ;;  %v10861_v41 = vld [vmem:[%s21198_s7 + $0xd0] sm:$0xff] }
 0x6c2   :  { %13758 = vmatprep.mubr.f32.mxu1 %v10346_v7  ;;  %14129 = vmatpush3.bf16.msra.mxu1 %v14126_v53  ;;  %v10548_v52 = vcombine.low %v10540_v17, %v10547_v23  ;;  %v10581_v58 = vrot.slane %v10567_v26, %v21853_v6  ;;  %v10854_v53 = vld [vmem:[%s21198_s7 + $0x98] sm:$0xff]  ;;  %v14167_v62 = vpack.c.bf16 %v10860_v37, %v10859_v60  ;;  %v10863_v7 = vld [vmem:[%s21198_s7 + $0xe0] sm:$0xff] }
 0x6c3   :  { %14131 = vmatprep.subr.bf16.mxu1 %v14130_v3  ;;  %v10565_v34 = vcombine.low %v10557_v20, %v10564_v45  ;;  %v14158_v9 = vpack.c.bf16 %v10854_v53, %v10853_v22  ;;  %v14173_v47 = vpack.c.bf16 %v10864_v4, %v10863_v7  ;;  %v14176_v54 = vpack.c.bf16 %v10866_v13, %v10865_v25  ;;  %v10734_v60 = vld [vmem:[%s21197_s6 + $0x1] sm:$0x1] }
 0x6c4   :  { %v10582_v27 = vcombine.low %v10574_v19, %v10581_v58 }
 0x6c5   :  { %13759 = vmatmul.mubr.f32.gmra.mrb[136].mxu1 %v10363_v8  ;;  %v11846_v8 = vld [vmem:[%s21197_s6] ss:$0 sm:$0xff] }
 0x6c6   :  { %14133 = vmatpush3.bf16.msra.mxu1 %v14130_v3  ;;  %13793 = vmatprep.mubr.f32.mxu1 %v10497_v51  ;;  %v14170_v3 = vpack.c.bf16 %v10862_v57, %v10861_v41  ;;  %v10738_v41 = vld [vmem:[%s21197_s6 + $0x2] sm:$0x1] }
 0x6c7   :  { %14135 = vmatprep.subr.bf16.mxu1 %v14134_v56 }
 0x6ca   :  { %14137 = vmatpush3.bf16.msra.mxu1 %v14134_v56 }
 0x6cb   :  { %14139 = vmatprep.subr.bf16.mxu1 %v14138_v39 }
 0x6ce   :  { %14141 = vmatpush3.bf16.msra.mxu1 %v14138_v39 }
 0x6cf   :  { %14143 = vmatprep.subr.bf16.mxu1 %v14142_v32 }
 0x6d2   :  { %14145 = vmatpush3.bf16.msra.mxu1 %v14142_v32 }
 0x6d3   :  { %14147 = vmatprep.subr.bf16.mxu1 %v14146_v43 }
 0x6d6   :  { %14149 = vmatpush3.bf16.msra.mxu1 %v14146_v43 }
 0x6d7   :  { %14151 = vmatprep.subr.bf16.mxu1 %v14150_v2 }
 0x6da   :  { %14153 = vmatpush3.bf16.msra.mxu1 %v14150_v2 }
 0x6db   :  { %14154 = vmatprep.subr.bf16.mxu1 %v14809_v40 }
 0x6dd   :  { %13794 = vmatmul.mubr.f32.vlgmr.msra.gmra.mrb[132].mxu1 %v10514_v28  ;;  %v10858_v28 = vld [vmem:[%s21198_s7 + $0xb8] sm:$0xff] }
 0x6de   :  { %13796 = vmatprep.mubr.f32.mxu1 %v10531_v15  ;;  %14156 = vmatpush3.bf16.msra.mxu1 %v14155_v49  ;;  %v14164_v10 = vpack.c.bf16 %v10858_v28, %v10857_v46 }
 0x6df   :  { %14157 = vmatprep.subr.bf16.mxu1 %v14809_v40 }
 0x6e1   :  { %13797 = vmatmul.mubr.f32.gmra.mrb[134].mxu1 %v10548_v52 }
 0x6e2   :  { %13799 = vmatprep.mubr.f32.mxu1 %v10565_v34  ;;  %14159 = vmatpush3.bf16.msra.mxu1 %v14158_v9 }
 0x6e3   :  { %14160 = vmatprep.subr.bf16.mxu1 %v14809_v40 }
 0x6e5   :  { %13800 = vmatmul.mubr.f32.gmra.mrb[136].mxu1 %v10582_v27 }
 0x6e6   :  { %13834 = vmatprep.mubr.msk.f32.mxu1 %vm14810_vm8, %v14811_v30  ;;  %14162 = vmatpush3.bf16.msra.mxu1 %v14161_v18 }
 0x6e7   :  { %14163 = vmatprep.subr.bf16.mxu1 %v14809_v40 }
 0x6ea   :  { %14165 = vmatpush3.bf16.msra.mxu1 %v14164_v10 }
 0x6eb   :  { %14166 = vmatprep.subr.bf16.mxu1 %v14809_v40 }
 0x6ee   :  { %14168 = vmatpush3.bf16.msra.mxu1 %v14167_v62 }
 0x6ef   :  { %14169 = vmatprep.subr.bf16.mxu1 %v14809_v40 }
 0x6f2   :  { %14171 = vmatpush3.bf16.msra.mxu1 %v14170_v3 }
 0x6f3   :  { %14172 = vmatprep.subr.bf16.mxu1 %v14809_v40 }
 0x6f6   :  { %14174 = vmatpush3.bf16.msra.mxu1 %v14173_v47 }
 0x6f7   :  { %14175 = vmatprep.subr.bf16.mxu1 %v14809_v40 }
 0x6fa   :  { %14177 = vmatpush3.bf16.msra.mxu1 %v14176_v54 }
 0x6fb   :  { %14178 = vmatprep.subr.bf16.mxu1 %v14809_v40 }
 0x7b0   :  { %v13795_v56 = vpop.f32.mrb[132].mxu1 }
 0x7b1   :  { %v10696_v51 = vadd.f32 %v13795_v56, %v11846_v8  ;;  %v10655_v12 = vpop.f32.mrb[133].mxu1 }
 0x7b2   :  { %v10695_v55 = vadd.f32 %v11846_v8, %v10655_v12 }
 0x7b3   :  { %v10714_v39 = vmul.f32 %v10696_v51, %v10696_v51 }
 0x7b4   :  { %v10701_v61 = vadd.f32 %v10696_v51, %v10695_v55  ;;  %v10713_v38 = vmul.f32 %v10695_v55, %v10695_v55  ;;  %v13798_v32 = vpop.f32.mrb[134].mxu1 }
 0x7b5   :  { %v10698_v31 = vadd.f32 %v13798_v32, %v11846_v8  ;;  %v10665_v21 = vpop.f32.mrb[135].mxu1 }
 0x7b6   :  { %v10719_v43 = vadd.f32 %v10714_v39, %v10713_v38  ;;  %v10697_v44 = vadd.f32 %v11846_v8, %v10665_v21 }
 0x7b7   :  { %v10716_v1 = vmul.f32 %v10698_v31, %v10698_v31 }
 0x7b8   :  { %v10702_v29 = vadd.f32 %v10701_v61, %v10697_v44  ;;  %v10715_v2 = vmul.f32 %v10697_v44, %v10697_v44  ;;  %v13801_v35 = vpop.f32.mrb[136].mxu1 }
 0x7b9   :  { %v10675_v0 = vpop.f32.mrb[137].mxu1  ;;  %v10700_v59 = vadd.f32 %v13801_v35, %v11846_v8 }
 0x7ba   :  { %v10720_v5 = vadd.f32 %v10719_v43, %v10715_v2  ;;  %v10699_v36 = vadd.f32 %v11846_v8, %v10675_v0  ;;  %v10703_v14 = vadd.f32 %v10702_v29, %v10698_v31 }
 0x7bb   :  { %v10718_v15 = vmul.f32 %v10700_v59, %v10700_v59 }
 0x7bc   :  { %v10704_v48 = vadd.f32 %v10703_v14, %v10699_v36  ;;  %v10717_v17 = vmul.f32 %v10699_v36, %v10699_v36  ;;  %v10721_v50 = vadd.f32 %v10720_v5, %v10716_v1 }
 0x7be   :  { %v10705_v20 = vadd.f32 %v10704_v48, %v10700_v59  ;;  %v10722_v23 = vadd.f32 %v10721_v50, %v10717_v17 }
 0x7c0   :  { %v10706_v26 = vrot.slane %v10705_v20, 4  ;;  %v10723_v45 = vadd.f32 %v10722_v23, %v10718_v15 }
 0x7c2   :  { %v10707_v52 = vadd.f32 %v10706_v26, %v10705_v20  ;;  %v10724_v19 = vrot.slane %v10723_v45, 4 }
 0x7c4   :  { %v10708_v34 = vrot.slane %v10707_v52, 2  ;;  %v10725_v58 = vadd.f32 %v10724_v19, %v10723_v45 }
 0x7c6   :  { %v10709_v27 = vadd.f32 %v10708_v34, %v10707_v52  ;;  %v10726_v63 = vrot.slane %v10725_v58, 2 }
 0x7c8   :  { %v10710_v33 = vrot.slane %v10709_v27, 1  ;;  %v10727_v22 = vadd.f32 %v10726_v63, %v10725_v58 }
 0x7ca   :  { %v10711_v49 = vadd.f32 %v10710_v33, %v10709_v27  ;;  %v10728_v53 = vrot.slane %v10727_v22, 1 }
 0x7cc   :  { %v10712_v9 = vmul.f32 0.020833334, %v10711_v49  ;;  %v10729_v24 = vadd.f32 %v10728_v53, %v10727_v22 }
 0x7ce   :  { %v10730_v16 = vmul.f32 0.020833334, %v10729_v24  ;;  %v10731_v18 = vmul.f32 %v10712_v9, %v10712_v9 }
 0x7d0   :  { %v10732_v46 = vsub.f32 %v10730_v16, %v10731_v18 }
 0x7d2   :  { %v10733_v28 = vmax.f32 %v10732_v46, 0.0 }
 0x7d4   :  { %v10735_v10 = vadd.f32 1e-05, %v10733_v28 }
 0x7d6   :  { %14752 = vrsqrt.f32 %v10735_v10 }
 0x7e0   :  { %v14753_v37 = vpop.eup %14752 }
 0x7e1   :  { %v10737_v62 = vmul.f32 %v14753_v37, %v10734_v60 }
 0x7e3   :  { %v10739_v57 = vmul.f32 %v10737_v62, %v10712_v9  ;;  %v10744_v3 = vrot.slane %v10737_v62, %v22050_v11 }
 0x7e5   :  { %v10740_v7 = vsub.f32 %v10738_v41, %v10739_v57  ;;  %v10745_v4 = vmul.f32 %v10744_v3, %v10695_v55  ;;  %v10746_v47 = vmul.f32 %v10744_v3, %v10696_v51  ;;  %v10747_v25 = vmul.f32 %v10744_v3, %v10697_v44 }
 0x7e6   :  { %v10748_v13 = vmul.f32 %v10744_v3, %v10698_v31  ;;  %v10749_v54 = vmul.f32 %v10744_v3, %v10699_v36  ;;  %v10750_v8 = vmul.f32 %v10744_v3, %v10700_v59 }
 0x7e7   :  { %v10754_v56 = vrot.slane %v10740_v7, %v22050_v11  ;;  %v10821_v7 = vld [vmem:[%s21198_s7] sm:$0xff] }
 0x7e9   :  { %v10755_v12 = vadd.f32 %v10754_v56, %v10745_v4  ;;  %v10756_v39 = vadd.f32 %v10754_v56, %v10746_v47  ;;  %v10757_v61 = vadd.f32 %v10754_v56, %v10747_v25  ;;  %v10758_v38 = vadd.f32 %v10754_v56, %v10748_v13  ;;  %v10822_v4 = vld [vmem:[%s21198_s7 + $0x8] sm:$0xff] }
 0x7ea   :  { %v10759_v32 = vadd.f32 %v10754_v56, %v10749_v54  ;;  %v10760_v21 = vadd.f32 %v10754_v56, %v10750_v8  ;;  %v14179_v54 = vpack.c.bf16 %v10822_v4, %v10821_v7  ;;  %v10823_v8 = vld [vmem:[%s21198_s7 + $0x10] sm:$0xff]  ;;  %v10824_v56 = vld [vmem:[%s21198_s7 + $0x18] sm:$0xff]  ;;  %v11203_v7 = vld [vmem:[#allocation6 + $0x10] sm:$0xff] }
 0x7eb   :  { %v10761_v43 = vmax.f32 %v10755_v12, 0.0  ;;  %v10762_v29 = vmax.f32 %v10756_v39, 0.0  ;;  %v10763_v2 = vmax.f32 %v10757_v61, 0.0  ;;  %v10764_v35 = vmax.f32 %v10758_v38, 0.0  ;;  %v10825_v39 = vld [vmem:[%s21198_s7 + $0x20] sm:$0xff]  ;;  %v10826_v61 = vld [vmem:[%s21198_s7 + $0x28] sm:$0xff] }
 0x7ec   :  { %v10765_v1 = vmax.f32 %v10759_v32, 0.0  ;;  %v10766_v0 = vmax.f32 %v10760_v21, 0.0  ;;  %v14182_v12 = vpack.c.bf16 %v10824_v56, %v10823_v8  ;;  %v14185_v38 = vpack.c.bf16 %v10826_v61, %v10825_v39  ;;  %v10827_v32 = vld [vmem:[%s21198_s7 + $0x30] sm:$0xff]  ;;  %v10828_v21 = vld [vmem:[%s21198_s7 + $0x38] sm:$0xff]  ;;  %v11210_v56 = vld [vmem:[#allocation6 + $0x48] sm:$0xff] }
 0x7ed   :  { %10767 = vst [vmem:[#allocation4] sm:$0xff] %v10761_v43  ;;  %10768 = vst [vmem:[#allocation4 + $0x8] sm:$0xff] %v10762_v29  ;;  %v14188_v43 = vpack.c.bf16 %v10828_v21, %v10827_v32  ;;  %v10829_v29 = vld [vmem:[%s21198_s7 + $0x40] sm:$0xff]  ;;  %v11212_v32 = vld [vmem:[#allocation6 + $0x58] sm:$0xff] }
 0x7ee   :  { %10769 = vst [vmem:[#allocation4 + $0x10] sm:$0xff] %v10763_v2  ;;  %10770 = vst [vmem:[#allocation4 + $0x18] sm:$0xff] %v10764_v35  ;;  %v10830_v2 = vld [vmem:[%s21198_s7 + $0x48] sm:$0xff] }
 0x7ef   :  { %10771 = vst [vmem:[#allocation4 + $0x20] sm:$0xff] %v10765_v1  ;;  %10772 = vst [vmem:[#allocation4 + $0x28] sm:$0xff] %v10766_v0  ;;  %v14191_v35 = vpack.c.bf16 %v10830_v2, %v10829_v29  ;;  %v10831_v1 = vld [vmem:[%s21198_s7 + $0x50] sm:$0xff]  ;;  %v10832_v0 = vld [vmem:[%s21198_s7 + $0x58] sm:$0xff] }
 0x7f0   :  { %v11214_v29 = vld [vmem:[#allocation6 + $0x68] sm:$0xff] }
 0x7f5   :  { %v10773_v51 = vld [vmem:[#allocation4] ss:$4 sm:$0xff]  ;;  %v10777_v55 = vld [vmem:[#allocation4 + $0x1] ss:$4 sm:$0xff]  ;;  %v10783_v36 = vld [vmem:[#allocation4 + $0x2] ss:$4 sm:$0xff] }
 0x7f6   :  { %v10775_v31 = vld [vmem:[#allocation4 + $0x20] ss:$4 sm:$0xf]  ;;  %v10779_v44 = vld [vmem:[#allocation4 + $0x21] ss:$4 sm:$0xf]  ;;  %v10780_v5 = vmax.f32 %v10773_v51, %v10777_v55  ;;  %v14194_v51 = vpack.c.bf16 %v10832_v0, %v10831_v1 }
 0x7f7   :  { %v10781_v59 = vmax.f32 %v10775_v31, %v10779_v44  ;;  %v10785_v14 = vld [vmem:[#allocation4 + $0x22] ss:$4 sm:$0xf]  ;;  %v10789_v50 = vld [vmem:[#allocation4 + $0x3] ss:$4 sm:$0xff] }
 0x7f8   :  { %v10786_v48 = vmax.f32 %v10780_v5, %v10783_v36  ;;  %v10791_v15 = vld [vmem:[#allocation4 + $0x23] ss:$4 sm:$0xf]  ;;  %v10835_v5 = vld [vmem:[%s21198_s7 + $0x70] sm:$0xff] }
 0x7f9   :  { %v10787_v17 = vmax.f32 %v10781_v59, %v10785_v14  ;;  %v10833_v55 = vld [vmem:[%s21198_s7 + $0x60] sm:$0xff]  ;;  %v10834_v31 = vld [vmem:[%s21198_s7 + $0x68] sm:$0xff]  ;;  %v10836_v59 = vld [vmem:[%s21198_s7 + $0x78] sm:$0xff] }
 0x7fa   :  { %v10792_v20 = vmax.f32 %v10786_v48, %v10789_v50  ;;  %v14197_v44 = vpack.c.bf16 %v10834_v31, %v10833_v55  ;;  %v14200_v48 = vpack.c.bf16 %v10836_v59, %v10835_v5  ;;  %v11043_v50 = vld [vmem:[%s21198_s7 + $0x100] sm:$0xff]  ;;  %v11216_v1 = vld [vmem:[#allocation6 + $0x78] sm:$0xff] }
 0x7fb   :  { %v10793_v23 = vmax.f32 %v10787_v17, %v10791_v15  ;;  %v11044_v15 = vld [vmem:[%s21198_s7 + $0x108] sm:$0xff]  ;;  %v11849_v5 = vld [vmem:[%s21199_s8] ss:$0 sm:$0xff] }
 0x7fc   :  { %v10796_v26 = vcombine.high %v10792_v20, %v10792_v20  ;;  %v20993_v45 = vrot.slane %v10792_v20, %v21853_v6 }
 0x7fd   :  { %v20996_v52 = vrot.slane %v10793_v23, %v21853_v6  ;;  %v14203_v23 = vpack.c.bf16 %v11044_v15, %v11043_v50 }
 0x7fe   :  { %v10810_v19 = vrot.slane %v10796_v26, %v21853_v6  ;;  %v21001_v34 = vcombine.high %v20993_v45, %v20993_v45  ;;  %v11847_v24 = vrot.slane %v20993_v45, 9 }
 0x7ff   :  { %v10820_v58 = vcombine.high %v20996_v52, %v20996_v52  ;;  %v10846_v27 = vrot.slane %v20996_v52, 7 }
 0x800   :  { %v21006_v63 = vcombine.high %v10810_v19, %v10810_v19  ;;  %v10839_v33 = vrot.slane %v21001_v34, 7  ;;  %v11059_v53 = vcombine.low %v21001_v34, %v10810_v19  ;;  %v10842_v18 = vrot.slane %v10810_v19, 7 }
 0x801   :  { %v10848_v22 = vrot.slane %v10846_v27, 2  ;;  %v10849_v49 = vrot.slane %v10820_v58, 7  ;;  %v11060_v9 = vcombine.low %v20996_v52, %v10820_v58  ;;  %v10955_v14 = vcombine.low %v20993_v45, %v21001_v34  ;;  %v11045_v45 = vld [vmem:[%s21198_s7 + $0x110] sm:$0xff]  ;;  %v11048_v34 = vld [vmem:[%s21198_s7 + $0x128] sm:$0xff] }
 0x802   :  { %v10841_v16 = vrot.slane %v10839_v33, 2  ;;  %v11848_v46 = vrot.slane %v21006_v63, 9  ;;  %v21014_v28 = vrot.slane %v11059_v53, %v21853_v6  ;;  %v10840_v60 = vsel %vm19131_vm7, %v11847_v24, %v10839_v33  ;;  %v11054_v24 = vld [vmem:[%s21198_s7 + $0x158] sm:$0xff] }
 0x803   :  { %v21017_v10 = vrot.slane %v11060_v9, %v21853_v6  ;;  %v10850_v41 = vsel %vm19131_vm7, %v10848_v22, %v10849_v49  ;;  %v10956_v36 = vcombine.low %v21006_v63, %v20996_v52  ;;  %v10963_v20 = vrot.slane %v10955_v14, %v21853_v6  ;;  %v11046_v52 = vld [vmem:[%s21198_s7 + $0x118] sm:$0xff]  ;;  %v11051_v22 = vld [vmem:[%s21198_s7 + $0x140] sm:$0xff]  ;;  %v11052_v49 = vld [vmem:[%s21198_s7 + $0x148] sm:$0xff] }
 0x804   :  { %v10843_v37 = vsel %vm19131_vm7, %v10841_v16, %v10842_v18  ;;  %v10847_v62 = vsel %vm19131_vm7, %v11848_v46, %v10846_v27  ;;  %v14206_v19 = vpack.c.bf16 %v11046_v52, %v11045_v45  ;;  %v11049_v27 = vld [vmem:[%s21198_s7 + $0x130] sm:$0xff]  ;;  %v11050_v63 = vld [vmem:[%s21198_s7 + $0x138] sm:$0xff]  ;;  %v14215_v53 = vpack.c.bf16 %v11052_v49, %v11051_v22  ;;  %v11055_v18 = vld [vmem:[%s21198_s7 + $0x160] sm:$0xff] }
 0x805   :  { %v10867_v57 = vcombine.low %v10840_v60, %v10843_v37  ;;  %v10868_v3 = vcombine.low %v10847_v62, %v10850_v41  ;;  %v11075_v47 = vcombine.low %v21014_v28, %v21017_v10  ;;  %v10970_v17 = vrot.slane %v10956_v36, %v21853_v6  ;;  %v11053_v9 = vld [vmem:[%s21198_s7 + $0x150] sm:$0xff]  ;;  %v11056_v46 = vld [vmem:[%s21198_s7 + $0x168] sm:$0xff]  ;;  %v11058_v62 = vld [vmem:[%s21198_s7 + $0x178] sm:$0xff] }
 0x806   :  { %v14212_v33 = vpack.c.bf16 %v11050_v63, %v11049_v27  ;;  %v14218_v16 = vpack.c.bf16 %v11054_v24, %v11053_v9  ;;  %v14221_v60 = vpack.c.bf16 %v11056_v46, %v11055_v18  ;;  %v11057_v37 = vld [vmem:[%s21198_s7 + $0x170] sm:$0xff]  ;;  %v11207_v28 = vld [vmem:[#allocation6 + $0x30] sm:$0xff] }
 0x807   :  { %v10875_v25 = vrot.slane %v10867_v57, %v21853_v6  ;;  %v10882_v13 = vrot.slane %v10868_v3, %v21853_v6  ;;  %v10971_v26 = vcombine.low %v10963_v20, %v10970_v17  ;;  %v11047_v6 = vld [vmem:[%s21198_s7 + $0x120] sm:$0xff]  ;;  %v14224_v41 = vpack.c.bf16 %v11058_v62, %v11057_v37  ;;  %v11201_v57 = vld [vmem:[#allocation6] sm:$0xff]  ;;  %v11208_v10 = vld [vmem:[#allocation6 + $0x38] sm:$0xff] }
 0x808   :  { %v14209_v58 = vpack.c.bf16 %v11048_v34, %v11047_v6  ;;  %v11202_v3 = vld [vmem:[#allocation6 + $0x8] sm:$0xff] }
 0x809   :  { %v10883_v42 = vcombine.low %v10875_v25, %v10882_v13  ;;  %v14227_v4 = vpack.c.bf16 %v11202_v3, %v11201_v57  ;;  %v11204_v25 = vld [vmem:[#allocation6 + $0x18] sm:$0xff] }
 0x80a   :  { %v14230_v13 = vpack.c.bf16 %v11204_v25, %v11203_v7 }
 0x80b   :  { %13835 = vmatmul.mubr.f32.vlgmr.msra.gmra.mrb[138].mxu1 %v10883_v42  ;;  %v11206_v42 = vld [vmem:[#allocation6 + $0x28] sm:$0xff] }
 0x80c   :  { %14180 = vmatpush3.bf16.msra.mxu1 %v14179_v54  ;;  %13869 = vmatprep.mubr.msk.f32.mxu1 %vm14810_vm8, %v14811_v30  ;;  %v11205_v54 = vld [vmem:[#allocation6 + $0x20] sm:$0xff] }
 0x80d   :  { %14181 = vmatprep.subr.bf16.mxu1 %v14809_v40  ;;  %v14233_v8 = vpack.c.bf16 %v11206_v42, %v11205_v54 }
 0x810   :  { %14183 = vmatpush3.bf16.msra.mxu1 %v14182_v12 }
 0x811   :  { %14184 = vmatprep.subr.bf16.mxu1 %v14809_v40 }
 0x814   :  { %14186 = vmatpush3.bf16.msra.mxu1 %v14185_v38  ;;  %v11211_v38 = vld [vmem:[#allocation6 + $0x50] sm:$0xff] }
 0x815   :  { %14187 = vmatprep.subr.bf16.mxu1 %v14809_v40  ;;  %v14242_v21 = vpack.c.bf16 %v11212_v32, %v11211_v38 }
 0x818   :  { %14189 = vmatpush3.bf16.msra.mxu1 %v14188_v43  ;;  %v11213_v43 = vld [vmem:[#allocation6 + $0x60] sm:$0xff] }
 0x819   :  { %14190 = vmatprep.subr.bf16.mxu1 %v14809_v40  ;;  %v14245_v2 = vpack.c.bf16 %v11214_v29, %v11213_v43 }
 0x81c   :  { %14192 = vmatpush3.bf16.msra.mxu1 %v14191_v35  ;;  %v11215_v35 = vld [vmem:[#allocation6 + $0x70] sm:$0xff] }
 0x81d   :  { %14193 = vmatprep.subr.bf16.mxu1 %v14809_v40  ;;  %v14248_v0 = vpack.c.bf16 %v11216_v1, %v11215_v35 }
 0x820   :  { %14195 = vmatpush3.bf16.msra.mxu1 %v14194_v51 }
 0x821   :  { %14196 = vmatprep.subr.bf16.mxu1 %v14809_v40 }
 0x824   :  { %14198 = vmatpush3.bf16.msra.mxu1 %v14197_v44 }
 0x825   :  { %14199 = vmatprep.subr.bf16.mxu1 %v14809_v40 }
 0x828   :  { %14201 = vmatpush3.bf16.msra.mxu1 %v14200_v48 }
 0x829   :  { %14202 = vmatprep.subr.bf16.mxu1 %v14809_v40 }
 0x82b   :  { %13870 = vmatmul.mubr.f32.vlgmr.msra.gmra.mrb[140].mxu1 %v10971_v26 }
 0x82c   :  { %14204 = vmatpush3.bf16.msra.mxu1 %v14203_v23  ;;  %13904 = vmatprep.mubr.msk.f32.mxu1 %vm14810_vm8, %v14811_v30 }
 0x82d   :  { %14205 = vmatprep.subr.bf16.mxu1 %v14809_v40 }
 0x830   :  { %14207 = vmatpush3.bf16.msra.mxu1 %v14206_v19 }
 0x831   :  { %14208 = vmatprep.subr.bf16.mxu1 %v14809_v40 }
 0x834   :  { %14210 = vmatpush3.bf16.msra.mxu1 %v14209_v58 }
 0x835   :  { %14211 = vmatprep.subr.bf16.mxu1 %v14809_v40 }
 0x838   :  { %14213 = vmatpush3.bf16.msra.mxu1 %v14212_v33 }
 0x839   :  { %14214 = vmatprep.subr.bf16.mxu1 %v14809_v40 }
 0x83c   :  { %14216 = vmatpush3.bf16.msra.mxu1 %v14215_v53  ;;  %v11172_v53 = vld [vmem:[%s21199_s8 + $0x1] sm:$0x1] }
 0x83d   :  { %14217 = vmatprep.subr.bf16.mxu1 %v14809_v40 }
 0x840   :  { %14219 = vmatpush3.bf16.msra.mxu1 %v14218_v16  ;;  %v11176_v16 = vld [vmem:[%s21199_s8 + $0x2] sm:$0x1] }
 0x841   :  { %14220 = vmatprep.subr.bf16.mxu1 %v14809_v40 }
 0x844   :  { %14222 = vmatpush3.bf16.msra.mxu1 %v14221_v60 }
 0x845   :  { %14223 = vmatprep.subr.bf16.mxu1 %v14809_v40 }
 0x848   :  { %14225 = vmatpush3.bf16.msra.mxu1 %v14224_v41 }
 0x849   :  { %14226 = vmatprep.subr.bf16.mxu1 %v14809_v40 }
 0x84b   :  { %13905 = vmatmul.mubr.f32.vlgmr.msra.gmra.mrb[142].mxu1 %v11075_v47  ;;  %v14236_v47 = vpack.c.bf16 %v11208_v10, %v11207_v28 }
 0x84c   :  { %13939 = vmatprep.mubr.msk.f32.mxu1 %vm14810_vm8, %v14811_v30  ;;  %14228 = vmatpush3.bf16.msra.mxu1 %v14227_v4  ;;  %v11209_v30 = vld [vmem:[#allocation6 + $0x40] sm:$0xff] }
 0x84d   :  { %14229 = vmatprep.subr.bf16.mxu1 %v14809_v40  ;;  %v14239_v61 = vpack.c.bf16 %v11210_v56, %v11209_v30 }
 0x850   :  { %14231 = vmatpush3.bf16.msra.mxu1 %v14230_v13 }
 0x851   :  { %14232 = vmatprep.subr.bf16.mxu1 %v14809_v40 }
 0x854   :  { %14234 = vmatpush3.bf16.msra.mxu1 %v14233_v8  ;;  %v11850_v8 = vld [vmem:[%s21201_s10] ss:$0 sm:$0xff] }
 0x855   :  { %14235 = vmatprep.subr.bf16.mxu1 %v14809_v40 }
 0x858   :  { %14237 = vmatpush3.bf16.msra.mxu1 %v14236_v47 }
 0x859   :  { %14238 = vmatprep.subr.bf16.mxu1 %v14809_v40 }
 0x85c   :  { %14240 = vmatpush3.bf16.msra.mxu1 %v14239_v61 }
 0x85d   :  { %14241 = vmatprep.subr.bf16.mxu1 %v14809_v40 }
 0x860   :  { %14243 = vmatpush3.bf16.msra.mxu1 %v14242_v21 }
 0x861   :  { %14244 = vmatprep.subr.bf16.mxu1 %v14809_v40 }
 0x864   :  { %14246 = vmatpush3.bf16.msra.mxu1 %v14245_v2 }
 0x865   :  { %14247 = vmatprep.subr.bf16.mxu1 %v14809_v40 }
 0x868   :  { %14249 = vmatpush3.bf16.msra.mxu1 %v14248_v0 }
 0x8de   :  { %v10951_v12 = vpop.f32.mrb[138].mxu1 }
 0x8df   :  { %v13836_v39 = vpop.f32.mrb[139].mxu1 }
 0x8fe   :  { %v11039_v51 = vpop.f32.mrb[140].mxu1 }
 0x8ff   :  { %v11040_v55 = vadd.f32 %v11039_v51, %v10951_v12  ;;  %v13871_v31 = vpop.f32.mrb[141].mxu1 }
 0x91e   :  { %v11143_v44 = vpop.f32.mrb[142].mxu1 }
 0x91f   :  { %v11147_v59 = vadd.f32 %v11143_v44, %v11040_v55  ;;  %v13906_v36 = vpop.f32.mrb[143].mxu1 }
 0x921   :  { %v11153_v14 = vadd.f32 %v11849_v5, %v11147_v59 }
 0x923   :  { %v11154_v48 = vrot.slane %v11153_v14, 4  ;;  %v11161_v17 = vmul.f32 %v11153_v14, %v11153_v14 }
 0x925   :  { %v11155_v50 = vadd.f32 %v11154_v48, %v11153_v14  ;;  %v11162_v15 = vrot.slane %v11161_v17, 4 }
 0x927   :  { %v11156_v20 = vrot.slane %v11155_v50, 2  ;;  %v11163_v23 = vadd.f32 %v11162_v15, %v11161_v17 }
 0x929   :  { %v11157_v26 = vadd.f32 %v11156_v20, %v11155_v50  ;;  %v11164_v40 = vrot.slane %v11163_v23, 2 }
 0x92b   :  { %v11158_v45 = vrot.slane %v11157_v26, 1  ;;  %v11165_v52 = vadd.f32 %v11164_v40, %v11163_v23 }
 0x92d   :  { %v11159_v19 = vadd.f32 %v11158_v45, %v11157_v26  ;;  %v11166_v6 = vrot.slane %v11165_v52, 1 }
 0x92f   :  { %v11160_v34 = vmul.f32 0.125, %v11159_v19  ;;  %v11167_v58 = vadd.f32 %v11166_v6, %v11165_v52 }
 0x931   :  { %v11168_v27 = vmul.f32 0.125, %v11167_v58  ;;  %v11169_v63 = vmul.f32 %v11160_v34, %v11160_v34 }
 0x933   :  { %v11170_v33 = vsub.f32 %v11168_v27, %v11169_v63 }
 0x935   :  { %v11171_v22 = vmax.f32 %v11170_v33, 0.0 }
 0x937   :  { %v11173_v49 = vadd.f32 1e-05, %v11171_v22 }
 0x939   :  { %14754 = vrsqrt.f32 %v11173_v49 }
 0x943   :  { %v14755_v9 = vpop.eup %14754 }
 0x944   :  { %v11175_v24 = vmul.f32 %v14755_v9, %v11172_v53 }
 0x946   :  { %v11177_v18 = vmul.f32 %v11175_v24, %v11160_v34  ;;  %v11182_v46 = vrot.slane %v11175_v24, %v22050_v11 }
 0x948   :  { %v11178_v60 = vsub.f32 %v11176_v16, %v11177_v18  ;;  %v11183_v37 = vmul.f32 %v11182_v46, %v11153_v14 }
 0x94a   :  { %v11187_v62 = vrot.slane %v11178_v60, %v22050_v11 }
 0x94c   :  { %v11188_v41 = vadd.f32 %v11187_v62, %v11183_v37 }
 0x94e   :  { %v11189_v57 = vmax.f32 %v11188_v41, 0.0 }
 0x950   :  { %11190 = vst [vmem:[#allocation5] sm:$0xff] %v11189_v57 }
 0x957   :  { %v11191_v3 = vld [vmem:[#allocation5] ss:$4 sm:$0x3]  ;;  %v11193_v7 = vld [vmem:[#allocation5 + $0x1] ss:$4 sm:$0x3] }
 0x958   :  { %v11194_v4 = vmax.f32 %v11191_v3, %v11193_v7  ;;  %v11196_v25 = vld [vmem:[#allocation5 + $0x2] ss:$4 sm:$0x3]  ;;  %v11199_v54 = vld [vmem:[#allocation5 + $0x3] ss:$4 sm:$0x3] }
 0x95a   :  { %v11197_v13 = vmax.f32 %v11194_v4, %v11196_v25 }
 0x95c   :  { %v11200_v42 = vmax.f32 %v11197_v13, %v11199_v54 }
 0x95e   :  { %13940 = vmatmul.mubr.f32.vlgmr.msra.gmra.mrb[144].mxu1 %v11200_v42 }
 0xa31   :  { %v11290_v28 = vpop.f32.mrb[144].mxu1 }
 0xa32   :  { %v11291_v10 = vadd.f32 %v11850_v8, %v11290_v28  ;;  %v13941_v11 = vpop.f32.mrb[145].mxu1 }
 0xa34   :  { %11294 = vst [vmem:[#allocation9] sm:$0x3] %v11291_v10 }
 0xa35   :  { %14790 = shalt.err (!%p14787_p12)
}
 0xa36   :  { %s14791_s30 = scalar_lea.hbm %s21202_s11, 32 }
 0xa37   :  { %p14792_p13 = scmp.ne.s32.totalorder %s21202_s11, %s14791_s30  ;;  %p14795_p0 = scmp.lt.u32.totalorder %s14791_s30, %s21202_s11 }
 0xa39   :  { %p14797_p1 = pnand %p14795_p0, %p14792_p13 }
 0xa3b   :  { %14800 = shalt.err (!%p14797_p1)
}
 0xa3c   :  { %11304 = dma.vmem_to_hbm [thread:$0]  %s11302_s26, 32, %s21202_s11, [#allocation8]  }
 0xa3d   :  { %14803 = dma.done.wait [#allocation8], 32  }
 0xa3e   :  { %14804 = vsyncadd [#allocation8], 4294967264 }
 0xa3f   :  { %11308 = vsyncpa [#allocation7], 1 }
 0xa40   :  { %11309 = vsyncpa [#allocation8], 1 }

</bundles_post_ra>
